<compile_context>
chip_gen: v7x
topology: tpu7x:2x2x1
jax: 0.10.0
libtpu: 0.0.40
codegen_flags: <defaults>
</compile_context>

<pallas_src>
import jax
import jax.numpy as jnp
from jax.experimental import pallas as pl
from jax.experimental.pallas import tpu as pltpu

# --- module hyper-parameters (from train.py) ---
N_EMBD = 64
N_HEAD = 4
HEAD_SIZE = N_EMBD // N_HEAD
BLOCK_SIZE = 32          # max sequence length (tril buffer size)
LN_EPS = 1e-5            # PyTorch nn.LayerNorm default


def _layernorm(x, gamma, beta):
    # f32 elementwise path (only MXU operands get cast to bf16).
    mu = jnp.mean(x, axis=-1, keepdims=True)
    var = jnp.mean((x - mu) ** 2, axis=-1, keepdims=True)
    return (x - mu) * jax.lax.rsqrt(var + LN_EPS) * gamma + beta


def _make_block_kernel(bt, t):
    """Kernel closed over the static batch-tile (bt) and sequence length (t)."""
    C = N_EMBD
    rows = bt * t

    def kernel(x_ref,
               g1_ref, b1_ref,
               wqkv_ref,
               wp_ref, bp_ref,
               g2_ref, b2_ref,
               w1_ref, bias1_ref,
               w2_ref, bias2_ref,
               o_ref):
        x2d = x_ref[...]                                    # (rows, C) f32

        # ---- x = x + proj(attn(ln1(x))) ----
        xn = _layernorm(x2d, g1_ref[...], b1_ref[...])
        # fused Q/K/V: one (rows, C) @ (C, 3C) bf16 MXU pass, f32 accumulate.
        # Attention scale (n_embd**-0.5, as in the reference) is already
        # folded into the Q columns of wqkv at weight-prep time.
        qkv = jnp.dot(xn.astype(jnp.bfloat16), wqkv_ref[...],
                      preferred_element_type=jnp.float32)   # (rows, 3C) f32

        # Single 2-D causal mask, broadcast over the einsum batch dim.
        # Safe with -inf: the diagonal is always unmasked, so after the
        # max-subtraction exp() never sees a fully -inf row.
        r = jax.lax.broadcasted_iota(jnp.int32, (t, t), 0)
        c = jax.lax.broadcasted_iota(jnp.int32, (t, t), 1)
        causal = (c <= r)[None]                              # (1, t, t)

        sa = jnp.zeros((rows, C), jnp.float32)
        for h in range(N_HEAD):                              # static 4-way unroll
            lo = h * HEAD_SIZE
            qh = qkv[:, lo:lo + HEAD_SIZE].reshape(bt, t, HEAD_SIZE)
            kh = qkv[:, C + lo:C + lo + HEAD_SIZE].reshape(bt, t, HEAD_SIZE)
            vh = qkv[:, 2 * C + lo:2 * C + lo + HEAD_SIZE].reshape(bt, t, HEAD_SIZE)

            wei = jnp.einsum('bqd,bkd->bqk',
                             qh.astype(jnp.bfloat16), kh.astype(jnp.bfloat16),
                             preferred_element_type=jnp.float32)
            wei = jnp.where(causal, wei, -jnp.inf)
            # numerically-stable softmax in f32; divide -> EUP reciprocal
            wei = wei - jnp.max(wei, axis=-1, keepdims=True)
            wei = jnp.exp(wei)
            wei = wei * pl.reciprocal(jnp.sum(wei, axis=-1, keepdims=True),
                                      approx=True)
            oh = jnp.einsum('bqk,bkd->bqd',
                            wei.astype(jnp.bfloat16), vh.astype(jnp.bfloat16),
                            preferred_element_type=jnp.float32)
            oh = oh.reshape(rows, HEAD_SIZE)
            # Fold the head-concat into the output projection: head h only
            # touches rows [h*hd, (h+1)*hd) of Wp (aligned 16-row bf16 slab).
            sa = sa + jnp.dot(oh.astype(jnp.bfloat16),
                              wp_ref[lo:lo + HEAD_SIZE, :],
                              preferred_element_type=jnp.float32)
        x2d = x2d + sa + bp_ref[...]

        # ---- x = x + ffwd(ln2(x)) ----
        xn2 = _layernorm(x2d, g2_ref[...], b2_ref[...])
        h1 = jnp.dot(xn2.astype(jnp.bfloat16), w1_ref[...],
                     preferred_element_type=jnp.float32) + bias1_ref[...]
        h1 = jnp.maximum(h1, 0.0)                            # ReLU (f32)
        ff = jnp.dot(h1.astype(jnp.bfloat16), w2_ref[...],
                     preferred_element_type=jnp.float32) + bias2_ref[...]

        o_ref[...] = x2d + ff

    return kernel


def _num_tensorcores():
    """2 on v7x (2 TensorCores/chip), 1 otherwise (v5e/v6e)."""
    try:
        kind = jax.devices()[0].device_kind.lower()
        if "v7" in kind or "7x" in kind:
            return 2
    except Exception:
        pass
    return 1


def _choose_batch_tile(B, T, num_cores, max_rows=2048):
    """Largest divisor of B with Bt*T <= max_rows; on multi-TC chips prefer
    exactly num_cores grid steps, otherwise a single step (grid loops are
    serial on one TensorCore)."""
    divisors = [d for d in range(1, B + 1) if B % d == 0]
    cap = max(1, max_rows // T)
    fitting = [d for d in divisors if d <= cap] or [1]
    if num_cores > 1:
        multi = [d for d in fitting if B // d >= num_cores]
        if multi:
            return max(multi)
    return max(fitting)


def prepare_params(params):
    """One-time weight transform (do NOT call per forward pass): fuse Q/K/V,
    fold the attention scale (n_embd**-0.5, matching the PyTorch reference)
    into the Q columns, and pre-cast all MXU weights to bf16."""
    scale = jnp.float32(N_EMBD) ** -0.5          # 0.125, exact power of two
    bf16 = jnp.bfloat16
    return {
        "g1": params["g1"], "b1": params["b1"],
        "wqkv": jnp.concatenate(
            [params["wq"] * scale, params["wk"], params["wv"]],
            axis=1).astype(bf16),
        "wp": params["wp"].astype(bf16),
        "bp": params["bp"],
        "g2": params["g2"], "b2": params["b2"],
        "w1": params["w1"].astype(bf16), "bias1": params["bias1"],
        "w2": params["w2"].astype(bf16), "bias2": params["bias2"],
    }


def block_forward(x, prepared, batch_tile=None):
    """x: (B, T, C) float32. prepared: output of prepare_params()."""
    B, T, C = x.shape
    assert C == N_EMBD and T <= BLOCK_SIZE
    Bt = (batch_tile if batch_tile is not None
          else _choose_batch_tile(B, T, _num_tensorcores()))
    assert B % Bt == 0
    grid = (B // Bt,)
    rows = Bt * T

    # Free metadata reshape: the kernel sees a lane-contiguous (rows, C) slab
    # and never reshapes x / the output in-kernel.
    x2d = x.reshape(B * T, C)

    def full(shape):
        # weights/biases: same (full) block every grid step -> VMEM resident
        return pl.BlockSpec(shape, lambda b, _s=shape: tuple(0 for _ in _s))

    in_specs = [
        pl.BlockSpec((rows, C), lambda b: (b, 0)),         # x row slab
        full((1, C)), full((1, C)),                        # ln1 gamma, beta
        full((C, 3 * C)),                                  # Wqkv (bf16, scaled)
        full((C, C)), full((1, C)),                        # Wproj (bf16), bproj
        full((1, C)), full((1, C)),                        # ln2 gamma, beta
        full((C, 4 * C)), full((1, 4 * C)),                # W1 (bf16), b1
        full((4 * C, C)), full((1, C)),                    # W2 (bf16), b2
    ]
    out_spec = pl.BlockSpec((rows, C), lambda b: (b, 0))

    out2d = pl.pallas_call(
        _make_block_kernel(Bt, T),
        out_shape=jax.ShapeDtypeStruct((B * T, C), jnp.float32),
        grid=grid,
        in_specs=in_specs,
        out_specs=out_spec,
        compiler_params=pltpu.CompilerParams(
            dimension_semantics=("parallel",)),
    )(x2d,
      prepared["g1"], prepared["b1"],
      prepared["wqkv"],
      prepared["wp"], prepared["bp"],
      prepared["g2"], prepared["b2"],
      prepared["w1"], prepared["bias1"],
      prepared["w2"], prepared["bias2"])
    return out2d.reshape(B, T, C)


def init_params(key):
    C = N_EMBD
    ks = jax.random.split(key, 8)
    scale = 0.02
    return {
        "g1": jnp.ones((1, C), jnp.float32),
        "b1": jnp.zeros((1, C), jnp.float32),
        # attention weights stored as (in, out); head h occupies columns
        # [h*HEAD_SIZE : (h+1)*HEAD_SIZE]
        "wq": scale * jax.random.normal(ks[0], (C, C), jnp.float32),
        "wk": scale * jax.random.normal(ks[1], (C, C), jnp.float32),
        "wv": scale * jax.random.normal(ks[2], (C, C), jnp.float32),
        "wp": scale * jax.random.normal(ks[3], (C, C), jnp.float32),
        "bp": scale * jax.random.normal(ks[4], (1, C), jnp.float32),
        "g2": jnp.ones((1, C), jnp.float32),
        "b2": jnp.zeros((1, C), jnp.float32),
        "w1": scale * jax.random.normal(ks[5], (C, 4 * C), jnp.float32),
        "bias1": jnp.zeros((1, 4 * C), jnp.float32),
        "w2": scale * jax.random.normal(ks[6], (4 * C, C), jnp.float32),
        "bias2": jnp.zeros((1, C), jnp.float32),
    }


def block_forward_ref(x, p):
    """Pure-JAX f32 reference mirroring the PyTorch module exactly."""
    B, T, C = x.shape

    def ln(z, g, b):
        mu = jnp.mean(z, -1, keepdims=True)
        var = jnp.mean((z - mu) ** 2, -1, keepdims=True)
        return (z - mu) / jnp.sqrt(var + LN_EPS) * g + b

    xn = ln(x, p["g1"][0], p["b1"][0])
    q = xn @ p["wq"]
    k = xn @ p["wk"]
    v = xn @ p["wv"]
    tril = jnp.tril(jnp.ones((T, T)))
    heads = []
    for h in range(N_HEAD):
        sl = slice(h * HEAD_SIZE, (h + 1) * HEAD_SIZE)
        wei = (q[:, :, sl] @ jnp.swapaxes(k[:, :, sl], -1, -2)) * C ** (-0.5)
        wei = jnp.where(tril == 0, -jnp.inf, wei)
        wei = jax.nn.softmax(wei, axis=-1)
        heads.append(wei @ v[:, :, sl])
    sa = jnp.concatenate(heads, axis=-1) @ p["wp"] + p["bp"][0]
    x = x + sa
    xn2 = ln(x, p["g2"][0], p["b2"][0])
    ff = jnp.maximum(xn2 @ p["w1"] + p["bias1"][0], 0.0) @ p["w2"] + p["bias2"][0]
    return x + ff


if __name__ == "__main__":
    key = jax.random.PRNGKey(0)
    kx, kp = jax.random.split(key)

    B, T, C = 8, BLOCK_SIZE, N_EMBD       # T == block_size (32)
    x = jax.random.normal(kx, (B, T, C), jnp.float32)
    params = init_params(kp)
    prepared = prepare_params(params)      # one-time weight fuse/scale/cast

    out = block_forward(x, prepared)
    out = jax.block_until_ready(out)

    ref = block_forward_ref(x, params)
    assert out.shape == (B, T, C)
    # bf16 MXU operands + approx reciprocal in the kernel vs. pure-f32
    # reference: the residual stream stays f32, so errors are limited to the
    # small sa/ffn terms.
    assert jnp.allclose(out, ref, atol=2e-2, rtol=2e-2), (
        "mismatch vs reference, max abs err "
        f"{float(jnp.max(jnp.abs(out - ref)))}")

    print("KERNEL_OK")
</pallas_src>

<mosaic_0001>
module attributes {stable_mosaic.version = 11 : i64} {
  func.func @kernel(%arg0: i32, %arg1: memref<256x64xf32, #tpu.memory_space<vmem>>, %arg2: memref<1x64xf32, #tpu.memory_space<vmem>>, %arg3: memref<1x64xf32, #tpu.memory_space<vmem>>, %arg4: memref<64x192xbf16, #tpu.memory_space<vmem>>, %arg5: memref<64x64xbf16, #tpu.memory_space<vmem>>, %arg6: memref<1x64xf32, #tpu.memory_space<vmem>>, %arg7: memref<1x64xf32, #tpu.memory_space<vmem>>, %arg8: memref<1x64xf32, #tpu.memory_space<vmem>>, %arg9: memref<64x256xbf16, #tpu.memory_space<vmem>>, %arg10: memref<1x256xf32, #tpu.memory_space<vmem>>, %arg11: memref<256x64xbf16, #tpu.memory_space<vmem>>, %arg12: memref<1x64xf32, #tpu.memory_space<vmem>>, %arg13: memref<256x64xf32, #tpu.memory_space<vmem>>) attributes {dimension_semantics = [#tpu.dimension_semantics<parallel>], iteration_bounds = array<i64: 1>, scalar_prefetch = 0 : i64, scratch_operands = 0 : i64, tpu.core_type = #tpu.core_type<tc>, window_params = [{transform_indices = @transform_0, window_bounds = array<i64: 256, 64>}, {pipeline_mode = #tpu.pipeline_mode<synchronous>, transform_indices = @transform_1, window_bounds = array<i64: 1, 64>}, {pipeline_mode = #tpu.pipeline_mode<synchronous>, transform_indices = @transform_2, window_bounds = array<i64: 1, 64>}, {pipeline_mode = #tpu.pipeline_mode<synchronous>, transform_indices = @transform_3, window_bounds = array<i64: 64, 192>}, {pipeline_mode = #tpu.pipeline_mode<synchronous>, transform_indices = @transform_4, window_bounds = array<i64: 64, 64>}, {pipeline_mode = #tpu.pipeline_mode<synchronous>, transform_indices = @transform_5, window_bounds = array<i64: 1, 64>}, {pipeline_mode = #tpu.pipeline_mode<synchronous>, transform_indices = @transform_6, window_bounds = array<i64: 1, 64>}, {pipeline_mode = #tpu.pipeline_mode<synchronous>, transform_indices = @transform_7, window_bounds = array<i64: 1, 64>}, {pipeline_mode = #tpu.pipeline_mode<synchronous>, transform_indices = @transform_8, window_bounds = array<i64: 64, 256>}, {pipeline_mode = #tpu.pipeline_mode<synchronous>, transform_indices = @transform_9, window_bounds = array<i64: 1, 256>}, {pipeline_mode = #tpu.pipeline_mode<synchronous>, transform_indices = @transform_10, window_bounds = array<i64: 256, 64>}, {pipeline_mode = #tpu.pipeline_mode<synchronous>, transform_indices = @transform_11, window_bounds = array<i64: 1, 64>}, {transform_indices = @transform_12, window_bounds = array<i64: 256, 64>}]} {
    %c0 = arith.constant 0 : index
    %c0_0 = arith.constant 0 : index
    %0 = vector.load %arg1[%c0, %c0_0] : memref<256x64xf32, #tpu.memory_space<vmem>>, vector<256x64xf32>
    %c0_1 = arith.constant 0 : index
    %c0_2 = arith.constant 0 : index
    %1 = vector.load %arg2[%c0_1, %c0_2] : memref<1x64xf32, #tpu.memory_space<vmem>>, vector<1x64xf32>
    %c0_3 = arith.constant 0 : index
    %c0_4 = arith.constant 0 : index
    %2 = vector.load %arg3[%c0_3, %c0_4] : memref<1x64xf32, #tpu.memory_space<vmem>>, vector<1x64xf32>
    %cst = arith.constant dense<0.000000e+00> : vector<256xf32>
    %3 = vector.multi_reduction <add>, %0, %cst [1] : vector<256x64xf32> to vector<256xf32>
    %4 = vector.shape_cast %3 : vector<256xf32> to vector<256x1xf32>
    %cst_5 = arith.constant 6.400000e+01 : f32
    %5 = vector.broadcast %cst_5 : f32 to vector<256x1xf32>
    %6 = arith.divf %4, %5 : vector<256x1xf32>
    %7 = vector.broadcast %6 : vector<256x1xf32> to vector<256x64xf32>
    %8 = arith.subf %0, %7 : vector<256x64xf32>
    %9 = arith.mulf %8, %8 : vector<256x64xf32>
    %cst_6 = arith.constant dense<0.000000e+00> : vector<256xf32>
    %10 = vector.multi_reduction <add>, %9, %cst_6 [1] : vector<256x64xf32> to vector<256xf32>
    %11 = vector.shape_cast %10 : vector<256xf32> to vector<256x1xf32>
    %cst_7 = arith.constant 6.400000e+01 : f32
    %12 = vector.broadcast %cst_7 : f32 to vector<256x1xf32>
    %13 = arith.divf %11, %12 : vector<256x1xf32>
    %14 = vector.broadcast %6 : vector<256x1xf32> to vector<256x64xf32>
    %15 = arith.subf %0, %14 : vector<256x64xf32>
    %cst_8 = arith.constant 9.99999974E-6 : f32
    %16 = vector.broadcast %cst_8 : f32 to vector<256x1xf32>
    %17 = arith.addf %13, %16 : vector<256x1xf32>
    %18 = math.rsqrt %17 : vector<256x1xf32>
    %19 = vector.broadcast %18 : vector<256x1xf32> to vector<256x64xf32>
    %20 = arith.mulf %15, %19 : vector<256x64xf32>
    %21 = vector.broadcast %1 : vector<1x64xf32> to vector<256x64xf32>
    %22 = arith.mulf %20, %21 : vector<256x64xf32>
    %23 = vector.broadcast %2 : vector<1x64xf32> to vector<256x64xf32>
    %24 = arith.addf %22, %23 : vector<256x64xf32>
    %25 = arith.truncf %24 : vector<256x64xf32> to vector<256x64xbf16>
    %c0_9 = arith.constant 0 : index
    %c0_10 = arith.constant 0 : index
    %26 = vector.load %arg4[%c0_9, %c0_10] : memref<64x192xbf16, #tpu.memory_space<vmem>>, vector<64x192xbf16>
    %cst_11 = arith.constant dense<0.000000e+00> : vector<256x192xf32>
    %27 = tpu.matmul %25, %26, %cst_11 {dimension_numbers = #tpu.dot_dimension_numbers<[1], [0], [0], [1], [0, 0, 1, 1], [], []>} : vector<256x64xbf16>, vector<64x192xbf16>, vector<256x192xf32> -> vector<256x192xf32>
    %28 = tpu.iota {dimensions = array<i32: 0>} : vector<32x32xi32>
    %29 = tpu.iota {dimensions = array<i32: 1>} : vector<32x32xi32>
    %30 = arith.cmpi sle, %29, %28 : vector<32x32xi32>
    %31 = vector.shape_cast %30 : vector<32x32xi1> to vector<1x32x32xi1>
    %cst_12 = arith.constant 0.000000e+00 : f32
    %32 = vector.broadcast %cst_12 : f32 to vector<256x64xf32>
    %33 = vector.extract_strided_slice %27 {offsets = [0, 0], sizes = [256, 16], strides = [1, 1]} : vector<256x192xf32> to vector<256x16xf32>
    %34 = vector.shape_cast %33 : vector<256x16xf32> to vector<8x32x16xf32>
    %35 = vector.extract_strided_slice %27 {offsets = [0, 64], sizes = [256, 16], strides = [1, 1]} : vector<256x192xf32> to vector<256x16xf32>
    %36 = vector.shape_cast %35 : vector<256x16xf32> to vector<8x32x16xf32>
    %37 = vector.extract_strided_slice %27 {offsets = [0, 128], sizes = [256, 16], strides = [1, 1]} : vector<256x192xf32> to vector<256x16xf32>
    %38 = vector.shape_cast %37 : vector<256x16xf32> to vector<8x32x16xf32>
    %39 = arith.truncf %34 : vector<8x32x16xf32> to vector<8x32x16xbf16>
    %40 = arith.truncf %36 : vector<8x32x16xf32> to vector<8x32x16xbf16>
    "tpu.trace_start"() <{level = 10 : i32, message = "bqd,bkd->bqk"}> : () -> ()
    %cst_13 = arith.constant dense<0.000000e+00> : vector<8x32x32xf32>
    %41 = tpu.matmul %39, %40, %cst_13 {dimension_numbers = #tpu.dot_dimension_numbers<[2], [2], [1], [1], [0, 0, 0, 1, 1, 1], [0], [0]>} : vector<8x32x16xbf16>, vector<8x32x16xbf16>, vector<8x32x32xf32> -> vector<8x32x32xf32>
    %cst_14 = arith.constant 0xFF800000 : f32
    "tpu.trace_stop"() : () -> ()
    %42 = vector.shape_cast %31 : vector<1x32x32xi1> to vector<1x32x32xi1>
    %43 = vector.broadcast %42 : vector<1x32x32xi1> to vector<8x32x32xi1>
    %44 = vector.broadcast %cst_14 : f32 to vector<8x32x32xf32>
    %45 = arith.select %43, %41, %44 : vector<8x32x32xi1>, vector<8x32x32xf32>
    %cst_15 = arith.constant dense<0xFF800000> : vector<8x32xf32>
    %46 = vector.multi_reduction <maximumf>, %45, %cst_15 [2] : vector<8x32x32xf32> to vector<8x32xf32>
    %47 = vector.shape_cast %46 : vector<8x32xf32> to vector<8x32x1xf32>
    %48 = vector.broadcast %47 : vector<8x32x1xf32> to vector<8x32x32xf32>
    %49 = arith.subf %45, %48 : vector<8x32x32xf32>
    %50 = math.exp %49 : vector<8x32x32xf32>
    %cst_16 = arith.constant dense<0.000000e+00> : vector<8x32xf32>
    %51 = vector.multi_reduction <add>, %50, %cst_16 [2] : vector<8x32x32xf32> to vector<8x32xf32>
    %52 = vector.shape_cast %51 : vector<8x32xf32> to vector<8x32x1xf32>
    %53 = tpu.reciprocal %52 {approx = true} : vector<8x32x1xf32> -> vector<8x32x1xf32>
    %54 = vector.broadcast %53 : vector<8x32x1xf32> to vector<8x32x32xf32>
    %55 = arith.mulf %50, %54 : vector<8x32x32xf32>
    %56 = arith.truncf %55 : vector<8x32x32xf32> to vector<8x32x32xbf16>
    %57 = arith.truncf %38 : vector<8x32x16xf32> to vector<8x32x16xbf16>
    "tpu.trace_start"() <{level = 10 : i32, message = "bqk,bkd->bqd"}> : () -> ()
    %cst_17 = arith.constant dense<0.000000e+00> : vector<8x32x16xf32>
    %58 = tpu.matmul %56, %57, %cst_17 {dimension_numbers = #tpu.dot_dimension_numbers<[2], [1], [1], [2], [0, 0, 0, 1, 1, 2], [0], [0]>} : vector<8x32x32xbf16>, vector<8x32x16xbf16>, vector<8x32x16xf32> -> vector<8x32x16xf32>
    "tpu.trace_stop"() : () -> ()
    %59 = vector.shape_cast %58 : vector<8x32x16xf32> to vector<256x16xf32>
    %60 = arith.truncf %59 : vector<256x16xf32> to vector<256x16xbf16>
    %c0_18 = arith.constant 0 : index
    %c0_19 = arith.constant 0 : index
    %61 = vector.load %arg5[%c0_18, %c0_19] : memref<64x64xbf16, #tpu.memory_space<vmem>>, vector<16x64xbf16>
    %cst_20 = arith.constant dense<0.000000e+00> : vector<256x64xf32>
    %62 = tpu.matmul %60, %61, %cst_20 {dimension_numbers = #tpu.dot_dimension_numbers<[1], [0], [0], [1], [0, 0, 1, 1], [], []>} : vector<256x16xbf16>, vector<16x64xbf16>, vector<256x64xf32> -> vector<256x64xf32>
    %63 = arith.addf %32, %62 : vector<256x64xf32>
    %64 = vector.extract_strided_slice %27 {offsets = [0, 16], sizes = [256, 16], strides = [1, 1]} : vector<256x192xf32> to vector<256x16xf32>
    %65 = vector.shape_cast %64 : vector<256x16xf32> to vector<8x32x16xf32>
    %66 = vector.extract_strided_slice %27 {offsets = [0, 80], sizes = [256, 16], strides = [1, 1]} : vector<256x192xf32> to vector<256x16xf32>
    %67 = vector.shape_cast %66 : vector<256x16xf32> to vector<8x32x16xf32>
    %68 = vector.extract_strided_slice %27 {offsets = [0, 144], sizes = [256, 16], strides = [1, 1]} : vector<256x192xf32> to vector<256x16xf32>
    %69 = vector.shape_cast %68 : vector<256x16xf32> to vector<8x32x16xf32>
    %70 = arith.truncf %65 : vector<8x32x16xf32> to vector<8x32x16xbf16>
    %71 = arith.truncf %67 : vector<8x32x16xf32> to vector<8x32x16xbf16>
    "tpu.trace_start"() <{level = 10 : i32, message = "bqd,bkd->bqk"}> : () -> ()
    %cst_21 = arith.constant dense<0.000000e+00> : vector<8x32x32xf32>
    %72 = tpu.matmul %70, %71, %cst_21 {dimension_numbers = #tpu.dot_dimension_numbers<[2], [2], [1], [1], [0, 0, 0, 1, 1, 1], [0], [0]>} : vector<8x32x16xbf16>, vector<8x32x16xbf16>, vector<8x32x32xf32> -> vector<8x32x32xf32>
    %cst_22 = arith.constant 0xFF800000 : f32
    "tpu.trace_stop"() : () -> ()
    %73 = vector.shape_cast %31 : vector<1x32x32xi1> to vector<1x32x32xi1>
    %74 = vector.broadcast %73 : vector<1x32x32xi1> to vector<8x32x32xi1>
    %75 = vector.broadcast %cst_22 : f32 to vector<8x32x32xf32>
    %76 = arith.select %74, %72, %75 : vector<8x32x32xi1>, vector<8x32x32xf32>
    %cst_23 = arith.constant dense<0xFF800000> : vector<8x32xf32>
    %77 = vector.multi_reduction <maximumf>, %76, %cst_23 [2] : vector<8x32x32xf32> to vector<8x32xf32>
    %78 = vector.shape_cast %77 : vector<8x32xf32> to vector<8x32x1xf32>
    %79 = vector.broadcast %78 : vector<8x32x1xf32> to vector<8x32x32xf32>
    %80 = arith.subf %76, %79 : vector<8x32x32xf32>
    %81 = math.exp %80 : vector<8x32x32xf32>
    %cst_24 = arith.constant dense<0.000000e+00> : vector<8x32xf32>
    %82 = vector.multi_reduction <add>, %81, %cst_24 [2] : vector<8x32x32xf32> to vector<8x32xf32>
    %83 = vector.shape_cast %82 : vector<8x32xf32> to vector<8x32x1xf32>
    %84 = tpu.reciprocal %83 {approx = true} : vector<8x32x1xf32> -> vector<8x32x1xf32>
    %85 = vector.broadcast %84 : vector<8x32x1xf32> to vector<8x32x32xf32>
    %86 = arith.mulf %81, %85 : vector<8x32x32xf32>
    %87 = arith.truncf %86 : vector<8x32x32xf32> to vector<8x32x32xbf16>
    %88 = arith.truncf %69 : vector<8x32x16xf32> to vector<8x32x16xbf16>
    "tpu.trace_start"() <{level = 10 : i32, message = "bqk,bkd->bqd"}> : () -> ()
    %cst_25 = arith.constant dense<0.000000e+00> : vector<8x32x16xf32>
    %89 = tpu.matmul %87, %88, %cst_25 {dimension_numbers = #tpu.dot_dimension_numbers<[2], [1], [1], [2], [0, 0, 0, 1, 1, 2], [0], [0]>} : vector<8x32x32xbf16>, vector<8x32x16xbf16>, vector<8x32x16xf32> -> vector<8x32x16xf32>
    "tpu.trace_stop"() : () -> ()
    %90 = vector.shape_cast %89 : vector<8x32x16xf32> to vector<256x16xf32>
    %91 = arith.truncf %90 : vector<256x16xf32> to vector<256x16xbf16>
    %c16 = arith.constant 16 : index
    %c0_26 = arith.constant 0 : index
    %92 = vector.load %arg5[%c16, %c0_26] : memref<64x64xbf16, #tpu.memory_space<vmem>>, vector<16x64xbf16>
    %cst_27 = arith.constant dense<0.000000e+00> : vector<256x64xf32>
    %93 = tpu.matmul %91, %92, %cst_27 {dimension_numbers = #tpu.dot_dimension_numbers<[1], [0], [0], [1], [0, 0, 1, 1], [], []>} : vector<256x16xbf16>, vector<16x64xbf16>, vector<256x64xf32> -> vector<256x64xf32>
    %94 = arith.addf %63, %93 : vector<256x64xf32>
    %95 = vector.extract_strided_slice %27 {offsets = [0, 32], sizes = [256, 16], strides = [1, 1]} : vector<256x192xf32> to vector<256x16xf32>
    %96 = vector.shape_cast %95 : vector<256x16xf32> to vector<8x32x16xf32>
    %97 = vector.extract_strided_slice %27 {offsets = [0, 96], sizes = [256, 16], strides = [1, 1]} : vector<256x192xf32> to vector<256x16xf32>
    %98 = vector.shape_cast %97 : vector<256x16xf32> to vector<8x32x16xf32>
    %99 = vector.extract_strided_slice %27 {offsets = [0, 160], sizes = [256, 16], strides = [1, 1]} : vector<256x192xf32> to vector<256x16xf32>
    %100 = vector.shape_cast %99 : vector<256x16xf32> to vector<8x32x16xf32>
    %101 = arith.truncf %96 : vector<8x32x16xf32> to vector<8x32x16xbf16>
    %102 = arith.truncf %98 : vector<8x32x16xf32> to vector<8x32x16xbf16>
    "tpu.trace_start"() <{level = 10 : i32, message = "bqd,bkd->bqk"}> : () -> ()
    %cst_28 = arith.constant dense<0.000000e+00> : vector<8x32x32xf32>
    %103 = tpu.matmul %101, %102, %cst_28 {dimension_numbers = #tpu.dot_dimension_numbers<[2], [2], [1], [1], [0, 0, 0, 1, 1, 1], [0], [0]>} : vector<8x32x16xbf16>, vector<8x32x16xbf16>, vector<8x32x32xf32> -> vector<8x32x32xf32>
    %cst_29 = arith.constant 0xFF800000 : f32
    "tpu.trace_stop"() : () -> ()
    %104 = vector.shape_cast %31 : vector<1x32x32xi1> to vector<1x32x32xi1>
    %105 = vector.broadcast %104 : vector<1x32x32xi1> to vector<8x32x32xi1>
    %106 = vector.broadcast %cst_29 : f32 to vector<8x32x32xf32>
    %107 = arith.select %105, %103, %106 : vector<8x32x32xi1>, vector<8x32x32xf32>
    %cst_30 = arith.constant dense<0xFF800000> : vector<8x32xf32>
    %108 = vector.multi_reduction <maximumf>, %107, %cst_30 [2] : vector<8x32x32xf32> to vector<8x32xf32>
    %109 = vector.shape_cast %108 : vector<8x32xf32> to vector<8x32x1xf32>
    %110 = vector.broadcast %109 : vector<8x32x1xf32> to vector<8x32x32xf32>
    %111 = arith.subf %107, %110 : vector<8x32x32xf32>
    %112 = math.exp %111 : vector<8x32x32xf32>
    %cst_31 = arith.constant dense<0.000000e+00> : vector<8x32xf32>
    %113 = vector.multi_reduction <add>, %112, %cst_31 [2] : vector<8x32x32xf32> to vector<8x32xf32>
    %114 = vector.shape_cast %113 : vector<8x32xf32> to vector<8x32x1xf32>
    %115 = tpu.reciprocal %114 {approx = true} : vector<8x32x1xf32> -> vector<8x32x1xf32>
    %116 = vector.broadcast %115 : vector<8x32x1xf32> to vector<8x32x32xf32>
    %117 = arith.mulf %112, %116 : vector<8x32x32xf32>
    %118 = arith.truncf %117 : vector<8x32x32xf32> to vector<8x32x32xbf16>
    %119 = arith.truncf %100 : vector<8x32x16xf32> to vector<8x32x16xbf16>
    "tpu.trace_start"() <{level = 10 : i32, message = "bqk,bkd->bqd"}> : () -> ()
    %cst_32 = arith.constant dense<0.000000e+00> : vector<8x32x16xf32>
    %120 = tpu.matmul %118, %119, %cst_32 {dimension_numbers = #tpu.dot_dimension_numbers<[2], [1], [1], [2], [0, 0, 0, 1, 1, 2], [0], [0]>} : vector<8x32x32xbf16>, vector<8x32x16xbf16>, vector<8x32x16xf32> -> vector<8x32x16xf32>
    "tpu.trace_stop"() : () -> ()
    %121 = vector.shape_cast %120 : vector<8x32x16xf32> to vector<256x16xf32>
    %122 = arith.truncf %121 : vector<256x16xf32> to vector<256x16xbf16>
    %c32 = arith.constant 32 : index
    %c0_33 = arith.constant 0 : index
    %123 = vector.load %arg5[%c32, %c0_33] : memref<64x64xbf16, #tpu.memory_space<vmem>>, vector<16x64xbf16>
    %cst_34 = arith.constant dense<0.000000e+00> : vector<256x64xf32>
    %124 = tpu.matmul %122, %123, %cst_34 {dimension_numbers = #tpu.dot_dimension_numbers<[1], [0], [0], [1], [0, 0, 1, 1], [], []>} : vector<256x16xbf16>, vector<16x64xbf16>, vector<256x64xf32> -> vector<256x64xf32>
    %125 = arith.addf %94, %124 : vector<256x64xf32>
    %126 = vector.extract_strided_slice %27 {offsets = [0, 48], sizes = [256, 16], strides = [1, 1]} : vector<256x192xf32> to vector<256x16xf32>
    %127 = vector.shape_cast %126 : vector<256x16xf32> to vector<8x32x16xf32>
    %128 = vector.extract_strided_slice %27 {offsets = [0, 112], sizes = [256, 16], strides = [1, 1]} : vector<256x192xf32> to vector<256x16xf32>
    %129 = vector.shape_cast %128 : vector<256x16xf32> to vector<8x32x16xf32>
    %130 = vector.extract_strided_slice %27 {offsets = [0, 176], sizes = [256, 16], strides = [1, 1]} : vector<256x192xf32> to vector<256x16xf32>
    %131 = vector.shape_cast %130 : vector<256x16xf32> to vector<8x32x16xf32>
    %132 = arith.truncf %127 : vector<8x32x16xf32> to vector<8x32x16xbf16>
    %133 = arith.truncf %129 : vector<8x32x16xf32> to vector<8x32x16xbf16>
    "tpu.trace_start"() <{level = 10 : i32, message = "bqd,bkd->bqk"}> : () -> ()
    %cst_35 = arith.constant dense<0.000000e+00> : vector<8x32x32xf32>
    %134 = tpu.matmul %132, %133, %cst_35 {dimension_numbers = #tpu.dot_dimension_numbers<[2], [2], [1], [1], [0, 0, 0, 1, 1, 1], [0], [0]>} : vector<8x32x16xbf16>, vector<8x32x16xbf16>, vector<8x32x32xf32> -> vector<8x32x32xf32>
    %cst_36 = arith.constant 0xFF800000 : f32
    "tpu.trace_stop"() : () -> ()
    %135 = vector.shape_cast %31 : vector<1x32x32xi1> to vector<1x32x32xi1>
    %136 = vector.broadcast %135 : vector<1x32x32xi1> to vector<8x32x32xi1>
    %137 = vector.broadcast %cst_36 : f32 to vector<8x32x32xf32>
    %138 = arith.select %136, %134, %137 : vector<8x32x32xi1>, vector<8x32x32xf32>
    %cst_37 = arith.constant dense<0xFF800000> : vector<8x32xf32>
    %139 = vector.multi_reduction <maximumf>, %138, %cst_37 [2] : vector<8x32x32xf32> to vector<8x32xf32>
    %140 = vector.shape_cast %139 : vector<8x32xf32> to vector<8x32x1xf32>
    %141 = vector.broadcast %140 : vector<8x32x1xf32> to vector<8x32x32xf32>
    %142 = arith.subf %138, %141 : vector<8x32x32xf32>
    %143 = math.exp %142 : vector<8x32x32xf32>
    %cst_38 = arith.constant dense<0.000000e+00> : vector<8x32xf32>
    %144 = vector.multi_reduction <add>, %143, %cst_38 [2] : vector<8x32x32xf32> to vector<8x32xf32>
    %145 = vector.shape_cast %144 : vector<8x32xf32> to vector<8x32x1xf32>
    %146 = tpu.reciprocal %145 {approx = true} : vector<8x32x1xf32> -> vector<8x32x1xf32>
    %147 = vector.broadcast %146 : vector<8x32x1xf32> to vector<8x32x32xf32>
    %148 = arith.mulf %143, %147 : vector<8x32x32xf32>
    %149 = arith.truncf %148 : vector<8x32x32xf32> to vector<8x32x32xbf16>
    %150 = arith.truncf %131 : vector<8x32x16xf32> to vector<8x32x16xbf16>
    "tpu.trace_start"() <{level = 10 : i32, message = "bqk,bkd->bqd"}> : () -> ()
    %cst_39 = arith.constant dense<0.000000e+00> : vector<8x32x16xf32>
    %151 = tpu.matmul %149, %150, %cst_39 {dimension_numbers = #tpu.dot_dimension_numbers<[2], [1], [1], [2], [0, 0, 0, 1, 1, 2], [0], [0]>} : vector<8x32x32xbf16>, vector<8x32x16xbf16>, vector<8x32x16xf32> -> vector<8x32x16xf32>
    "tpu.trace_stop"() : () -> ()
    %152 = vector.shape_cast %151 : vector<8x32x16xf32> to vector<256x16xf32>
    %153 = arith.truncf %152 : vector<256x16xf32> to vector<256x16xbf16>
    %c48 = arith.constant 48 : index
    %c0_40 = arith.constant 0 : index
    %154 = vector.load %arg5[%c48, %c0_40] : memref<64x64xbf16, #tpu.memory_space<vmem>>, vector<16x64xbf16>
    %cst_41 = arith.constant dense<0.000000e+00> : vector<256x64xf32>
    %155 = tpu.matmul %153, %154, %cst_41 {dimension_numbers = #tpu.dot_dimension_numbers<[1], [0], [0], [1], [0, 0, 1, 1], [], []>} : vector<256x16xbf16>, vector<16x64xbf16>, vector<256x64xf32> -> vector<256x64xf32>
    %156 = arith.addf %125, %155 : vector<256x64xf32>
    %157 = arith.addf %0, %156 : vector<256x64xf32>
    %c0_42 = arith.constant 0 : index
    %c0_43 = arith.constant 0 : index
    %158 = vector.load %arg6[%c0_42, %c0_43] : memref<1x64xf32, #tpu.memory_space<vmem>>, vector<1x64xf32>
    %159 = vector.broadcast %158 : vector<1x64xf32> to vector<256x64xf32>
    %160 = arith.addf %157, %159 : vector<256x64xf32>
    %c0_44 = arith.constant 0 : index
    %c0_45 = arith.constant 0 : index
    %161 = vector.load %arg7[%c0_44, %c0_45] : memref<1x64xf32, #tpu.memory_space<vmem>>, vector<1x64xf32>
    %c0_46 = arith.constant 0 : index
    %c0_47 = arith.constant 0 : index
    %162 = vector.load %arg8[%c0_46, %c0_47] : memref<1x64xf32, #tpu.memory_space<vmem>>, vector<1x64xf32>
    %cst_48 = arith.constant dense<0.000000e+00> : vector<256xf32>
    %163 = vector.multi_reduction <add>, %160, %cst_48 [1] : vector<256x64xf32> to vector<256xf32>
    %164 = vector.shape_cast %163 : vector<256xf32> to vector<256x1xf32>
    %cst_49 = arith.constant 6.400000e+01 : f32
    %165 = vector.broadcast %cst_49 : f32 to vector<256x1xf32>
    %166 = arith.divf %164, %165 : vector<256x1xf32>
    %167 = vector.broadcast %166 : vector<256x1xf32> to vector<256x64xf32>
    %168 = arith.subf %160, %167 : vector<256x64xf32>
    %169 = arith.mulf %168, %168 : vector<256x64xf32>
    %cst_50 = arith.constant dense<0.000000e+00> : vector<256xf32>
    %170 = vector.multi_reduction <add>, %169, %cst_50 [1] : vector<256x64xf32> to vector<256xf32>
    %171 = vector.shape_cast %170 : vector<256xf32> to vector<256x1xf32>
    %cst_51 = arith.constant 6.400000e+01 : f32
    %172 = vector.broadcast %cst_51 : f32 to vector<256x1xf32>
    %173 = arith.divf %171, %172 : vector<256x1xf32>
    %174 = vector.broadcast %166 : vector<256x1xf32> to vector<256x64xf32>
    %175 = arith.subf %160, %174 : vector<256x64xf32>
    %cst_52 = arith.constant 9.99999974E-6 : f32
    %176 = vector.broadcast %cst_52 : f32 to vector<256x1xf32>
    %177 = arith.addf %173, %176 : vector<256x1xf32>
    %178 = math.rsqrt %177 : vector<256x1xf32>
    %179 = vector.broadcast %178 : vector<256x1xf32> to vector<256x64xf32>
    %180 = arith.mulf %175, %179 : vector<256x64xf32>
    %181 = vector.broadcast %161 : vector<1x64xf32> to vector<256x64xf32>
    %182 = arith.mulf %180, %181 : vector<256x64xf32>
    %183 = vector.broadcast %162 : vector<1x64xf32> to vector<256x64xf32>
    %184 = arith.addf %182, %183 : vector<256x64xf32>
    %185 = arith.truncf %184 : vector<256x64xf32> to vector<256x64xbf16>
    %c0_53 = arith.constant 0 : index
    %c0_54 = arith.constant 0 : index
    %186 = vector.load %arg9[%c0_53, %c0_54] : memref<64x256xbf16, #tpu.memory_space<vmem>>, vector<64x256xbf16>
    %cst_55 = arith.constant dense<0.000000e+00> : vector<256x256xf32>
    %187 = tpu.matmul %185, %186, %cst_55 {dimension_numbers = #tpu.dot_dimension_numbers<[1], [0], [0], [1], [0, 0, 1, 1], [], []>} : vector<256x64xbf16>, vector<64x256xbf16>, vector<256x256xf32> -> vector<256x256xf32>
    %c0_56 = arith.constant 0 : index
    %c0_57 = arith.constant 0 : index
    %188 = vector.load %arg10[%c0_56, %c0_57] : memref<1x256xf32, #tpu.memory_space<vmem>>, vector<1x256xf32>
    %189 = vector.broadcast %188 : vector<1x256xf32> to vector<256x256xf32>
    %190 = arith.addf %187, %189 : vector<256x256xf32>
    %cst_58 = arith.constant 0.000000e+00 : f32
    %191 = vector.broadcast %cst_58 : f32 to vector<256x256xf32>
    %192 = arith.maximumf %190, %191 : vector<256x256xf32>
    %193 = arith.truncf %192 : vector<256x256xf32> to vector<256x256xbf16>
    %c0_59 = arith.constant 0 : index
    %c0_60 = arith.constant 0 : index
    %194 = vector.load %arg11[%c0_59, %c0_60] : memref<256x64xbf16, #tpu.memory_space<vmem>>, vector<256x64xbf16>
    %cst_61 = arith.constant dense<0.000000e+00> : vector<256x64xf32>
    %195 = tpu.matmul %193, %194, %cst_61 {dimension_numbers = #tpu.dot_dimension_numbers<[1], [0], [0], [1], [0, 0, 1, 1], [], []>} : vector<256x256xbf16>, vector<256x64xbf16>, vector<256x64xf32> -> vector<256x64xf32>
    %c0_62 = arith.constant 0 : index
    %c0_63 = arith.constant 0 : index
    %196 = vector.load %arg12[%c0_62, %c0_63] : memref<1x64xf32, #tpu.memory_space<vmem>>, vector<1x64xf32>
    %197 = vector.broadcast %196 : vector<1x64xf32> to vector<256x64xf32>
    %198 = arith.addf %195, %197 : vector<256x64xf32>
    %199 = arith.addf %160, %198 : vector<256x64xf32>
    %c0_64 = arith.constant 0 : index
    %c0_65 = arith.constant 0 : index
    %200 = vector.load %arg13[%c0_64, %c0_65] : memref<256x64xf32, #tpu.memory_space<vmem>>, vector<256x64xf32>
    tpu.vector_store %arg13[%c0_64, %c0_65], %199 {strides = array<i32>} : memref<256x64xf32, #tpu.memory_space<vmem>>, vector<256x64xf32>,
    return
  }
  func.func @transform_0(%arg0: i32) -> (i32, i32) {
    %c0_i32 = arith.constant 0 : i32
    %c0_i32_0 = arith.constant 0 : i32
    return %arg0, %c0_i32 : i32, i32
  }
  func.func @transform_1(%arg0: i32) -> (i32, i32) {
    %c0_i32 = arith.constant 0 : i32
    %c0_i32_0 = arith.constant 0 : i32
    %c0_i32_1 = arith.constant 0 : i32
    return %c0_i32, %c0_i32_0 : i32, i32
  }
  func.func @transform_2(%arg0: i32) -> (i32, i32) {
    %c0_i32 = arith.constant 0 : i32
    %c0_i32_0 = arith.constant 0 : i32
    %c0_i32_1 = arith.constant 0 : i32
    return %c0_i32, %c0_i32_0 : i32, i32
  }
  func.func @transform_3(%arg0: i32) -> (i32, i32) {
    %c0_i32 = arith.constant 0 : i32
    %c0_i32_0 = arith.constant 0 : i32
    %c0_i32_1 = arith.constant 0 : i32
    return %c0_i32, %c0_i32_0 : i32, i32
  }
  func.func @transform_4(%arg0: i32) -> (i32, i32) {
    %c0_i32 = arith.constant 0 : i32
    %c0_i32_0 = arith.constant 0 : i32
    %c0_i32_1 = arith.constant 0 : i32
    return %c0_i32, %c0_i32_0 : i32, i32
  }
  func.func @transform_5(%arg0: i32) -> (i32, i32) {
    %c0_i32 = arith.constant 0 : i32
    %c0_i32_0 = arith.constant 0 : i32
    %c0_i32_1 = arith.constant 0 : i32
    return %c0_i32, %c0_i32_0 : i32, i32
  }
  func.func @transform_6(%arg0: i32) -> (i32, i32) {
    %c0_i32 = arith.constant 0 : i32
    %c0_i32_0 = arith.constant 0 : i32
    %c0_i32_1 = arith.constant 0 : i32
    return %c0_i32, %c0_i32_0 : i32, i32
  }
  func.func @transform_7(%arg0: i32) -> (i32, i32) {
    %c0_i32 = arith.constant 0 : i32
    %c0_i32_0 = arith.constant 0 : i32
    %c0_i32_1 = arith.constant 0 : i32
    return %c0_i32, %c0_i32_0 : i32, i32
  }
  func.func @transform_8(%arg0: i32) -> (i32, i32) {
    %c0_i32 = arith.constant 0 : i32
    %c0_i32_0 = arith.constant 0 : i32
    %c0_i32_1 = arith.constant 0 : i32
    return %c0_i32, %c0_i32_0 : i32, i32
  }
  func.func @transform_9(%arg0: i32) -> (i32, i32) {
    %c0_i32 = arith.constant 0 : i32
    %c0_i32_0 = arith.constant 0 : i32
    %c0_i32_1 = arith.constant 0 : i32
    return %c0_i32, %c0_i32_0 : i32, i32
  }
  func.func @transform_10(%arg0: i32) -> (i32, i32) {
    %c0_i32 = arith.constant 0 : i32
    %c0_i32_0 = arith.constant 0 : i32
    %c0_i32_1 = arith.constant 0 : i32
    return %c0_i32, %c0_i32_0 : i32, i32
  }
  func.func @transform_11(%arg0: i32) -> (i32, i32) {
    %c0_i32 = arith.constant 0 : i32
    %c0_i32_0 = arith.constant 0 : i32
    %c0_i32_1 = arith.constant 0 : i32
    return %c0_i32, %c0_i32_0 : i32, i32
  }
  func.func @transform_12(%arg0: i32) -> (i32, i32) {
    %c0_i32 = arith.constant 0 : i32
    %c0_i32_0 = arith.constant 0 : i32
    return %arg0, %c0_i32 : i32, i32
  }
}

</mosaic_0001>

<bundles_post_ra>
// kernel: tpu_custom_call.1
= control target key start
LH: loop header
LB: loop body
LE: loop exit
PB: predicated region body
PF: predicated region fallthrough
CT: control target
= control target key end

     0   :  { %vm76_vm0 = vcmask 523264   ;;  %vm908_vm1 = vcmask 130048   ;;  %vm1479_vm3 = vcmask 261120   ;;  %s11216_s13 = smov 48   ;;  %s11217_s14 = smov 112   ;;  %s15709_s0 = inlined_call_operand.vmem [shape: f32[256,64], index: 0, kind: input, shape index: {}]   ;;  %s15710_s3 = inlined_call_operand.vmem [shape: bf16[64,192], index: 3, kind: input, shape index: {}]   ;;  %s15711_s1 = inlined_call_operand.vmem [shape: f32[1,64], index: 1, kind: input, shape index: {}]   ;;  %s15712_s2 = inlined_call_operand.vmem [shape: f32[1,64], index: 2, kind: input, shape index: {}]   ;;  %s15713_s4 = inlined_call_operand.vmem [shape: bf16[64,64], index: 4, kind: input, shape index: {}]   ;;  %s15714_s5 = inlined_call_operand.vmem [shape: f32[1,64], index: 5, kind: input, shape index: {}]   ;;  %s15715_s8 = inlined_call_operand.vmem [shape: bf16[64,256], index: 8, kind: input, shape index: {}]   ;;  %s15716_s6 = inlined_call_operand.vmem [shape: f32[1,64], index: 6, kind: input, shape index: {}]   ;;  %s15717_s7 = inlined_call_operand.vmem [shape: f32[1,64], index: 7, kind: input, shape index: {}]   ;;  %s15718_s10 = inlined_call_operand.vmem [shape: bf16[256,64], index: 10, kind: input, shape index: {}]   ;;  %s15719_s9 = inlined_call_operand.vmem [shape: f32[1,256], index: 9, kind: input, shape index: {}]   ;;  %s15720_s11 = inlined_call_operand.vmem [shape: f32[1,64], index: 11, kind: input, shape index: {}]   ;;  %s15721_s12 = inlined_call_operand.vmem [shape: f32[256,64], index: 12, kind: output, shape index: {}]  }
   0x1   :  { %v11290_v0 = vld [vmem:[%s15709_s0] sm:$0xff]  ;;  %v11295_v1 = vld [vmem:[%s15709_s0 + $0x8] sm:$0xff]  ;;  %v11300_v2 = vld [vmem:[%s15709_s0 + $0x10] sm:$0xff]  ;;  %s11218_s15 = smov 32   ;;  %s11219_s16 = smov 96  }
   0x2   :  { %v77_v3 = vsel %vm76_vm0, %v11290_v0, 0.0  ;;  %v83_v4 = vsel %vm76_vm0, %v11300_v2, 0.0  ;;  %v11309_v5 = vld [vmem:[%s15709_s0 + $0x18] sm:$0xff]  ;;  %v80_v6 = vsel %vm76_vm0, %v11295_v1, 0.0  ;;  %v11318_v8 = vld [vmem:[%s15709_s0 + $0x20] sm:$0xff]  ;;  %v11323_v9 = vld [vmem:[%s15709_s0 + $0x28] sm:$0xff] }
   0x3   :  { %78 = vadd.xlane.f32.xlu0 %v77_v3  ;;  %84 = vadd.xlane.f32.xlu1 %v83_v4  ;;  %v86_v7 = vsel %vm76_vm0, %v11309_v5, 0.0  ;;  %v89_v10 = vsel %vm76_vm0, %v11318_v8, 0.0  ;;  %v92_v11 = vsel %vm76_vm0, %v11323_v9, 0.0  ;;  %v11332_v12 = vld [vmem:[%s15709_s0 + $0x30] sm:$0xff]  ;;  %v11337_v13 = vld [vmem:[%s15709_s0 + $0x38] sm:$0xff]  ;;  %v11346_v16 = vld [vmem:[%s15709_s0 + $0x40] sm:$0xff] }
   0x4   :  { %v95_v14 = vsel %vm76_vm0, %v11332_v12, 0.0  ;;  %v98_v15 = vsel %vm76_vm0, %v11337_v13, 0.0  ;;  %v11351_v17 = vld [vmem:[%s15709_s0 + $0x48] sm:$0xff]  ;;  %v101_v18 = vsel %vm76_vm0, %v11346_v16, 0.0  ;;  %v11360_v20 = vld [vmem:[%s15709_s0 + $0x50] sm:$0xff]  ;;  %v11365_v21 = vld [vmem:[%s15709_s0 + $0x58] sm:$0xff] }
   0x5   :  { %v104_v19 = vsel %vm76_vm0, %v11351_v17, 0.0  ;;  %v107_v22 = vsel %vm76_vm0, %v11360_v20, 0.0  ;;  %v110_v23 = vsel %vm76_vm0, %v11365_v21, 0.0  ;;  %v11374_v24 = vld [vmem:[%s15709_s0 + $0x60] sm:$0xff]  ;;  %v11379_v25 = vld [vmem:[%s15709_s0 + $0x68] sm:$0xff]  ;;  %v11388_v28 = vld [vmem:[%s15709_s0 + $0x70] sm:$0xff] }
   0x6   :  { %v113_v26 = vsel %vm76_vm0, %v11374_v24, 0.0  ;;  %v116_v27 = vsel %vm76_vm0, %v11379_v25, 0.0  ;;  %v11393_v29 = vld [vmem:[%s15709_s0 + $0x78] sm:$0xff]  ;;  %v119_v30 = vsel %vm76_vm0, %v11388_v28, 0.0  ;;  %v11402_v32 = vld [vmem:[%s15709_s0 + $0x80] sm:$0xff]  ;;  %v11407_v33 = vld [vmem:[%s15709_s0 + $0x88] sm:$0xff] }
   0x7   :  { %81 = vadd.xlane.f32.xlu0 %v80_v6  ;;  %87 = vadd.xlane.f32.xlu1 %v86_v7  ;;  %v122_v31 = vsel %vm76_vm0, %v11393_v29, 0.0  ;;  %v125_v34 = vsel %vm76_vm0, %v11402_v32, 0.0  ;;  %v128_v35 = vsel %vm76_vm0, %v11407_v33, 0.0  ;;  %v11416_v36 = vld [vmem:[%s15709_s0 + $0x90] sm:$0xff]  ;;  %v11421_v37 = vld [vmem:[%s15709_s0 + $0x98] sm:$0xff]  ;;  %v11438_v51 = vld [vmem:[%s15709_s0 + $0xa0] sm:$0xff] }
   0x8   :  { %v131_v38 = vsel %vm76_vm0, %v11416_v36, 0.0  ;;  %v134_v39 = vsel %vm76_vm0, %v11421_v37, 0.0  ;;  %v137_v54 = vsel %vm76_vm0, %v11438_v51, 0.0  ;;  %v11456_v59 = vld [vmem:[%s15709_s0 + $0xa8] sm:$0xff]  ;;  %v11468_v3 = vld [vmem:[%s15709_s0 + $0xb0] sm:$0xff]  ;;  %s11220_s21 = smov 16  }
   0x9   :  { %v140_v63 = vsel %vm76_vm0, %v11456_v59, 0.0  ;;  %v143_v6 = vsel %vm76_vm0, %v11468_v3, 0.0  ;;  %s11221_s22 = smov 80  }
   0xb   :  { %90 = vadd.xlane.f32.xlu0 %v89_v10  ;;  %93 = vadd.xlane.f32.xlu1 %v92_v11  ;;  %v11481_v10 = vld [vmem:[%s15709_s0 + $0xb8] sm:$0xff] }
   0xf   :  { %96 = vadd.xlane.f32.xlu0 %v95_v14  ;;  %99 = vadd.xlane.f32.xlu1 %v98_v15 }
  0x13   :  { %102 = vadd.xlane.f32.xlu0 %v101_v18  ;;  %105 = vadd.xlane.f32.xlu1 %v104_v19  ;;  %v146_v18 = vsel %vm76_vm0, %v11481_v10, 0.0 }
  0x17   :  { %108 = vadd.xlane.f32.xlu0 %v107_v22  ;;  %111 = vadd.xlane.f32.xlu1 %v110_v23 }
  0x1b   :  { %114 = vadd.xlane.f32.xlu0 %v113_v26  ;;  %117 = vadd.xlane.f32.xlu1 %v116_v27  ;;  %v11496_v26 = vld [vmem:[%s15709_s0 + $0xc0] sm:$0xff] }
  0x1f   :  { %120 = vadd.xlane.f32.xlu0 %v119_v30  ;;  %123 = vadd.xlane.f32.xlu1 %v122_v31  ;;  %v149_v30 = vsel %vm76_vm0, %v11496_v26, 0.0 }
  0x23   :  { %126 = vadd.xlane.f32.xlu0 %v125_v34  ;;  %129 = vadd.xlane.f32.xlu1 %v128_v35  ;;  %v11507_v34 = vld [vmem:[%s15709_s0 + $0xc8] sm:$0xff] }
  0x27   :  { %132 = vadd.xlane.f32.xlu0 %v131_v38  ;;  %135 = vadd.xlane.f32.xlu1 %v134_v39 }
  0x90   :  { %v79_v40 = vpop.xlane.xlu0 %78  ;;  %v85_v41 = vpop.xlane.xlu1 %84 }
  0x91   :  { %v174_v42 = vmul.f32 0.015625, %v79_v40  ;;  %v176_v43 = vmul.f32 0.015625, %v85_v41  ;;  %v152_v40 = vsel %vm76_vm0, %v11507_v34, 0.0 }
  0x93   :  { %v11428_v44 = vsub.f32 %v11290_v0, %v174_v42  ;;  %v11431_v48 = vsub.f32 %v11300_v2, %v176_v43 }
  0x94   :  { %v82_v45 = vpop.xlane.xlu0 %81  ;;  %v88_v46 = vpop.xlane.xlu1 %87 }
  0x95   :  { %v175_v47 = vmul.f32 0.015625, %v82_v45  ;;  %v238_v49 = vmul.f32 %v11428_v44, %v11428_v44  ;;  %v177_v50 = vmul.f32 0.015625, %v88_v46  ;;  %v240_v58 = vmul.f32 %v11431_v48, %v11431_v48  ;;  %v11522_v46 = vld [vmem:[%s15709_s0 + $0xd0] sm:$0xff] }
  0x97   :  { %v11441_v52 = vsub.f32 %v11295_v1, %v175_v47  ;;  %v270_v53 = vsel %vm76_vm0, %v238_v49, 0.0  ;;  %v11447_v56 = vsub.f32 %v11309_v5, %v177_v50  ;;  %v276_v0 = vsel %vm76_vm0, %v240_v58, 0.0  ;;  %v11527_v47 = vld [vmem:[%s15709_s0 + $0xd8] sm:$0xff]  ;;  %v10498_v49 = vld [vmem:[%s15710_s3 + $0x4] ss:$8 sps:$4 sm:$0xff]  }
  0x98   :  { %271 = vadd.xlane.f32.xlu0 %v270_v53  ;;  %v91_v55 = vpop.xlane.xlu0 %90  ;;  %v94_v61 = vpop.xlane.xlu1 %93  ;;  %682 = vmatprep.subr.bf16.mxu0 %v10498_v49 }
  0x99   :  { %v239_v57 = vmul.f32 %v11441_v52, %v11441_v52  ;;  %v178_v60 = vmul.f32 0.015625, %v91_v55  ;;  %v179_v2 = vmul.f32 0.015625, %v94_v61  ;;  %v241_v4 = vmul.f32 %v11447_v56, %v11447_v56  ;;  %v10501_v61 = vld [vmem:[%s15710_s3 + $0x14] ss:$8 sps:$4 sm:$0xff]  }
  0x9b   :  { %v273_v62 = vsel %vm76_vm0, %v239_v57, 0.0  ;;  %v11463_v1 = vsub.f32 %v11318_v8, %v178_v60  ;;  %v11475_v7 = vsub.f32 %v11323_v9, %v179_v2  ;;  %v279_v8 = vsel %vm76_vm0, %v241_v4, 0.0 }
  0x9c   :  { %138 = vadd.xlane.f32.xlu0 %v137_v54  ;;  %274 = vadd.xlane.f32.xlu1 %v273_v62  ;;  %v97_v5 = vpop.xlane.xlu0 %96  ;;  %v100_v15 = vpop.xlane.xlu1 %99  ;;  %v10500_v54 = vld [vmem:[%s15710_s3] ss:$8 sps:$4 sm:$0xff]   ;;  %v158_v62 = vsel %vm76_vm0, %v11527_v47, 0.0 }
  0x9d   :  { %v242_v11 = vmul.f32 %v11463_v1, %v11463_v1  ;;  %v180_v14 = vmul.f32 0.015625, %v97_v5  ;;  %v181_v22 = vmul.f32 0.015625, %v100_v15  ;;  %v243_v23 = vmul.f32 %v11475_v7, %v11475_v7  ;;  %683 = vmatpush1.bf16.msra.mxu0 %v10500_v54  ;;  %v11612_v54 = vld [vmem:[%s15709_s0 + $0xf8] sm:$0xff] }
  0x9e   :  { %684 = vmatprep.subr.bf16.mxu0 %v10501_v61 }
  0x9f   :  { %v282_v9 = vsel %vm76_vm0, %v242_v11, 0.0  ;;  %v11489_v19 = vsub.f32 %v11332_v12, %v180_v14  ;;  %v11501_v31 = vsub.f32 %v11337_v13, %v181_v22  ;;  %v285_v12 = vsel %vm76_vm0, %v243_v23, 0.0  ;;  %v10504_v11 = vld [vmem:[%s15710_s3 + $0x24] ss:$8 sps:$4 sm:$0xff]   ;;  %v10506_v14 = vld [vmem:[%s15710_s3 + $0x20] ss:$8 sps:$4 sm:$0xff]  }
  0xa0   :  { %277 = vadd.xlane.f32.xlu0 %v276_v0  ;;  %141 = vadd.xlane.f32.xlu1 %v140_v63  ;;  %v103_v27 = vpop.xlane.xlu0 %102  ;;  %v106_v39 = vpop.xlane.xlu1 %105 }
  0xa1   :  { %v244_v35 = vmul.f32 %v11489_v19, %v11489_v19  ;;  %v182_v38 = vmul.f32 0.015625, %v103_v27  ;;  %v183_v43 = vmul.f32 0.015625, %v106_v39  ;;  %v245_v45 = vmul.f32 %v11501_v31, %v11501_v31 }
  0xa3   :  { %v288_v13 = vsel %vm76_vm0, %v244_v35, 0.0  ;;  %v11515_v42 = vsub.f32 %v11346_v16, %v182_v38  ;;  %v155_v16 = vsel %vm76_vm0, %v11522_v46, 0.0  ;;  %v11538_v55 = vsub.f32 %v11351_v17, %v183_v43  ;;  %v10503_v17 = vld [vmem:[%s15710_s3 + $0x10] ss:$8 sps:$4 sm:$0xff]  }
  0xa4   :  { %144 = vadd.xlane.f32.xlu0 %v143_v6  ;;  %280 = vadd.xlane.f32.xlu1 %v279_v8  ;;  %v109_v41 = vpop.xlane.xlu0 %108  ;;  %v112_v50 = vpop.xlane.xlu1 %111  ;;  %v291_v57 = vsel %vm76_vm0, %v245_v45, 0.0  ;;  %v11560_v6 = vld [vmem:[%s15709_s0 + $0xe0] sm:$0xff]  ;;  %v10509_v38 = vld [vmem:[%s15710_s3 + $0x30] ss:$8 sps:$4 sm:$0xff]  }
  0xa5   :  { %v246_v58 = vmul.f32 %v11515_v42, %v11515_v42  ;;  %v184_v60 = vmul.f32 0.015625, %v109_v41  ;;  %v185_v4 = vmul.f32 0.015625, %v112_v50  ;;  %v247_v5 = vmul.f32 %v11538_v55, %v11538_v55  ;;  %685 = vmatpush1.bf16.msra.mxu0 %v10503_v17 }
  0xa6   :  { %686 = vmatprep.subr.bf16.mxu0 %v10504_v11 }
  0xa7   :  { %v294_v0 = vsel %vm76_vm0, %v246_v58, 0.0  ;;  %v11553_v2 = vsub.f32 %v11360_v20, %v184_v60  ;;  %v161_v20 = vsel %vm76_vm0, %v11560_v6, 0.0  ;;  %v11571_v15 = vsub.f32 %v11365_v21, %v185_v4 }
  0xa8   :  { %147 = vadd.xlane.f32.xlu1 %v146_v18  ;;  %283 = vadd.xlane.f32.xlu0 %v282_v9  ;;  %v115_v53 = vpop.xlane.xlu0 %114  ;;  %v118_v63 = vpop.xlane.xlu1 %117  ;;  %v297_v18 = vsel %vm76_vm0, %v247_v5, 0.0  ;;  %v11577_v9 = vld [vmem:[%s15709_s0 + $0xe8] sm:$0xff]  ;;  %v15722_v58 = vmov 0  }
  0xa9   :  { %v248_v22 = vmul.f32 %v11553_v2, %v11553_v2  ;;  %v186_v23 = vmul.f32 0.015625, %v115_v53  ;;  %687 = vmatpush1.bf16.msra.mxu0 %v10506_v14  ;;  %v164_v21 = vsel %vm76_vm0, %v11577_v9, 0.0  ;;  %v249_v41 = vmul.f32 %v11571_v15, %v11571_v15  ;;  %714 = vmatprep.mubr.bf16.mxu0 %v15722_v58 }
  0xab   :  { %v300_v39 = vsel %vm76_vm0, %v248_v22, 0.0  ;;  %v303_v50 = vsel %vm76_vm0, %v249_v41, 0.0 }
  0xac   :  { %286 = vadd.xlane.f32.xlu1 %v285_v12  ;;  %150 = vadd.xlane.f32.xlu0 %v149_v30  ;;  %v121_v8 = vpop.xlane.xlu0 %120  ;;  %v124_v27 = vpop.xlane.xlu1 %123  ;;  %v10507_v30 = vld [vmem:[%s15710_s3 + $0x34] ss:$8 sps:$4 sm:$0xff]   ;;  %v187_v12 = vmul.f32 0.015625, %v118_v63 }
  0xad   :  { %v188_v43 = vmul.f32 0.015625, %v121_v8  ;;  %688 = vmatprep.subr.bf16.mxu0 %v10507_v30  ;;  %v189_v49 = vmul.f32 0.015625, %v124_v27 }
  0xae   :  { %689 = vmatpush1.bf16.msra.mxu0 %v10509_v38  ;;  %v11601_v45 = vsub.f32 %v11379_v25, %v187_v12 }
  0xaf   :  { %v11607_v53 = vsub.f32 %v11388_v28, %v188_v43  ;;  %v11618_v61 = vsub.f32 %v11393_v29, %v189_v49  ;;  %v170_v28 = vsel %vm76_vm0, %v11612_v54, 0.0 }
  0xb0   :  { %153 = vadd.xlane.f32.xlu1 %v152_v40  ;;  %289 = vadd.xlane.f32.xlu0 %v288_v13  ;;  %v127_v35 = vpop.xlane.xlu0 %126  ;;  %v11591_v40 = vsub.f32 %v11374_v24, %v186_v23  ;;  %v11598_v13 = vld [vmem:[%s15709_s0 + $0xf0] sm:$0xff]  ;;  %v251_v63 = vmul.f32 %v11601_v45, %v11601_v45 }
  0xb1   :  { %v167_v24 = vsel %vm76_vm0, %v11598_v13, 0.0  ;;  %v190_v25 = vmul.f32 0.015625, %v127_v35  ;;  %v252_v4 = vmul.f32 %v11607_v53, %v11607_v53 }
  0xb2   :  { %v309_v11 = vsel %vm76_vm0, %v251_v63, 0.0 }
  0xb3   :  { %v312_v14 = vsel %vm76_vm0, %v252_v4, 0.0 }
  0xb4   :  { %292 = vadd.xlane.f32.xlu1 %v291_v57  ;;  %156 = vadd.xlane.f32.xlu0 %v155_v16  ;;  %v130_v16 = vpop.xlane.xlu1 %129  ;;  %v250_v57 = vmul.f32 %v11591_v40, %v11591_v40  ;;  %v133_v60 = vpop.xlane.xlu0 %132 }
  0xb5   :  { %v192_v5 = vmul.f32 0.015625, %v133_v60 }
  0xb6   :  { %v306_v17 = vsel %vm76_vm0, %v250_v57, 0.0 }
  0xb8   :  { %159 = vadd.xlane.f32.xlu1 %v158_v62  ;;  %295 = vadd.xlane.f32.xlu0 %v294_v0  ;;  %v191_v62 = vmul.f32 0.015625, %v130_v16  ;;  %v11626_v0 = vsub.f32 %v11402_v32, %v190_v25  ;;  %v136_v8 = vpop.xlane.xlu1 %135  ;;  %v11638_v32 = vsub.f32 %v11416_v36, %v192_v5 }
  0xba   :  { %v11631_v29 = vsub.f32 %v11407_v33, %v191_v62  ;;  %v254_v22 = vmul.f32 %v11626_v0, %v11626_v0  ;;  %v256_v36 = vmul.f32 %v11638_v32, %v11638_v32 }
  0xbc   :  { %298 = vadd.xlane.f32.xlu1 %v297_v18  ;;  %162 = vadd.xlane.f32.xlu0 %v161_v20  ;;  %v253_v20 = vmul.f32 %v11618_v61, %v11618_v61  ;;  %v193_v18 = vmul.f32 0.015625, %v136_v8  ;;  %v318_v27 = vsel %vm76_vm0, %v254_v22, 0.0  ;;  %v255_v30 = vmul.f32 %v11631_v29, %v11631_v29 }
  0xbd   :  { %v324_v12 = vsel %vm76_vm0, %v256_v36, 0.0 }
  0xbe   :  { %v315_v23 = vsel %vm76_vm0, %v253_v20, 0.0  ;;  %v11644_v33 = vsub.f32 %v11421_v37, %v193_v18 }
  0xc0   :  { %165 = vadd.xlane.f32.xlu1 %v164_v21  ;;  %301 = vadd.xlane.f32.xlu0 %v300_v39  ;;  %v321_v21 = vsel %vm76_vm0, %v255_v30, 0.0  ;;  %v257_v35 = vmul.f32 %v11644_v33, %v11644_v33 }
  0xc2   :  { %v327_v37 = vsel %vm76_vm0, %v257_v35, 0.0 }
  0xc4   :  { %304 = vadd.xlane.f32.xlu1 %v303_v50  ;;  %168 = vadd.xlane.f32.xlu0 %v167_v24 }
  0xc8   :  { %171 = vadd.xlane.f32.xlu1 %v170_v28  ;;  %307 = vadd.xlane.f32.xlu0 %v306_v17 }
  0xcc   :  { %310 = vadd.xlane.f32.xlu1 %v309_v11  ;;  %313 = vadd.xlane.f32.xlu0 %v312_v14 }
  0xd0   :  { %316 = vadd.xlane.f32.xlu1 %v315_v23  ;;  %319 = vadd.xlane.f32.xlu0 %v318_v27 }
  0xd4   :  { %322 = vadd.xlane.f32.xlu1 %v321_v21  ;;  %325 = vadd.xlane.f32.xlu0 %v324_v12 }
  0xd8   :  { %328 = vadd.xlane.f32.xlu1 %v327_v37  ;;  %v11677_v37 = vld [vmem:[%s15711_s1] ss:$0 sm:$0xff] }
 0x125   :  { %v272_v38 = vpop.xlane.xlu0 %271 }
 0x126   :  { %v366_v39 = vmul.f32 0.015625, %v272_v38 }
 0x128   :  { %v398_v41 = vadd.f32 1e-05, %v366_v39 }
 0x129   :  { %v275_v43 = vpop.xlane.xlu1 %274  ;;  %v139_v24 = vpop.xlane.xlu0 %138 }
 0x12a   :  { %10542 = vrsqrt.f32 %v398_v41  ;;  %v367_v49 = vmul.f32 0.015625, %v275_v43  ;;  %v194_v16 = vmul.f32 0.015625, %v139_v24 }
 0x12c   :  { %v399_v50 = vadd.f32 1e-05, %v367_v49  ;;  %v11657_v57 = vsub.f32 %v11438_v51, %v194_v16 }
 0x12d   :  { %v142_v25 = vpop.xlane.xlu1 %141  ;;  %v278_v60 = vpop.xlane.xlu0 %277 }
 0x12e   :  { %10544 = vrsqrt.f32 %v399_v50  ;;  %v195_v28 = vmul.f32 0.015625, %v142_v25  ;;  %v368_v62 = vmul.f32 0.015625, %v278_v60  ;;  %v258_v63 = vmul.f32 %v11657_v57, %v11657_v57 }
 0x130   :  { %v11662_v17 = vsub.f32 %v11456_v59, %v195_v28  ;;  %v400_v4 = vadd.f32 1e-05, %v368_v62  ;;  %v330_v5 = vsel %vm76_vm0, %v258_v63, 0.0 }
 0x131   :  { %v281_v8 = vpop.xlane.xlu1 %280  ;;  %331 = vadd.xlane.f32.xlu0 %v330_v5  ;;  %v145_v11 = vpop.xlane.xlu0 %144 }
 0x132   :  { %10546 = vrsqrt.f32 %v400_v4  ;;  %v369_v51 = vmul.f32 0.015625, %v281_v8  ;;  %v196_v20 = vmul.f32 0.015625, %v145_v11  ;;  %v259_v14 = vmul.f32 %v11662_v17, %v11662_v17 }
 0x134   :  { %v10543_v18 = vpop.eup %10542  ;;  %v401_v22 = vadd.f32 1e-05, %v369_v51  ;;  %v11668_v23 = vsub.f32 %v11468_v3, %v196_v20  ;;  %v333_v59 = vsel %vm76_vm0, %v259_v14, 0.0 }
 0x135   :  { %334 = vadd.xlane.f32.xlu1 %v333_v59  ;;  %v148_v27 = vpop.xlane.xlu1 %147  ;;  %v284_v30 = vpop.xlane.xlu0 %283  ;;  %v462_v36 = vmul.f32 %v10543_v18, %v11428_v44 }
 0x136   :  { %10548 = vrsqrt.f32 %v401_v22  ;;  %v197_v21 = vmul.f32 0.015625, %v148_v27  ;;  %v370_v12 = vmul.f32 0.015625, %v284_v30  ;;  %v260_v35 = vmul.f32 %v11668_v23, %v11668_v23 }
 0x137   :  { %v500_v49 = vmul.f32 %v11677_v37, %v462_v36 }
 0x138   :  { %v10545_v3 = vpop.eup %10544  ;;  %v11680_v38 = vsub.f32 %v11481_v10, %v197_v21  ;;  %v402_v39 = vadd.f32 1e-05, %v370_v12  ;;  %v336_v41 = vsel %vm76_vm0, %v260_v35, 0.0  ;;  %v11690_v10 = vld [vmem:[%s15712_s2] ss:$0 sm:$0xff]  ;;  %s11215_s2 = smov 64  }
 0x139   :  { %v287_v43 = vpop.xlane.xlu1 %286  ;;  %337 = vadd.xlane.f32.xlu0 %v336_v41  ;;  %v151_v44 = vpop.xlane.xlu0 %150  ;;  %v463_v24 = vmul.f32 %v10545_v3, %v11441_v52  ;;  %v538_v8 = vadd.f32 %v11690_v10, %v500_v49 }
 0x13a   :  { %10550 = vrsqrt.f32 %v402_v39  ;;  %v371_v16 = vmul.f32 0.015625, %v287_v43  ;;  %v198_v50 = vmul.f32 0.015625, %v151_v44  ;;  %v261_v25 = vmul.f32 %v11680_v38, %v11680_v38 }
 0x13b   :  { %v501_v60 = vmul.f32 %v11677_v37, %v463_v24 }
 0x13c   :  { %v10547_v28 = vpop.eup %10546  ;;  %v403_v62 = vadd.f32 1e-05, %v371_v16  ;;  %v11694_v63 = vsub.f32 %v11496_v26, %v198_v50  ;;  %v339_v52 = vsel %vm76_vm0, %v261_v25, 0.0 }
 0x13d   :  { %340 = vadd.xlane.f32.xlu1 %v339_v52  ;;  %v154_v4 = vpop.xlane.xlu1 %153  ;;  %v290_v5 = vpop.xlane.xlu0 %289  ;;  %v539_v11 = vadd.f32 %v11690_v10, %v501_v60  ;;  %v464_v51 = vmul.f32 %v10547_v28, %v11431_v48 }
 0x13e   :  { %10552 = vrsqrt.f32 %v403_v62  ;;  %v199_v20 = vmul.f32 0.015625, %v154_v4  ;;  %v372_v14 = vmul.f32 0.015625, %v290_v5  ;;  %v262_v18 = vmul.f32 %v11694_v63, %v11694_v63 }
 0x13f   :  { %v570_v22 = vpack.c.bf16 %v539_v11, %v538_v8  ;;  %v502_v12 = vmul.f32 %v11677_v37, %v464_v51 }
 0x140   :  { %v10549_v26 = vpop.eup %10548  ;;  %v11703_v59 = vsub.f32 %v11507_v34, %v199_v20  ;;  %v404_v27 = vadd.f32 1e-05, %v372_v14  ;;  %v342_v30 = vsel %vm76_vm0, %v262_v18, 0.0 }
 0x141   :  { %v293_v36 = vpop.xlane.xlu1 %292  ;;  %8988 = vmatmul.mubr.msk.bf16.vlgmr.msra.gmra.mrb[0].mxu0 %vm76_vm0, %v570_v22  ;;  %343 = vadd.xlane.f32.xlu0 %v342_v30  ;;  %v157_v21 = vpop.xlane.xlu0 %156  ;;  %v465_v48 = vmul.f32 %v10549_v26, %v11447_v56  ;;  %v540_v16 = vadd.f32 %v11690_v10, %v502_v12 }
 0x142   :  { %10554 = vrsqrt.f32 %v404_v27  ;;  %v373_v35 = vmul.f32 0.015625, %v293_v36  ;;  %v200_v3 = vmul.f32 0.015625, %v157_v21  ;;  %v263_v39 = vmul.f32 %v11703_v59, %v11703_v59  ;;  %724 = vmatprep.mubr.bf16.mxu0 %v15722_v58 }
 0x143   :  { %v503_v34 = vmul.f32 %v11677_v37, %v465_v48 }
 0x144   :  { %v10551_v41 = vpop.eup %10550  ;;  %v405_v43 = vadd.f32 1e-05, %v373_v35  ;;  %v11714_v44 = vsub.f32 %v11522_v46, %v200_v3  ;;  %v345_v24 = vsel %vm76_vm0, %v263_v39, 0.0 }
 0x145   :  { %346 = vadd.xlane.f32.xlu1 %v345_v24  ;;  %v160_v56 = vpop.xlane.xlu1 %159  ;;  %v296_v49 = vpop.xlane.xlu0 %295  ;;  %v541_v50 = vadd.f32 %v11690_v10, %v503_v34  ;;  %v466_v25 = vmul.f32 %v10551_v41, %v11463_v1 }
 0x146   :  { %10556 = vrsqrt.f32 %v405_v43  ;;  %v201_v60 = vmul.f32 0.015625, %v160_v56  ;;  %v374_v28 = vmul.f32 0.015625, %v296_v49  ;;  %v264_v62 = vmul.f32 %v11714_v44, %v11714_v44 }
 0x147   :  { %v571_v52 = vpack.c.bf16 %v541_v50, %v540_v16  ;;  %v504_v20 = vmul.f32 %v11677_v37, %v466_v25 }
 0x148   :  { %v10553_v46 = vpop.eup %10552  ;;  %v11723_v4 = vsub.f32 %v11527_v47, %v201_v60  ;;  %v406_v5 = vadd.f32 1e-05, %v374_v28  ;;  %v348_v8 = vsel %vm76_vm0, %v264_v62, 0.0 }
 0x149   :  { %v299_v11 = vpop.xlane.xlu1 %298  ;;  %8989 = vmatmul.mubr.msk.bf16.gmra.mrb[4].mxu0 %vm76_vm0, %v571_v52  ;;  %349 = vadd.xlane.f32.xlu0 %v348_v8  ;;  %v163_v51 = vpop.xlane.xlu0 %162  ;;  %v467_v1 = vmul.f32 %v10553_v46, %v11475_v7  ;;  %v542_v48 = vadd.f32 %v11690_v10, %v504_v20 }
 0x14a   :  { %10558 = vrsqrt.f32 %v406_v5  ;;  %v375_v14 = vmul.f32 0.015625, %v299_v11  ;;  %v202_v18 = vmul.f32 0.015625, %v163_v51  ;;  %v265_v22 = vmul.f32 %v11723_v4, %v11723_v4  ;;  %734 = vmatprep.mubr.bf16.mxu0 %v15722_v58 }
 0x14b   :  { %v505_v47 = vmul.f32 %v11677_v37, %v467_v1 }
 0x14c   :  { %v10555_v26 = vpop.eup %10554  ;;  %v407_v27 = vadd.f32 1e-05, %v375_v14  ;;  %v11734_v30 = vsub.f32 %v11560_v6, %v202_v18  ;;  %v351_v36 = vsel %vm76_vm0, %v265_v22, 0.0 }
 0x14d   :  { %352 = vadd.xlane.f32.xlu1 %v351_v36  ;;  %v166_v7 = vpop.xlane.xlu1 %165  ;;  %v302_v21 = vpop.xlane.xlu0 %301  ;;  %v543_v12 = vadd.f32 %v11690_v10, %v505_v47  ;;  %v468_v35 = vmul.f32 %v10555_v26, %v11489_v19 }
 0x14e   :  { %10560 = vrsqrt.f32 %v407_v27  ;;  %v203_v3 = vmul.f32 0.015625, %v166_v7  ;;  %v376_v39 = vmul.f32 0.015625, %v302_v21  ;;  %v266_v34 = vmul.f32 %v11734_v30, %v11734_v30 }
 0x14f   :  { %v572_v41 = vpack.c.bf16 %v543_v12, %v542_v48  ;;  %v506_v50 = vmul.f32 %v11677_v37, %v468_v35 }
 0x150   :  { %v10557_v6 = vpop.eup %10556  ;;  %v11743_v43 = vsub.f32 %v11577_v9, %v203_v3  ;;  %v408_v24 = vadd.f32 1e-05, %v376_v39  ;;  %v354_v56 = vsel %vm76_vm0, %v266_v34, 0.0 }
 0x151   :  { %v305_v49 = vpop.xlane.xlu1 %304  ;;  %8990 = vmatmul.mubr.msk.bf16.gmra.mrb[8].mxu0 %vm76_vm0, %v572_v41  ;;  %355 = vadd.xlane.f32.xlu0 %v354_v56  ;;  %v169_v16 = vpop.xlane.xlu0 %168  ;;  %v469_v19 = vmul.f32 %v10557_v6, %v11501_v31  ;;  %v544_v11 = vadd.f32 %v11690_v10, %v506_v50 }
 0x152   :  { %10562 = vrsqrt.f32 %v408_v24  ;;  %v377_v25 = vmul.f32 0.015625, %v305_v49  ;;  %v204_v60 = vmul.f32 0.015625, %v169_v16  ;;  %v267_v28 = vmul.f32 %v11743_v43, %v11743_v43  ;;  %744 = vmatprep.mubr.bf16.mxu0 %v15722_v58 }
 0x153   :  { %v507_v9 = vmul.f32 %v11677_v37, %v469_v19 }
 0x154   :  { %v10559_v62 = vpop.eup %10558  ;;  %v409_v52 = vadd.f32 1e-05, %v377_v25  ;;  %v11754_v46 = vsub.f32 %v11598_v13, %v204_v60  ;;  %v357_v5 = vsel %vm76_vm0, %v267_v28, 0.0 }
 0x155   :  { %358 = vadd.xlane.f32.xlu1 %v357_v5  ;;  %v172_v31 = vpop.xlane.xlu1 %171  ;;  %v308_v8 = vpop.xlane.xlu0 %307  ;;  %v545_v51 = vadd.f32 %v11690_v10, %v507_v9  ;;  %v470_v1 = vmul.f32 %v10559_v62, %v11515_v42 }
 0x156   :  { %10564 = vrsqrt.f32 %v409_v52  ;;  %v205_v20 = vmul.f32 0.015625, %v172_v31  ;;  %v378_v14 = vmul.f32 0.015625, %v308_v8  ;;  %v268_v18 = vmul.f32 %v11754_v46, %v11754_v46 }
 0x157   :  { %v573_v22 = vpack.c.bf16 %v545_v51, %v544_v11  ;;  %v508_v21 = vmul.f32 %v11677_v37, %v470_v1 }
 0x158   :  { %v10561_v13 = vpop.eup %10560  ;;  %v11763_v47 = vsub.f32 %v11612_v54, %v205_v20  ;;  %v410_v26 = vadd.f32 1e-05, %v378_v14  ;;  %v360_v27 = vsel %vm76_vm0, %v268_v18, 0.0 }
 0x159   :  { %v311_v36 = vpop.xlane.xlu1 %310  ;;  %8991 = vmatmul.mubr.msk.bf16.gmra.mrb[12].mxu0 %vm76_vm0, %v573_v22  ;;  %361 = vadd.xlane.f32.xlu0 %v360_v27  ;;  %v314_v7 = vpop.xlane.xlu0 %313  ;;  %v471_v42 = vmul.f32 %v10561_v13, %v11538_v55  ;;  %v546_v24 = vadd.f32 %v11690_v10, %v508_v21 }
 0x15a   :  { %10566 = vrsqrt.f32 %v410_v26  ;;  %v379_v48 = vmul.f32 0.015625, %v311_v36  ;;  %v380_v12 = vmul.f32 0.015625, %v314_v7  ;;  %v269_v35 = vmul.f32 %v11763_v47, %v11763_v47  ;;  %754 = vmatprep.mubr.bf16.mxu0 %v15722_v58 }
 0x15b   :  { %v509_v54 = vmul.f32 %v11677_v37, %v471_v42 }
 0x15c   :  { %v10563_v3 = vpop.eup %10562  ;;  %v411_v39 = vadd.f32 1e-05, %v379_v48  ;;  %v412_v34 = vadd.f32 1e-05, %v380_v12  ;;  %v363_v41 = vsel %vm76_vm0, %v269_v35, 0.0 }
 0x15d   :  { %364 = vadd.xlane.f32.xlu1 %v363_v41  ;;  %v317_v6 = vpop.xlane.xlu1 %316  ;;  %v320_v55 = vpop.xlane.xlu0 %319  ;;  %v547_v56 = vadd.f32 %v11690_v10, %v509_v54  ;;  %v472_v49 = vmul.f32 %v10563_v3, %v11553_v2 }
 0x15e   :  { %10568 = vrsqrt.f32 %v411_v39  ;;  %v381_v16 = vmul.f32 0.015625, %v317_v6  ;;  %v382_v60 = vmul.f32 0.015625, %v320_v55 }
 0x15f   :  { %v574_v19 = vpack.c.bf16 %v547_v56, %v546_v24  ;;  %10570 = vrsqrt.f32 %v412_v34  ;;  %v510_v62 = vmul.f32 %v11677_v37, %v472_v49 }
 0x160   :  { %v10565_v50 = vpop.eup %10564  ;;  %v413_v25 = vadd.f32 1e-05, %v381_v16  ;;  %v414_v31 = vadd.f32 1e-05, %v382_v60 }
 0x161   :  { %v323_v28 = vpop.xlane.xlu1 %322  ;;  %8992 = vmatmul.mubr.msk.bf16.gmra.mrb[16].mxu0 %vm76_vm0, %v574_v19  ;;  %v473_v9 = vmul.f32 %v10565_v50, %v11571_v15  ;;  %v326_v11 = vpop.xlane.xlu0 %325  ;;  %v548_v1 = vadd.f32 %v11690_v10, %v510_v62 }
 0x162   :  { %10572 = vrsqrt.f32 %v413_v25  ;;  %v383_v52 = vmul.f32 0.015625, %v323_v28  ;;  %764 = vmatprep.mubr.bf16.mxu0 %v15722_v58  ;;  %v384_v13 = vmul.f32 0.015625, %v326_v11 }
 0x163   :  { %v511_v2 = vmul.f32 %v11677_v37, %v473_v9 }
 0x164   :  { %v10567_v5 = vpop.eup %10566  ;;  %v415_v8 = vadd.f32 1e-05, %v383_v52 }
 0x165   :  { %v329_v51 = vpop.xlane.xlu1 %328  ;;  %v549_v20 = vadd.f32 %v11690_v10, %v511_v2  ;;  %v474_v14 = vmul.f32 %v10567_v5, %v11591_v40  ;;  %v416_v40 = vadd.f32 1e-05, %v384_v13 }
 0x166   :  { %10574 = vrsqrt.f32 %v415_v8  ;;  %v385_v15 = vmul.f32 0.015625, %v329_v51 }
 0x167   :  { %v575_v18 = vpack.c.bf16 %v549_v20, %v548_v1  ;;  %10576 = vrsqrt.f32 %v414_v31  ;;  %v512_v27 = vmul.f32 %v11677_v37, %v474_v14 }
 0x168   :  { %v10569_v22 = vpop.eup %10568  ;;  %v417_v7 = vadd.f32 1e-05, %v385_v15 }
 0x169   :  { %8993 = vmatmul.mubr.msk.bf16.gmra.mrb[20].mxu0 %vm76_vm0, %v575_v18  ;;  %v475_v26 = vmul.f32 %v10569_v22, %v11601_v45  ;;  %v10571_v36 = vpop.eup %10570  ;;  %v550_v48 = vadd.f32 %v11690_v10, %v512_v27 }
 0x16a   :  { %774 = vmatprep.mubr.bf16.mxu0 %v15722_v58  ;;  %v476_v35 = vmul.f32 %v10571_v36, %v11607_v53  ;;  %10578 = vrsqrt.f32 %v417_v7 }
 0x16b   :  { %v513_v42 = vmul.f32 %v11677_v37, %v475_v26  ;;  %10580 = vrsqrt.f32 %v416_v40 }
 0x16c   :  { %v10573_v21 = vpop.eup %10572  ;;  %v514_v34 = vmul.f32 %v11677_v37, %v476_v35 }
 0x16d   :  { %v551_v12 = vadd.f32 %v11690_v10, %v513_v42  ;;  %v477_v54 = vmul.f32 %v10573_v21, %v11618_v61 }
 0x16e   :  { %v552_v53 = vadd.f32 %v11690_v10, %v514_v34 }
 0x16f   :  { %v576_v45 = vpack.c.bf16 %v551_v12, %v550_v48  ;;  %v515_v3 = vmul.f32 %v11677_v37, %v477_v54 }
 0x170   :  { %v10575_v39 = vpop.eup %10574 }
 0x171   :  { %8994 = vmatmul.mubr.msk.bf16.gmra.mrb[24].mxu0 %vm76_vm0, %v576_v45  ;;  %v10577_v41 = vpop.eup %10576  ;;  %v553_v6 = vadd.f32 %v11690_v10, %v515_v3  ;;  %v479_v55 = vmul.f32 %v10575_v39, %v11631_v29 }
 0x172   :  { %784 = vmatprep.mubr.bf16.mxu0 %v15722_v58  ;;  %v478_v61 = vmul.f32 %v10577_v41, %v11626_v0 }
 0x173   :  { %v577_v24 = vpack.c.bf16 %v553_v6, %v552_v53  ;;  %v517_v56 = vmul.f32 %v11677_v37, %v479_v55 }
 0x174   :  { %v10579_v49 = vpop.eup %10578  ;;  %v516_v16 = vmul.f32 %v11677_v37, %v478_v61 }
 0x175   :  { %v10581_v19 = vpop.eup %10580  ;;  %v555_v50 = vadd.f32 %v11690_v10, %v517_v56  ;;  %v481_v25 = vmul.f32 %v10579_v49, %v11644_v33 }
 0x176   :  { %v554_v29 = vadd.f32 %v11690_v10, %v516_v16  ;;  %v480_v60 = vmul.f32 %v10581_v19, %v11638_v32 }
 0x177   :  { %v519_v28 = vmul.f32 %v11677_v37, %v481_v25 }
 0x178   :  { %v578_v0 = vpack.c.bf16 %v555_v50, %v554_v29  ;;  %v518_v9 = vmul.f32 %v11677_v37, %v480_v60 }
 0x179   :  { %8995 = vmatmul.mubr.msk.bf16.gmra.mrb[28].mxu0 %vm76_vm0, %v577_v24  ;;  %v557_v62 = vadd.f32 %v11690_v10, %v519_v28 }
 0x17a   :  { %794 = vmatprep.mubr.bf16.mxu0 %v15722_v58  ;;  %v556_v52 = vadd.f32 %v11690_v10, %v518_v9 }
 0x17c   :  { %v579_v2 = vpack.c.bf16 %v557_v62, %v556_v52 }
 0x181   :  { %8996 = vmatmul.mubr.msk.bf16.gmra.mrb[32].mxu0 %vm76_vm0, %v578_v0 }
 0x182   :  { %804 = vmatprep.mubr.bf16.mxu0 %v15722_v58 }
 0x189   :  { %8997 = vmatmul.mubr.msk.bf16.gmra.mrb[36].mxu0 %vm76_vm0, %v579_v2 }
 0x18a   :  { %814 = vmatprep.mubr.bf16.mxu0 %v15722_v58 }
 0x1be   :  { %v332_v33 = vpop.xlane.xlu0 %331 }
 0x1bf   :  { %v386_v32 = vmul.f32 0.015625, %v332_v33 }
 0x1c1   :  { %v418_v5 = vadd.f32 1e-05, %v386_v32 }
 0x1c2   :  { %v335_v31 = vpop.xlane.xlu1 %334 }
 0x1c3   :  { %10582 = vrsqrt.f32 %v418_v5  ;;  %v387_v8 = vmul.f32 0.015625, %v335_v31 }
 0x1c5   :  { %v419_v11 = vadd.f32 1e-05, %v387_v8 }
 0x1c6   :  { %v338_v51 = vpop.xlane.xlu0 %337 }
 0x1c7   :  { %10584 = vrsqrt.f32 %v419_v11  ;;  %v388_v1 = vmul.f32 0.015625, %v338_v51 }
 0x1c9   :  { %v420_v20 = vadd.f32 1e-05, %v388_v1 }
 0x1ca   :  { %v341_v14 = vpop.xlane.xlu1 %340 }
 0x1cb   :  { %10586 = vrsqrt.f32 %v420_v20  ;;  %v389_v15 = vmul.f32 0.015625, %v341_v14 }
 0x1cd   :  { %v10583_v18 = vpop.eup %10582  ;;  %v421_v22 = vadd.f32 1e-05, %v389_v15 }
 0x1ce   :  { %v344_v13 = vpop.xlane.xlu0 %343  ;;  %v482_v26 = vmul.f32 %v10583_v18, %v11657_v57 }
 0x1cf   :  { %10588 = vrsqrt.f32 %v421_v22  ;;  %v390_v27 = vmul.f32 0.015625, %v344_v13 }
 0x1d0   :  { %v520_v40 = vmul.f32 %v11677_v37, %v482_v26 }
 0x1d1   :  { %v10585_v36 = vpop.eup %10584  ;;  %v422_v7 = vadd.f32 1e-05, %v390_v27 }
 0x1d2   :  { %v347_v42 = vpop.xlane.xlu1 %346  ;;  %v483_v21 = vmul.f32 %v10585_v36, %v11662_v17  ;;  %v558_v3 = vadd.f32 %v11690_v10, %v520_v40 }
 0x1d3   :  { %10590 = vrsqrt.f32 %v422_v7  ;;  %v391_v48 = vmul.f32 0.015625, %v347_v42 }
 0x1d4   :  { %v521_v12 = vmul.f32 %v11677_v37, %v483_v21 }
 0x1d5   :  { %v10587_v35 = vpop.eup %10586  ;;  %v423_v54 = vadd.f32 1e-05, %v391_v48 }
 0x1d6   :  { %v350_v45 = vpop.xlane.xlu0 %349  ;;  %v559_v57 = vadd.f32 %v11690_v10, %v521_v12  ;;  %v484_v39 = vmul.f32 %v10587_v35, %v11668_v23 }
 0x1d7   :  { %10592 = vrsqrt.f32 %v423_v54  ;;  %v392_v34 = vmul.f32 0.015625, %v350_v45 }
 0x1d8   :  { %v580_v41 = vpack.c.bf16 %v559_v57, %v558_v3  ;;  %v522_v61 = vmul.f32 %v11677_v37, %v484_v39 }
 0x1d9   :  { %v10589_v6 = vpop.eup %10588  ;;  %v424_v17 = vadd.f32 1e-05, %v392_v34 }
 0x1da   :  { %v353_v55 = vpop.xlane.xlu1 %352  ;;  %8998 = vmatmul.mubr.msk.bf16.gmra.mrb[40].mxu0 %vm76_vm0, %v580_v41  ;;  %v485_v53 = vmul.f32 %v10589_v6, %v11680_v38  ;;  %v560_v19 = vadd.f32 %v11690_v10, %v522_v61 }
 0x1db   :  { %10594 = vrsqrt.f32 %v424_v17  ;;  %v393_v24 = vmul.f32 0.015625, %v353_v55  ;;  %824 = vmatprep.mubr.bf16.mxu0 %v15722_v58 }
 0x1dc   :  { %v523_v56 = vmul.f32 %v11677_v37, %v485_v53 }
 0x1dd   :  { %v10591_v49 = vpop.eup %10590  ;;  %v425_v23 = vadd.f32 1e-05, %v393_v24 }
 0x1de   :  { %v356_v16 = vpop.xlane.xlu0 %355  ;;  %v561_v50 = vadd.f32 %v11690_v10, %v523_v56  ;;  %v486_v25 = vmul.f32 %v10591_v49, %v11694_v63 }
 0x1df   :  { %10596 = vrsqrt.f32 %v425_v23  ;;  %v394_v29 = vmul.f32 0.015625, %v356_v16 }
 0x1e0   :  { %v581_v38 = vpack.c.bf16 %v561_v50, %v560_v19  ;;  %v524_v62 = vmul.f32 %v11677_v37, %v486_v25 }
 0x1e1   :  { %v10593_v60 = vpop.eup %10592  ;;  %v426_v0 = vadd.f32 1e-05, %v394_v29 }
 0x1e2   :  { %v359_v28 = vpop.xlane.xlu1 %358  ;;  %8999 = vmatmul.mubr.msk.bf16.gmra.mrb[44].mxu0 %vm76_vm0, %v581_v38  ;;  %v487_v9 = vmul.f32 %v10593_v60, %v11703_v59  ;;  %v562_v5 = vadd.f32 %v11690_v10, %v524_v62 }
 0x1e3   :  { %10598 = vrsqrt.f32 %v426_v0  ;;  %v395_v52 = vmul.f32 0.015625, %v359_v28  ;;  %834 = vmatprep.mubr.bf16.mxu0 %v15722_v58 }
 0x1e4   :  { %v525_v2 = vmul.f32 %v11677_v37, %v487_v9 }
 0x1e5   :  { %v10595_v33 = vpop.eup %10594  ;;  %v427_v63 = vadd.f32 1e-05, %v395_v52 }
 0x1e6   :  { %v362_v32 = vpop.xlane.xlu0 %361  ;;  %v563_v31 = vadd.f32 %v11690_v10, %v525_v2  ;;  %v488_v8 = vmul.f32 %v10595_v33, %v11714_v44 }
 0x1e7   :  { %10600 = vrsqrt.f32 %v427_v63  ;;  %v396_v11 = vmul.f32 0.015625, %v362_v32 }
 0x1e8   :  { %v582_v59 = vpack.c.bf16 %v563_v31, %v562_v5  ;;  %v526_v15 = vmul.f32 %v11677_v37, %v488_v8 }
 0x1e9   :  { %v10597_v51 = vpop.eup %10596  ;;  %v428_v1 = vadd.f32 1e-05, %v396_v11 }
 0x1ea   :  { %v365_v20 = vpop.xlane.xlu1 %364  ;;  %9000 = vmatmul.mubr.msk.bf16.gmra.mrb[48].mxu0 %vm76_vm0, %v582_v59  ;;  %v489_v14 = vmul.f32 %v10597_v51, %v11723_v4  ;;  %v564_v26 = vadd.f32 %v11690_v10, %v526_v15 }
 0x1eb   :  { %10602 = vrsqrt.f32 %v428_v1  ;;  %v397_v18 = vmul.f32 0.015625, %v365_v20  ;;  %844 = vmatprep.mubr.bf16.mxu0 %v15722_v58 }
 0x1ec   :  { %v527_v22 = vmul.f32 %v11677_v37, %v489_v14 }
 0x1ed   :  { %v10599_v13 = vpop.eup %10598  ;;  %v429_v44 = vadd.f32 1e-05, %v397_v18 }
 0x1ee   :  { %v565_v27 = vadd.f32 %v11690_v10, %v527_v22  ;;  %v490_v36 = vmul.f32 %v10599_v13, %v11734_v30 }
 0x1ef   :  { %10604 = vrsqrt.f32 %v429_v44 }
 0x1f0   :  { %v583_v7 = vpack.c.bf16 %v565_v27, %v564_v26  ;;  %v528_v21 = vmul.f32 %v11677_v37, %v490_v36 }
 0x1f1   :  { %v10601_v42 = vpop.eup %10600 }
 0x1f2   :  { %9001 = vmatmul.mubr.msk.bf16.gmra.mrb[52].mxu0 %vm76_vm0, %v583_v7  ;;  %v491_v4 = vmul.f32 %v10601_v42, %v11743_v43  ;;  %v566_v12 = vadd.f32 %v11690_v10, %v528_v21 }
 0x1f3   :  { %854 = vmatprep.mubr.bf16.mxu0 %v15722_v58 }
 0x1f4   :  { %v529_v40 = vmul.f32 %v11677_v37, %v491_v4 }
 0x1f5   :  { %v10603_v48 = vpop.eup %10602 }
 0x1f6   :  { %v567_v35 = vadd.f32 %v11690_v10, %v529_v40  ;;  %v492_v30 = vmul.f32 %v10603_v48, %v11754_v46 }
 0x1f8   :  { %v584_v54 = vpack.c.bf16 %v567_v35, %v566_v12  ;;  %v530_v43 = vmul.f32 %v11677_v37, %v492_v30 }
 0x1f9   :  { %v10605_v45 = vpop.eup %10604 }
 0x1fa   :  { %9002 = vmatmul.mubr.msk.bf16.gmra.mrb[56].mxu0 %vm76_vm0, %v584_v54  ;;  %v493_v3 = vmul.f32 %v10605_v45, %v11763_v47  ;;  %v568_v39 = vadd.f32 %v11690_v10, %v530_v43 }
 0x1fb   :  { %864 = vmatprep.mubr.bf16.mxu0 %v15722_v58 }
 0x1fc   :  { %v531_v57 = vmul.f32 %v11677_v37, %v493_v3 }
 0x1fe   :  { %v569_v34 = vadd.f32 %v11690_v10, %v531_v57 }
 0x200   :  { %v585_v41 = vpack.c.bf16 %v569_v34, %v568_v39 }
 0x202   :  { %9003 = vmatmul.mubr.msk.bf16.gmra.mrb[60].mxu0 %vm76_vm0, %v585_v41 }
 0x214   :  { %v716_v46 = vpop.f32.mrb[0].mxu0 }
 0x215   :  { %v718_v6 = vpop.f32.mrb[1].mxu0 }
 0x216   :  { %v720_v17 = vpop.f32.mrb[2].mxu0 }
 0x217   :  { %v11865_v55 = vpack.c.bf16 %v720_v17, %v716_v46  ;;  %v722_v47 = vpop.f32.mrb[3].mxu0 }
 0x218   :  { %v11867_v53 = vpack.c.bf16 %v722_v47, %v718_v6 }
 0x219   :  { %15858 = vst [vmem:[#allocation2_spill] sm:$0xff] %v11865_v55  ;;  %9684 = vmatprep.mubr.msk.bf16.mxu1 %vm908_vm1, %v11865_v55  ;;  %904 = vrot.lane.b32.xlu0 %v11865_v55, %s11215_s2 }
 0x21a   :  { %15859 = vst [vmem:[#allocation3_spill] sm:$0xff] %v11867_v53 }
 0x21c   :  { %v726_v37 = vpop.f32.mrb[4].mxu0 }
 0x21d   :  { %v728_v10 = vpop.f32.mrb[5].mxu0 }
 0x21e   :  { %v730_v61 = vpop.f32.mrb[6].mxu0 }
 0x21f   :  { %v11873_v24 = vpack.c.bf16 %v730_v61, %v726_v37  ;;  %v732_v56 = vpop.f32.mrb[7].mxu0 }
 0x220   :  { %v11875_v49 = vpack.c.bf16 %v732_v56, %v728_v10 }
 0x221   :  { %906 = vrot.lane.b32.xlu1 %v11873_v24, %s11215_s2 }
 0x222   :  { %15860 = vst [vmem:[#allocation4_spill] sm:$0xff] %v11875_v49 }
 0x224   :  { %v736_v23 = vpop.f32.mrb[8].mxu0 }
 0x225   :  { %v738_v16 = vpop.f32.mrb[9].mxu0 }
 0x226   :  { %v740_v19 = vpop.f32.mrb[10].mxu0 }
 0x227   :  { %v11879_v50 = vpack.c.bf16 %v740_v19, %v736_v23  ;;  %v742_v25 = vpop.f32.mrb[11].mxu0 }
 0x228   :  { %v11881_v29 = vpack.c.bf16 %v742_v25, %v738_v16 }
 0x229   :  { %15861 = vst [vmem:[#allocation5_spill] sm:$0xff] %v11879_v50  ;;  %972 = vrot.lane.b32.xlu1 %v11879_v50, %s11215_s2 }
 0x22a   :  { %15862 = vst [vmem:[#allocation6_spill] sm:$0xff] %v11881_v29  ;;  %9752 = vmatprep.subr.bf16.mxu0 %v11881_v29 }
 0x22b   :  { %9753 = vmatpush3.bf16.msra.mxu0 %v11881_v29 }
 0x22c   :  { %v746_v38 = vpop.f32.mrb[12].mxu0 }
 0x22d   :  { %v748_v60 = vpop.f32.mrb[13].mxu0 }
 0x22e   :  { %v750_v0 = vpop.f32.mrb[14].mxu0 }
 0x22f   :  { %v11887_v28 = vpack.c.bf16 %v750_v0, %v746_v38  ;;  %v752_v9 = vpop.f32.mrb[15].mxu0 }
 0x230   :  { %v11889_v62 = vpack.c.bf16 %v752_v9, %v748_v60 }
 0x231   :  { %974 = vrot.lane.b32.xlu1 %v11887_v28, %s11215_s2 }
 0x232   :  { %15863 = vst [vmem:[#allocation7_spill] sm:$0xff] %v11889_v62  ;;  %9754 = vmatprep.subr.bf16.mxu0 %v11889_v62 }
 0x233   :  { %9755 = vmatpush3.bf16.msra.mxu0 %v11889_v62 }
 0x234   :  { %v756_v52 = vpop.f32.mrb[16].mxu0 }
 0x235   :  { %v758_v2 = vpop.f32.mrb[17].mxu0 }
 0x236   :  { %v760_v33 = vpop.f32.mrb[18].mxu0 }
 0x237   :  { %v11895_v63 = vpack.c.bf16 %v760_v33, %v756_v52  ;;  %v762_v32 = vpop.f32.mrb[19].mxu0 }
 0x238   :  { %v11897_v5 = vpack.c.bf16 %v762_v32, %v758_v2 }
 0x239   :  { %15864 = vst [vmem:[#allocation8_spill] sm:$0xff] %v11895_v63  ;;  %1039 = vrot.lane.b32.xlu0 %v11895_v63, %s11215_s2 }
 0x23a   :  { %15865 = vst [vmem:[#allocation9_spill] sm:$0xff] %v11897_v5 }
 0x23c   :  { %v766_v31 = vpop.f32.mrb[20].mxu0 }
 0x23d   :  { %v768_v8 = vpop.f32.mrb[21].mxu0 }
 0x23e   :  { %v770_v11 = vpop.f32.mrb[22].mxu0 }
 0x23f   :  { %v11901_v59 = vpack.c.bf16 %v770_v11, %v766_v31  ;;  %v772_v51 = vpop.f32.mrb[23].mxu0 }
 0x240   :  { %v11903_v1 = vpack.c.bf16 %v772_v51, %v768_v8 }
 0x241   :  { %15866 = vst [vmem:[#allocation10_spill] sm:$0xff] %v11901_v59  ;;  %1041 = vrot.lane.b32.xlu1 %v11901_v59, %s11215_s2 }
 0x242   :  { %15867 = vst [vmem:[#allocation11_spill] sm:$0xff] %v11903_v1 }
 0x244   :  { %v776_v20 = vpop.f32.mrb[24].mxu0 }
 0x245   :  { %v778_v14 = vpop.f32.mrb[25].mxu0 }
 0x246   :  { %v780_v15 = vpop.f32.mrb[26].mxu0 }
 0x247   :  { %v11907_v18 = vpack.c.bf16 %v780_v15, %v776_v20  ;;  %v782_v22 = vpop.f32.mrb[27].mxu0 }
 0x248   :  { %v11909_v13 = vpack.c.bf16 %v782_v22, %v778_v14 }
 0x249   :  { %15868 = vst [vmem:[#allocation12_spill] sm:$0xff] %v11907_v18  ;;  %1106 = vrot.lane.b32.xlu0 %v11907_v18, %s11215_s2 }
 0x24a   :  { %15869 = vst [vmem:[#allocation13_spill] sm:$0xff] %v11909_v13  ;;  %9768 = vmatprep.subr.bf16.mxu0 %v11909_v13 }
 0x24c   :  { %v786_v44 = vpop.f32.mrb[28].mxu0 }
 0x24d   :  { %v788_v26 = vpop.f32.mrb[29].mxu0 }
 0x24e   :  { %v790_v27 = vpop.f32.mrb[30].mxu0 }
 0x24f   :  { %v11914_v36 = vpack.c.bf16 %v790_v27, %v786_v44  ;;  %v792_v7 = vpop.f32.mrb[31].mxu0 }
 0x250   :  { %v11916_v42 = vpack.c.bf16 %v792_v7, %v788_v26 }
 0x251   :  { %15870 = vst [vmem:[#allocation14_spill] sm:$0xff] %v11914_v36  ;;  %1108 = vrot.lane.b32.xlu1 %v11914_v36, %s11215_s2 }
 0x252   :  { %15871 = vst [vmem:[#allocation15_spill] sm:$0xff] %v11916_v42 }
 0x254   :  { %v796_v4 = vpop.f32.mrb[32].mxu0 }
 0x255   :  { %v798_v21 = vpop.f32.mrb[33].mxu0 }
 0x256   :  { %v800_v40 = vpop.f32.mrb[34].mxu0 }
 0x257   :  { %v11920_v48 = vpack.c.bf16 %v800_v40, %v796_v4  ;;  %v802_v12 = vpop.f32.mrb[35].mxu0 }
 0x258   :  { %v11922_v35 = vpack.c.bf16 %v802_v12, %v798_v21 }
 0x259   :  { %15872 = vst [vmem:[#allocation16_spill] sm:$0xff] %v11920_v48  ;;  %1173 = vrot.lane.b32.xlu0 %v11920_v48, %s11215_s2 }
 0x25a   :  { %15873 = vst [vmem:[#allocation17_spill] sm:$0xff] %v11922_v35 }
 0x25c   :  { %v806_v30 = vpop.f32.mrb[36].mxu0 }
 0x25d   :  { %v808_v54 = vpop.f32.mrb[37].mxu0 }
 0x25e   :  { %v810_v45 = vpop.f32.mrb[38].mxu0 }
 0x25f   :  { %v11926_v3 = vpack.c.bf16 %v810_v45, %v806_v30  ;;  %v812_v43 = vpop.f32.mrb[39].mxu0 }
 0x260   :  { %v11928_v57 = vpack.c.bf16 %v812_v43, %v808_v54 }
 0x261   :  { %15874 = vst [vmem:[#allocation18_spill] sm:$0xff] %v11926_v3  ;;  %1175 = vrot.lane.b32.xlu1 %v11926_v3, %s11215_s2 }
 0x262   :  { %15875 = vst [vmem:[#allocation19_spill] sm:$0xff] %v11928_v57 }
 0x28b   :  { %v905_v39 = vpop.permute.xlu0 %904 }
 0x28c   :  { %10426 = vmatprep.subr.msk.bf16.mxu1 %vm908_vm1, %v905_v39  ;;  %v916_v34 = vsel %vm908_vm1, %v905_v39, 0 }
 0x28d   :  { %9681 = vmatpush3.bf16.xpose.msra.mxu1 %v916_v34 }
 0x293   :  { %v907_v41 = vpop.permute.xlu1 %906 }
 0x294   :  { %10427 = vmatprep.subr.msk.bf16.mxu1 %vm908_vm1, %v907_v41  ;;  %v919_v46 = vsel %vm908_vm1, %v907_v41, 0 }
 0x295   :  { %9683 = vmatpush3.bf16.xpose.msra.mxu1 %v919_v46 }
 0x29b   :  { %v973_v6 = vpop.permute.xlu1 %972 }
 0x29c   :  { %9685 = vmatmul.mubr.msk.bf16.vlgmr.msra.gmra.mrb[0].mxu1 %vm908_vm1, %v11873_v24  ;;  %10428 = vmatprep.subr.msk.bf16.mxu1 %vm908_vm1, %v973_v6  ;;  %v983_v17 = vsel %vm908_vm1, %v973_v6, 0 }
 0x29d   :  { %9689 = vmatpush3.bf16.xpose.msra.mxu1 %v983_v17  ;;  %9692 = vmatprep.mubr.msk.bf16.mxu1 %vm908_vm1, %v11879_v50 }
 0x2a3   :  { %v975_v47 = vpop.permute.xlu1 %974 }
 0x2a4   :  { %10429 = vmatprep.subr.msk.bf16.mxu1 %vm908_vm1, %v975_v47  ;;  %v986_v37 = vsel %vm908_vm1, %v975_v47, 0 }
 0x2a5   :  { %9691 = vmatpush3.bf16.xpose.msra.mxu1 %v986_v37 }
 0x2ab   :  { %v1040_v10 = vpop.permute.xlu0 %1039 }
 0x2ac   :  { %9693 = vmatmul.mubr.msk.bf16.vlgmr.msra.gmra.mrb[4].mxu1 %vm908_vm1, %v11887_v28  ;;  %10430 = vmatprep.subr.msk.bf16.mxu1 %vm908_vm1, %v1040_v10  ;;  %v1050_v61 = vsel %vm908_vm1, %v1040_v10, 0 }
 0x2ad   :  { %v816_v56 = vpop.f32.mrb[40].mxu0  ;;  %9697 = vmatpush3.bf16.xpose.msra.mxu1 %v1050_v61  ;;  %9700 = vmatprep.mubr.msk.bf16.mxu1 %vm908_vm1, %v11895_v63 }
 0x2ae   :  { %v818_v23 = vpop.f32.mrb[41].mxu0 }
 0x2af   :  { %v820_v16 = vpop.f32.mrb[42].mxu0 }
 0x2b0   :  { %v11950_v19 = vpack.c.bf16 %v820_v16, %v816_v56  ;;  %v822_v25 = vpop.f32.mrb[43].mxu0 }
 0x2b1   :  { %v11952_v38 = vpack.c.bf16 %v822_v25, %v818_v23 }
 0x2b2   :  { %15876 = vst [vmem:[#allocation20_spill] sm:$0xff] %v11950_v19  ;;  %1240 = vrot.lane.b32.xlu0 %v11950_v19, %s11215_s2 }
 0x2b3   :  { %15877 = vst [vmem:[#allocation21_spill] sm:$0xff] %v11952_v38  ;;  %v1042_v60 = vpop.permute.xlu1 %1041 }
 0x2b4   :  { %10431 = vmatprep.subr.msk.bf16.mxu1 %vm908_vm1, %v1042_v60  ;;  %v1053_v0 = vsel %vm908_vm1, %v1042_v60, 0 }
 0x2b5   :  { %v826_v9 = vpop.f32.mrb[44].mxu0  ;;  %9699 = vmatpush3.bf16.xpose.msra.mxu1 %v1053_v0 }
 0x2b6   :  { %v828_v52 = vpop.f32.mrb[45].mxu0 }
 0x2b7   :  { %v830_v2 = vpop.f32.mrb[46].mxu0 }
 0x2b8   :  { %v11958_v33 = vpack.c.bf16 %v830_v2, %v826_v9  ;;  %v832_v32 = vpop.f32.mrb[47].mxu0 }
 0x2b9   :  { %v11960_v31 = vpack.c.bf16 %v832_v32, %v828_v52 }
 0x2ba   :  { %15878 = vst [vmem:[#allocation22_spill] sm:$0xff] %v11958_v33  ;;  %1242 = vrot.lane.b32.xlu1 %v11958_v33, %s11215_s2 }
 0x2bb   :  { %15879 = vst [vmem:[#allocation23_spill] sm:$0xff] %v11960_v31  ;;  %v1107_v8 = vpop.permute.xlu0 %1106 }
 0x2bc   :  { %9701 = vmatmul.mubr.msk.bf16.vlgmr.msra.gmra.mrb[8].mxu1 %vm908_vm1, %v11901_v59  ;;  %10432 = vmatprep.subr.msk.bf16.mxu1 %vm908_vm1, %v1107_v8  ;;  %v1117_v11 = vsel %vm908_vm1, %v1107_v8, 0 }
 0x2bd   :  { %v836_v51 = vpop.f32.mrb[48].mxu0  ;;  %9705 = vmatpush3.bf16.xpose.msra.mxu1 %v1117_v11  ;;  %9708 = vmatprep.mubr.msk.bf16.mxu1 %vm908_vm1, %v11907_v18 }
 0x2be   :  { %v838_v20 = vpop.f32.mrb[49].mxu0 }
 0x2bf   :  { %v840_v14 = vpop.f32.mrb[50].mxu0 }
 0x2c0   :  { %v11970_v15 = vpack.c.bf16 %v840_v14, %v836_v51  ;;  %v842_v22 = vpop.f32.mrb[51].mxu0 }
 0x2c1   :  { %v11972_v44 = vpack.c.bf16 %v842_v22, %v838_v20  ;;  %v875_v22 = vlaneseq }
 0x2c2   :  { %15880 = vst [vmem:[#allocation24_spill] sm:$0xff] %v11970_v15  ;;  %1307 = vrot.lane.b32.xlu0 %v11970_v15, %s11215_s2 }
 0x2c3   :  { %15881 = vst [vmem:[#allocation25_spill] sm:$0xff] %v11972_v44  ;;  %v1109_v26 = vpop.permute.xlu1 %1108 }
 0x2c4   :  { %10433 = vmatprep.subr.msk.bf16.mxu1 %vm908_vm1, %v1109_v26  ;;  %v1120_v27 = vsel %vm908_vm1, %v1109_v26, 0  ;;  %v12035_v26 = vshrl.u32 %v875_v22, 7 }
 0x2c5   :  { %v846_v7 = vpop.f32.mrb[52].mxu0  ;;  %9707 = vmatpush3.bf16.xpose.msra.mxu1 %v1120_v27 }
 0x2c6   :  { %v848_v4 = vpop.f32.mrb[53].mxu0  ;;  %15888 = vst [vmem:[#allocation32_spill] sm:$0xff] %v12035_v26  ;;  %v878_v27 = vadd.s32 16, %v12035_v26 }
 0x2c7   :  { %v850_v21 = vpop.f32.mrb[54].mxu0 }
 0x2c8   :  { %v11978_v40 = vpack.c.bf16 %v850_v21, %v846_v7  ;;  %v852_v12 = vpop.f32.mrb[55].mxu0  ;;  %v881_v7 = vand.u32 127, %v875_v22  ;;  %v15889_v21 = vmov 0 }
 0x2c9   :  { %v11980_v30 = vpack.c.bf16 %v852_v12, %v848_v4  ;;  %v877_v4 = vadd.s32 8, %v12035_v26 }
 0x2ca   :  { %15882 = vst [vmem:[#allocation26_spill] sm:$0xff] %v11978_v40  ;;  %1309 = vrot.lane.b32.xlu1 %v11978_v40, %s11215_s2  ;;  %vm12039_vm2 = vcmp.le.s32.totalorder %v881_v7, %v878_v27  ;;  %vm12044_vm4 = vcmp.le.s32.totalorder %v881_v7, %v12035_v26 }
 0x2cb   :  { %15883 = vst [vmem:[#allocation27_spill] sm:$0xff] %v11980_v30  ;;  %v1174_v54 = vpop.permute.xlu0 %1173  ;;  %v15890_v21 = vsel %vm12039_vm2, 4294967295, %v15889_v21  ;;  %vm12053_vm5 = vcmp.le.s32.totalorder %v881_v7, %v877_v4 }
 0x2cc   :  { %9709 = vmatmul.mubr.msk.bf16.vlgmr.msra.gmra.mrb[12].mxu1 %vm908_vm1, %v11914_v36  ;;  %10434 = vmatprep.subr.msk.bf16.mxu1 %vm908_vm1, %v1174_v54  ;;  %v1184_v45 = vsel %vm908_vm1, %v1174_v54, 0  ;;  %15891 = vst [vmem:[#allocation33_spill] sm:$0xff] %v15890_v21  ;;  %v15892_v54 = vmov 0 }
 0x2cd   :  { %v856_v43 = vpop.f32.mrb[56].mxu0  ;;  %9713 = vmatpush3.bf16.xpose.msra.mxu1 %v1184_v45  ;;  %9716 = vmatprep.mubr.msk.bf16.mxu1 %vm908_vm1, %v11920_v48  ;;  %v15893_v54 = vsel %vm12044_vm4, 4294967295, %v15892_v54  ;;  %v879_v45 = vadd.s32 24, %v12035_v26 }
 0x2ce   :  { %v858_v39 = vpop.f32.mrb[57].mxu0  ;;  %15894 = vst [vmem:[#allocation34_spill] sm:$0xff] %v15893_v54 }
 0x2cf   :  { %v860_v34 = vpop.f32.mrb[58].mxu0  ;;  %vm12063_vm6 = vcmp.le.s32.totalorder %v881_v7, %v879_v45 }
 0x2d0   :  { %v11990_v41 = vpack.c.bf16 %v860_v34, %v856_v43  ;;  %v862_v46 = vpop.f32.mrb[59].mxu0  ;;  %v15895_v34 = vmov 0 }
 0x2d1   :  { %v11992_v6 = vpack.c.bf16 %v862_v46, %v858_v39  ;;  %v15896_v34 = vsel %vm12053_vm5, 4294967295, %v15895_v34 }
 0x2d2   :  { %15884 = vst [vmem:[#allocation28_spill] sm:$0xff] %v11990_v41  ;;  %1374 = vrot.lane.b32.xlu0 %v11990_v41, %s11215_s2  ;;  %15897 = vst [vmem:[#allocation35_spill] sm:$0xff] %v15896_v34 }
 0x2d3   :  { %15885 = vst [vmem:[#allocation29_spill] sm:$0xff] %v11992_v6  ;;  %v1176_v17 = vpop.permute.xlu1 %1175 }
 0x2d4   :  { %10435 = vmatprep.subr.msk.bf16.mxu1 %vm908_vm1, %v1176_v17  ;;  %v1187_v47 = vsel %vm908_vm1, %v1176_v17, 0 }
 0x2d5   :  { %v866_v37 = vpop.f32.mrb[60].mxu0  ;;  %9715 = vmatpush3.bf16.xpose.msra.mxu1 %v1187_v47 }
 0x2d6   :  { %v868_v10 = vpop.f32.mrb[61].mxu0 }
 0x2d7   :  { %v870_v61 = vpop.f32.mrb[62].mxu0 }
 0x2d8   :  { %v11998_v56 = vpack.c.bf16 %v870_v61, %v866_v37  ;;  %v872_v23 = vpop.f32.mrb[63].mxu0 }
 0x2d9   :  { %v12000_v16 = vpack.c.bf16 %v872_v23, %v868_v10  ;;  %v15898_v10 = vmov 0 }
 0x2da   :  { %15886 = vst [vmem:[#allocation30_spill] sm:$0xff] %v11998_v56  ;;  %1376 = vrot.lane.b32.xlu1 %v11998_v56, %s11215_s2  ;;  %v15899_v10 = vsel %vm12063_vm6, 4294967295, %v15898_v10 }
 0x2db   :  { %15887 = vst [vmem:[#allocation31_spill] sm:$0xff] %v12000_v16  ;;  %15900 = vst [vmem:[#allocation36_spill] sm:$0xff] %v15899_v10 }
 0x2dc   :  { %9717 = vmatmul.mubr.msk.bf16.vlgmr.msra.gmra.mrb[16].mxu1 %vm908_vm1, %v11926_v3 }
 0x2dd   :  { %9724 = vmatprep.mubr.msk.bf16.mxu1 %vm908_vm1, %v11950_v19 }
 0x324   :  { %v1241_v25 = vpop.permute.xlu0 %1240 }
 0x325   :  { %10436 = vmatprep.subr.msk.bf16.mxu1 %vm908_vm1, %v1241_v25  ;;  %v1251_v60 = vsel %vm908_vm1, %v1241_v25, 0 }
 0x326   :  { %9721 = vmatpush3.bf16.xpose.msra.mxu1 %v1251_v60 }
 0x32c   :  { %v1243_v0 = vpop.permute.xlu1 %1242 }
 0x32d   :  { %10437 = vmatprep.subr.msk.bf16.mxu1 %vm908_vm1, %v1243_v0  ;;  %v1254_v9 = vsel %vm908_vm1, %v1243_v0, 0 }
 0x32e   :  { %9723 = vmatpush3.bf16.xpose.msra.mxu1 %v1254_v9 }
 0x334   :  { %v1308_v52 = vpop.permute.xlu0 %1307 }
 0x335   :  { %9725 = vmatmul.mubr.msk.bf16.vlgmr.msra.gmra.mrb[20].mxu1 %vm908_vm1, %v11958_v33  ;;  %10438 = vmatprep.subr.msk.bf16.mxu1 %vm908_vm1, %v1308_v52  ;;  %v1318_v2 = vsel %vm908_vm1, %v1308_v52, 0 }
 0x336   :  { %9729 = vmatpush3.bf16.xpose.msra.mxu1 %v1318_v2  ;;  %9732 = vmatprep.mubr.msk.bf16.mxu1 %vm908_vm1, %v11970_v15 }
 0x33c   :  { %v1310_v32 = vpop.permute.xlu1 %1309 }
 0x33d   :  { %10439 = vmatprep.subr.msk.bf16.mxu1 %vm908_vm1, %v1310_v32  ;;  %v1321_v8 = vsel %vm908_vm1, %v1310_v32, 0 }
 0x33e   :  { %9731 = vmatpush3.bf16.xpose.msra.mxu1 %v1321_v8 }
 0x344   :  { %v1375_v11 = vpop.permute.xlu0 %1374 }
 0x345   :  { %9733 = vmatmul.mubr.msk.bf16.vlgmr.msra.gmra.mrb[24].mxu1 %vm908_vm1, %v11978_v40  ;;  %10440 = vmatprep.subr.msk.bf16.mxu1 %vm908_vm1, %v1375_v11  ;;  %v1385_v51 = vsel %vm908_vm1, %v1375_v11, 0 }
 0x346   :  { %9737 = vmatpush3.bf16.xpose.msra.mxu1 %v1385_v51  ;;  %9740 = vmatprep.mubr.msk.bf16.mxu1 %vm908_vm1, %v11990_v41 }
 0x34c   :  { %v1377_v20 = vpop.permute.xlu1 %1376 }
 0x34d   :  { %10441 = vmatprep.subr.msk.bf16.mxu1 %vm908_vm1, %v1377_v20  ;;  %v1388_v14 = vsel %vm908_vm1, %v1377_v20, 0 }
 0x34e   :  { %9739 = vmatpush3.bf16.xpose.msra.mxu1 %v1388_v14 }
 0x34f   :  { %9744 = vmatprep.subr.bf16.mxu1 %v11867_v53 }
 0x355   :  { %9741 = vmatmul.mubr.msk.bf16.vlgmr.msra.gmra.mrb[28].mxu1 %vm908_vm1, %v11998_v56 }
 0x356   :  { %9745 = vmatpush3.bf16.msra.mxu1 %v11867_v53 }
 0x357   :  { %9746 = vmatprep.subr.bf16.mxu1 %v11875_v49 }
 0x35a   :  { %9747 = vmatpush3.bf16.msra.mxu1 %v11875_v49 }
 0x35b   :  { %9760 = vmatprep.subr.bf16.mxu1 %v11897_v5 }
 0x36f   :  { %v9686_v12 = vpop.f32.mrb[0].mxu1 }
 0x370   :  { %v12051_v43 = vsel %vm12039_vm2, %v9686_v12, -inf  ;;  %v955_v39 = vpop.f32.mrb[1].mxu1 }
 0x371   :  { %v9687_v46 = vpop.f32.mrb[2].mxu1  ;;  %v1486_v17 = vsel %vm1479_vm3, %v12051_v43, -inf  ;;  %v12061_v47 = vsel %vm12044_vm4, %v955_v39, -inf }
 0x372   :  { %1487 = vmax.xlane.f32.xlu0 %v1486_v17  ;;  %v958_v37 = vpop.f32.mrb[3].mxu1  ;;  %v1480_v25 = vsel %vm1479_vm3, %v12061_v47, -inf  ;;  %v12077_v60 = vsel %vm12063_vm6, %v9687_v46, -inf }
 0x373   :  { %v12069_v61 = vsel %vm12053_vm5, %v958_v37, -inf  ;;  %v1489_v0 = vsel %vm1479_vm3, %v12077_v60, -inf }
 0x374   :  { %v1483_v23 = vsel %vm1479_vm3, %v12069_v61, -inf }
 0x375   :  { %1484 = vmax.xlane.f32.xlu1 %v1483_v23 }
 0x376   :  { %1481 = vmax.xlane.f32.xlu0 %v1480_v25 }
 0x37a   :  { %1490 = vmax.xlane.f32.xlu0 %v1489_v0 }
 0x37f   :  { %v9694_v9 = vpop.f32.mrb[4].mxu1 }
 0x380   :  { %v12083_v52 = vsel %vm12039_vm2, %v9694_v9, -inf  ;;  %v1022_v2 = vpop.f32.mrb[5].mxu1 }
 0x381   :  { %v9695_v32 = vpop.f32.mrb[6].mxu1  ;;  %v1498_v8 = vsel %vm1479_vm3, %v12083_v52, -inf  ;;  %v12089_v11 = vsel %vm12044_vm4, %v1022_v2, -inf }
 0x382   :  { %v12093_v51 = vsel %vm12063_vm6, %v9695_v32, -inf  ;;  %1499 = vmax.xlane.f32.xlu0 %v1498_v8  ;;  %v1025_v20 = vpop.f32.mrb[7].mxu1  ;;  %v1492_v27 = vsel %vm1479_vm3, %v12089_v11, -inf }
 0x383   :  { %v1501_v14 = vsel %vm1479_vm3, %v12093_v51, -inf  ;;  %v12099_v22 = vsel %vm12053_vm5, %v1025_v20, -inf }
 0x384   :  { %1502 = vmax.xlane.f32.xlu1 %v1501_v14  ;;  %v1495_v7 = vsel %vm1479_vm3, %v12099_v22, -inf }
 0x386   :  { %1493 = vmax.xlane.f32.xlu0 %v1492_v27 }
 0x388   :  { %1496 = vmax.xlane.f32.xlu1 %v1495_v7 }
 0x38f   :  { %v9702_v4 = vpop.f32.mrb[8].mxu1 }
 0x390   :  { %v12107_v12 = vsel %vm12039_vm2, %v9702_v4, -inf  ;;  %v1089_v45 = vpop.f32.mrb[9].mxu1 }
 0x391   :  { %v9703_v39 = vpop.f32.mrb[10].mxu1  ;;  %v1510_v46 = vsel %vm1479_vm3, %v12107_v12, -inf  ;;  %v12113_v17 = vsel %vm12044_vm4, %v1089_v45, -inf }
 0x392   :  { %v12117_v37 = vsel %vm12063_vm6, %v9703_v39, -inf  ;;  %1511 = vmax.xlane.f32.xlu0 %v1510_v46  ;;  %v1092_v23 = vpop.f32.mrb[11].mxu1  ;;  %v1504_v9 = vsel %vm1479_vm3, %v12113_v17, -inf }
 0x393   :  { %v1513_v25 = vsel %vm1479_vm3, %v12117_v37, -inf  ;;  %v12123_v0 = vsel %vm12053_vm5, %v1092_v23, -inf }
 0x394   :  { %1514 = vmax.xlane.f32.xlu1 %v1513_v25  ;;  %v1507_v2 = vsel %vm1479_vm3, %v12123_v0, -inf }
 0x396   :  { %1505 = vmax.xlane.f32.xlu0 %v1504_v9 }
 0x398   :  { %1508 = vmax.xlane.f32.xlu1 %v1507_v2 }
 0x39f   :  { %v9710_v32 = vpop.f32.mrb[12].mxu1 }
 0x3a0   :  { %v12131_v8 = vsel %vm12039_vm2, %v9710_v32, -inf  ;;  %v1156_v20 = vpop.f32.mrb[13].mxu1 }
 0x3a1   :  { %v9711_v14 = vpop.f32.mrb[14].mxu1  ;;  %v1522_v27 = vsel %vm1479_vm3, %v12131_v8, -inf  ;;  %v12137_v7 = vsel %vm12044_vm4, %v1156_v20, -inf }
 0x3a2   :  { %v12141_v4 = vsel %vm12063_vm6, %v9711_v14, -inf  ;;  %1523 = vmax.xlane.f32.xlu0 %v1522_v27  ;;  %v1159_v45 = vpop.f32.mrb[15].mxu1  ;;  %v1516_v23 = vsel %vm1479_vm3, %v12137_v7, -inf }
 0x3a3   :  { %v1525_v39 = vsel %vm1479_vm3, %v12141_v4, -inf  ;;  %v12147_v46 = vsel %vm12053_vm5, %v1159_v45, -inf }
 0x3a4   :  { %1526 = vmax.xlane.f32.xlu1 %v1525_v39  ;;  %v1519_v25 = vsel %vm1479_vm3, %v12147_v46, -inf }
 0x3a6   :  { %1517 = vmax.xlane.f32.xlu0 %v1516_v23 }
 0x3a8   :  { %1520 = vmax.xlane.f32.xlu1 %v1519_v25 }
 0x3af   :  { %v9718_v9 = vpop.f32.mrb[16].mxu1 }
 0x3b0   :  { %v12155_v2 = vsel %vm12039_vm2, %v9718_v9, -inf  ;;  %v1223_v32 = vpop.f32.mrb[17].mxu1 }
 0x3b1   :  { %v9719_v20 = vpop.f32.mrb[18].mxu1  ;;  %v1534_v14 = vsel %vm1479_vm3, %v12155_v2, -inf  ;;  %v12161_v27 = vsel %vm12044_vm4, %v1223_v32, -inf }
 0x3b2   :  { %v12165_v45 = vsel %vm12063_vm6, %v9719_v20, -inf  ;;  %1535 = vmax.xlane.f32.xlu0 %v1534_v14  ;;  %v1226_v39 = vpop.f32.mrb[19].mxu1  ;;  %v1528_v9 = vsel %vm1479_vm3, %v12161_v27, -inf }
 0x3b3   :  { %v1537_v23 = vsel %vm1479_vm3, %v12165_v45, -inf  ;;  %v12171_v25 = vsel %vm12053_vm5, %v1226_v39, -inf }
 0x3b4   :  { %1538 = vmax.xlane.f32.xlu1 %v1537_v23  ;;  %v1531_v32 = vsel %vm1479_vm3, %v12171_v25, -inf }
 0x3b6   :  { %1529 = vmax.xlane.f32.xlu0 %v1528_v9 }
 0x3b8   :  { %1532 = vmax.xlane.f32.xlu1 %v1531_v32 }
 0x402   :  { %v1485_v3 = vpop.xlane.xlu1 %1484 }
 0x408   :  { %v9726_v20 = vpop.f32.mrb[20].mxu1 }
 0x409   :  { %v12179_v14 = vsel %vm12039_vm2, %v9726_v20, -inf  ;;  %v1290_v58 = vpop.f32.mrb[21].mxu1  ;;  %v1488_v20 = vpop.xlane.xlu0 %1487 }
 0x40a   :  { %v1546_v26 = vsel %vm1479_vm3, %v12179_v14, -inf  ;;  %v9727_v39 = vpop.f32.mrb[22].mxu1  ;;  %v12185_v23 = vsel %vm12044_vm4, %v1290_v58, -inf  ;;  %v1578_v48 = vsub.f32 %v12051_v43, %v1488_v20 }
 0x40b   :  { %v12189_v9 = vsel %vm12063_vm6, %v9727_v39, -inf  ;;  %1547 = vmax.xlane.f32.xlu0 %v1546_v26  ;;  %v1293_v32 = vpop.f32.mrb[23].mxu1  ;;  %v1540_v16 = vsel %vm1479_vm3, %v12185_v23, -inf }
 0x40c   :  { %v1549_v62 = vsel %vm1479_vm3, %v12189_v9, -inf  ;;  %v12195_v49 = vsel %vm12053_vm5, %v1293_v32, -inf  ;;  %v1612_v19 = vmul.f32 1.442695, %v1578_v48 }
 0x40d   :  { %1550 = vmax.xlane.f32.xlu1 %v1549_v62  ;;  %v1543_v58 = vsel %vm1479_vm3, %v12195_v49, -inf  ;;  %v1482_v39 = vpop.xlane.xlu0 %1481 }
 0x40e   :  { %10606 = vpow2.f32 %v1612_v19 }
 0x40f   :  { %1541 = vmax.xlane.f32.xlu0 %v1540_v16 }
 0x411   :  { %1544 = vmax.xlane.f32.xlu1 %v1543_v58  ;;  %v1491_v53 = vpop.xlane.xlu0 %1490  ;;  %v1503_v41 = vpop.xlane.xlu1 %1502 }
 0x415   :  { %v1500_v40 = vpop.xlane.xlu0 %1499  ;;  %v1497_v30 = vpop.xlane.xlu1 %1496 }
 0x418   :  { %v9734_v26 = vpop.f32.mrb[24].mxu1 }
 0x419   :  { %v1357_v15 = vpop.f32.mrb[25].mxu1  ;;  %v12213_v58 = vsel %vm12039_vm2, %v9734_v26, -inf }
 0x41a   :  { %v12203_v56 = vsel %vm12044_vm4, %v1357_v15, -inf  ;;  %v9735_v32 = vpop.f32.mrb[26].mxu1  ;;  %v1558_v33 = vsel %vm1479_vm3, %v12213_v58, -inf }
 0x41b   :  { %v1552_v62 = vsel %vm1479_vm3, %v12203_v56, -inf  ;;  %v12209_v16 = vsel %vm12063_vm6, %v9735_v32, -inf  ;;  %v1360_v36 = vpop.f32.mrb[27].mxu1  ;;  %v1579_v32 = vsub.f32 %v12077_v60, %v1491_v53  ;;  %v1582_v53 = vsub.f32 %v12083_v52, %v1500_v40 }
 0x41c   :  { %v1561_v29 = vsel %vm1479_vm3, %v12209_v16, -inf  ;;  %1553 = vmax.xlane.f32.xlu0 %v1552_v62  ;;  %v12219_v15 = vsel %vm12053_vm5, %v1360_v36, -inf  ;;  %v1577_v62 = vsub.f32 %v12069_v61, %v1485_v3  ;;  %v1576_v36 = vsub.f32 %v12061_v47, %v1482_v39 }
 0x41d   :  { %1562 = vmax.xlane.f32.xlu1 %v1561_v29  ;;  %v1555_v26 = vsel %vm1479_vm3, %v12219_v15, -inf  ;;  %v1614_v59 = vmul.f32 1.442695, %v1579_v32  ;;  %v1494_v29 = vpop.xlane.xlu0 %1493  ;;  %v1583_v60 = vsub.f32 %v12093_v51, %v1503_v41  ;;  %v1620_v48 = vmul.f32 1.442695, %v1582_v53 }
 0x41e   :  { %v1610_v43 = vmul.f32 1.442695, %v1577_v62  ;;  %v1608_v20 = vmul.f32 1.442695, %v1576_v36  ;;  %v1580_v47 = vsub.f32 %v12089_v11, %v1494_v29  ;;  %v1581_v40 = vsub.f32 %v12099_v22, %v1497_v30 }
 0x41f   :  { %10608 = vpow2.f32 %v1614_v59  ;;  %v1622_v39 = vmul.f32 1.442695, %v1583_v60 }
 0x420   :  { %1559 = vmax.xlane.f32.xlu0 %v1558_v33  ;;  %10610 = vpow2.f32 %v1610_v43  ;;  %v1616_v22 = vmul.f32 1.442695, %v1580_v47  ;;  %v1618_v36 = vmul.f32 1.442695, %v1581_v40 }
 0x421   :  { %1556 = vmax.xlane.f32.xlu1 %v1555_v26  ;;  %v1512_v18 = vpop.xlane.xlu0 %1511  ;;  %v1515_v6 = vpop.xlane.xlu1 %1514  ;;  %10612 = vpow2.f32 %v1608_v20 }
 0x422   :  { %10614 = vpow2.f32 %v1620_v48  ;;  %v1586_v26 = vsub.f32 %v12107_v12, %v1512_v18  ;;  %v1587_v29 = vsub.f32 %v12117_v37, %v1515_v6  ;;  %v12257_v20 = vpop.eup %10606 }
 0x423   :  { %10616 = vpow2.f32 %v1622_v39  ;;  %v1678_v47 = vsel %vm1479_vm3, %v12257_v20, 0.0 }
 0x424   :  { %10618 = vpow2.f32 %v1616_v22  ;;  %v1628_v18 = vmul.f32 1.442695, %v1586_v26  ;;  %v1630_v6 = vmul.f32 1.442695, %v1587_v29 }
 0x425   :  { %v1506_v32 = vpop.xlane.xlu0 %1505  ;;  %v1509_v62 = vpop.xlane.xlu1 %1508  ;;  %10620 = vpow2.f32 %v1618_v36 }
 0x426   :  { %v1584_v12 = vsub.f32 %v12113_v17, %v1506_v32  ;;  %v1585_v37 = vsub.f32 %v12123_v0, %v1509_v62  ;;  %10622 = vpow2.f32 %v1628_v18 }
 0x427   :  { %10624 = vpow2.f32 %v1630_v6 }
 0x428   :  { %v9742_v33 = vpop.f32.mrb[28].mxu1  ;;  %v1624_v40 = vmul.f32 1.442695, %v1584_v12 }
 0x429   :  { %v1424_v3 = vpop.f32.mrb[29].mxu1  ;;  %v12245_v51 = vsel %vm12039_vm2, %v9742_v33, -inf  ;;  %v12261_v60 = vpop.eup %10608 }
 0x42a   :  { %v12234_v61 = vsel %vm12044_vm4, %v1424_v3, -inf  ;;  %v9743_v19 = vpop.f32.mrb[30].mxu1  ;;  %v1570_v43 = vsel %vm1479_vm3, %v12245_v51, -inf  ;;  %v12264_v48 = vpop.eup %10610  ;;  %v1681_v39 = vsel %vm1479_vm3, %v12261_v60, 0.0  ;;  %10626 = vpow2.f32 %v1624_v40 }
 0x42b   :  { %v1564_v59 = vsel %vm1479_vm3, %v12234_v61, -inf  ;;  %v12241_v41 = vsel %vm12063_vm6, %v9743_v19, -inf  ;;  %v1427_v52 = vpop.f32.mrb[31].mxu1  ;;  %v12269_v19 = vpop.eup %10612  ;;  %v1675_v26 = vsel %vm1479_vm3, %v12264_v48, 0.0 }
 0x42c   :  { %v1573_v11 = vsel %vm1479_vm3, %v12241_v41, -inf  ;;  %1565 = vmax.xlane.f32.xlu0 %v1564_v59  ;;  %v12251_v30 = vsel %vm12053_vm5, %v1427_v52, -inf  ;;  %v1626_v59 = vmul.f32 1.442695, %v1585_v37  ;;  %v1672_v0 = vsel %vm1479_vm3, %v12269_v19, 0.0  ;;  %v12277_v32 = vpop.eup %10614 }
 0x42d   :  { %1574 = vmax.xlane.f32.xlu1 %v1573_v11  ;;  %v1567_v53 = vsel %vm1479_vm3, %v12251_v30, -inf  ;;  %v12281_v62 = vpop.eup %10616 }
 0x42e   :  { %10628 = vpow2.f32 %v1626_v59 }
 0x42f   :  { %v1524_v33 = vpop.xlane.xlu0 %1523 }
 0x430   :  { %1571 = vmax.xlane.f32.xlu0 %v1570_v43  ;;  %v1590_v17 = vsub.f32 %v12131_v8, %v1524_v33  ;;  %v1690_v43 = vsel %vm1479_vm3, %v12277_v32, 0.0  ;;  %v1693_v33 = vsel %vm1479_vm3, %v12281_v62, 0.0 }
 0x431   :  { %1568 = vmax.xlane.f32.xlu1 %v1567_v53  ;;  %v1527_v3 = vpop.xlane.xlu1 %1526  ;;  %v12287_v53 = vpop.eup %10618 }
 0x432   :  { %v1591_v52 = vsub.f32 %v12141_v4, %v1527_v3  ;;  %v1636_v8 = vmul.f32 1.442695, %v1590_v17  ;;  %v12291_v18 = vpop.eup %10620 }
 0x433   :  { %v1518_v11 = vpop.xlane.xlu0 %1517  ;;  %v12295_v6 = vpop.eup %10622 }
 0x434   :  { %1679 = vadd.xlane.f32.xlu0 %v1678_v47  ;;  %v1588_v36 = vsub.f32 %v12137_v7, %v1518_v11  ;;  %v1638_v4 = vmul.f32 1.442695, %v1591_v52  ;;  %10630 = vpow2.f32 %v1636_v8  ;;  %v1687_v47 = vsel %vm1479_vm3, %v12291_v18, 0.0 }
 0x435   :  { %1682 = vadd.xlane.f32.xlu1 %v1681_v39  ;;  %v1521_v22 = vpop.xlane.xlu1 %1520  ;;  %v12300_v39 = vpop.eup %10624  ;;  %v1702_v11 = vsel %vm1479_vm3, %v12295_v6, 0.0 }
 0x436   :  { %v1589_v29 = vsub.f32 %v12147_v46, %v1521_v22  ;;  %v1632_v12 = vmul.f32 1.442695, %v1588_v36  ;;  %10632 = vpow2.f32 %v1638_v4  ;;  %v1684_v46 = vsel %vm1479_vm3, %v12287_v53, 0.0 }
 0x438   :  { %1673 = vadd.xlane.f32.xlu0 %v1672_v0  ;;  %v1634_v7 = vmul.f32 1.442695, %v1589_v29  ;;  %10634 = vpow2.f32 %v1632_v12  ;;  %v12305_v0 = vpop.eup %10626 }
 0x439   :  { %1676 = vadd.xlane.f32.xlu1 %v1675_v26  ;;  %v1705_v26 = vsel %vm1479_vm3, %v12300_v39, 0.0  ;;  %v12310_v8 = vpop.eup %10628  ;;  %v1696_v29 = vsel %vm1479_vm3, %v12305_v0, 0.0 }
 0x43a   :  { %10636 = vpow2.f32 %v1634_v7 }
 0x43c   :  { %1691 = vadd.xlane.f32.xlu0 %v1690_v43 }
 0x43d   :  { %1694 = vadd.xlane.f32.xlu1 %v1693_v33 }
 0x43e   :  { %v12315_v43 = vpop.eup %10630 }
 0x43f   :  { %v1536_v3 = vpop.xlane.xlu0 %1535  ;;  %v1714_v7 = vsel %vm1479_vm3, %v12315_v43, 0.0 }
 0x440   :  { %v1594_v37 = vsub.f32 %v12155_v2, %v1536_v3  ;;  %1685 = vadd.xlane.f32.xlu0 %v1684_v46  ;;  %v12319_v12 = vpop.eup %10632 }
 0x441   :  { %v1539_v40 = vpop.xlane.xlu1 %1538  ;;  %1688 = vadd.xlane.f32.xlu1 %v1687_v47  ;;  %v1717_v3 = vsel %vm1479_vm3, %v12319_v12, 0.0 }
 0x442   :  { %v1644_v17 = vmul.f32 1.442695, %v1594_v37  ;;  %v1595_v59 = vsub.f32 %v12165_v45, %v1539_v40 }
 0x443   :  { %v1530_v52 = vpop.xlane.xlu0 %1529 }
 0x444   :  { %v1646_v2 = vmul.f32 1.442695, %v1595_v59  ;;  %v1592_v22 = vsub.f32 %v12161_v27, %v1530_v52  ;;  %1703 = vadd.xlane.f32.xlu0 %v1702_v11  ;;  %10638 = vpow2.f32 %v1644_v17  ;;  %v1699_v27 = vsel %vm1479_vm3, %v12310_v8, 0.0 }
 0x445   :  { %v1533_v36 = vpop.xlane.xlu1 %1532  ;;  %1706 = vadd.xlane.f32.xlu1 %v1705_v26 }
 0x446   :  { %v1640_v45 = vmul.f32 1.442695, %v1592_v22  ;;  %v1593_v4 = vsub.f32 %v12171_v25, %v1533_v36  ;;  %10640 = vpow2.f32 %v1646_v2  ;;  %v12323_v25 = vpop.eup %10634 }
 0x447   :  { %v12327_v46 = vpop.eup %10636  ;;  %v1708_v37 = vsel %vm1479_vm3, %v12323_v25, 0.0 }
 0x448   :  { %v1642_v33 = vmul.f32 1.442695, %v1593_v4  ;;  %1697 = vadd.xlane.f32.xlu0 %v1696_v29  ;;  %10642 = vpow2.f32 %v1640_v45  ;;  %v1711_v40 = vsel %vm1479_vm3, %v12327_v46, 0.0 }
 0x449   :  { %1700 = vadd.xlane.f32.xlu1 %v1699_v27 }
 0x44a   :  { %10644 = vpow2.f32 %v1642_v33 }
 0x44c   :  { %1715 = vadd.xlane.f32.xlu0 %v1714_v7 }
 0x44d   :  { %1718 = vadd.xlane.f32.xlu1 %v1717_v3 }
 0x44e   :  { %v12331_v47 = vpop.eup %10638 }
 0x44f   :  { %v1726_v59 = vsel %vm1479_vm3, %v12331_v47, 0.0 }
 0x450   :  { %1709 = vadd.xlane.f32.xlu0 %v1708_v37  ;;  %v12335_v17 = vpop.eup %10640 }
 0x451   :  { %1712 = vadd.xlane.f32.xlu1 %v1711_v40  ;;  %v1729_v11 = vsel %vm1479_vm3, %v12335_v17, 0.0 }
 0x452   :  { %v12339_v52 = vpop.eup %10642 }
 0x453   :  { %v1720_v22 = vsel %vm1479_vm3, %v12339_v52, 0.0 }
 0x454   :  { %1727 = vadd.xlane.f32.xlu0 %v1726_v59  ;;  %v12343_v2 = vpop.eup %10644 }
 0x455   :  { %1730 = vadd.xlane.f32.xlu1 %v1729_v11  ;;  %v1723_v26 = vsel %vm1479_vm3, %v12343_v2, 0.0 }
 0x458   :  { %1721 = vadd.xlane.f32.xlu0 %v1720_v22 }
 0x459   :  { %1724 = vadd.xlane.f32.xlu1 %v1723_v26 }
 0x498   :  { %v1548_v36 = vpop.xlane.xlu0 %1547 }
 0x499   :  { %v1598_v45 = vsub.f32 %v12179_v14, %v1548_v36 }
 0x49a   :  { %v1551_v4 = vpop.xlane.xlu1 %1550 }
 0x49b   :  { %v1652_v29 = vmul.f32 1.442695, %v1598_v45  ;;  %v1599_v33 = vsub.f32 %v12189_v9, %v1551_v4 }
 0x49c   :  { %v1542_v27 = vpop.xlane.xlu0 %1541 }
 0x49d   :  { %10646 = vpow2.f32 %v1652_v29  ;;  %v1654_v7 = vmul.f32 1.442695, %v1599_v33  ;;  %v1596_v3 = vsub.f32 %v12185_v23, %v1542_v27 }
 0x49e   :  { %v1545_v37 = vpop.xlane.xlu1 %1544 }
 0x49f   :  { %10648 = vpow2.f32 %v1654_v7  ;;  %v1648_v40 = vmul.f32 1.442695, %v1596_v3  ;;  %v1597_v59 = vsub.f32 %v12195_v49, %v1545_v37 }
 0x4a1   :  { %10650 = vpow2.f32 %v1648_v40  ;;  %v1650_v11 = vmul.f32 1.442695, %v1597_v59 }
 0x4a3   :  { %10652 = vpow2.f32 %v1650_v11 }
 0x4a7   :  { %v12353_v22 = vpop.eup %10646 }
 0x4a8   :  { %v1738_v14 = vsel %vm1479_vm3, %v12353_v22, 0.0 }
 0x4a9   :  { %v12357_v26 = vpop.eup %10648  ;;  %1739 = vadd.xlane.f32.xlu0 %v1738_v14  ;;  %v1554_v9 = vpop.xlane.xlu0 %1553 }
 0x4aa   :  { %v1563_v36 = vpop.xlane.xlu1 %1562  ;;  %v1741_v23 = vsel %vm1479_vm3, %v12357_v26, 0.0  ;;  %v1600_v4 = vsub.f32 %v12203_v56, %v1554_v9 }
 0x4ab   :  { %v12361_v45 = vpop.eup %10650  ;;  %v1603_v49 = vsub.f32 %v12209_v16, %v1563_v36  ;;  %1742 = vadd.xlane.f32.xlu1 %v1741_v23 }
 0x4ac   :  { %v1732_v29 = vsel %vm1479_vm3, %v12361_v45, 0.0  ;;  %v1656_v59 = vmul.f32 1.442695, %v1600_v4 }
 0x4ad   :  { %v12367_v33 = vpop.eup %10652  ;;  %v1662_v27 = vmul.f32 1.442695, %v1603_v49  ;;  %1733 = vadd.xlane.f32.xlu0 %v1732_v29  ;;  %v1560_v7 = vpop.xlane.xlu0 %1559 }
 0x4ae   :  { %v1602_v3 = vsub.f32 %v12213_v58, %v1560_v7  ;;  %v1557_v37 = vpop.xlane.xlu1 %1556  ;;  %v1735_v40 = vsel %vm1479_vm3, %v12367_v33, 0.0 }
 0x4af   :  { %10654 = vpow2.f32 %v1662_v27  ;;  %v1601_v16 = vsub.f32 %v12219_v15, %v1557_v37  ;;  %1736 = vadd.xlane.f32.xlu1 %v1735_v40 }
 0x4b0   :  { %v1660_v56 = vmul.f32 1.442695, %v1602_v3 }
 0x4b1   :  { %v1658_v11 = vmul.f32 1.442695, %v1601_v16 }
 0x4b2   :  { %10656 = vpow2.f32 %v1660_v56 }
 0x4b3   :  { %10658 = vpow2.f32 %v1658_v11 }
 0x4b4   :  { %10660 = vpow2.f32 %v1656_v59 }
 0x4b9   :  { %v12373_v14 = vpop.eup %10654  ;;  %v1566_v9 = vpop.xlane.xlu0 %1565 }
 0x4ba   :  { %v12375_v36 = vpop.xlane.xlu1 %1574  ;;  %v1753_v58 = vsel %vm1479_vm3, %v12373_v14, 0.0  ;;  %v1604_v23 = vsub.f32 %v12234_v61, %v1566_v9 }
 0x4bb   :  { %1754 = vadd.xlane.f32.xlu1 %v1753_v58 }
 0x4bc   :  { %v12380_v49 = vpop.eup %10656  ;;  %v1664_v61 = vmul.f32 1.442695, %v1604_v23 }
 0x4bd   :  { %v12382_v15 = vpop.eup %10658  ;;  %v1572_v4 = vpop.xlane.xlu0 %1571  ;;  %v1750_v29 = vsel %vm1479_vm3, %v12380_v49, 0.0 }
 0x4be   :  { %v12386_v27 = vpop.eup %10660  ;;  %v1606_v7 = vsub.f32 %v12245_v51, %v1572_v4  ;;  %v12389_v3 = vpop.xlane.xlu1 %1568  ;;  %1751 = vadd.xlane.f32.xlu0 %v1750_v29  ;;  %v1747_v37 = vsel %vm1479_vm3, %v12382_v15, 0.0 }
 0x4bf   :  { %1748 = vadd.xlane.f32.xlu1 %v1747_v37  ;;  %v1744_v59 = vsel %vm1479_vm3, %v12386_v27, 0.0 }
 0x4c0   :  { %v1668_v40 = vmul.f32 1.442695, %v1606_v7 }
 0x4c1   :  { %v1680_v16 = vpop.xlane.xlu0 %1679 }
 0x4c2   :  { %10662 = vpow2.f32 %v1668_v40  ;;  %v1683_v56 = vpop.xlane.xlu1 %1682  ;;  %1745 = vadd.xlane.f32.xlu0 %v1744_v59 }
 0x4c3   :  { %10664 = vpow2.f32 %v1664_v61 }
 0x4c4   :  { %10666 = vrcp.f32 %v1680_v16 }
 0x4c5   :  { %10668 = vrcp.f32 %v1683_v56  ;;  %v1674_v51 = vpop.xlane.xlu0 %1673 }
 0x4c6   :  { %10670 = vrcp.f32 %v1674_v51  ;;  %v1677_v11 = vpop.xlane.xlu1 %1676 }
 0x4c7   :  { %10672 = vrcp.f32 %v1677_v11 }
 0x4c9   :  { %v1692_v9 = vpop.xlane.xlu0 %1691 }
 0x4ca   :  { %v1695_v58 = vpop.xlane.xlu1 %1694  ;;  %10674 = vrcp.f32 %v1692_v9 }
 0x4cb   :  { %10676 = vrcp.f32 %v1695_v58 }
 0x4cc   :  { %v12395_v23 = vpop.eup %10662 }
 0x4cd   :  { %v12397_v4 = vpop.eup %10664  ;;  %v1686_v29 = vpop.xlane.xlu0 %1685  ;;  %v1762_v7 = vsel %vm1479_vm3, %v12395_v23, 0.0 }
 0x4ce   :  { %v10667_v37 = vpop.eup %10666  ;;  %10678 = vrcp.f32 %v1686_v29  ;;  %v1689_v61 = vpop.xlane.xlu1 %1688  ;;  %1763 = vadd.xlane.f32.xlu0 %v1762_v7  ;;  %v1756_v9 = vsel %vm1479_vm3, %v12397_v4, 0.0 }
 0x4cf   :  { %v10669_v40 = vpop.eup %10668  ;;  %10680 = vrcp.f32 %v1689_v61  ;;  %v1802_v56 = vmul.f32 %v10667_v37, %v12257_v20 }
 0x4d0   :  { %v10671_v16 = vpop.eup %10670  ;;  %2328 = vrot.lane.b32.xlu1 %v11873_v24, %s11216_s13  ;;  %v1803_v51 = vmul.f32 %v10669_v40, %v12261_v60 }
 0x4d1   :  { %v10673_v59 = vpop.eup %10672  ;;  %v1704_v11 = vpop.xlane.xlu0 %1703  ;;  %v1800_v58 = vmul.f32 %v10671_v16, %v12269_v19 }
 0x4d2   :  { %v1707_v29 = vpop.xlane.xlu1 %1706  ;;  %1757 = vadd.xlane.f32.xlu0 %v1756_v9  ;;  %v1801_v7 = vmul.f32 %v10673_v59, %v12264_v48  ;;  %10682 = vrcp.f32 %v1704_v11  ;;  %v1833_v37 = vpack.c.bf16 %v1803_v51, %v1802_v56 }
 0x4d3   :  { %10684 = vrcp.f32 %v1707_v29 }
 0x4d4   :  { %2395 = vrot.lane.b32.xlu1 %v11879_v50, %s11216_s13  ;;  %v1832_v61 = vpack.c.bf16 %v1801_v7, %v1800_v58  ;;  %v10675_v10 = vpop.eup %10674 }
 0x4d5   :  { %v1698_v20 = vpop.xlane.xlu0 %1697  ;;  %v10677_v60 = vpop.eup %10676  ;;  %v1806_v16 = vmul.f32 %v10675_v10, %v12277_v32 }
 0x4d6   :  { %10686 = vrcp.f32 %v1698_v20  ;;  %v1701_v40 = vpop.xlane.xlu1 %1700  ;;  %9748 = vmatprep.mubr.msk.bf16.mxu1 %vm1479_vm3, %v1832_v61  ;;  %v1807_v59 = vmul.f32 %v10677_v60, %v12281_v62 }
 0x4d7   :  { %10688 = vrcp.f32 %v1701_v40  ;;  %9749 = vmatmul.mubr.msk.bf16.vlgmr.msra.gmra.mrb[32].mxu1 %vm1479_vm3, %v1833_v37  ;;  %v1607_v40 = vsub.f32 %v12241_v41, %v12375_v36 }
 0x4d8   :  { %v10679_v19 = vpop.eup %10678  ;;  %9761 = vmatpush3.bf16.msra.mxu1 %v11897_v5  ;;  %v1835_v7 = vpack.c.bf16 %v1807_v59, %v1806_v16 }
 0x4d9   :  { %v10681_v48 = vpop.eup %10680  ;;  %9762 = vmatprep.subr.bf16.mxu1 %v11903_v1  ;;  %v1716_v11 = vpop.xlane.xlu0 %1715  ;;  %v1804_v56 = vmul.f32 %v10679_v19, %v12287_v53 }
 0x4da   :  { %v1719_v51 = vpop.xlane.xlu1 %1718  ;;  %v1805_v9 = vmul.f32 %v10681_v48, %v12291_v18  ;;  %10690 = vrcp.f32 %v1716_v11 }
 0x4db   :  { %10692 = vrcp.f32 %v1719_v51 }
 0x4dc   :  { %9763 = vmatpush3.bf16.msra.mxu1 %v11903_v1  ;;  %v1834_v58 = vpack.c.bf16 %v1805_v9, %v1804_v56  ;;  %v10683_v29 = vpop.eup %10682  ;;  %v1670_v56 = vmul.f32 1.442695, %v1607_v40  ;;  %v15904_v40 = vld [vmem:[#allocation10_spill] sm:$0xff] }
 0x4dd   :  { %9776 = vmatprep.subr.bf16.mxu1 %v11922_v35  ;;  %v1710_v10 = vpop.xlane.xlu0 %1709  ;;  %v10685_v32 = vpop.eup %10684  ;;  %v1810_v61 = vmul.f32 %v10683_v29, %v12295_v6 }
 0x4de   :  { %10694 = vrcp.f32 %v1710_v10  ;;  %v1713_v62 = vpop.xlane.xlu1 %1712  ;;  %9756 = vmatprep.mubr.msk.bf16.mxu0 %vm1479_vm3, %v1834_v58  ;;  %v1811_v20 = vmul.f32 %v10685_v32, %v12300_v39 }
 0x4df   :  { %10696 = vrcp.f32 %v1713_v62  ;;  %9757 = vmatmul.mubr.msk.bf16.vlgmr.msra.gmra.mrb[64].mxu0 %vm1479_vm3, %v1835_v7 }
 0x4e0   :  { %v10687_v53 = vpop.eup %10686  ;;  %9769 = vmatpush3.bf16.msra.mxu0 %v11909_v13  ;;  %v1837_v39 = vpack.c.bf16 %v1811_v20, %v1810_v61  ;;  %v15901_v20 = vld [vmem:[#allocation29_spill] sm:$0xff] }
 0x4e1   :  { %v10689_v18 = vpop.eup %10688  ;;  %9770 = vmatprep.subr.bf16.mxu0 %v11916_v42  ;;  %v1728_v37 = vpop.xlane.xlu0 %1727  ;;  %v1808_v60 = vmul.f32 %v10687_v53, %v12305_v0  ;;  %v1605_v0 = vsub.f32 %v12251_v30, %v12389_v3 }
 0x4e2   :  { %v1731_v19 = vpop.xlane.xlu1 %1730  ;;  %v1809_v48 = vmul.f32 %v10689_v18, %v12310_v8  ;;  %10698 = vrcp.f32 %v1728_v37 }
 0x4e3   :  { %10700 = vrcp.f32 %v1731_v19  ;;  %v1666_v3 = vmul.f32 1.442695, %v1605_v0  ;;  %v15905_v19 = vld [vmem:[#allocation20_spill] sm:$0xff] }
 0x4e4   :  { %9771 = vmatpush3.bf16.msra.mxu0 %v11916_v42  ;;  %v1836_v16 = vpack.c.bf16 %v1809_v48, %v1808_v60  ;;  %v10691_v59 = vpop.eup %10690  ;;  %v15906_v48 = vld [vmem:[#allocation22_spill] sm:$0xff] }
 0x4e5   :  { %9784 = vmatprep.subr.bf16.mxu0 %v11952_v38  ;;  %v1722_v6 = vpop.xlane.xlu0 %1721  ;;  %v10693_v11 = vpop.eup %10692  ;;  %v1814_v51 = vmul.f32 %v10691_v59, %v12315_v43  ;;  %v15908_v59 = vld [vmem:[#allocation16_spill] sm:$0xff] }
 0x4e6   :  { %10702 = vrcp.f32 %v1722_v6  ;;  %v1725_v41 = vpop.xlane.xlu1 %1724  ;;  %9764 = vmatprep.mubr.msk.bf16.mxu1 %vm1479_vm3, %v1836_v16  ;;  %v1815_v9 = vmul.f32 %v10693_v11, %v12319_v12  ;;  %v15907_v16 = vld [vmem:[#allocation28_spill] sm:$0xff]  ;;  %v15909_v6 = vld [vmem:[#allocation26_spill] sm:$0xff] }
 0x4e7   :  { %10704 = vrcp.f32 %v1725_v41  ;;  %9765 = vmatmul.mubr.msk.bf16.vlgmr.msra.gmra.mrb[36].mxu1 %vm1479_vm3, %v1837_v39  ;;  %v15910_v39 = vld [vmem:[#allocation6_spill] sm:$0xff] }
 0x4e8   :  { %v10695_v8 = vpop.eup %10694  ;;  %9777 = vmatpush3.bf16.msra.mxu1 %v11922_v35  ;;  %2326 = vrot.lane.b32.xlu0 %v11865_v55, %s11216_s13  ;;  %10706 = vpow2.f32 %v1670_v56  ;;  %v1839_v43 = vpack.c.bf16 %v1815_v9, %v1814_v51  ;;  %v15911_v11 = vld [vmem:[#allocation14_spill] sm:$0xff]  ;;  %v15914_v9 = vld [vmem:[#allocation24_spill] sm:$0xff] }
 0x4e9   :  { %v10697_v36 = vpop.eup %10696  ;;  %9778 = vmatprep.subr.bf16.mxu1 %v11928_v57  ;;  %v1812_v30 = vmul.f32 %v10695_v8, %v12323_v25  ;;  %10708 = vpow2.f32 %v1666_v3  ;;  %v15912_v56 = vld [vmem:[#allocation30_spill] sm:$0xff] }
 0x4ea   :  { %v1813_v58 = vmul.f32 %v10697_v36, %v12327_v46  ;;  %v15913_v8 = vld [vmem:[#allocation18_spill] sm:$0xff] }
 0x4ec   :  { %9779 = vmatpush3.bf16.msra.mxu1 %v11928_v57  ;;  %2324 = vrot.lane.b32.xlu0 %v11873_v24, %s11217_s14  ;;  %v1838_v29 = vpack.c.bf16 %v1813_v58, %v1812_v30  ;;  %v10699_v7 = vpop.eup %10698 }
 0x4ed   :  { %9792 = vmatprep.subr.bf16.mxu1 %v11972_v44  ;;  %v10701_v12 = vpop.eup %10700  ;;  %v1818_v10 = vmul.f32 %v10699_v7, %v12331_v47 }
 0x4ee   :  { %9772 = vmatprep.mubr.msk.bf16.mxu0 %vm1479_vm3, %v1838_v29  ;;  %v1819_v32 = vmul.f32 %v10701_v12, %v12335_v17 }
 0x4ef   :  { %9773 = vmatmul.mubr.msk.bf16.vlgmr.msra.gmra.mrb[68].mxu0 %vm1479_vm3, %v1839_v43 }
 0x4f0   :  { %v10703_v25 = vpop.eup %10702  ;;  %9785 = vmatpush3.bf16.msra.mxu0 %v11952_v38  ;;  %2464 = vrot.lane.b32.xlu0 %v11895_v63, %s11216_s13  ;;  %v1841_v37 = vpack.c.bf16 %v1819_v32, %v1818_v10 }
 0x4f1   :  { %v10705_v46 = vpop.eup %10704  ;;  %9786 = vmatprep.subr.bf16.mxu0 %v11960_v31  ;;  %v1816_v62 = vmul.f32 %v10703_v25, %v12339_v52  ;;  %v15902_v52 = vld [vmem:[#allocation12_spill] sm:$0xff] }
 0x4f2   :  { %v1817_v53 = vmul.f32 %v10705_v46, %v12343_v2  ;;  %v12459_v18 = vpop.eup %10706  ;;  %v15903_v2 = vld [vmem:[#allocation27_spill] sm:$0xff] }
 0x4f3   :  { %v1765_v47 = vsel %vm1479_vm3, %v12459_v18, 0.0  ;;  %v12469_v17 = vpop.eup %10708 }
 0x4f4   :  { %9787 = vmatpush3.bf16.msra.mxu0 %v11960_v31  ;;  %2393 = vrot.lane.b32.xlu0 %v11887_v28, %s11217_s14  ;;  %v1840_v61 = vpack.c.bf16 %v1817_v53, %v1816_v62  ;;  %v1759_v60 = vsel %vm1479_vm3, %v12469_v17, 0.0 }
 0x4f5   :  { %9800 = vmatprep.subr.bf16.mxu0 %v15901_v20 }
 0x4f6   :  { %9780 = vmatprep.mubr.msk.bf16.mxu1 %vm1479_vm3, %v1840_v61  ;;  %v15915_v61 = vld [vmem:[#allocation3_spill] sm:$0xff] }
 0x4f7   :  { %9781 = vmatmul.mubr.msk.bf16.vlgmr.msra.gmra.mrb[40].mxu1 %vm1479_vm3, %v1841_v37 }
 0x4f8   :  { %9793 = vmatpush3.bf16.msra.mxu1 %v11972_v44  ;;  %1766 = vadd.xlane.f32.xlu1 %v1765_v47 }
 0x4f9   :  { %2533 = vrot.lane.b32.xlu0 %v15902_v52, %s11216_s13  ;;  %9794 = vmatprep.subr.bf16.mxu1 %v15903_v2 }
 0x4fc   :  { %9795 = vmatpush3.bf16.msra.mxu1 %v15903_v2  ;;  %1760 = vadd.xlane.f32.xlu1 %v1759_v60 }
 0x4fd   :  { %2462 = vrot.lane.b32.xlu0 %v15904_v40, %s11217_s14 }
 0x501   :  { %2529 = vrot.lane.b32.xlu0 %v15902_v52, %s11217_s14 }
 0x505   :  { %2671 = vrot.lane.b32.xlu0 %v15905_v19, %s11216_s13 }
 0x509   :  { %2667 = vrot.lane.b32.xlu0 %v15905_v19, %s11217_s14 }
 0x50d   :  { %2669 = vrot.lane.b32.xlu0 %v15906_v48, %s11217_s14  ;;  %2322 = vrot.lane.b32.xlu1 %v11865_v55, %s11217_s14 }
 0x511   :  { %2805 = vrot.lane.b32.xlu0 %v15907_v16, %s11217_s14  ;;  %2397 = vrot.lane.b32.xlu1 %v11887_v28, %s11216_s13 }
 0x515   :  { %2602 = vrot.lane.b32.xlu0 %v15908_v59, %s11216_s13  ;;  %2391 = vrot.lane.b32.xlu1 %v11879_v50, %s11217_s14 }
 0x519   :  { %2598 = vrot.lane.b32.xlu0 %v15908_v59, %s11217_s14  ;;  %2466 = vrot.lane.b32.xlu1 %v15904_v40, %s11216_s13 }
 0x51d   :  { %2738 = vrot.lane.b32.xlu0 %v15909_v6, %s11217_s14  ;;  %2460 = vrot.lane.b32.xlu1 %v11895_v63, %s11217_s14 }
 0x521   :  { %3339 = vrot.lane.b32.xlu0 %v15910_v39, %s11217_s14  ;;  %2535 = vrot.lane.b32.xlu1 %v15911_v11, %s11216_s13 }
 0x525   :  { %2531 = vrot.lane.b32.xlu1 %v15911_v11, %s11217_s14 }
 0x529   :  { %2673 = vrot.lane.b32.xlu1 %v15906_v48, %s11216_s13 }
 0x52d   :  { %2809 = vrot.lane.b32.xlu1 %v15907_v16, %s11216_s13 }
 0x531   :  { %2811 = vrot.lane.b32.xlu1 %v15912_v56, %s11216_s13 }
 0x535   :  { %2807 = vrot.lane.b32.xlu1 %v15912_v56, %s11217_s14 }
 0x536   :  { %v1740_v0 = vpop.xlane.xlu0 %1739 }
 0x538   :  { %v1743_v41 = vpop.xlane.xlu1 %1742 }
 0x539   :  { %2604 = vrot.lane.b32.xlu1 %v15913_v8, %s11216_s13  ;;  %10710 = vrcp.f32 %v1743_v41 }
 0x53a   :  { %v1734_v36 = vpop.xlane.xlu0 %1733 }
 0x53b   :  { %10712 = vrcp.f32 %v1734_v36 }
 0x53c   :  { %10714 = vrcp.f32 %v1740_v0  ;;  %v1737_v51 = vpop.xlane.xlu1 %1736 }
 0x53d   :  { %10716 = vrcp.f32 %v1737_v51  ;;  %2740 = vrot.lane.b32.xlu1 %v15914_v9, %s11216_s13 }
 0x541   :  { %2600 = vrot.lane.b32.xlu1 %v15913_v8, %s11217_s14 }
 0x543   :  { %v10711_v30 = vpop.eup %10710 }
 0x544   :  { %v1823_v7 = vmul.f32 %v10711_v30, %v12357_v26 }
 0x545   :  { %v10713_v3 = vpop.eup %10712  ;;  %2742 = vrot.lane.b32.xlu1 %v15909_v6, %s11216_s13 }
 0x546   :  { %v10715_v58 = vpop.eup %10714  ;;  %v1820_v12 = vmul.f32 %v10713_v3, %v12361_v45 }
 0x547   :  { %v10717_v29 = vpop.eup %10716  ;;  %v1822_v46 = vmul.f32 %v10715_v58, %v12353_v22  ;;  %v15916_v22 = vld [vmem:[#allocation31_spill] sm:$0xff] }
 0x548   :  { %v1755_v43 = vpop.xlane.xlu1 %1754  ;;  %v1821_v25 = vmul.f32 %v10717_v29, %v12367_v33  ;;  %v15917_v33 = vld [vmem:[#allocation4_spill] sm:$0xff] }
 0x549   :  { %2736 = vrot.lane.b32.xlu1 %v15914_v9, %s11217_s14  ;;  %v1843_v62 = vpack.c.bf16 %v1823_v7, %v1822_v46 }
 0x54a   :  { %v1842_v10 = vpack.c.bf16 %v1821_v25, %v1820_v12 }
 0x54b   :  { %v1752_v32 = vpop.xlane.xlu0 %1751 }
 0x54c   :  { %v1749_v53 = vpop.xlane.xlu1 %1748  ;;  %9788 = vmatprep.mubr.msk.bf16.mxu0 %vm1479_vm3, %v1842_v10  ;;  %10718 = vrcp.f32 %v1752_v32 }
 0x54d   :  { %3276 = vrot.lane.b32.xlu1 %v15915_v61, %s11217_s14  ;;  %9789 = vmatmul.mubr.msk.bf16.vlgmr.msra.gmra.mrb[72].mxu0 %vm1479_vm3, %v1843_v62  ;;  %10720 = vrcp.f32 %v1749_v53 }
 0x54e   :  { %9801 = vmatpush3.bf16.msra.mxu0 %v15901_v20  ;;  %10722 = vrcp.f32 %v1755_v43 }
 0x54f   :  { %9802 = vmatprep.subr.bf16.mxu0 %v15916_v22  ;;  %v1746_v26 = vpop.xlane.xlu0 %1745 }
 0x550   :  { %10724 = vrcp.f32 %v1746_v26  ;;  %v2329_v45 = vpop.permute.xlu1 %2328 }
 0x551   :  { %3278 = vrot.lane.b32.xlu1 %v15917_v33, %s11217_s14 }
 0x552   :  { %9803 = vmatpush3.bf16.msra.mxu0 %v15916_v22 }
 0x554   :  { %v2396_v37 = vpop.permute.xlu1 %2395 }
 0x555   :  { %10444 = vmatprep.subr.msk.bf16.mxu0 %vm908_vm1, %v2396_v37 }
 0x556   :  { %v10719_v47 = vpop.eup %10718 }
 0x557   :  { %v10721_v60 = vpop.eup %10720  ;;  %v1826_v36 = vmul.f32 %v10719_v47, %v12380_v49 }
 0x558   :  { %v10723_v0 = vpop.eup %10722  ;;  %v1825_v3 = vmul.f32 %v10721_v60, %v12382_v15  ;;  %v2340_v15 = vsel %vm908_vm1, %v2329_v45, 0 }
 0x559   :  { %v1827_v58 = vmul.f32 %v10723_v0, %v12373_v14 }
 0x55a   :  { %v10725_v41 = vpop.eup %10724 }
 0x55b   :  { %v1764_v51 = vpop.xlane.xlu0 %1763  ;;  %v1824_v30 = vmul.f32 %v10725_v41, %v12386_v27  ;;  %v1845_v7 = vpack.c.bf16 %v1827_v58, %v1826_v36 }
 0x55d   :  { %v1844_v29 = vpack.c.bf16 %v1825_v3, %v1824_v30 }
 0x55f   :  { %9796 = vmatprep.mubr.msk.bf16.mxu1 %vm1479_vm3, %v1844_v29  ;;  %v1758_v43 = vpop.xlane.xlu0 %1757 }
 0x560   :  { %9797 = vmatmul.mubr.msk.bf16.vlgmr.msra.gmra.mrb[44].mxu1 %vm1479_vm3, %v1845_v7 }
 0x563   :  { %v2327_v12 = vpop.permute.xlu0 %2326 }
 0x564   :  { %10442 = vmatprep.subr.msk.bf16.mxu1 %vm908_vm1, %v2327_v12  ;;  %v2337_v25 = vsel %vm908_vm1, %v2327_v12, 0 }
 0x565   :  { %9809 = vmatpush3.bf16.xpose.msra.mxu1 %v2337_v25 }
 0x566   :  { %10443 = vmatprep.subr.msk.bf16.mxu1 %vm908_vm1, %v2329_v45 }
 0x567   :  { %v2325_v49 = vpop.permute.xlu0 %2324 }
 0x56b   :  { %v2465_v27 = vpop.permute.xlu0 %2464 }
 0x56c   :  { %v2475_v45 = vsel %vm908_vm1, %v2465_v27, 0 }
 0x56d   :  { %9811 = vmatpush3.bf16.xpose.msra.mxu1 %v2340_v15 }
 0x56e   :  { %10446 = vmatprep.subr.msk.bf16.mxu1 %vm908_vm1, %v2465_v27 }
 0x56f   :  { %v2394_v14 = vpop.permute.xlu0 %2393 }
 0x573   :  { %v2534_v46 = vpop.permute.xlu0 %2533 }
 0x577   :  { %v2463_v10 = vpop.permute.xlu0 %2462 }
 0x57b   :  { %v2530_v32 = vpop.permute.xlu0 %2529 }
 0x57f   :  { %v12555_v62 = vpop.permute.xlu0 %2671 }
 0x583   :  { %v12557_v47 = vpop.permute.xlu0 %2667 }
 0x585   :  { %v1767_v53 = vpop.xlane.xlu1 %1766 }
 0x586   :  { %10726 = vrcp.f32 %v1767_v53  ;;  %v2406_v53 = vsel %vm908_vm1, %v2396_v37, 0 }
 0x587   :  { %10728 = vrcp.f32 %v1758_v43  ;;  %v12562_v0 = vpop.permute.xlu0 %2669 }
 0x588   :  { %10730 = vrcp.f32 %v1764_v51 }
 0x589   :  { %v1761_v26 = vpop.xlane.xlu1 %1760 }
 0x58a   :  { %10732 = vrcp.f32 %v1761_v26 }
 0x58b   :  { %v12568_v25 = vpop.permute.xlu0 %2805 }
 0x58d   :  { %v2323_v60 = vpop.permute.xlu1 %2322 }
 0x58e   :  { %9812 = vmatprep.mubr.msk.bf16.mxu1 %vm908_vm1, %v2323_v60 }
 0x58f   :  { %9813 = vmatmul.mubr.msk.bf16.vlgmr.msra.gmra.mrb[48].mxu1 %vm908_vm1, %v2325_v49 }
 0x590   :  { %9825 = vmatpush3.bf16.xpose.msra.mxu1 %v2475_v45  ;;  %v10727_v41 = vpop.eup %10726 }
 0x591   :  { %v2398_v36 = vpop.permute.xlu1 %2397  ;;  %v10729_v30 = vpop.eup %10728  ;;  %v1831_v51 = vmul.f32 %v10727_v41, %v12459_v18 }
 0x592   :  { %v10731_v3 = vpop.eup %10730  ;;  %v1828_v7 = vmul.f32 %v10729_v30, %v12397_v4  ;;  %v2603_v4 = vpop.permute.xlu0 %2602  ;;  %v2409_v26 = vsel %vm908_vm1, %v2398_v36, 0 }
 0x593   :  { %v1830_v12 = vmul.f32 %v10731_v3, %v12395_v23  ;;  %v2613_v37 = vsel %vm908_vm1, %v2603_v4, 0  ;;  %v2544_v3 = vsel %vm908_vm1, %v2534_v46, 0 }
 0x594   :  { %v10733_v58 = vpop.eup %10732 }
 0x595   :  { %v2392_v29 = vpop.permute.xlu1 %2391  ;;  %v1829_v43 = vmul.f32 %v10733_v58, %v12469_v17  ;;  %v1847_v27 = vpack.c.bf16 %v1831_v51, %v1830_v12 }
 0x596   :  { %v2599_v60 = vpop.permute.xlu0 %2598 }
 0x597   :  { %v1846_v49 = vpack.c.bf16 %v1829_v43, %v1828_v7 }
 0x599   :  { %v2467_v15 = vpop.permute.xlu1 %2466  ;;  %9804 = vmatprep.mubr.msk.bf16.mxu0 %vm1479_vm3, %v1846_v49 }
 0x59a   :  { %9805 = vmatmul.mubr.msk.bf16.vlgmr.msra.gmra.mrb[76].mxu0 %vm1479_vm3, %v1847_v27  ;;  %10447 = vmatprep.subr.msk.bf16.mxu1 %vm908_vm1, %v2467_v15  ;;  %v2478_v18 = vsel %vm908_vm1, %v2467_v15, 0 }
 0x59b   :  { %9817 = vmatpush3.bf16.xpose.msra.mxu0 %v2406_v53  ;;  %9820 = vmatprep.mubr.msk.bf16.mxu0 %vm908_vm1, %v2392_v29 }
 0x59c   :  { %10445 = vmatprep.subr.msk.bf16.mxu0 %vm908_vm1, %v2398_v36  ;;  %9827 = vmatpush3.bf16.xpose.msra.mxu1 %v2478_v18 }
 0x59d   :  { %10450 = vmatprep.subr.msk.bf16.mxu1 %vm908_vm1, %v2603_v4  ;;  %v2461_v23 = vpop.permute.xlu1 %2460 }
 0x59e   :  { %9828 = vmatprep.mubr.msk.bf16.mxu1 %vm908_vm1, %v2461_v23  ;;  %v2682_v23 = vsel %vm908_vm1, %v12555_v62, 0 }
 0x5a1   :  { %v2536_v17 = vpop.permute.xlu1 %2535 }
 0x5a3   :  { %9819 = vmatpush3.bf16.xpose.msra.mxu0 %v2409_v26  ;;  %9829 = vmatmul.mubr.msk.bf16.vlgmr.msra.gmra.mrb[52].mxu1 %vm908_vm1, %v2463_v10 }
 0x5a4   :  { %10448 = vmatprep.subr.msk.bf16.mxu0 %vm908_vm1, %v2534_v46  ;;  %9841 = vmatpush3.bf16.xpose.msra.mxu1 %v2613_v37 }
 0x5a5   :  { %9844 = vmatprep.mubr.msk.bf16.mxu1 %vm908_vm1, %v2599_v60  ;;  %v2532_v45 = vpop.permute.xlu1 %2531 }
 0x5a9   :  { %v2674_v41 = vpop.permute.xlu1 %2673 }
 0x5aa   :  { %9821 = vmatmul.mubr.msk.bf16.vlgmr.msra.gmra.mrb[80].mxu0 %vm908_vm1, %v2394_v14  ;;  %v12585_v30 = vpop.f32.mrb[32].mxu1 }
 0x5ab   :  { %15918 = vst [vmem:[#allocation10_spill] sm:$0xff] %v12585_v30  ;;  %9833 = vmatpush3.bf16.xpose.msra.mxu0 %v2544_v3  ;;  %9836 = vmatprep.mubr.msk.bf16.mxu0 %vm908_vm1, %v2530_v32  ;;  %v12589_v10 = vpop.f32.mrb[33].mxu1  ;;  %v2547_v32 = vsel %vm908_vm1, %v2536_v17, 0 }
 0x5ac   :  { %15919 = vst [vmem:[#allocation31_spill] sm:$0xff] %v12589_v10  ;;  %10449 = vmatprep.subr.msk.bf16.mxu0 %vm908_vm1, %v2536_v17  ;;  %v12592_v36 = vpop.f32.mrb[34].mxu1 }
 0x5ad   :  { %15920 = vst [vmem:[#allocation37_spill] sm:$0xff] %v12592_v36  ;;  %v2810_v51 = vpop.permute.xlu1 %2809  ;;  %v12596_v29 = vpop.f32.mrb[35].mxu1 }
 0x5ae   :  { %15921 = vst [vmem:[#allocation38_spill] sm:$0xff] %v12596_v29 }
 0x5b1   :  { %v2812_v7 = vpop.permute.xlu1 %2811 }
 0x5b2   :  { %v12600_v46 = vpop.f32.mrb[64].mxu0 }
 0x5b3   :  { %15922 = vst [vmem:[#allocation39_spill] sm:$0xff] %v12600_v46  ;;  %9835 = vmatpush3.bf16.xpose.msra.mxu0 %v2547_v32  ;;  %v12603_v43 = vpop.f32.mrb[65].mxu0 }
 0x5b4   :  { %15923 = vst [vmem:[#allocation40_spill] sm:$0xff] %v12603_v43  ;;  %10452 = vmatprep.subr.msk.bf16.mxu0 %vm908_vm1, %v12555_v62  ;;  %v12607_v12 = vpop.f32.mrb[66].mxu0  ;;  %v15951_v43 = vld [vmem:[#allocation7_spill] sm:$0xff] }
 0x5b5   :  { %15924 = vst [vmem:[#allocation41_spill] sm:$0xff] %v12607_v12  ;;  %v2808_v27 = vpop.permute.xlu1 %2807  ;;  %v12611_v15 = vpop.f32.mrb[67].mxu0 }
 0x5b6   :  { %15925 = vst [vmem:[#allocation42_spill] sm:$0xff] %v12611_v15 }
 0x5b9   :  { %v2605_v18 = vpop.permute.xlu1 %2604 }
 0x5ba   :  { %9837 = vmatmul.mubr.msk.bf16.vlgmr.msra.gmra.mrb[84].mxu0 %vm908_vm1, %v2532_v45  ;;  %v12616_v4 = vpop.f32.mrb[36].mxu1  ;;  %10451 = vmatprep.subr.msk.bf16.mxu1 %vm908_vm1, %v2605_v18  ;;  %v2616_v17 = vsel %vm908_vm1, %v2605_v18, 0  ;;  %v2685_v18 = vsel %vm908_vm1, %v2674_v41, 0 }
 0x5bb   :  { %15926 = vst [vmem:[#allocation43_spill] sm:$0xff] %v12616_v4  ;;  %9849 = vmatpush3.bf16.xpose.msra.mxu0 %v2682_v23  ;;  %9852 = vmatprep.mubr.msk.bf16.mxu0 %vm908_vm1, %v12557_v47  ;;  %v12624_v26 = vpop.f32.mrb[37].mxu1 }
 0x5bc   :  { %15927 = vst [vmem:[#allocation44_spill] sm:$0xff] %v12624_v26  ;;  %9843 = vmatpush3.bf16.xpose.msra.mxu1 %v2616_v17  ;;  %10453 = vmatprep.subr.msk.bf16.mxu0 %vm908_vm1, %v2674_v41  ;;  %v12627_v37 = vpop.f32.mrb[38].mxu1  ;;  %v2739_v41 = vpop.permute.xlu0 %2738 }
 0x5bd   :  { %15928 = vst [vmem:[#allocation45_spill] sm:$0xff] %v12627_v37  ;;  %v2741_v45 = vpop.permute.xlu1 %2740  ;;  %v12631_v3 = vpop.f32.mrb[39].mxu1 }
 0x5be   :  { %15929 = vst [vmem:[#allocation46_spill] sm:$0xff] %v12631_v3  ;;  %10454 = vmatprep.subr.msk.bf16.mxu1 %vm908_vm1, %v2741_v45  ;;  %v2751_v17 = vsel %vm908_vm1, %v2741_v45, 0 }
 0x5c1   :  { %v2601_v32 = vpop.permute.xlu1 %2600 }
 0x5c2   :  { %v12636_v47 = vpop.f32.mrb[68].mxu0 }
 0x5c3   :  { %15930 = vst [vmem:[#allocation47_spill] sm:$0xff] %v12636_v47  ;;  %9845 = vmatmul.mubr.msk.bf16.vlgmr.msra.gmra.mrb[56].mxu1 %vm908_vm1, %v2601_v32  ;;  %9851 = vmatpush3.bf16.xpose.msra.mxu0 %v2685_v18  ;;  %v12640_v23 = vpop.f32.mrb[69].mxu0  ;;  %v2820_v18 = vsel %vm908_vm1, %v2810_v51, 0 }
 0x5c4   :  { %15931 = vst [vmem:[#allocation48_spill] sm:$0xff] %v12640_v23  ;;  %9857 = vmatpush3.bf16.xpose.msra.mxu1 %v2751_v17  ;;  %10456 = vmatprep.subr.msk.bf16.mxu0 %vm908_vm1, %v2810_v51  ;;  %v12644_v60 = vpop.f32.mrb[70].mxu0 }
 0x5c5   :  { %15932 = vst [vmem:[#allocation49_spill] sm:$0xff] %v12644_v60  ;;  %v2743_v49 = vpop.permute.xlu1 %2742  ;;  %v12648_v53 = vpop.f32.mrb[71].mxu0 }
 0x5c6   :  { %15933 = vst [vmem:[#allocation50_spill] sm:$0xff] %v12648_v53  ;;  %10455 = vmatprep.subr.msk.bf16.mxu1 %vm908_vm1, %v2743_v49  ;;  %v2754_v62 = vsel %vm908_vm1, %v2743_v49, 0 }
 0x5c9   :  { %v2737_v32 = vpop.permute.xlu1 %2736 }
 0x5ca   :  { %9853 = vmatmul.mubr.msk.bf16.vlgmr.msra.gmra.mrb[88].mxu0 %vm908_vm1, %v12562_v0  ;;  %v12655_v45 = vpop.f32.mrb[40].mxu1  ;;  %9860 = vmatprep.mubr.msk.bf16.mxu1 %vm908_vm1, %v2737_v32 }
 0x5cb   :  { %15934 = vst [vmem:[#allocation51_spill] sm:$0xff] %v12655_v45  ;;  %9865 = vmatpush3.bf16.xpose.msra.mxu0 %v2820_v18  ;;  %9868 = vmatprep.mubr.msk.bf16.mxu0 %vm908_vm1, %v12568_v25  ;;  %v12661_v17 = vpop.f32.mrb[41].mxu1  ;;  %v2823_v25 = vsel %vm908_vm1, %v2812_v7, 0  ;;  %v3340_v18 = vpop.permute.xlu0 %3339 }
 0x5cc   :  { %15935 = vst [vmem:[#allocation52_spill] sm:$0xff] %v12661_v17  ;;  %9859 = vmatpush3.bf16.xpose.msra.mxu1 %v2754_v62  ;;  %10457 = vmatprep.subr.msk.bf16.mxu0 %vm908_vm1, %v2812_v7  ;;  %v12665_v58 = vpop.f32.mrb[42].mxu1 }
 0x5cd   :  { %15936 = vst [vmem:[#allocation53_spill] sm:$0xff] %v12665_v58  ;;  %v3277_v32 = vpop.permute.xlu1 %3276  ;;  %v12669_v14 = vpop.f32.mrb[43].mxu1 }
 0x5ce   :  { %15937 = vst [vmem:[#allocation54_spill] sm:$0xff] %v12669_v14  ;;  %9872 = vmatprep.subr.bf16.mxu1 %v3277_v32 }
 0x5d1   :  { %v3279_v49 = vpop.permute.xlu1 %3278 }
 0x5d3   :  { %9861 = vmatmul.mubr.msk.bf16.vlgmr.msra.gmra.mrb[60].mxu1 %vm908_vm1, %v2739_v41  ;;  %9867 = vmatpush3.bf16.xpose.msra.mxu0 %v2823_v25 }
 0x5d4   :  { %9873 = vmatpush3.bf16.msra.mxu1 %v3277_v32  ;;  %9880 = vmatprep.subr.bf16.mxu0 %v3340_v18 }
 0x5d5   :  { %9874 = vmatprep.subr.bf16.mxu1 %v3279_v49 }
 0x5d8   :  { %9875 = vmatpush3.bf16.msra.mxu1 %v3279_v49 }
 0x5da   :  { %9869 = vmatmul.mubr.msk.bf16.vlgmr.msra.gmra.mrb[92].mxu0 %vm908_vm1, %v2808_v27 }
 0x5db   :  { %9881 = vmatpush3.bf16.msra.mxu0 %v3340_v18 }
 0x620   :  { %v12676_v62 = vpop.f32.mrb[72].mxu0 }
 0x621   :  { %15938 = vst [vmem:[#allocation55_spill] sm:$0xff] %v12676_v62  ;;  %v12678_v0 = vpop.f32.mrb[73].mxu0 }
 0x622   :  { %15939 = vst [vmem:[#allocation56_spill] sm:$0xff] %v12678_v0  ;;  %v12680_v51 = vpop.f32.mrb[74].mxu0 }
 0x623   :  { %15940 = vst [vmem:[#allocation57_spill] sm:$0xff] %v12680_v51  ;;  %v12684_v45 = vpop.f32.mrb[75].mxu0 }
 0x624   :  { %15941 = vst [vmem:[#allocation58_spill] sm:$0xff] %v12684_v45 }
 0x633   :  { %v12688_v32 = vpop.f32.mrb[44].mxu1 }
 0x634   :  { %15942 = vst [vmem:[#allocation59_spill] sm:$0xff] %v12688_v32  ;;  %v12690_v25 = vpop.f32.mrb[45].mxu1 }
 0x635   :  { %15943 = vst [vmem:[#allocation60_spill] sm:$0xff] %v12690_v25  ;;  %v12692_v27 = vpop.f32.mrb[46].mxu1 }
 0x636   :  { %15944 = vst [vmem:[#allocation61_spill] sm:$0xff] %v12692_v27  ;;  %v12696_v49 = vpop.f32.mrb[47].mxu1 }
 0x637   :  { %15945 = vst [vmem:[#allocation62_spill] sm:$0xff] %v12696_v49 }
 0x662   :  { %v9814_v7 = vpop.f32.mrb[48].mxu1 }
 0x663   :  { %v12702_v62 = vsel %vm12039_vm2, %v9814_v7, -inf  ;;  %v2376_v41 = vpop.f32.mrb[49].mxu1 }
 0x664   :  { %v2912_v51 = vsel %vm1479_vm3, %v12702_v62, -inf  ;;  %v9815_v0 = vpop.f32.mrb[50].mxu1  ;;  %v12708_v45 = vsel %vm12044_vm4, %v2376_v41, -inf }
 0x665   :  { %2913 = vmax.xlane.f32.xlu0 %v2912_v51  ;;  %v2379_v18 = vpop.f32.mrb[51].mxu1  ;;  %v2906_v7 = vsel %vm1479_vm3, %v12708_v45, -inf  ;;  %v12720_v25 = vsel %vm12063_vm6, %v9815_v0, -inf }
 0x666   :  { %v12712_v32 = vsel %vm12053_vm5, %v2379_v18, -inf  ;;  %v2915_v51 = vsel %vm1479_vm3, %v12720_v25, -inf }
 0x667   :  { %v2909_v58 = vsel %vm1479_vm3, %v12712_v32, -inf }
 0x668   :  { %2910 = vmax.xlane.f32.xlu1 %v2909_v58 }
 0x669   :  { %2907 = vmax.xlane.f32.xlu0 %v2906_v7 }
 0x66d   :  { %v12724_v41 = vpop.f32.mrb[76].mxu0  ;;  %2916 = vmax.xlane.f32.xlu0 %v2915_v51 }
 0x66e   :  { %15947 = vst [vmem:[#allocation63_spill] sm:$0xff] %v12724_v41  ;;  %v12726_v18 = vpop.f32.mrb[77].mxu0 }
 0x66f   :  { %15948 = vst [vmem:[#allocation64_spill] sm:$0xff] %v12726_v18  ;;  %v12728_v49 = vpop.f32.mrb[78].mxu0 }
 0x670   :  { %15949 = vst [vmem:[#allocation65_spill] sm:$0xff] %v12728_v49  ;;  %v12732_v14 = vpop.f32.mrb[79].mxu0 }
 0x671   :  { %15950 = vst [vmem:[#allocation66_spill] sm:$0xff] %v12732_v14 }
 0x676   :  { %v9830_v0 = vpop.f32.mrb[52].mxu1 }
 0x677   :  { %v2514_v7 = vpop.f32.mrb[53].mxu1  ;;  %v12744_v17 = vsel %vm12039_vm2, %v9830_v0, -inf }
 0x678   :  { %v9831_v47 = vpop.f32.mrb[54].mxu1  ;;  %v2936_v18 = vsel %vm1479_vm3, %v12744_v17, -inf }
 0x679   :  { %v2517_v60 = vpop.f32.mrb[55].mxu1 }
 0x67a   :  { %v12828_v61 = vsel %vm12053_vm5, %v2517_v60, -inf }
 0x67b   :  { %v2933_v44 = vsel %vm1479_vm3, %v12828_v61, -inf }
 0x67d   :  { %v9822_v23 = vpop.f32.mrb[80].mxu0 }
 0x67e   :  { %v12738_v51 = vsel %vm12039_vm2, %v9822_v23, -inf  ;;  %v2445_v53 = vpop.f32.mrb[81].mxu0  ;;  %v12754_v23 = vsel %vm12063_vm6, %v9831_v47, -inf }
 0x67f   :  { %v2924_v4 = vsel %vm1479_vm3, %v12738_v51, -inf  ;;  %v9823_v37 = vpop.f32.mrb[82].mxu0  ;;  %v12760_v0 = vsel %vm12044_vm4, %v2445_v53, -inf }
 0x680   :  { %v12748_v58 = vsel %vm12063_vm6, %v9823_v37, -inf  ;;  %2925 = vmax.xlane.f32.xlu0 %v2924_v4  ;;  %v2448_v41 = vpop.f32.mrb[83].mxu0  ;;  %v2939_v4 = vsel %vm1479_vm3, %v12754_v23, -inf  ;;  %v2918_v47 = vsel %vm1479_vm3, %v12760_v0, -inf }
 0x681   :  { %v2927_v49 = vsel %vm1479_vm3, %v12748_v58, -inf  ;;  %v12766_v37 = vsel %vm12053_vm5, %v2448_v41, -inf }
 0x682   :  { %2928 = vmax.xlane.f32.xlu1 %v2927_v49  ;;  %v12772_v49 = vsel %vm12044_vm4, %v2514_v7, -inf  ;;  %v2921_v53 = vsel %vm1479_vm3, %v12766_v37, -inf }
 0x684   :  { %2937 = vmax.xlane.f32.xlu0 %v2936_v18  ;;  %v2930_v18 = vsel %vm1479_vm3, %v12772_v49, -inf }
 0x686   :  { %2940 = vmax.xlane.f32.xlu1 %v2939_v4 }
 0x688   :  { %2919 = vmax.xlane.f32.xlu0 %v2918_v47 }
 0x68a   :  { %2922 = vmax.xlane.f32.xlu1 %v2921_v53 }
 0x68c   :  { %2931 = vmax.xlane.f32.xlu0 %v2930_v18 }
 0x68d   :  { %v9838_v14 = vpop.f32.mrb[84].mxu0 }
 0x68e   :  { %v12780_v41 = vsel %vm12039_vm2, %v9838_v14, -inf  ;;  %v2583_v4 = vpop.f32.mrb[85].mxu0 }
 0x68f   :  { %v2948_v26 = vsel %vm1479_vm3, %v12780_v41, -inf  ;;  %v9839_v7 = vpop.f32.mrb[86].mxu0  ;;  %v12786_v47 = vsel %vm12044_vm4, %v2583_v4, -inf }
 0x690   :  { %2949 = vmax.xlane.f32.xlu0 %v2948_v26  ;;  %v2586_v53 = vpop.f32.mrb[87].mxu0  ;;  %v2942_v3 = vsel %vm1479_vm3, %v12786_v47, -inf  ;;  %v12834_v35 = vsel %vm12063_vm6, %v9839_v7, -inf }
 0x691   :  { %v12840_v57 = vsel %vm12053_vm5, %v2586_v53, -inf }
 0x692   :  { %v2945_v60 = vsel %vm1479_vm3, %v12840_v57, -inf }
 0x694   :  { %2943 = vmax.xlane.f32.xlu0 %v2942_v3 }
 0x696   :  { %v12790_v18 = vpop.f32.mrb[56].mxu1 }
 0x697   :  { %v12792_v46 = vpop.f32.mrb[57].mxu1 }
 0x698   :  { %v12794_v14 = vpop.f32.mrb[58].mxu1 }
 0x699   :  { %v12796_v12 = vpop.f32.mrb[59].mxu1 }
 0x69b   :  { %3341 = vrot.lane.b32.xlu1 %v15951_v43, %s11217_s14 }
 0x69d   :  { %v12800_v15 = vpop.f32.mrb[88].mxu0 }
 0x69e   :  { %v12802_v4 = vpop.f32.mrb[89].mxu0 }
 0x69f   :  { %v12804_v26 = vpop.f32.mrb[90].mxu0 }
 0x6a0   :  { %v12806_v30 = vpop.f32.mrb[91].mxu0 }
 0x6a6   :  { %v12808_v3 = vpop.f32.mrb[60].mxu1 }
 0x6a7   :  { %v12810_v36 = vpop.f32.mrb[61].mxu1 }
 0x6a8   :  { %v12812_v10 = vpop.f32.mrb[62].mxu1 }
 0x6a9   :  { %v12814_v29 = vpop.f32.mrb[63].mxu1 }
 0x6aa   :  { %3465 = vrot.lane.b32.xlu0 %v11909_v13, %s11217_s14  ;;  %v2951_v13 = vsel %vm1479_vm3, %v12834_v35, -inf }
 0x6ad   :  { %v12818_v43 = vpop.f32.mrb[92].mxu0 }
 0x6ae   :  { %v12820_v33 = vpop.f32.mrb[93].mxu0 }
 0x6af   :  { %v12822_v39 = vpop.f32.mrb[94].mxu0 }
 0x6b0   :  { %v12824_v2 = vpop.f32.mrb[95].mxu0 }
 0x6bf   :  { %2934 = vmax.xlane.f32.xlu1 %v2933_v44 }
 0x6c3   :  { %2952 = vmax.xlane.f32.xlu1 %v2951_v13 }
 0x6c7   :  { %2946 = vmax.xlane.f32.xlu1 %v2945_v60 }
 0x6d8   :  { %3402 = vrot.lane.b32.xlu1 %v11897_v5, %s11217_s14 }
 0x6dc   :  { %3404 = vrot.lane.b32.xlu1 %v11903_v1, %s11217_s14 }
 0x6f2   :  { %v2914_v7 = vpop.xlane.xlu0 %2913 }
 0x6f3   :  { %v3004_v44 = vsub.f32 %v12702_v62, %v2914_v7 }
 0x6f5   :  { %v3038_v56 = vmul.f32 1.442695, %v3004_v44  ;;  %v2911_v16 = vpop.xlane.xlu1 %2910 }
 0x6f6   :  { %v3003_v6 = vsub.f32 %v12712_v32, %v2911_v16  ;;  %v2908_v53 = vpop.xlane.xlu0 %2907 }
 0x6f7   :  { %10734 = vpow2.f32 %v3038_v56  ;;  %v3002_v13 = vsub.f32 %v12708_v45, %v2908_v53 }
 0x6f8   :  { %v3036_v9 = vmul.f32 1.442695, %v3003_v6 }
 0x6f9   :  { %v3034_v48 = vmul.f32 1.442695, %v3002_v13 }
 0x6fa   :  { %10736 = vpow2.f32 %v3036_v9  ;;  %v2917_v60 = vpop.xlane.xlu0 %2916 }
 0x6fb   :  { %10738 = vpow2.f32 %v3034_v48  ;;  %v3005_v5 = vsub.f32 %v12720_v25, %v2917_v60 }
 0x6fd   :  { %v3040_v19 = vmul.f32 1.442695, %v3005_v5 }
 0x6ff   :  { %10740 = vpow2.f32 %v3040_v19 }
 0x701   :  { %v12852_v1 = vpop.eup %10734 }
 0x702   :  { %v3104_v62 = vsel %vm1479_vm3, %v12852_v1, 0.0 }
 0x703   :  { %3105 = vadd.xlane.f32.xlu0 %v3104_v62 }
 0x704   :  { %v12856_v16 = vpop.eup %10736 }
 0x705   :  { %v12858_v56 = vpop.eup %10738  ;;  %v3101_v6 = vsel %vm1479_vm3, %v12856_v16, 0.0 }
 0x706   :  { %v3098_v48 = vsel %vm1479_vm3, %v12858_v56, 0.0 }
 0x707   :  { %3102 = vadd.xlane.f32.xlu0 %v3101_v6  ;;  %3099 = vadd.xlane.f32.xlu1 %v3098_v48 }
 0x709   :  { %v12864_v5 = vpop.eup %10740 }
 0x70a   :  { %v3107_v19 = vsel %vm1479_vm3, %v12864_v5, 0.0 }
 0x70b   :  { %3108 = vadd.xlane.f32.xlu1 %v3107_v19 }
 0x70d   :  { %v2926_v9 = vpop.xlane.xlu0 %2925 }
 0x70e   :  { %v3008_v45 = vsub.f32 %v12738_v51, %v2926_v9 }
 0x70f   :  { %v2929_v32 = vpop.xlane.xlu1 %2928 }
 0x710   :  { %v3046_v25 = vmul.f32 1.442695, %v3008_v45  ;;  %v3009_v48 = vsub.f32 %v12748_v58, %v2929_v32 }
 0x711   :  { %v2938_v7 = vpop.xlane.xlu0 %2937 }
 0x712   :  { %10742 = vpow2.f32 %v3046_v25  ;;  %v3012_v44 = vsub.f32 %v12744_v17, %v2938_v7  ;;  %v3048_v25 = vmul.f32 1.442695, %v3009_v48 }
 0x713   :  { %v2941_v53 = vpop.xlane.xlu1 %2940 }
 0x714   :  { %v3054_v13 = vmul.f32 1.442695, %v3012_v44  ;;  %v3013_v17 = vsub.f32 %v12754_v23, %v2941_v53 }
 0x715   :  { %v2920_v60 = vpop.xlane.xlu0 %2919 }
 0x716   :  { %10744 = vpow2.f32 %v3054_v13  ;;  %v3006_v62 = vsub.f32 %v12760_v0, %v2920_v60 }
 0x717   :  { %v2923_v6 = vpop.xlane.xlu1 %2922 }
 0x718   :  { %v3042_v8 = vmul.f32 1.442695, %v3006_v62  ;;  %v3007_v32 = vsub.f32 %v12766_v37, %v2923_v6 }
 0x719   :  { %v2932_v19 = vpop.xlane.xlu0 %2931 }
 0x71a   :  { %10746 = vpow2.f32 %v3042_v8  ;;  %v3010_v51 = vsub.f32 %v12772_v49, %v2932_v19  ;;  %v3056_v49 = vmul.f32 1.442695, %v3013_v17 }
 0x71b   :  { %v3342_v9 = vpop.permute.xlu1 %3341 }
 0x71c   :  { %v12873_v45 = vpop.eup %10742  ;;  %v3050_v7 = vmul.f32 1.442695, %v3010_v51  ;;  %9882 = vmatprep.subr.bf16.mxu0 %v3342_v9 }
 0x71d   :  { %9883 = vmatpush3.bf16.msra.mxu0 %v3342_v9  ;;  %v2950_v44 = vpop.xlane.xlu0 %2949  ;;  %v3116_v0 = vsel %vm1479_vm3, %v12873_v45, 0.0 }
 0x71e   :  { %10748 = vpow2.f32 %v3050_v7  ;;  %v3016_v58 = vsub.f32 %v12780_v41, %v2950_v44  ;;  %3117 = vadd.xlane.f32.xlu0 %v3116_v0  ;;  %v3044_v41 = vmul.f32 1.442695, %v3007_v32 }
 0x71f   :  { %10750 = vpow2.f32 %v3048_v25 }
 0x720   :  { %v12879_v8 = vpop.eup %10744  ;;  %v3062_v13 = vmul.f32 1.442695, %v3016_v58 }
 0x721   :  { %v2944_v60 = vpop.xlane.xlu0 %2943  ;;  %v3128_v23 = vsel %vm1479_vm3, %v12879_v8, 0.0 }
 0x722   :  { %10752 = vpow2.f32 %v3062_v13  ;;  %v3014_v53 = vsub.f32 %v12786_v47, %v2944_v60  ;;  %3129 = vadd.xlane.f32.xlu0 %v3128_v23 }
 0x723   :  { %10754 = vpow2.f32 %v3056_v49 }
 0x724   :  { %v12885_v62 = vpop.eup %10746  ;;  %v3058_v48 = vmul.f32 1.442695, %v3014_v53 }
 0x725   :  { %v12887_v19 = vpop.permute.xlu0 %3465  ;;  %v3110_v51 = vsel %vm1479_vm3, %v12885_v62, 0.0 }
 0x726   :  { %10756 = vpow2.f32 %v3058_v48  ;;  %3111 = vadd.xlane.f32.xlu1 %v3110_v51  ;;  %9896 = vmatprep.subr.bf16.mxu0 %v12887_v19 }
 0x727   :  { %10758 = vpow2.f32 %v3044_v41 }
 0x728   :  { %v12892_v37 = vpop.eup %10748 }
 0x729   :  { %v3122_v47 = vsel %vm1479_vm3, %v12892_v37, 0.0  ;;  %v12896_v6 = vpop.eup %10750 }
 0x72a   :  { %3123 = vadd.xlane.f32.xlu0 %v3122_v47  ;;  %v3119_v25 = vsel %vm1479_vm3, %v12896_v6, 0.0 }
 0x72c   :  { %v12898_v9 = vpop.eup %10752 }
 0x72d   :  { %v3140_v17 = vsel %vm1479_vm3, %v12898_v9, 0.0  ;;  %v12904_v7 = vpop.eup %10754 }
 0x72e   :  { %3120 = vadd.xlane.f32.xlu0 %v3119_v25  ;;  %3141 = vadd.xlane.f32.xlu1 %v3140_v17  ;;  %v3131_v0 = vsel %vm1479_vm3, %v12904_v7, 0.0 }
 0x730   :  { %v12906_v44 = vpop.eup %10756 }
 0x731   :  { %v3134_v58 = vsel %vm1479_vm3, %v12906_v44, 0.0  ;;  %v12912_v49 = vpop.eup %10758 }
 0x732   :  { %3132 = vadd.xlane.f32.xlu0 %v3131_v0  ;;  %3135 = vadd.xlane.f32.xlu1 %v3134_v58  ;;  %v3113_v32 = vsel %vm1479_vm3, %v12912_v49, 0.0  ;;  %v12929_v58 = vsel %vm12044_vm4, %v12802_v4, -inf }
 0x736   :  { %3114 = vadd.xlane.f32.xlu0 %v3113_v32 }
 0x74c   :  { %v2935_v13 = vpop.xlane.xlu1 %2934 }
 0x74d   :  { %v3011_v60 = vsub.f32 %v12828_v61, %v2935_v13  ;;  %v12940_v13 = vsel %vm12039_vm2, %v12800_v15, -inf }
 0x74e   :  { %v2972_v4 = vsel %vm1479_vm3, %v12940_v13, -inf }
 0x74f   :  { %v3052_v23 = vmul.f32 1.442695, %v3011_v60  ;;  %v12947_v60 = vsel %vm12063_vm6, %v12804_v26, -inf }
 0x750   :  { %v2953_v53 = vpop.xlane.xlu1 %2952 }
 0x751   :  { %10760 = vpow2.f32 %v3052_v23  ;;  %v3017_v41 = vsub.f32 %v12834_v35, %v2953_v53  ;;  %v2975_v23 = vsel %vm1479_vm3, %v12947_v60, -inf }
 0x753   :  { %v3064_v48 = vmul.f32 1.442695, %v3017_v41  ;;  %v12958_v41 = vsel %vm12044_vm4, %v12820_v33, -inf }
 0x754   :  { %v2947_v51 = vpop.xlane.xlu1 %2946  ;;  %v2990_v26 = vsel %vm1479_vm3, %v12958_v41, -inf }
 0x755   :  { %10762 = vpow2.f32 %v3064_v48  ;;  %v3015_v47 = vsub.f32 %v12840_v57, %v2947_v51  ;;  %v2966_v57 = vsel %vm1479_vm3, %v12929_v58, -inf  ;;  %v12965_v48 = vsel %vm12039_vm2, %v12818_v43, -inf }
 0x756   :  { %v2996_v51 = vsel %vm1479_vm3, %v12965_v48, -inf  ;;  %v12978_v43 = vsel %vm12053_vm5, %v12806_v30, -inf }
 0x757   :  { %v3060_v0 = vmul.f32 1.442695, %v3015_v47 }
 0x758   :  { %v12919_v25 = vpop.permute.xlu1 %3402 }
 0x759   :  { %9888 = vmatprep.subr.bf16.mxu1 %v12919_v25  ;;  %10764 = vpow2.f32 %v3060_v0 }
 0x75b   :  { %v12922_v17 = vpop.eup %10760 }
 0x75c   :  { %v3125_v61 = vsel %vm1479_vm3, %v12922_v17, 0.0  ;;  %v3405_v33 = vpop.permute.xlu1 %3404 }
 0x75d   :  { %3126 = vadd.xlane.f32.xlu0 %v3125_v61 }
 0x75f   :  { %v12931_v35 = vpop.eup %10762 }
 0x760   :  { %v3143_v32 = vsel %vm1479_vm3, %v12931_v35, 0.0 }
 0x761   :  { %2967 = vmax.xlane.f32.xlu0 %v2966_v57  ;;  %3144 = vadd.xlane.f32.xlu1 %v3143_v32  ;;  %v2969_v57 = vsel %vm1479_vm3, %v12978_v43, -inf  ;;  %v12987_v32 = vsel %vm12053_vm5, %v12824_v2, -inf }
 0x763   :  { %v12951_v53 = vpop.eup %10764 }
 0x764   :  { %v3137_v15 = vsel %vm1479_vm3, %v12951_v53, 0.0 }
 0x765   :  { %2973 = vmax.xlane.f32.xlu0 %v2972_v4  ;;  %v2993_v4 = vsel %vm1479_vm3, %v12987_v32, -inf }
 0x769   :  { %2976 = vmax.xlane.f32.xlu0 %v2975_v23  ;;  %v12996_v23 = vsel %vm12063_vm6, %v12822_v39, -inf }
 0x76a   :  { %v2999_v2 = vsel %vm1479_vm3, %v12996_v23, -inf }
 0x76d   :  { %3138 = vadd.xlane.f32.xlu0 %v3137_v15 }
 0x771   :  { %2991 = vmax.xlane.f32.xlu0 %v2990_v26 }
 0x772   :  { %3467 = vrot.lane.b32.xlu1 %v11916_v42, %s11217_s14 }
 0x775   :  { %2997 = vmax.xlane.f32.xlu0 %v2996_v51 }
 0x78b   :  { %3591 = vrot.lane.b32.xlu0 %v11952_v38, %s11217_s14 }
 0x78f   :  { %4230 = vrot.lane.b32.xlu0 %v11865_v55, %s11218_s15 }
 0x790   :  { %v3106_v47 = vpop.xlane.xlu0 %3105 }
 0x793   :  { %4226 = vrot.lane.b32.xlu0 %v11865_v55, %s11219_s16 }
 0x794   :  { %v3100_v0 = vpop.xlane.xlu1 %3099  ;;  %v3103_v61 = vpop.xlane.xlu0 %3102 }
 0x795   :  { %10766 = vrcp.f32 %v3100_v0 }
 0x796   :  { %10768 = vrcp.f32 %v3103_v61  ;;  %2970 = vmax.xlane.f32.xlu1 %v2969_v57 }
 0x797   :  { %10770 = vrcp.f32 %v3106_v47  ;;  %4228 = vrot.lane.b32.xlu0 %v11873_v24, %s11219_s16 }
 0x798   :  { %v3109_v30 = vpop.xlane.xlu1 %3108 }
 0x799   :  { %10772 = vrcp.f32 %v3109_v30 }
 0x79a   :  { %2994 = vmax.xlane.f32.xlu1 %v2993_v4 }
 0x79b   :  { %4295 = vrot.lane.b32.xlu0 %v11879_v50, %s11219_s16 }
 0x79e   :  { %3000 = vmax.xlane.f32.xlu1 %v2999_v2 }
 0x79f   :  { %v10767_v15 = vpop.eup %10766 }
 0x7a0   :  { %v10769_v26 = vpop.eup %10768  ;;  %v3226_v51 = vmul.f32 %v10767_v15, %v12858_v56 }
 0x7a1   :  { %v10771_v47 = vpop.eup %10770  ;;  %v3227_v0 = vmul.f32 %v10769_v26, %v12856_v16 }
 0x7a2   :  { %v3228_v39 = vmul.f32 %v10771_v47, %v12852_v1  ;;  %v13016_v1 = vsel %vm12044_vm4, %v12792_v46, -inf }
 0x7a3   :  { %v10773_v61 = vpop.eup %10772  ;;  %v3258_v57 = vpack.c.bf16 %v3227_v0, %v3226_v51 }
 0x7a4   :  { %v3229_v30 = vmul.f32 %v10773_v61, %v12864_v5  ;;  %v2954_v5 = vsel %vm1479_vm3, %v13016_v1, -inf }
 0x7a5   :  { %9876 = vmatprep.mubr.msk.bf16.mxu1 %vm1479_vm3, %v3258_v57 }
 0x7a6   :  { %v3259_v4 = vpack.c.bf16 %v3229_v30, %v3228_v39 }
 0x7a8   :  { %9877 = vmatmul.mubr.msk.bf16.vlgmr.msra.gmra.mrb[64].mxu1 %vm1479_vm3, %v3259_v4 }
 0x7a9   :  { %9889 = vmatpush3.bf16.msra.mxu1 %v12919_v25 }
 0x7aa   :  { %9890 = vmatprep.subr.bf16.mxu1 %v3405_v33 }
 0x7ab   :  { %v3118_v2 = vpop.xlane.xlu0 %3117 }
 0x7ad   :  { %9891 = vmatpush3.bf16.msra.mxu1 %v3405_v33 }
 0x7af   :  { %3593 = vrot.lane.b32.xlu1 %v11960_v31, %s11217_s14  ;;  %v3130_v16 = vpop.xlane.xlu0 %3129 }
 0x7b3   :  { %3717 = vrot.lane.b32.xlu1 %v15901_v20, %s11217_s14  ;;  %v3112_v33 = vpop.xlane.xlu1 %3111 }
 0x7b7   :  { %3719 = vrot.lane.b32.xlu1 %v15916_v22, %s11217_s14  ;;  %v3124_v56 = vpop.xlane.xlu0 %3123 }
 0x7ba   :  { %2955 = vmax.xlane.f32.xlu0 %v2954_v5 }
 0x7bb   :  { %4232 = vrot.lane.b32.xlu1 %v11873_v24, %s11218_s15  ;;  %v3121_v25 = vpop.xlane.xlu0 %3120  ;;  %v3142_v5 = vpop.xlane.xlu1 %3141 }
 0x7bc   :  { %10774 = vrcp.f32 %v3121_v25  ;;  %v13049_v25 = vsel %vm12039_vm2, %v12790_v18, -inf }
 0x7bd   :  { %10776 = vrcp.f32 %v3112_v33 }
 0x7be   :  { %10778 = vrcp.f32 %v3118_v2 }
 0x7bf   :  { %4299 = vrot.lane.b32.xlu1 %v11879_v50, %s11218_s15  ;;  %v3133_v15 = vpop.xlane.xlu0 %3132 }
 0x7c3   :  { %4301 = vrot.lane.b32.xlu1 %v11887_v28, %s11218_s15  ;;  %v3115_v46 = vpop.xlane.xlu0 %3114 }
 0x7c4   :  { %10780 = vrcp.f32 %v3115_v46 }
 0x7c5   :  { %10782 = vrcp.f32 %v3133_v15 }
 0x7c6   :  { %v10775_v26 = vpop.eup %10774  ;;  %10784 = vrcp.f32 %v3124_v56  ;;  %v13056_v56 = vsel %vm12063_vm6, %v12794_v14, -inf }
 0x7c7   :  { %4368 = vrot.lane.b32.xlu1 %v11895_v63, %s11218_s15  ;;  %v10777_v51 = vpop.eup %10776  ;;  %v3233_v61 = vmul.f32 %v10775_v26, %v12896_v6  ;;  %10786 = vrcp.f32 %v3130_v16  ;;  %v3136_v6 = vpop.xlane.xlu1 %3135  ;;  %v2963_v18 = vsel %vm1479_vm3, %v13056_v56, -inf }
 0x7c8   :  { %v10779_v47 = vpop.eup %10778  ;;  %v3230_v57 = vmul.f32 %v10777_v51, %v12885_v62  ;;  %v13042_v62 = vsel %vm12053_vm5, %v12796_v12, -inf }
 0x7c9   :  { %v3232_v30 = vmul.f32 %v10779_v47, %v12873_v45  ;;  %v2957_v45 = vsel %vm1479_vm3, %v13042_v62, -inf }
 0x7cb   :  { %v3261_v2 = vpack.c.bf16 %v3233_v61, %v3232_v30 }
 0x7ce   :  { %v10781_v0 = vpop.eup %10780 }
 0x7cf   :  { %v3231_v39 = vmul.f32 %v10781_v0, %v12912_v49  ;;  %v10783_v15 = vpop.eup %10782 }
 0x7d0   :  { %4297 = vrot.lane.b32.xlu0 %v11887_v28, %s11219_s16  ;;  %v10785_v51 = vpop.eup %10784  ;;  %v3237_v14 = vmul.f32 %v10783_v15, %v12904_v7 }
 0x7d1   :  { %v3260_v4 = vpack.c.bf16 %v3231_v39, %v3230_v57  ;;  %v10787_v0 = vpop.eup %10786  ;;  %v3234_v30 = vmul.f32 %v10785_v51, %v12892_v37 }
 0x7d3   :  { %9884 = vmatprep.mubr.msk.bf16.mxu0 %vm1479_vm3, %v3260_v4 }
 0x7d4   :  { %9885 = vmatmul.mubr.msk.bf16.vlgmr.msra.gmra.mrb[96].mxu0 %vm1479_vm3, %v3261_v2  ;;  %v3236_v2 = vmul.f32 %v10787_v0, %v12879_v8 }
 0x7d5   :  { %9897 = vmatpush3.bf16.msra.mxu0 %v12887_v19  ;;  %v2960_v19 = vsel %vm1479_vm3, %v13049_v25, -inf }
 0x7ea   :  { %v3127_v49 = vpop.xlane.xlu0 %3126 }
 0x7eb   :  { %10788 = vrcp.f32 %v3127_v49  ;;  %2958 = vmax.xlane.f32.xlu1 %v2957_v45 }
 0x7ec   :  { %10790 = vrcp.f32 %v3142_v5 }
 0x7ee   :  { %v3145_v12 = vpop.xlane.xlu1 %3144  ;;  %v2968_v33 = vpop.xlane.xlu0 %2967 }
 0x7ef   :  { %2961 = vmax.xlane.f32.xlu1 %v2960_v19  ;;  %v3022_v16 = vsub.f32 %v12929_v58, %v2968_v33  ;;  %v3263_v19 = vpack.c.bf16 %v3237_v14, %v3236_v2 }
 0x7f1   :  { %v3074_v57 = vmul.f32 1.442695, %v3022_v16 }
 0x7f2   :  { %v3468_v46 = vpop.permute.xlu1 %3467  ;;  %v2974_v26 = vpop.xlane.xlu0 %2973 }
 0x7f3   :  { %v3024_v47 = vsub.f32 %v12940_v13, %v2974_v26  ;;  %2964 = vmax.xlane.f32.xlu1 %v2963_v18  ;;  %9898 = vmatprep.subr.bf16.mxu0 %v3468_v46 }
 0x7f4   :  { %9899 = vmatpush3.bf16.msra.mxu0 %v3468_v46 }
 0x7f5   :  { %v10789_v61 = vpop.eup %10788  ;;  %v3078_v39 = vmul.f32 1.442695, %v3024_v47 }
 0x7f6   :  { %v2977_v58 = vpop.xlane.xlu0 %2976  ;;  %v3235_v4 = vmul.f32 %v10789_v61, %v12922_v17  ;;  %v10791_v17 = vpop.eup %10790 }
 0x7f7   :  { %10792 = vpow2.f32 %v3078_v39  ;;  %v3025_v13 = vsub.f32 %v12947_v60, %v2977_v58 }
 0x7f8   :  { %10794 = vrcp.f32 %v3145_v12  ;;  %v3262_v45 = vpack.c.bf16 %v3235_v4, %v3234_v30 }
 0x7f9   :  { %10796 = vpow2.f32 %v3074_v57  ;;  %v3080_v49 = vmul.f32 1.442695, %v3025_v13  ;;  %v3240_v57 = vmul.f32 %v10791_v17, %v12898_v9 }
 0x7fa   :  { %10798 = vrcp.f32 %v3136_v6  ;;  %9892 = vmatprep.mubr.msk.bf16.mxu1 %vm1479_vm3, %v3262_v45  ;;  %v3139_v7 = vpop.xlane.xlu0 %3138 }
 0x7fb   :  { %10800 = vpow2.f32 %v3080_v49  ;;  %9893 = vmatmul.mubr.msk.bf16.vlgmr.msra.gmra.mrb[68].mxu1 %vm1479_vm3, %v3263_v19 }
 0x7fc   :  { %10802 = vrcp.f32 %v3139_v7 }
 0x7fe   :  { %v2992_v37 = vpop.xlane.xlu0 %2991 }
 0x7ff   :  { %v3030_v8 = vsub.f32 %v12958_v41, %v2992_v37 }
 0x801   :  { %v13069_v5 = vpop.eup %10792  ;;  %v3090_v46 = vmul.f32 1.442695, %v3030_v8 }
 0x802   :  { %v10795_v60 = vpop.eup %10794  ;;  %v2998_v12 = vpop.xlane.xlu0 %2997  ;;  %v3164_v33 = vsel %vm1479_vm3, %v13069_v5, 0.0 }
 0x803   :  { %v13074_v16 = vpop.eup %10796  ;;  %v3032_v6 = vsub.f32 %v12965_v48, %v2998_v12  ;;  %3165 = vadd.xlane.f32.xlu0 %v3164_v33  ;;  %v3241_v47 = vmul.f32 %v10795_v60, %v12931_v35 }
 0x804   :  { %v10799_v15 = vpop.eup %10798  ;;  %v3158_v41 = vsel %vm1479_vm3, %v13074_v16, 0.0 }
 0x805   :  { %v13077_v18 = vpop.eup %10800  ;;  %v3094_v26 = vmul.f32 1.442695, %v3032_v6  ;;  %v3238_v48 = vmul.f32 %v10799_v15, %v12906_v44  ;;  %v3265_v35 = vpack.c.bf16 %v3241_v47, %v3240_v57  ;;  %v13122_v6 = vsel %vm12044_vm4, %v12810_v36, -inf }
 0x806   :  { %v10803_v51 = vpop.eup %10802  ;;  %v3592_v0 = vpop.permute.xlu0 %3591  ;;  %v3167_v61 = vsel %vm1479_vm3, %v13077_v18, 0.0  ;;  %v2978_v15 = vsel %vm1479_vm3, %v13122_v6, -inf  ;;  %v13139_v36 = vsel %vm12053_vm5, %v12814_v29, -inf }
 0x807   :  { %10804 = vpow2.f32 %v3094_v26  ;;  %3159 = vadd.xlane.f32.xlu0 %v3158_v41  ;;  %3168 = vadd.xlane.f32.xlu1 %v3167_v61  ;;  %v3239_v14 = vmul.f32 %v10803_v51, %v12951_v53  ;;  %v2981_v26 = vsel %vm1479_vm3, %v13139_v36, -inf  ;;  %v13148_v51 = vsel %vm12039_vm2, %v12808_v3, -inf  ;;  %v15952_v3 = vld [vmem:[#allocation18_spill] sm:$0xff] }
 0x808   :  { %9912 = vmatprep.subr.bf16.mxu0 %v3592_v0  ;;  %10806 = vpow2.f32 %v3090_v46  ;;  %v2984_v29 = vsel %vm1479_vm3, %v13148_v51, -inf }
 0x809   :  { %v3264_v39 = vpack.c.bf16 %v3239_v14, %v3238_v48 }
 0x80a   :  { %v13161_v41 = vpop.permute.xlu0 %4230 }
 0x80b   :  { %9900 = vmatprep.mubr.msk.bf16.mxu0 %vm1479_vm3, %v3264_v39 }
 0x80c   :  { %9901 = vmatmul.mubr.msk.bf16.vlgmr.msra.gmra.mrb[100].mxu0 %vm1479_vm3, %v3265_v35  ;;  %v15953_v35 = vld [vmem:[#allocation20_spill] sm:$0xff] }
 0x80d   :  { %9913 = vmatpush3.bf16.msra.mxu0 %v3592_v0  ;;  %v13159_v0 = vsel %vm12063_vm6, %v12812_v10, -inf }
 0x80e   :  { %v2987_v48 = vsel %vm1479_vm3, %v13159_v0, -inf }
 0x811   :  { %v13089_v58 = vpop.eup %10804 }
 0x812   :  { %v3188_v30 = vsel %vm1479_vm3, %v13089_v58, 0.0  ;;  %v13093_v4 = vpop.eup %10806 }
 0x813   :  { %3189 = vadd.xlane.f32.xlu0 %v3188_v30  ;;  %v3182_v9 = vsel %vm1479_vm3, %v13093_v4, 0.0 }
 0x817   :  { %3183 = vadd.xlane.f32.xlu0 %v3182_v9 }
 0x823   :  { %v2971_v44 = vpop.xlane.xlu1 %2970 }
 0x824   :  { %v3023_v53 = vsub.f32 %v12978_v43, %v2971_v44  ;;  %v13183_v44 = vpop.permute.xlu0 %4226 }
 0x826   :  { %v3076_v2 = vmul.f32 1.442695, %v3023_v53 }
 0x827   :  { %v2995_v13 = vpop.xlane.xlu1 %2994 }
 0x828   :  { %10808 = vpow2.f32 %v3076_v2  ;;  %v3031_v45 = vsub.f32 %v12987_v32, %v2995_v13  ;;  %v15954_v2 = vld [vmem:[#allocation22_spill] sm:$0xff]  ;;  %v13189_v13 = vpop.permute.xlu0 %4228 }
 0x82a   :  { %v3092_v7 = vmul.f32 1.442695, %v3031_v45  ;;  %v15955_v45 = vld [vmem:[#allocation24_spill] sm:$0xff] }
 0x82b   :  { %v3001_v49 = vpop.xlane.xlu1 %3000 }
 0x82c   :  { %v3033_v19 = vsub.f32 %v12996_v23, %v3001_v49 }
 0x82d   :  { %4364 = vrot.lane.b32.xlu0 %v11895_v63, %s11219_s16 }
 0x82e   :  { %v3096_v37 = vmul.f32 1.442695, %v3033_v19  ;;  %v15956_v19 = vld [vmem:[#allocation26_spill] sm:$0xff] }
 0x82f   :  { %v3594_v17 = vpop.permute.xlu1 %3593 }
 0x830   :  { %10810 = vpow2.f32 %v3096_v37  ;;  %9914 = vmatprep.subr.bf16.mxu0 %v3594_v17 }
 0x831   :  { %4437 = vrot.lane.b32.xlu0 %v15902_v52, %s11218_s15  ;;  %9915 = vmatpush3.bf16.msra.mxu0 %v3594_v17  ;;  %10812 = vpow2.f32 %v3092_v7  ;;  %v13197_v7 = vpop.permute.xlu0 %4295 }
 0x832   :  { %v13104_v43 = vpop.eup %10808 }
 0x833   :  { %v13106_v8 = vpop.permute.xlu1 %3717  ;;  %v3161_v32 = vsel %vm1479_vm3, %v13104_v43, 0.0 }
 0x834   :  { %3162 = vadd.xlane.f32.xlu1 %v3161_v32  ;;  %9928 = vmatprep.subr.bf16.mxu0 %v13106_v8 }
 0x837   :  { %v13134_v46 = vpop.permute.xlu1 %3719 }
 0x83a   :  { %v13111_v23 = vpop.eup %10810 }
 0x83b   :  { %v3191_v60 = vsel %vm1479_vm3, %v13111_v23, 0.0  ;;  %v13115_v12 = vpop.eup %10812  ;;  %v13150_v47 = vpop.permute.xlu1 %4232 }
 0x83c   :  { %3192 = vadd.xlane.f32.xlu1 %v3191_v60  ;;  %v3185_v33 = vsel %vm1479_vm3, %v13115_v12, 0.0 }
 0x83f   :  { %v13169_v14 = vpop.permute.xlu1 %4299 }
 0x840   :  { %3186 = vadd.xlane.f32.xlu1 %v3185_v33 }
 0x843   :  { %v13185_v53 = vpop.permute.xlu1 %4301 }
 0x847   :  { %v13193_v49 = vpop.permute.xlu1 %4368  ;;  %v2956_v17 = vpop.xlane.xlu0 %2955 }
 0x848   :  { %v3018_v60 = vsub.f32 %v13016_v1, %v2956_v17 }
 0x84a   :  { %v3066_v33 = vmul.f32 1.442695, %v3018_v60 }
 0x84c   :  { %10814 = vpow2.f32 %v3066_v33 }
 0x850   :  { %2979 = vmax.xlane.f32.xlu0 %v2978_v15 }
 0x851   :  { %4370 = vrot.lane.b32.xlu1 %v15904_v40, %s11218_s15 }
 0x856   :  { %v13214_v1 = vpop.eup %10814 }
 0x866   :  { %4366 = vrot.lane.b32.xlu0 %v15904_v40, %s11219_s16 }
 0x86a   :  { %4433 = vrot.lane.b32.xlu0 %v15902_v52, %s11219_s16 }
 0x86e   :  { %4506 = vrot.lane.b32.xlu0 %v15908_v59, %s11218_s15 }
 0x872   :  { %4435 = vrot.lane.b32.xlu0 %v15911_v11, %s11219_s16 }
 0x875   :  { %2982 = vmax.xlane.f32.xlu1 %v2981_v26 }
 0x876   :  { %4502 = vrot.lane.b32.xlu0 %v15908_v59, %s11219_s16 }
 0x878   :  { %v2959_v37 = vpop.xlane.xlu1 %2958 }
 0x879   :  { %2985 = vmax.xlane.f32.xlu1 %v2984_v29 }
 0x87a   :  { %4504 = vrot.lane.b32.xlu0 %v15952_v3, %s11219_s16 }
 0x87b   :  { %v13165_v61 = vpop.f32.mrb[64].mxu1 }
 0x87c   :  { %v13171_v57 = vpop.f32.mrb[65].mxu1  ;;  %v2962_v32 = vpop.xlane.xlu1 %2961 }
 0x87d   :  { %2988 = vmax.xlane.f32.xlu1 %v2987_v48  ;;  %v13173_v39 = vpop.f32.mrb[66].mxu1  ;;  %v3020_v15 = vsub.f32 %v13049_v25, %v2962_v32  ;;  %v15957_v25 = vld [vmem:[#allocation28_spill] sm:$0xff] }
 0x87e   :  { %4571 = vrot.lane.b32.xlu0 %v15953_v35, %s11219_s16  ;;  %v13179_v30 = vpop.f32.mrb[67].mxu1 }
 0x87f   :  { %v3070_v29 = vmul.f32 1.442695, %v3020_v15 }
 0x880   :  { %v2965_v26 = vpop.xlane.xlu1 %2964 }
 0x881   :  { %v3021_v48 = vsub.f32 %v13056_v56, %v2965_v26  ;;  %10816 = vpow2.f32 %v3070_v29  ;;  %v3146_v56 = vsel %vm1479_vm3, %v13214_v1, 0.0  ;;  %v15958_v26 = vld [vmem:[#allocation30_spill] sm:$0xff] }
 0x882   :  { %4573 = vrot.lane.b32.xlu0 %v15954_v2, %s11219_s16 }
 0x883   :  { %v3072_v10 = vmul.f32 1.442695, %v3021_v48 }
 0x885   :  { %10818 = vpow2.f32 %v3072_v10  ;;  %v3019_v10 = vsub.f32 %v13042_v62, %v2959_v37 }
 0x886   :  { %4640 = vrot.lane.b32.xlu0 %v15955_v45, %s11219_s16 }
 0x887   :  { %v3068_v59 = vmul.f32 1.442695, %v3019_v10 }
 0x889   :  { %10820 = vpow2.f32 %v3068_v59 }
 0x88a   :  { %4642 = vrot.lane.b32.xlu0 %v15956_v19, %s11219_s16 }
 0x88b   :  { %v13224_v60 = vpop.eup %10816 }
 0x88c   :  { %v3152_v48 = vsel %vm1479_vm3, %v13224_v60, 0.0 }
 0x88e   :  { %4439 = vrot.lane.b32.xlu1 %v15911_v11, %s11218_s15 }
 0x88f   :  { %v13238_v9 = vpop.eup %10818 }
 0x892   :  { %4508 = vrot.lane.b32.xlu1 %v15952_v3, %s11218_s15 }
 0x894   :  { %v3169_v52 = vpop.xlane.xlu1 %3168 }
 0x895   :  { %10822 = vrcp.f32 %v3169_v52 }
 0x896   :  { %4575 = vrot.lane.b32.xlu1 %v15953_v35, %s11218_s15 }
 0x89a   :  { %4577 = vrot.lane.b32.xlu1 %v15954_v2, %s11218_s15 }
 0x89e   :  { %4644 = vrot.lane.b32.xlu1 %v15955_v45, %s11218_s15  ;;  %v13242_v45 = vpop.permute.xlu0 %4297 }
 0x8a2   :  { %4646 = vrot.lane.b32.xlu1 %v15956_v19, %s11218_s15  ;;  %v3166_v35 = vpop.xlane.xlu0 %3165 }
 0x8a6   :  { %4713 = vrot.lane.b32.xlu1 %v15957_v25, %s11218_s15  ;;  %v3160_v63 = vpop.xlane.xlu0 %3159 }
 0x8a7   :  { %v13218_v17 = vpop.f32.mrb[96].mxu0  ;;  %10824 = vrcp.f32 %v3160_v63 }
 0x8a8   :  { %v13220_v32 = vpop.f32.mrb[97].mxu0  ;;  %10826 = vrcp.f32 %v3166_v35 }
 0x8a9   :  { %v13226_v33 = vpop.f32.mrb[98].mxu0  ;;  %3147 = vadd.xlane.f32.xlu0 %v3146_v56  ;;  %v3155_v56 = vsel %vm1479_vm3, %v13238_v9, 0.0 }
 0x8aa   :  { %v13230_v15 = vpop.f32.mrb[99].mxu0  ;;  %4715 = vrot.lane.b32.xlu1 %v15958_v26, %s11218_s15  ;;  %v3190_v50 = vpop.xlane.xlu0 %3189 }
 0x8ad   :  { %3153 = vadd.xlane.f32.xlu0 %v3152_v48  ;;  %v13247_v48 = vpop.eup %10820 }
 0x8ae   :  { %v3184_v55 = vpop.xlane.xlu0 %3183  ;;  %v3149_v52 = vsel %vm1479_vm3, %v13247_v48, 0.0 }
 0x8b1   :  { %3156 = vadd.xlane.f32.xlu0 %v3155_v56  ;;  %v10823_v56 = vpop.eup %10822 }
 0x8b2   :  { %v10825_v62 = vpop.eup %10824  ;;  %v3249_v59 = vmul.f32 %v10823_v56, %v13077_v18 }
 0x8b3   :  { %v10827_v37 = vpop.eup %10826  ;;  %v3246_v35 = vmul.f32 %v10825_v62, %v13074_v16 }
 0x8c1   :  { %v3163_v29 = vpop.xlane.xlu1 %3162 }
 0x8c2   :  { %10828 = vrcp.f32 %v3163_v29 }
 0x8c7   :  { %4709 = vrot.lane.b32.xlu0 %v15957_v25, %s11219_s16  ;;  %v3248_v25 = vmul.f32 %v10827_v37, %v13069_v5  ;;  %v13262_v5 = vld [vmem:[%s15713_s4 + $0x8] sm:$0xff]  }
 0x8c9   :  { %v3193_v19 = vpop.xlane.xlu1 %3192  ;;  %v3269_v11 = vpack.c.bf16 %v3249_v59, %v3248_v25 }
 0x8ca   :  { %10830 = vrcp.f32 %v3193_v19 }
 0x8cb   :  { %10832 = vrcp.f32 %v3184_v55 }
 0x8cc   :  { %v10829_v10 = vpop.eup %10828  ;;  %10834 = vrcp.f32 %v3190_v50 }
 0x8cd   :  { %v3187_v63 = vpop.xlane.xlu1 %3186  ;;  %v3247_v29 = vmul.f32 %v10829_v10, %v13104_v43 }
 0x8ce   :  { %10836 = vrcp.f32 %v3187_v63  ;;  %v9894_v20 = vpop.f32.mrb[68].mxu1  ;;  %3150 = vadd.xlane.f32.xlu1 %v3149_v52  ;;  %v15960_v52 = vpack.c.bf16 %v13173_v39, %v13165_v61  ;;  %v15962_v61 = vpack.c.bf16 %v13226_v33, %v13218_v17  ;;  %v4244_v39 = vsel %vm908_vm1, %v13150_v47, 0 }
 0x8cf   :  { %v3448_v2 = vpop.f32.mrb[69].mxu1  ;;  %v3268_v19 = vpack.c.bf16 %v3247_v29, %v3246_v35  ;;  %v15961_v35 = vpack.c.bf16 %v13230_v15, %v13220_v32 }
 0x8d0   :  { %v9895_v3 = vpop.f32.mrb[70].mxu1 }
 0x8d1   :  { %v3783_v18 = vpack.c.bf16 %v9895_v3, %v9894_v20  ;;  %v3451_v55 = vpop.f32.mrb[71].mxu1  ;;  %9916 = vmatprep.mubr.msk.bf16.mxu0 %vm1479_vm3, %v3268_v19 }
 0x8d2   :  { %v3782_v50 = vpack.c.bf16 %v3451_v55, %v3448_v2  ;;  %9917 = vmatmul.mubr.msk.bf16.vlgmr.msra.gmra.mrb[104].mxu0 %vm1479_vm3, %v3269_v11 }
 0x8d3   :  { %9929 = vmatpush3.bf16.msra.mxu0 %v13106_v8 }
 0x8d4   :  { %9930 = vmatprep.subr.bf16.mxu0 %v13134_v46  ;;  %v10831_v16 = vpop.eup %10830 }
 0x8d5   :  { %v10833_v43 = vpop.eup %10832  ;;  %v3257_v3 = vmul.f32 %v10831_v16, %v13111_v23  ;;  %v4365_v23 = vpop.permute.xlu0 %4364 }
 0x8d6   :  { %v10835_v56 = vpop.eup %10834  ;;  %v3254_v11 = vmul.f32 %v10833_v43, %v13093_v4  ;;  %v15959_v4 = vpack.c.bf16 %v13179_v30, %v13171_v57  ;;  %v4241_v57 = vsel %vm908_vm1, %v13161_v41, 0 }
 0x8d7   :  { %9931 = vmatpush3.bf16.msra.mxu0 %v13134_v46  ;;  %v3256_v2 = vmul.f32 %v10835_v56, %v13089_v58 }
 0x8d8   :  { %v10837_v20 = vpop.eup %10836  ;;  %9936 = vmatprep.subr.bf16.mxu0 %v13262_v5 }
 0x8d9   :  { %v3255_v8 = vmul.f32 %v10837_v20, %v13115_v12  ;;  %v3273_v62 = vpack.c.bf16 %v3257_v3, %v3256_v2  ;;  %v13281_v63 = vpop.permute.xlu0 %4437 }
 0x8db   :  { %v3272_v25 = vpack.c.bf16 %v3255_v8, %v3254_v11  ;;  %v4448_v11 = vsel %vm908_vm1, %v13281_v63, 0 }
 0x8dd   :  { %9932 = vmatprep.mubr.msk.bf16.mxu0 %vm1479_vm3, %v3272_v25  ;;  %v2980_v30 = vpop.xlane.xlu0 %2979  ;;  %v15963_v25 = vld [vmem:[#allocation19_spill] sm:$0xff] }
 0x8de   :  { %9933 = vmatmul.mubr.msk.bf16.vlgmr.msra.gmra.mrb[108].mxu0 %vm1479_vm3, %v3273_v62  ;;  %v3026_v29 = vsub.f32 %v13122_v6, %v2980_v30  ;;  %v4371_v6 = vpop.permute.xlu1 %4370  ;;  %v15964_v62 = vld [vmem:[#allocation17_spill] sm:$0xff] }
 0x8df   :  { %v9902_v37 = vpop.f32.mrb[100].mxu0  ;;  %9937 = vmatpush3.bf16.msra.mxu0 %v13262_v5  ;;  %4711 = vrot.lane.b32.xlu1 %v15958_v26, %s11219_s16  ;;  %v15971_v30 = vld [vmem:[#allocation9_spill] sm:$0xff] }
 0x8e0   :  { %v3511_v46 = vpop.f32.mrb[101].mxu0  ;;  %9938 = vmatprep.mubr.msk.bf16.mxu0 %vm908_vm1, %v15959_v4  ;;  %10458 = vmatprep.subr.msk.bf16.mxu0 %vm908_vm1, %v13161_v41  ;;  %v3082_v32 = vmul.f32 1.442695, %v3026_v29  ;;  %v15966_v4 = vld [vmem:[#allocation3_spill] sm:$0xff] }
 0x8e1   :  { %v9903_v58 = vpop.f32.mrb[102].mxu0  ;;  %v4367_v56 = vpop.permute.xlu0 %4366 }
 0x8e2   :  { %v3785_v12 = vpack.c.bf16 %v9903_v58, %v9902_v37  ;;  %v3514_v10 = vpop.f32.mrb[103].mxu0  ;;  %10838 = vpow2.f32 %v3082_v32 }
 0x8e3   :  { %v3784_v59 = vpack.c.bf16 %v3514_v10, %v3511_v46  ;;  %v15968_v10 = vld [vmem:[#allocation6_spill] sm:$0xff] }
 0x8e6   :  { %9939 = vmatmul.mubr.msk.bf16.vlgmr.msra.gmra.mrb[112].mxu0 %vm908_vm1, %v15960_v52  ;;  %v15969_v52 = vld [vmem:[#allocation4_spill] sm:$0xff] }
 0x8e7   :  { %9942 = vmatprep.mubr.msk.bf16.mxu0 %vm908_vm1, %v15961_v35 }
 0x8e8   :  { %10005 = vmatpush3.bf16.xpose.msra.mxu0 %v4241_v57  ;;  %v15970_v57 = vld [vmem:[#allocation7_spill] sm:$0xff] }
 0x8e9   :  { %10459 = vmatprep.subr.msk.bf16.mxu0 %vm908_vm1, %v13150_v47 }
 0x8ec   :  { %v13308_v41 = vpop.eup %10838 }
 0x8ed   :  { %v3170_v47 = vsel %vm1479_vm3, %v13308_v41, 0.0 }
 0x8ee   :  { %9943 = vmatmul.mubr.msk.bf16.gmra.mrb[116].mxu0 %vm908_vm1, %v15962_v61  ;;  %v15972_v61 = vld [vmem:[#allocation13_spill] sm:$0xff] }
 0x8ef   :  { %9946 = vmatprep.mubr.msk.bf16.mxu0 %vm908_vm1, %v3782_v50 }
 0x8f0   :  { %10007 = vmatpush3.bf16.xpose.msra.mxu0 %v4244_v39 }
 0x8f1   :  { %10460 = vmatprep.subr.msk.bf16.mxu0 %vm908_vm1, %v13169_v14 }
 0x8f6   :  { %9947 = vmatmul.mubr.msk.bf16.gmra.mrb[120].mxu0 %vm908_vm1, %v3783_v18  ;;  %v4310_v18 = vsel %vm908_vm1, %v13169_v14, 0 }
 0x8f7   :  { %9950 = vmatprep.mubr.msk.bf16.mxu0 %vm908_vm1, %v3784_v59 }
 0x8fe   :  { %9951 = vmatmul.mubr.msk.bf16.gmra.mrb[124].mxu0 %vm908_vm1, %v3785_v12  ;;  %v15967_v12 = vld [vmem:[#allocation27_spill] sm:$0xff] }
 0x8ff   :  { %10008 = vmatprep.mubr.msk.bf16.mxu0 %vm908_vm1, %v13183_v44 }
 0x902   :  { %v2983_v17 = vpop.xlane.xlu1 %2982 }
 0x903   :  { %v3027_v33 = vsub.f32 %v13139_v36, %v2983_v17  ;;  %3171 = vadd.xlane.f32.xlu1 %v3170_v47 }
 0x905   :  { %v3084_v15 = vmul.f32 1.442695, %v3027_v33 }
 0x906   :  { %v2986_v19 = vpop.xlane.xlu1 %2985  ;;  %10009 = vmatmul.mubr.msk.bf16.vlgmr.msra.gmra.mrb[128].mxu0 %vm908_vm1, %v13189_v13  ;;  %v4313_v13 = vsel %vm908_vm1, %v13185_v53, 0 }
 0x907   :  { %10840 = vpow2.f32 %v3084_v15  ;;  %v3028_v55 = vsub.f32 %v13148_v51, %v2986_v19  ;;  %10013 = vmatpush3.bf16.xpose.msra.mxu0 %v4310_v18  ;;  %10016 = vmatprep.mubr.msk.bf16.mxu0 %vm908_vm1, %v13197_v7 }
 0x908   :  { %10461 = vmatprep.subr.msk.bf16.mxu0 %vm908_vm1, %v13185_v53 }
 0x909   :  { %v3086_v36 = vmul.f32 1.442695, %v3028_v55 }
 0x90a   :  { %v2989_v44 = vpop.xlane.xlu1 %2988 }
 0x90b   :  { %10842 = vpow2.f32 %v3086_v36  ;;  %v3029_v50 = vsub.f32 %v13159_v0, %v2989_v44  ;;  %v4379_v0 = vsel %vm908_vm1, %v13193_v49, 0 }
 0x90d   :  { %v3088_v16 = vmul.f32 1.442695, %v3029_v50 }
 0x90e   :  { %v4440_v8 = vpop.permute.xlu1 %4439 }
 0x90f   :  { %10844 = vpow2.f32 %v3088_v16  ;;  %10015 = vmatpush3.bf16.xpose.msra.mxu0 %v4313_v13  ;;  %v4451_v37 = vsel %vm908_vm1, %v4440_v8, 0 }
 0x910   :  { %10462 = vmatprep.subr.msk.bf16.mxu0 %vm908_vm1, %v13193_v49  ;;  %v4434_v49 = vpop.permute.xlu0 %4433 }
 0x911   :  { %v13329_v51 = vpop.eup %10840 }
 0x912   :  { %v3173_v14 = vsel %vm1479_vm3, %v13329_v51, 0.0  ;;  %v4509_v58 = vpop.permute.xlu1 %4508 }
 0x913   :  { %3174 = vadd.xlane.f32.xlu0 %v3173_v14  ;;  %v4520_v39 = vsel %vm908_vm1, %v4509_v58, 0 }
 0x914   :  { %v4507_v3 = vpop.permute.xlu0 %4506 }
 0x915   :  { %v13333_v7 = vpop.eup %10842  ;;  %v4517_v59 = vsel %vm908_vm1, %v4507_v3, 0 }
 0x916   :  { %10017 = vmatmul.mubr.msk.bf16.vlgmr.msra.gmra.mrb[132].mxu0 %vm908_vm1, %v13242_v45  ;;  %v3176_v53 = vsel %vm1479_vm3, %v13333_v7, 0.0  ;;  %v4382_v45 = vsel %vm908_vm1, %v4371_v6, 0  ;;  %v4576_v35 = vpop.permute.xlu1 %4575 }
 0x917   :  { %10021 = vmatpush3.bf16.xpose.msra.mxu0 %v4379_v0  ;;  %10024 = vmatprep.mubr.msk.bf16.mxu0 %vm908_vm1, %v4365_v23  ;;  %v15965_v23 = vld [vmem:[#allocation25_spill] sm:$0xff]  ;;  %v4586_v33 = vsel %vm908_vm1, %v4576_v35, 0 }
 0x918   :  { %3177 = vadd.xlane.f32.xlu0 %v3176_v53  ;;  %10463 = vmatprep.subr.msk.bf16.mxu0 %vm908_vm1, %v4371_v6  ;;  %v4436_v2 = vpop.permute.xlu0 %4435  ;;  %v15973_v6 = vld [vmem:[#allocation11_spill] sm:$0xff] }
 0x919   :  { %v13343_v43 = vpop.eup %10844 }
 0x91a   :  { %v3179_v20 = vsel %vm1479_vm3, %v13343_v43, 0.0  ;;  %v4578_v32 = vpop.permute.xlu1 %4577 }
 0x91b   :  { %3180 = vadd.xlane.f32.xlu1 %v3179_v20  ;;  %v4589_v18 = vsel %vm908_vm1, %v4578_v32, 0 }
 0x91c   :  { %v4503_v46 = vpop.permute.xlu0 %4502 }
 0x91e   :  { %v4645_v47 = vpop.permute.xlu1 %4644 }
 0x91f   :  { %10023 = vmatpush3.bf16.xpose.msra.mxu0 %v4382_v45  ;;  %v4655_v50 = vsel %vm908_vm1, %v4645_v47, 0 }
 0x920   :  { %10464 = vmatprep.subr.msk.bf16.mxu0 %vm908_vm1, %v13281_v63  ;;  %v4505_v63 = vpop.permute.xlu0 %4504 }
 0x922   :  { %v4647_v19 = vpop.permute.xlu1 %4646 }
 0x923   :  { %v4658_v0 = vsel %vm908_vm1, %v4647_v19, 0 }
 0x924   :  { %v4572_v29 = vpop.permute.xlu0 %4571 }
 0x926   :  { %10025 = vmatmul.mubr.msk.bf16.vlgmr.msra.gmra.mrb[136].mxu0 %vm908_vm1, %v4367_v56  ;;  %v4714_v36 = vpop.permute.xlu1 %4713 }
 0x927   :  { %10029 = vmatpush3.bf16.xpose.msra.mxu0 %v4448_v11  ;;  %10032 = vmatprep.mubr.msk.bf16.mxu0 %vm908_vm1, %v4434_v49  ;;  %v4724_v49 = vsel %vm908_vm1, %v4714_v36, 0 }
 0x928   :  { %10465 = vmatprep.subr.msk.bf16.mxu0 %vm908_vm1, %v4440_v8  ;;  %v4574_v17 = vpop.permute.xlu0 %4573 }
 0x92a   :  { %v4716_v16 = vpop.permute.xlu1 %4715 }
 0x92c   :  { %3530 = vrot.lane.b32.xlu1 %v15963_v25, %s11217_s14  ;;  %v4641_v15 = vpop.permute.xlu0 %4640 }
 0x92e   :  { %3528 = vrot.lane.b32.xlu0 %v15964_v62, %s11217_s14 }
 0x92f   :  { %10031 = vmatpush3.bf16.xpose.msra.mxu0 %v4451_v37 }
 0x930   :  { %10466 = vmatprep.subr.msk.bf16.mxu0 %vm908_vm1, %v4507_v3  ;;  %3654 = vrot.lane.b32.xlu1 %v15965_v23, %s11217_s14  ;;  %v4643_v55 = vpop.permute.xlu0 %4642 }
 0x932   :  { %5178 = vrot.lane.b32.xlu0 %v15966_v4, %s11219_s16 }
 0x934   :  { %3656 = vrot.lane.b32.xlu1 %v15967_v12, %s11217_s14 }
 0x936   :  { %5239 = vrot.lane.b32.xlu0 %v15968_v10, %s11219_s16  ;;  %10033 = vmatmul.mubr.msk.bf16.vlgmr.msra.gmra.mrb[140].mxu0 %vm908_vm1, %v4436_v2  ;;  %v3148_v44 = vpop.xlane.xlu0 %3147  ;;  %v4727_v2 = vsel %vm908_vm1, %v4716_v16, 0 }
 0x937   :  { %10037 = vmatpush3.bf16.xpose.msra.mxu0 %v4517_v59  ;;  %10040 = vmatprep.mubr.msk.bf16.mxu0 %vm908_vm1, %v4503_v46  ;;  %10846 = vrcp.f32 %v3148_v44 }
 0x938   :  { %10467 = vmatprep.subr.msk.bf16.mxu0 %vm908_vm1, %v4509_v58  ;;  %5180 = vrot.lane.b32.xlu1 %v15969_v52, %s11219_s16 }
 0x93a   :  { %5241 = vrot.lane.b32.xlu0 %v15970_v57, %s11219_s16  ;;  %v3154_v13 = vpop.xlane.xlu0 %3153 }
 0x93c   :  { %5300 = vrot.lane.b32.xlu1 %v15971_v30, %s11219_s16 }
 0x93e   :  { %5361 = vrot.lane.b32.xlu0 %v15972_v61, %s11219_s16  ;;  %v3157_v53 = vpop.xlane.xlu0 %3156 }
 0x93f   :  { %10039 = vmatpush3.bf16.xpose.msra.mxu0 %v4520_v39 }
 0x940   :  { %10468 = vmatprep.subr.msk.bf16.mxu0 %vm908_vm1, %v4576_v35  ;;  %5302 = vrot.lane.b32.xlu1 %v15973_v6, %s11219_s16 }
 0x941   :  { %v10847_v56 = vpop.eup %10846 }
 0x942   :  { %5422 = vrot.lane.b32.xlu0 %v15964_v62, %s11219_s16  ;;  %v4710_v45 = vpop.permute.xlu0 %4709  ;;  %v3242_v3 = vmul.f32 %v10847_v56, %v13214_v1 }
 0x944   :  { %5363 = vrot.lane.b32.xlu1 %v11916_v42, %s11219_s16 }
 0x946   :  { %10041 = vmatmul.mubr.msk.bf16.vlgmr.msra.gmra.mrb[144].mxu0 %vm908_vm1, %v4505_v63 }
 0x947   :  { %10045 = vmatpush3.bf16.xpose.msra.mxu0 %v4586_v33  ;;  %10048 = vmatprep.mubr.msk.bf16.mxu0 %vm908_vm1, %v4572_v29 }
 0x948   :  { %10469 = vmatprep.subr.msk.bf16.mxu0 %vm908_vm1, %v4578_v32  ;;  %5424 = vrot.lane.b32.xlu1 %v15963_v25, %s11219_s16 }
 0x94f   :  { %10047 = vmatpush3.bf16.xpose.msra.mxu0 %v4589_v18 }
 0x950   :  { %10470 = vmatprep.subr.msk.bf16.mxu0 %vm908_vm1, %v4645_v47 }
 0x956   :  { %10049 = vmatmul.mubr.msk.bf16.vlgmr.msra.gmra.mrb[148].mxu0 %vm908_vm1, %v4574_v17 }
 0x957   :  { %10053 = vmatpush3.bf16.xpose.msra.mxu0 %v4655_v50  ;;  %10056 = vmatprep.mubr.msk.bf16.mxu0 %vm908_vm1, %v4641_v15 }
 0x958   :  { %10471 = vmatprep.subr.msk.bf16.mxu0 %vm908_vm1, %v4647_v19 }
 0x95b   :  { %v3151_v14 = vpop.xlane.xlu1 %3150 }
 0x95c   :  { %10848 = vrcp.f32 %v3151_v14 }
 0x95d   :  { %10850 = vrcp.f32 %v3157_v53 }
 0x95e   :  { %10852 = vrcp.f32 %v3154_v13 }
 0x95f   :  { %10055 = vmatpush3.bf16.xpose.msra.mxu0 %v4658_v0  ;;  %v4712_v37 = vpop.permute.xlu1 %4711 }
 0x960   :  { %10472 = vmatprep.subr.msk.bf16.mxu0 %vm908_vm1, %v4714_v36 }
 0x966   :  { %v10849_v20 = vpop.eup %10848  ;;  %10057 = vmatmul.mubr.msk.bf16.vlgmr.msra.gmra.mrb[152].mxu0 %vm908_vm1, %v4643_v55 }
 0x967   :  { %10061 = vmatpush3.bf16.xpose.msra.mxu0 %v4724_v49  ;;  %10064 = vmatprep.mubr.msk.bf16.mxu0 %vm908_vm1, %v4710_v45  ;;  %v3243_v11 = vmul.f32 %v10849_v20, %v13247_v48  ;;  %v10851_v32 = vpop.eup %10850 }
 0x968   :  { %10473 = vmatprep.subr.msk.bf16.mxu0 %vm908_vm1, %v4716_v16  ;;  %v10853_v33 = vpop.eup %10852  ;;  %v3245_v18 = vmul.f32 %v10851_v32, %v13238_v9 }
 0x969   :  { %v3266_v8 = vpack.c.bf16 %v3243_v11, %v3242_v3  ;;  %v3244_v50 = vmul.f32 %v10853_v33, %v13224_v60 }
 0x96b   :  { %9908 = vmatprep.mubr.msk.bf16.mxu1 %vm1479_vm3, %v3266_v8  ;;  %v3267_v14 = vpack.c.bf16 %v3245_v18, %v3244_v50 }
 0x96f   :  { %10063 = vmatpush3.bf16.xpose.msra.mxu0 %v4727_v2 }
 0x976   :  { %10065 = vmatmul.mubr.msk.bf16.vlgmr.msra.gmra.mrb[156].mxu0 %vm908_vm1, %v4712_v37 }
 0x990   :  { %v3172_v46 = vpop.xlane.xlu1 %3171 }
 0x9a0   :  { %v3175_v58 = vpop.xlane.xlu0 %3174 }
 0x9a1   :  { %10854 = vrcp.f32 %v3175_v58 }
 0x9a2   :  { %10856 = vrcp.f32 %v3172_v46 }
 0x9a5   :  { %v3178_v1 = vpop.xlane.xlu0 %3177  ;;  %v13412_v59 = vpop.f32.mrb[104].mxu0 }
 0x9a6   :  { %v13414_v48 = vpop.f32.mrb[105].mxu0  ;;  %10858 = vrcp.f32 %v3178_v1 }
 0x9a7   :  { %v13416_v63 = vpop.f32.mrb[106].mxu0 }
 0x9a8   :  { %v13420_v29 = vpop.f32.mrb[107].mxu0  ;;  %v3181_v39 = vpop.xlane.xlu1 %3180 }
 0x9a9   :  { %10860 = vrcp.f32 %v3181_v39  ;;  %v3529_v47 = vpop.permute.xlu0 %3528 }
 0x9aa   :  { %9904 = vmatprep.subr.bf16.mxu1 %v3529_v47 }
 0x9ab   :  { %v10855_v15 = vpop.eup %10854  ;;  %9905 = vmatpush3.bf16.msra.mxu1 %v3529_v47 }
 0x9ac   :  { %v10857_v19 = vpop.eup %10856  ;;  %v3531_v55 = vpop.permute.xlu1 %3530  ;;  %v3251_v44 = vmul.f32 %v10855_v15, %v13329_v51 }
 0x9ad   :  { %v13425_v36 = vpop.permute.xlu0 %5178  ;;  %9906 = vmatprep.subr.bf16.mxu1 %v3531_v55  ;;  %v3250_v16 = vmul.f32 %v10857_v19, %v13308_v41 }
 0x9af   :  { %9907 = vmatpush3.bf16.msra.mxu1 %v3531_v55  ;;  %v3270_v20 = vpack.c.bf16 %v3251_v44, %v3250_v16 }
 0x9b0   :  { %v3655_v13 = vpop.permute.xlu1 %3654  ;;  %v10859_v0 = vpop.eup %10858 }
 0x9b1   :  { %v5240_v53 = vpop.permute.xlu0 %5239  ;;  %9920 = vmatprep.subr.bf16.mxu1 %v3655_v13  ;;  %v13430_v56 = vpop.f32.mrb[108].mxu0  ;;  %v3252_v41 = vmul.f32 %v10859_v0, %v13333_v7 }
 0x9b2   :  { %9909 = vmatmul.mubr.msk.bf16.vlgmr.msra.gmra.mrb[72].mxu1 %vm1479_vm3, %v3267_v14  ;;  %10076 = vmatprep.subr.bf16.mxu0 %v5240_v53  ;;  %v13433_v9 = vpop.f32.mrb[109].mxu0 }
 0x9b3   :  { %v10861_v45 = vpop.eup %10860  ;;  %9921 = vmatpush3.bf16.msra.mxu1 %v3655_v13  ;;  %9924 = vmatprep.mubr.msk.bf16.mxu1 %vm1479_vm3, %v3270_v20  ;;  %v13436_v60 = vpop.f32.mrb[110].mxu0 }
 0x9b4   :  { %v3253_v51 = vmul.f32 %v10861_v45, %v13343_v43  ;;  %10077 = vmatpush3.bf16.msra.mxu0 %v5240_v53  ;;  %v13442_v3 = vpop.f32.mrb[111].mxu0  ;;  %v3657_v11 = vpop.permute.xlu1 %3656 }
 0x9b5   :  { %v5242_v2 = vpop.permute.xlu0 %5241  ;;  %9922 = vmatprep.subr.bf16.mxu1 %v3657_v11 }
 0x9b6   :  { %10078 = vmatprep.subr.bf16.mxu0 %v5242_v2  ;;  %v3271_v37 = vpack.c.bf16 %v3253_v51, %v3252_v41 }
 0x9b7   :  { %9923 = vmatpush3.bf16.msra.mxu1 %v3657_v11 }
 0x9b8   :  { %10079 = vmatpush3.bf16.msra.mxu0 %v5242_v2  ;;  %10328 = vmatprep.subr.bf16.mxu1 %v13262_v5 }
 0x9b9   :  { %v13447_v7 = vpop.permute.xlu0 %5361  ;;  %v13449_v43 = vpop.f32.mrb[112].mxu0 }
 0x9ba   :  { %15974 = vst [vmem:[#allocation30_spill] sm:$0xff] %v13447_v7  ;;  %15975 = vst [vmem:[#allocation27_spill] sm:$0xff] %v13449_v43  ;;  %9925 = vmatmul.mubr.msk.bf16.vlgmr.msra.gmra.mrb[76].mxu1 %vm1479_vm3, %v3271_v37  ;;  %10092 = vmatprep.subr.bf16.mxu0 %v13447_v7  ;;  %v13453_v46 = vpop.f32.mrb[113].mxu0 }
 0x9bb   :  { %15976 = vst [vmem:[#allocation4_spill] sm:$0xff] %v13453_v46  ;;  %v13455_v58 = vpop.f32.mrb[114].mxu0  ;;  %10329 = vmatpush3.bf16.msra.mxu1 %v13262_v5 }
 0x9bc   :  { %15977 = vst [vmem:[#allocation7_spill] sm:$0xff] %v13455_v58  ;;  %v13458_v1 = vpop.f32.mrb[115].mxu0 }
 0x9bd   :  { %15978 = vst [vmem:[#allocation67_spill] sm:$0xff] %v13458_v1 }
 0x9c1   :  { %v13460_v39 = vpop.f32.mrb[116].mxu0 }
 0x9c2   :  { %15979 = vst [vmem:[#allocation68_spill] sm:$0xff] %v13460_v39  ;;  %v13462_v32 = vpop.f32.mrb[117].mxu0 }
 0x9c3   :  { %15980 = vst [vmem:[#allocation69_spill] sm:$0xff] %v13462_v32  ;;  %v13464_v47 = vpop.f32.mrb[118].mxu0 }
 0x9c4   :  { %15981 = vst [vmem:[#allocation70_spill] sm:$0xff] %v13464_v47  ;;  %v13466_v33 = vpop.f32.mrb[119].mxu0 }
 0x9c5   :  { %15982 = vst [vmem:[#allocation71_spill] sm:$0xff] %v13466_v33 }
 0x9c9   :  { %v13468_v15 = vpop.f32.mrb[120].mxu0 }
 0x9ca   :  { %15983 = vst [vmem:[#allocation72_spill] sm:$0xff] %v13468_v15  ;;  %v13470_v19 = vpop.f32.mrb[121].mxu0 }
 0x9cb   :  { %15984 = vst [vmem:[#allocation73_spill] sm:$0xff] %v13470_v19  ;;  %v13472_v18 = vpop.f32.mrb[122].mxu0 }
 0x9cc   :  { %15985 = vst [vmem:[#allocation74_spill] sm:$0xff] %v13472_v18  ;;  %v13474_v55 = vpop.f32.mrb[123].mxu0 }
 0x9cd   :  { %15986 = vst [vmem:[#allocation75_spill] sm:$0xff] %v13474_v55 }
 0x9d1   :  { %v13476_v44 = vpop.f32.mrb[124].mxu0 }
 0x9d2   :  { %15987 = vst [vmem:[#allocation76_spill] sm:$0xff] %v13476_v44  ;;  %v13478_v5 = vpop.f32.mrb[125].mxu0 }
 0x9d3   :  { %15988 = vst [vmem:[#allocation77_spill] sm:$0xff] %v13478_v5  ;;  %v13480_v50 = vpop.f32.mrb[126].mxu0 }
 0x9d4   :  { %15989 = vst [vmem:[#allocation78_spill] sm:$0xff] %v13480_v50  ;;  %v13482_v16 = vpop.f32.mrb[127].mxu0 }
 0x9d5   :  { %15990 = vst [vmem:[#allocation79_spill] sm:$0xff] %v13482_v16 }
 0x9d9   :  { %v10010_v13 = vpop.f32.mrb[128].mxu0 }
 0x9da   :  { %v13486_v14 = vsel %vm12039_vm2, %v10010_v13, -inf  ;;  %v4280_v0 = vpop.f32.mrb[129].mxu0 }
 0x9db   :  { %v4816_v53 = vsel %vm1479_vm3, %v13486_v14, -inf  ;;  %v10011_v20 = vpop.f32.mrb[130].mxu0  ;;  %v13492_v45 = vsel %vm12044_vm4, %v4280_v0, -inf }
 0x9dc   :  { %4817 = vmax.xlane.f32.xlu0 %v4816_v53  ;;  %v4283_v41 = vpop.f32.mrb[131].mxu0  ;;  %v4810_v2 = vsel %vm1479_vm3, %v13492_v45, -inf  ;;  %v13504_v37 = vsel %vm12063_vm6, %v10011_v20, -inf }
 0x9dd   :  { %v13496_v51 = vsel %vm12053_vm5, %v4283_v41, -inf  ;;  %v4819_v13 = vsel %vm1479_vm3, %v13504_v37, -inf }
 0x9de   :  { %v4813_v11 = vsel %vm1479_vm3, %v13496_v51, -inf }
 0x9df   :  { %4814 = vmax.xlane.f32.xlu1 %v4813_v11 }
 0x9e0   :  { %4811 = vmax.xlane.f32.xlu0 %v4810_v2 }
 0x9e4   :  { %4820 = vmax.xlane.f32.xlu0 %v4819_v13 }
 0x9e9   :  { %v10018_v0 = vpop.f32.mrb[132].mxu0 }
 0x9ea   :  { %v13510_v53 = vsel %vm12039_vm2, %v10018_v0, -inf  ;;  %v4349_v41 = vpop.f32.mrb[133].mxu0 }
 0x9eb   :  { %v4828_v49 = vsel %vm1479_vm3, %v13510_v53, -inf  ;;  %v10019_v8 = vpop.f32.mrb[134].mxu0  ;;  %v13516_v11 = vsel %vm12044_vm4, %v4349_v41, -inf }
 0x9ec   :  { %v13520_v20 = vsel %vm12063_vm6, %v10019_v8, -inf  ;;  %4829 = vmax.xlane.f32.xlu0 %v4828_v49  ;;  %v4352_v2 = vpop.f32.mrb[135].mxu0  ;;  %v4822_v35 = vsel %vm1479_vm3, %v13516_v11, -inf }
 0x9ed   :  { %v4831_v13 = vsel %vm1479_vm3, %v13520_v20, -inf  ;;  %v13526_v0 = vsel %vm12053_vm5, %v4352_v2, -inf }
 0x9ee   :  { %4832 = vmax.xlane.f32.xlu1 %v4831_v13  ;;  %v4825_v41 = vsel %vm1479_vm3, %v13526_v0, -inf }
 0x9f0   :  { %4823 = vmax.xlane.f32.xlu0 %v4822_v35 }
 0x9f2   :  { %4826 = vmax.xlane.f32.xlu1 %v4825_v41 }
 0x9f9   :  { %v10026_v8 = vpop.f32.mrb[136].mxu0 }
 0x9fa   :  { %v13534_v49 = vsel %vm12039_vm2, %v10026_v8, -inf  ;;  %v4418_v17 = vpop.f32.mrb[137].mxu0 }
 0x9fb   :  { %v4840_v16 = vsel %vm1479_vm3, %v13534_v49, -inf  ;;  %v10027_v2 = vpop.f32.mrb[138].mxu0  ;;  %v13540_v13 = vsel %vm12044_vm4, %v4418_v17, -inf }
 0x9fc   :  { %v13544_v35 = vsel %vm12063_vm6, %v10027_v2, -inf  ;;  %4841 = vmax.xlane.f32.xlu0 %v4840_v16  ;;  %v4421_v41 = vpop.f32.mrb[139].mxu0  ;;  %v4834_v5 = vsel %vm1479_vm3, %v13540_v13, -inf }
 0x9fd   :  { %v4843_v50 = vsel %vm1479_vm3, %v13544_v35, -inf  ;;  %v13550_v8 = vsel %vm12053_vm5, %v4421_v41, -inf  ;;  %v13563_v41 = vld [vmem:[%s15713_s4] sm:$0xff]  }
 0x9fe   :  { %4844 = vmax.xlane.f32.xlu1 %v4843_v50  ;;  %v4837_v17 = vsel %vm1479_vm3, %v13550_v8, -inf  ;;  %9970 = vmatprep.subr.bf16.mxu1 %v13563_v41 }
 0xa00   :  { %4835 = vmax.xlane.f32.xlu0 %v4834_v5 }
 0xa02   :  { %4838 = vmax.xlane.f32.xlu1 %v4837_v17 }
 0xa09   :  { %v10034_v2 = vpop.f32.mrb[140].mxu0 }
 0xa0a   :  { %v13558_v16 = vsel %vm12039_vm2, %v10034_v2, -inf  ;;  %v4487_v44 = vpop.f32.mrb[141].mxu0 }
 0xa0b   :  { %v4852_v50 = vsel %vm1479_vm3, %v13558_v16, -inf  ;;  %v10035_v55 = vpop.f32.mrb[142].mxu0  ;;  %v13569_v5 = vsel %vm12044_vm4, %v4487_v44, -inf }
 0xa0c   :  { %v13573_v17 = vsel %vm12063_vm6, %v10035_v55, -inf  ;;  %4853 = vmax.xlane.f32.xlu0 %v4852_v50  ;;  %v4490_v2 = vpop.f32.mrb[143].mxu0  ;;  %v4846_v44 = vsel %vm1479_vm3, %v13569_v5, -inf }
 0xa0d   :  { %v4855_v18 = vsel %vm1479_vm3, %v13573_v17, -inf  ;;  %v13580_v19 = vsel %vm12053_vm5, %v4490_v2, -inf }
 0xa0e   :  { %4856 = vmax.xlane.f32.xlu1 %v4855_v18  ;;  %v4849_v55 = vsel %vm1479_vm3, %v13580_v19, -inf }
 0xa10   :  { %4847 = vmax.xlane.f32.xlu0 %v4846_v44 }
 0xa12   :  { %4850 = vmax.xlane.f32.xlu1 %v4849_v55 }
 0xa19   :  { %v10042_v50 = vpop.f32.mrb[144].mxu0 }
 0xa1a   :  { %v13588_v15 = vsel %vm12039_vm2, %v10042_v50, -inf  ;;  %v4556_v33 = vpop.f32.mrb[145].mxu0 }
 0xa1b   :  { %v4864_v47 = vsel %vm1479_vm3, %v13588_v15, -inf  ;;  %v10043_v2 = vpop.f32.mrb[146].mxu0  ;;  %v13594_v18 = vsel %vm12044_vm4, %v4556_v33, -inf }
 0xa1c   :  { %v13598_v44 = vsel %vm12063_vm6, %v10043_v2, -inf  ;;  %4865 = vmax.xlane.f32.xlu0 %v4864_v47  ;;  %v4559_v55 = vpop.f32.mrb[147].mxu0  ;;  %v4858_v39 = vsel %vm1479_vm3, %v13594_v18, -inf }
 0xa1d   :  { %v4867_v32 = vsel %vm1479_vm3, %v13598_v44, -inf  ;;  %v13604_v50 = vsel %vm12053_vm5, %v4559_v55, -inf }
 0xa1e   :  { %4868 = vmax.xlane.f32.xlu1 %v4867_v32  ;;  %v4861_v33 = vsel %vm1479_vm3, %v13604_v50, -inf }
 0xa20   :  { %4859 = vmax.xlane.f32.xlu0 %v4858_v39 }
 0xa22   :  { %4862 = vmax.xlane.f32.xlu1 %v4861_v33 }
 0xa29   :  { %v10050_v2 = vpop.f32.mrb[148].mxu0 }
 0xa2a   :  { %v13612_v47 = vsel %vm12039_vm2, %v10050_v2, -inf  ;;  %v4625_v1 = vpop.f32.mrb[149].mxu0 }
 0xa2b   :  { %v4876_v58 = vsel %vm1479_vm3, %v13612_v47, -inf  ;;  %v10051_v55 = vpop.f32.mrb[150].mxu0  ;;  %v13618_v32 = vsel %vm12044_vm4, %v4625_v1, -inf }
 0xa2c   :  { %v13622_v39 = vsel %vm12063_vm6, %v10051_v55, -inf  ;;  %4877 = vmax.xlane.f32.xlu0 %v4876_v58  ;;  %v4628_v33 = vpop.f32.mrb[151].mxu0  ;;  %v4870_v43 = vsel %vm1479_vm3, %v13618_v32, -inf }
 0xa2d   :  { %v4879_v46 = vsel %vm1479_vm3, %v13622_v39, -inf  ;;  %v13628_v2 = vsel %vm12053_vm5, %v4628_v33, -inf }
 0xa2e   :  { %4880 = vmax.xlane.f32.xlu1 %v4879_v46  ;;  %v4873_v1 = vsel %vm1479_vm3, %v13628_v2, -inf }
 0xa30   :  { %4871 = vmax.xlane.f32.xlu0 %v4870_v43 }
 0xa32   :  { %4874 = vmax.xlane.f32.xlu1 %v4873_v1 }
 0xa39   :  { %v10058_v55 = vpop.f32.mrb[152].mxu0 }
 0xa3a   :  { %v13636_v58 = vsel %vm12039_vm2, %v10058_v55, -inf  ;;  %v4694_v62 = vpop.f32.mrb[153].mxu0 }
 0xa3b   :  { %v4888_v25 = vsel %vm1479_vm3, %v13636_v58, -inf  ;;  %v10059_v33 = vpop.f32.mrb[154].mxu0  ;;  %v13642_v46 = vsel %vm12044_vm4, %v4694_v62, -inf }
 0xa3c   :  { %v13646_v43 = vsel %vm12063_vm6, %v10059_v33, -inf  ;;  %4889 = vmax.xlane.f32.xlu0 %v4888_v25  ;;  %v4697_v1 = vpop.f32.mrb[155].mxu0  ;;  %v4882_v30 = vsel %vm1479_vm3, %v13642_v46, -inf }
 0xa3d   :  { %v4891_v61 = vsel %vm1479_vm3, %v13646_v43, -inf  ;;  %v13652_v55 = vsel %vm12053_vm5, %v4697_v1, -inf }
 0xa3e   :  { %4892 = vmax.xlane.f32.xlu1 %v4891_v61  ;;  %v4885_v62 = vsel %vm1479_vm3, %v13652_v55, -inf }
 0xa40   :  { %4883 = vmax.xlane.f32.xlu0 %v4882_v30 }
 0xa42   :  { %4886 = vmax.xlane.f32.xlu1 %v4885_v62  ;;  %v13674_v62 = vpop.permute.xlu0 %5422 }
 0xa43   :  { %15991 = vst [vmem:[#allocation80_spill] sm:$0xff] %v13674_v62 }
 0xa49   :  { %v10066_v33 = vpop.f32.mrb[156].mxu0 }
 0xa4a   :  { %v13660_v25 = vsel %vm12039_vm2, %v10066_v33, -inf  ;;  %v4763_v10 = vpop.f32.mrb[157].mxu0 }
 0xa4b   :  { %v4900_v4 = vsel %vm1479_vm3, %v13660_v25, -inf  ;;  %v10067_v1 = vpop.f32.mrb[158].mxu0  ;;  %v13666_v61 = vsel %vm12044_vm4, %v4763_v10, -inf  ;;  %v13678_v10 = vpop.permute.xlu1 %5180 }
 0xa4c   :  { %4901 = vmax.xlane.f32.xlu0 %v4900_v4  ;;  %v4766_v30 = vpop.f32.mrb[159].mxu0  ;;  %v4894_v7 = vsel %vm1479_vm3, %v13666_v61, -inf }
 0xa4f   :  { %v13681_v21 = vpop.permute.xlu1 %5300 }
 0xa50   :  { %4895 = vmax.xlane.f32.xlu0 %v4894_v7 }
 0xa53   :  { %5485 = vrot.lane.b32.xlu1 %v11960_v31, %s11219_s16 }
 0xa57   :  { %5544 = vrot.lane.b32.xlu1 %v15965_v23, %s11219_s16  ;;  %v13688_v23 = vsel %vm12063_vm6, %v10067_v1, -inf }
 0xa66   :  { %5483 = vrot.lane.b32.xlu0 %v11952_v38, %s11219_s16  ;;  %v13690_v38 = vpop.permute.xlu1 %5302 }
 0xa67   :  { %15992 = vst [vmem:[#allocation81_spill] sm:$0xff] %v13690_v38 }
 0xa69   :  { %v4818_v33 = vpop.xlane.xlu0 %4817 }
 0xa6a   :  { %v4908_v4 = vsub.f32 %v13486_v14, %v4818_v33  ;;  %v4903_v14 = vsel %vm1479_vm3, %v13688_v23, -inf  ;;  %v13699_v1 = vpop.permute.xlu1 %5363 }
 0xa6b   :  { %15993 = vst [vmem:[#allocation82_spill] sm:$0xff] %v13699_v1 }
 0xa6c   :  { %v4942_v7 = vmul.f32 1.442695, %v4908_v4  ;;  %v13697_v4 = vsel %vm12053_vm5, %v4766_v30, -inf }
 0xa6d   :  { %v4812_v54 = vpop.xlane.xlu0 %4811 }
 0xa6e   :  { %v4906_v42 = vsub.f32 %v13492_v45, %v4812_v54  ;;  %10862 = vpow2.f32 %v4942_v7 }
 0xa70   :  { %v4938_v62 = vmul.f32 1.442695, %v4906_v42  ;;  %v4897_v42 = vsel %vm1479_vm3, %v13697_v4, -inf }
 0xa71   :  { %v13684_v31 = vpop.xlane.xlu0 %4820 }
 0xa72   :  { %10864 = vpow2.f32 %v4938_v62 }
 0xa78   :  { %v13704_v38 = vpop.eup %10862 }
 0xa79   :  { %v4830_v6 = vpop.xlane.xlu0 %4829  ;;  %15994 = vst [vmem:[#allocation83_spill] sm:$0xff] %v13704_v38 }
 0xa7a   :  { %v4912_v33 = vsub.f32 %v13510_v53, %v4830_v6  ;;  %v13706_v6 = vpop.permute.xlu1 %5424  ;;  %v5008_v53 = vsel %vm1479_vm3, %v13704_v38, 0.0 }
 0xa7b   :  { %4904 = vmax.xlane.f32.xlu1 %v4903_v14  ;;  %15995 = vst [vmem:[#allocation84_spill] sm:$0xff] %v13706_v6 }
 0xa7c   :  { %v4950_v54 = vmul.f32 1.442695, %v4912_v33  ;;  %v13710_v30 = vpop.eup %10864 }
 0xa7d   :  { %v4824_v45 = vpop.xlane.xlu0 %4823 }
 0xa7e   :  { %v4910_v7 = vsub.f32 %v13516_v11, %v4824_v45  ;;  %10866 = vpow2.f32 %v4950_v54  ;;  %v4815_v34 = vpop.xlane.xlu1 %4814  ;;  %v5002_v54 = vsel %vm1479_vm3, %v13710_v30, 0.0 }
 0xa7f   :  { %4898 = vmax.xlane.f32.xlu1 %v4897_v42 }
 0xa80   :  { %v4946_v27 = vmul.f32 1.442695, %v4910_v7 }
 0xa82   :  { %10868 = vpow2.f32 %v4946_v27  ;;  %v4833_v6 = vpop.xlane.xlu1 %4832 }
 0xa85   :  { %v9910_v62 = vpop.f32.mrb[72].mxu1  ;;  %5009 = vadd.xlane.f32.xlu0 %v5008_v53 }
 0xa86   :  { %v3574_v14 = vpop.f32.mrb[73].mxu1 }
 0xa87   :  { %v9911_v33 = vpop.f32.mrb[74].mxu1 }
 0xa88   :  { %v3787_v1 = vpack.c.bf16 %v9911_v33, %v9910_v62  ;;  %v3577_v11 = vpop.f32.mrb[75].mxu1  ;;  %v13714_v7 = vpop.eup %10866  ;;  %v15996_v62 = vpack.c.bf16 %v13420_v29, %v13414_v48 }
 0xa89   :  { %v3786_v45 = vpack.c.bf16 %v3577_v11, %v3574_v14  ;;  %5003 = vadd.xlane.f32.xlu0 %v5002_v54  ;;  %v4842_v42 = vpop.xlane.xlu0 %4841  ;;  %v5020_v14 = vsel %vm1479_vm3, %v13714_v7, 0.0 }
 0xa8a   :  { %v4916_v27 = vsub.f32 %v13534_v49, %v4842_v42 }
 0xa8b   :  { %9954 = vmatprep.mubr.msk.bf16.mxu1 %vm908_vm1, %v3786_v45 }
 0xa8c   :  { %v4958_v38 = vmul.f32 1.442695, %v4916_v27  ;;  %9955 = vmatmul.mubr.msk.bf16.vlgmr.msra.gmra.mrb[80].mxu1 %vm908_vm1, %v3787_v1  ;;  %v13726_v11 = vpop.eup %10868  ;;  %v15997_v27 = vpack.c.bf16 %v13416_v63, %v13412_v59  ;;  %v4909_v63 = vsub.f32 %v13504_v37, %v13684_v31 }
 0xa8d   :  { %9971 = vmatpush3.bf16.msra.mxu1 %v13563_v41  ;;  %v9926_v53 = vpop.f32.mrb[76].mxu1  ;;  %9958 = vmatprep.mubr.msk.bf16.mxu1 %vm908_vm1, %v15996_v62  ;;  %v4836_v33 = vpop.xlane.xlu0 %4835  ;;  %v5014_v42 = vsel %vm1479_vm3, %v13726_v11, 0.0 }
 0xa8e   :  { %10870 = vpow2.f32 %v4958_v38  ;;  %10068 = vmatprep.subr.bf16.mxu1 %v13425_v36  ;;  %5021 = vadd.xlane.f32.xlu0 %v5020_v14  ;;  %v4914_v49 = vsub.f32 %v13540_v13, %v4836_v33  ;;  %v3700_v1 = vpop.f32.mrb[77].mxu1  ;;  %v4827_v38 = vpop.xlane.xlu1 %4826 }
 0xa8f   :  { %v9927_v41 = vpop.f32.mrb[78].mxu1 }
 0xa90   :  { %v4954_v54 = vmul.f32 1.442695, %v4914_v49  ;;  %v3791_v45 = vpack.c.bf16 %v9927_v41, %v9926_v53  ;;  %5546 = vrot.lane.b32.xlu1 %v15967_v12, %s11219_s16  ;;  %v3703_v48 = vpop.f32.mrb[79].mxu1  ;;  %v15998_v49 = vpack.c.bf16 %v13442_v3, %v13433_v9  ;;  %v4913_v9 = vsub.f32 %v13520_v20, %v4833_v6 }
 0xa91   :  { %v3790_v29 = vpack.c.bf16 %v3703_v48, %v3700_v1  ;;  %v4944_v48 = vmul.f32 1.442695, %v4909_v63 }
 0xa92   :  { %10872 = vpow2.f32 %v4954_v54  ;;  %5015 = vadd.xlane.f32.xlu0 %v5014_v42  ;;  %v4845_v13 = vpop.xlane.xlu1 %4844  ;;  %v4907_v54 = vsub.f32 %v13496_v51, %v4815_v34  ;;  %v16001_v42 = vld [vmem:[#allocation31_spill] sm:$0xff]  ;;  %v4952_v34 = vmul.f32 1.442695, %v4913_v9  ;;  %v4911_v51 = vsub.f32 %v13526_v0, %v4827_v38 }
 0xa93   :  { %10874 = vpow2.f32 %v4944_v48  ;;  %v16006_v48 = vld [vmem:[#allocation42_spill] sm:$0xff] }
 0xa94   :  { %9959 = vmatmul.mubr.msk.bf16.gmra.mrb[84].mxu1 %vm908_vm1, %v15997_v27  ;;  %v4940_v31 = vmul.f32 1.442695, %v4907_v54  ;;  %v4948_v54 = vmul.f32 1.442695, %v4911_v51  ;;  %v16012_v51 = vld [vmem:[#allocation46_spill] sm:$0xff] }
 0xa95   :  { %9962 = vmatprep.mubr.msk.bf16.mxu1 %vm908_vm1, %v3790_v29  ;;  %v16000_v29 = vld [vmem:[#allocation38_spill] sm:$0xff] }
 0xa96   :  { %v4839_v33 = vpop.xlane.xlu1 %4838  ;;  %v16002_v27 = vpack.c.bf16 %v16000_v29, %v16001_v42  ;;  %10876 = vpow2.f32 %v4940_v31  ;;  %v16010_v31 = vld [vmem:[#allocation39_spill] sm:$0xff] }
 0xa97   :  { %10878 = vpow2.f32 %v4952_v34 }
 0xa98   :  { %v13739_v53 = vpop.eup %10870 }
 0xa99   :  { %v5032_v62 = vsel %vm1479_vm3, %v13739_v53, 0.0  ;;  %v4854_v1 = vpop.xlane.xlu0 %4853 }
 0xa9a   :  { %5033 = vadd.xlane.f32.xlu0 %v5032_v62 }
 0xa9b   :  { %v13754_v41 = vpop.xlane.xlu1 %4856 }
 0xa9c   :  { %v13743_v14 = vpop.eup %10872  ;;  %9963 = vmatmul.mubr.msk.bf16.gmra.mrb[88].mxu1 %vm908_vm1, %v3791_v45  ;;  %v15999_v45 = vpack.c.bf16 %v13436_v60, %v13430_v56 }
 0xa9d   :  { %9966 = vmatprep.mubr.msk.bf16.mxu1 %vm908_vm1, %v15998_v49  ;;  %v5026_v59 = vsel %vm1479_vm3, %v13743_v14, 0.0  ;;  %v13762_v3 = vpop.xlane.xlu0 %4847  ;;  %v16003_v49 = vld [vmem:[#allocation37_spill] sm:$0xff]  ;;  %v13785_v9 = vpop.eup %10874 }
 0xa9e   :  { %5027 = vadd.xlane.f32.xlu0 %v5026_v59  ;;  %v16004_v59 = vld [vmem:[#allocation10_spill] sm:$0xff] }
 0xa9f   :  { %v13768_v37 = vpop.xlane.xlu1 %4850  ;;  %v16005_v63 = vpack.c.bf16 %v16003_v49, %v16004_v59 }
 0xaa4   :  { %9967 = vmatmul.mubr.msk.bf16.gmra.mrb[92].mxu1 %vm908_vm1, %v15999_v45  ;;  %v16007_v45 = vld [vmem:[#allocation40_spill] sm:$0xff] }
 0xaa5   :  { %9972 = vmatprep.mubr.msk.bf16.mxu1 %vm908_vm1, %v16002_v27  ;;  %v16008_v0 = vpack.c.bf16 %v16006_v48, %v16007_v45  ;;  %v4915_v27 = vsub.f32 %v13550_v8, %v4839_v33 }
 0xaa7   :  { %v4956_v33 = vmul.f32 1.442695, %v4915_v27 }
 0xaa9   :  { %v4866_v62 = vpop.xlane.xlu0 %4865 }
 0xaaa   :  { %v4924_v56 = vsub.f32 %v13588_v15, %v4866_v62  ;;  %v4917_v15 = vsub.f32 %v13544_v35, %v4845_v13  ;;  %v5011_v35 = vsel %vm1479_vm3, %v13785_v9, 0.0  ;;  %v13792_v13 = vpop.eup %10876  ;;  %v16013_v62 = vld [vmem:[#allocation44_spill] sm:$0xff] }
 0xaab   :  { %v4869_v60 = vpop.xlane.xlu1 %4868  ;;  %v16014_v8 = vpack.c.bf16 %v16012_v51, %v16013_v62 }
 0xaac   :  { %v4974_v20 = vmul.f32 1.442695, %v4924_v56  ;;  %v4925_v6 = vsub.f32 %v13598_v44, %v4869_v60  ;;  %9973 = vmatmul.mubr.msk.bf16.vlgmr.msra.gmra.mrb[96].mxu1 %vm908_vm1, %v16005_v63  ;;  %v13803_v56 = vpop.eup %10878 }
 0xaad   :  { %10069 = vmatpush3.bf16.msra.mxu1 %v13425_v36  ;;  %9976 = vmatprep.mubr.msk.bf16.mxu1 %vm908_vm1, %v16008_v0  ;;  %v4860_v38 = vpop.xlane.xlu0 %4859  ;;  %v4960_v36 = vmul.f32 1.442695, %v4917_v15  ;;  %v5023_v45 = vsel %vm1479_vm3, %v13803_v56, 0.0 }
 0xaae   :  { %10880 = vpow2.f32 %v4974_v20  ;;  %10070 = vmatprep.subr.bf16.mxu1 %v13678_v10  ;;  %v4922_v44 = vsub.f32 %v13594_v18, %v4860_v38  ;;  %v4976_v29 = vmul.f32 1.442695, %v4925_v6  ;;  %v16009_v18 = vld [vmem:[#allocation41_spill] sm:$0xff]  ;;  %v5005_v20 = vsel %vm1479_vm3, %v13792_v13, 0.0 }
 0xaaf   :  { %10882 = vpow2.f32 %v4948_v54  ;;  %v16011_v34 = vpack.c.bf16 %v16009_v18, %v16010_v31  ;;  %v4863_v60 = vpop.xlane.xlu1 %4862 }
 0xab0   :  { %v4970_v42 = vmul.f32 1.442695, %v4922_v44  ;;  %v16015_v44 = vld [vmem:[#allocation45_spill] sm:$0xff] }
 0xab1   :  { %10071 = vmatpush3.bf16.msra.mxu1 %v13678_v10  ;;  %v4920_v10 = vsub.f32 %v13558_v16, %v4854_v1  ;;  %v4918_v1 = vsub.f32 %v13569_v5, %v13762_v3  ;;  %v16018_v5 = vld [vmem:[#allocation50_spill] sm:$0xff] }
 0xab2   :  { %10884 = vpow2.f32 %v4970_v42  ;;  %10084 = vmatprep.subr.bf16.mxu1 %v13681_v21 }
 0xab3   :  { %10886 = vpow2.f32 %v4976_v29  ;;  %v4966_v49 = vmul.f32 1.442695, %v4920_v10  ;;  %v16016_v29 = vld [vmem:[#allocation43_spill] sm:$0xff] }
 0xab4   :  { %9977 = vmatmul.mubr.msk.bf16.gmra.mrb[100].mxu1 %vm908_vm1, %v16011_v34  ;;  %5012 = vadd.xlane.f32.xlu1 %v5011_v35  ;;  %10888 = vpow2.f32 %v4960_v36  ;;  %v16017_v42 = vpack.c.bf16 %v16015_v44, %v16016_v29  ;;  %v4962_v35 = vmul.f32 1.442695, %v4918_v1  ;;  %v16024_v1 = vld [vmem:[#allocation54_spill] sm:$0xff] }
 0xab5   :  { %9980 = vmatprep.mubr.msk.bf16.mxu1 %vm908_vm1, %v16014_v8  ;;  %10890 = vpow2.f32 %v4956_v33 }
 0xab6   :  { %10892 = vpow2.f32 %v4966_v49  ;;  %v16021_v49 = vld [vmem:[#allocation49_spill] sm:$0xff] }
 0xab8   :  { %v13807_v6 = vpop.eup %10880  ;;  %5006 = vadd.xlane.f32.xlu1 %v5005_v20 }
 0xab9   :  { %v4878_v59 = vpop.xlane.xlu0 %4877  ;;  %v5056_v16 = vsel %vm1479_vm3, %v13807_v6, 0.0  ;;  %v13814_v54 = vpop.eup %10882 }
 0xaba   :  { %v4928_v63 = vsub.f32 %v13612_v47, %v4878_v59  ;;  %5057 = vadd.xlane.f32.xlu0 %v5056_v16  ;;  %v16019_v47 = vld [vmem:[#allocation48_spill] sm:$0xff]  ;;  %v5017_v34 = vsel %vm1479_vm3, %v13814_v54, 0.0  ;;  %v16022_v59 = vld [vmem:[#allocation47_spill] sm:$0xff] }
 0xabb   :  { %v4881_v48 = vpop.xlane.xlu1 %4880  ;;  %v16020_v3 = vpack.c.bf16 %v16018_v5, %v16019_v47 }
 0xabc   :  { %v13818_v0 = vpop.eup %10884  ;;  %v4982_v38 = vmul.f32 1.442695, %v4928_v63  ;;  %v4929_v15 = vsub.f32 %v13622_v39, %v4881_v48  ;;  %9981 = vmatmul.mubr.msk.bf16.gmra.mrb[104].mxu1 %vm908_vm1, %v16017_v42  ;;  %5024 = vadd.xlane.f32.xlu1 %v5023_v45  ;;  %v4921_v39 = vsub.f32 %v13573_v17, %v13754_v41  ;;  %v4919_v17 = vsub.f32 %v13580_v19, %v13768_v37  ;;  %v16025_v63 = vld [vmem:[#allocation52_spill] sm:$0xff] }
 0xabd   :  { %9984 = vmatprep.mubr.msk.bf16.mxu1 %vm908_vm1, %v16020_v3  ;;  %v5050_v36 = vsel %vm1479_vm3, %v13818_v0, 0.0  ;;  %v13831_v27 = vpop.eup %10886  ;;  %v4872_v16 = vpop.xlane.xlu0 %4871  ;;  %v16026_v48 = vpack.c.bf16 %v16024_v1, %v16025_v63  ;;  %v4923_v37 = vsub.f32 %v13604_v50, %v4863_v60 }
 0xabe   :  { %10894 = vpow2.f32 %v4982_v38  ;;  %v4984_v18 = vmul.f32 1.442695, %v4929_v15  ;;  %5051 = vadd.xlane.f32.xlu0 %v5050_v36  ;;  %v13837_v10 = vpop.eup %10888  ;;  %v5059_v62 = vsel %vm1479_vm3, %v13831_v27, 0.0  ;;  %v4968_v8 = vmul.f32 1.442695, %v4921_v39  ;;  %v16027_v39 = vld [vmem:[#allocation53_spill] sm:$0xff] }
 0xabf   :  { %v4875_v31 = vpop.xlane.xlu1 %4874  ;;  %v5035_v33 = vsel %vm1479_vm3, %v13837_v10, 0.0  ;;  %v13846_v20 = vpop.eup %10890  ;;  %v4964_v19 = vmul.f32 1.442695, %v4919_v17  ;;  %v4972_v5 = vmul.f32 1.442695, %v4923_v37  ;;  %v4926_v47 = vsub.f32 %v13618_v32, %v4872_v16  ;;  %v16033_v37 = vld [vmem:[#allocation57_spill] sm:$0xff] }
 0xac0   :  { %10896 = vpow2.f32 %v4984_v18  ;;  %v4927_v51 = vsub.f32 %v13628_v2, %v4875_v31  ;;  %5018 = vadd.xlane.f32.xlu1 %v5017_v34  ;;  %v16023_v2 = vpack.c.bf16 %v16021_v49, %v16022_v59  ;;  %v13857_v45 = vpop.eup %10892  ;;  %v5029_v38 = vsel %vm1479_vm3, %v13846_v20, 0.0  ;;  %v16030_v31 = vld [vmem:[#allocation58_spill] sm:$0xff]  ;;  %v16031_v34 = vld [vmem:[#allocation56_spill] sm:$0xff] }
 0xac1   :  { %10898 = vpow2.f32 %v4962_v35  ;;  %v5044_v60 = vsel %vm1479_vm3, %v13857_v45, 0.0  ;;  %v16028_v35 = vld [vmem:[#allocation51_spill] sm:$0xff] }
 0xac2   :  { %v4980_v41 = vmul.f32 1.442695, %v4927_v51  ;;  %5060 = vadd.xlane.f32.xlu0 %v5059_v62  ;;  %v16029_v18 = vpack.c.bf16 %v16027_v39, %v16028_v35  ;;  %v16032_v51 = vpack.c.bf16 %v16030_v31, %v16031_v34 }
 0xac4   :  { %10900 = vpow2.f32 %v4980_v41  ;;  %9985 = vmatmul.mubr.msk.bf16.gmra.mrb[108].mxu1 %vm908_vm1, %v16023_v2  ;;  %5036 = vadd.xlane.f32.xlu1 %v5035_v33 }
 0xac5   :  { %9988 = vmatprep.mubr.msk.bf16.mxu1 %vm908_vm1, %v16026_v48  ;;  %10902 = vpow2.f32 %v4968_v8  ;;  %v4978_v8 = vmul.f32 1.442695, %v4926_v47 }
 0xac6   :  { %10904 = vpow2.f32 %v4964_v19 }
 0xac7   :  { %10906 = vpow2.f32 %v4972_v5 }
 0xac8   :  { %v13861_v15 = vpop.eup %10894  ;;  %5030 = vadd.xlane.f32.xlu1 %v5029_v38  ;;  %v16034_v38 = vld [vmem:[#allocation55_spill] sm:$0xff] }
 0xac9   :  { %v4890_v44 = vpop.xlane.xlu0 %4889  ;;  %v5068_v29 = vsel %vm1479_vm3, %v13861_v15, 0.0 }
 0xaca   :  { %v13865_v42 = vpop.eup %10896  ;;  %5069 = vadd.xlane.f32.xlu0 %v5068_v29  ;;  %v16037_v29 = vld [vmem:[#allocation60_spill] sm:$0xff] }
 0xacb   :  { %v4893_v50 = vpop.xlane.xlu1 %4892  ;;  %v13870_v3 = vpop.eup %10898  ;;  %v5071_v32 = vsel %vm1479_vm3, %v13865_v42, 0.0 }
 0xacc   :  { %v4933_v36 = vsub.f32 %v13646_v43, %v4893_v50  ;;  %9989 = vmatmul.mubr.msk.bf16.gmra.mrb[80].mxu1 %vm908_vm1, %v16029_v18  ;;  %5045 = vadd.xlane.f32.xlu1 %v5044_v60  ;;  %v4932_v43 = vsub.f32 %v13636_v58, %v4890_v44  ;;  %v5038_v49 = vsel %vm1479_vm3, %v13870_v3, 0.0  ;;  %v16035_v44 = vpack.c.bf16 %v16033_v37, %v16034_v38  ;;  %v16045_v37 = vld [vmem:[#allocation65_spill] sm:$0xff]  ;;  %v16046_v38 = vld [vmem:[#allocation63_spill] sm:$0xff] }
 0xacd   :  { %9992 = vmatprep.mubr.msk.bf16.mxu1 %vm908_vm1, %v16032_v51  ;;  %v4884_v41 = vpop.xlane.xlu0 %4883  ;;  %v16039_v51 = vld [vmem:[#allocation61_spill] sm:$0xff] }
 0xace   :  { %v13883_v62 = vpop.eup %10900  ;;  %v4992_v17 = vmul.f32 1.442695, %v4933_v36  ;;  %5072 = vadd.xlane.f32.xlu0 %v5071_v32  ;;  %v4990_v1 = vmul.f32 1.442695, %v4932_v43  ;;  %v4930_v58 = vsub.f32 %v13642_v46, %v4884_v41  ;;  %v16040_v32 = vld [vmem:[#allocation59_spill] sm:$0xff]  ;;  %v16042_v43 = vld [vmem:[#allocation66_spill] sm:$0xff] }
 0xacf   :  { %v4887_v33 = vpop.xlane.xlu1 %4886  ;;  %v13888_v59 = vpop.eup %10902  ;;  %v5065_v16 = vsel %vm1479_vm3, %v13883_v62, 0.0 }
 0xad0   :  { %10908 = vpow2.f32 %v4992_v17  ;;  %v4931_v2 = vsub.f32 %v13652_v55, %v4887_v33  ;;  %5039 = vadd.xlane.f32.xlu1 %v5038_v49  ;;  %v5047_v48 = vsel %vm1479_vm3, %v13888_v59, 0.0  ;;  %v13896_v19 = vpop.eup %10904  ;;  %v16036_v55 = vld [vmem:[#allocation62_spill] sm:$0xff]  ;;  %v4986_v46 = vmul.f32 1.442695, %v4930_v58  ;;  %v16043_v17 = vld [vmem:[#allocation64_spill] sm:$0xff] }
 0xad1   :  { %10910 = vpow2.f32 %v4978_v8  ;;  %v16038_v5 = vpack.c.bf16 %v16036_v55, %v16037_v29  ;;  %v5041_v47 = vsel %vm1479_vm3, %v13896_v19, 0.0  ;;  %v13908_v50 = vpop.eup %10906  ;;  %v16041_v8 = vpack.c.bf16 %v16039_v51, %v16040_v32 }
 0xad2   :  { %v4988_v63 = vmul.f32 1.442695, %v4931_v2  ;;  %5066 = vadd.xlane.f32.xlu0 %v5065_v16  ;;  %v5053_v35 = vsel %vm1479_vm3, %v13908_v50, 0.0  ;;  %v16044_v41 = vpack.c.bf16 %v16042_v43, %v16043_v17  ;;  %v16049_v43 = vld [vmem:[#allocation18_spill] sm:$0xff] }
 0xad4   :  { %10912 = vpow2.f32 %v4988_v63  ;;  %9993 = vmatmul.mubr.msk.bf16.gmra.mrb[84].mxu1 %vm908_vm1, %v16035_v44  ;;  %5048 = vadd.xlane.f32.xlu1 %v5047_v48 }
 0xad5   :  { %9996 = vmatprep.mubr.msk.bf16.mxu1 %vm908_vm1, %v16038_v5  ;;  %10914 = vpow2.f32 %v4990_v1 }
 0xad6   :  { %10916 = vpow2.f32 %v4986_v46 }
 0xad8   :  { %5042 = vadd.xlane.f32.xlu1 %v5041_v47  ;;  %v13954_v47 = vpop.permute.xlu1 %5485 }
 0xad9   :  { %v4902_v60 = vpop.xlane.xlu0 %4901 }
 0xada   :  { %v13910_v36 = vpop.eup %10908  ;;  %v4936_v39 = vsub.f32 %v13660_v25, %v4902_v60 }
 0xadb   :  { %v5083_v18 = vsel %vm1479_vm3, %v13910_v36, 0.0  ;;  %v13917_v31 = vpop.eup %10910 }
 0xadc   :  { %v4998_v34 = vmul.f32 1.442695, %v4936_v39  ;;  %9997 = vmatmul.mubr.msk.bf16.gmra.mrb[88].mxu1 %vm908_vm1, %v16041_v8  ;;  %5054 = vadd.xlane.f32.xlu1 %v5053_v35  ;;  %v5062_v16 = vsel %vm1479_vm3, %v13917_v31, 0.0  ;;  %v13958_v60 = vpop.permute.xlu1 %5544 }
 0xadd   :  { %5084 = vadd.xlane.f32.xlu0 %v5083_v18  ;;  %10000 = vmatprep.mubr.msk.bf16.mxu1 %vm908_vm1, %v16044_v41  ;;  %v4896_v25 = vpop.xlane.xlu0 %4895  ;;  %v16050_v41 = vld [vmem:[#allocation22_spill] sm:$0xff] }
 0xade   :  { %v13927_v33 = vpop.eup %10912  ;;  %10918 = vpow2.f32 %v4998_v34  ;;  %v4934_v49 = vsub.f32 %v13666_v61, %v4896_v25  ;;  %v16047_v61 = vpack.c.bf16 %v16045_v37, %v16046_v38  ;;  %v16054_v38 = vld [vmem:[#allocation5_spill] sm:$0xff] }
 0xadf   :  { %v5077_v2 = vsel %vm1479_vm3, %v13927_v33, 0.0  ;;  %v13934_v1 = vpop.eup %10914 }
 0xae0   :  { %v4994_v58 = vmul.f32 1.442695, %v4934_v49  ;;  %5063 = vadd.xlane.f32.xlu1 %v5062_v16  ;;  %v5080_v63 = vsel %vm1479_vm3, %v13934_v1, 0.0  ;;  %v13938_v48 = vpop.eup %10916  ;;  %v16051_v49 = vld [vmem:[#allocation29_spill] sm:$0xff] }
 0xae1   :  { %5078 = vadd.xlane.f32.xlu0 %v5077_v2  ;;  %v5074_v44 = vsel %vm1479_vm3, %v13938_v48, 0.0  ;;  %v13988_v17 = vpop.permute.xlu0 %5483  ;;  %v16052_v2 = vld [vmem:[#allocation26_spill] sm:$0xff] }
 0xae2   :  { %10920 = vpow2.f32 %v4994_v58  ;;  %v16053_v58 = vld [vmem:[#allocation2_spill] sm:$0xff] }
 0xae4   :  { %10001 = vmatmul.mubr.msk.bf16.gmra.mrb[92].mxu1 %vm908_vm1, %v16047_v61  ;;  %5081 = vadd.xlane.f32.xlu1 %v5080_v63 }
 0xae8   :  { %v13946_v55 = vpop.eup %10918  ;;  %5075 = vadd.xlane.f32.xlu1 %v5074_v44 }
 0xae9   :  { %v5092_v29 = vsel %vm1479_vm3, %v13946_v55, 0.0 }
 0xaec   :  { %v13950_v5 = vpop.eup %10920  ;;  %5093 = vadd.xlane.f32.xlu1 %v5092_v29 }
 0xaed   :  { %v5086_v46 = vsel %vm1479_vm3, %v13950_v5, 0.0 }
 0xaf0   :  { %5087 = vadd.xlane.f32.xlu1 %v5086_v46 }
 0xb01   :  { %5607 = vrot.lane.b32.xlu1 %v15916_v22, %s11219_s16 }
 0xb05   :  { %5937 = vrot.lane.b32.xlu1 %v11873_v24, %s11220_s21 }
 0xb08   :  { %v4905_v39 = vpop.xlane.xlu1 %4904 }
 0xb09   :  { %v4937_v35 = vsub.f32 %v13688_v23, %v4905_v39  ;;  %5933 = vrot.lane.b32.xlu1 %v11873_v24, %s11221_s22  ;;  %v16055_v39 = vld [vmem:[#allocation8_spill] sm:$0xff] }
 0xb0b   :  { %v5000_v18 = vmul.f32 1.442695, %v4937_v35 }
 0xb0c   :  { %v4899_v34 = vpop.xlane.xlu1 %4898 }
 0xb0d   :  { %10922 = vpow2.f32 %v5000_v18  ;;  %v4935_v51 = vsub.f32 %v13697_v4, %v4899_v34  ;;  %6006 = vrot.lane.b32.xlu1 %v11887_v28, %s11220_s21 }
 0xb0f   :  { %v4996_v32 = vmul.f32 1.442695, %v4935_v51 }
 0xb10   :  { %v14006_v63 = vpop.permute.xlu1 %5546 }
 0xb11   :  { %10924 = vpow2.f32 %v4996_v32  ;;  %6002 = vrot.lane.b32.xlu1 %v11887_v28, %s11221_s22  ;;  %v16048_v28 = vld [vmem:[#allocation14_spill] sm:$0xff] }
 0xb15   :  { %6075 = vrot.lane.b32.xlu1 %v15904_v40, %s11220_s21 }
 0xb17   :  { %v13972_v23 = vpop.eup %10922 }
 0xb18   :  { %v5095_v24 = vsel %vm1479_vm3, %v13972_v23, 0.0 }
 0xb19   :  { %5096 = vadd.xlane.f32.xlu0 %v5095_v24  ;;  %6071 = vrot.lane.b32.xlu1 %v15904_v40, %s11221_s22  ;;  %v5010_v40 = vpop.xlane.xlu0 %5009  ;;  %v16057_v24 = vld [vmem:[#allocation12_spill] sm:$0xff] }
 0xb1b   :  { %v13978_v4 = vpop.eup %10924 }
 0xb1c   :  { %v5089_v8 = vsel %vm1479_vm3, %v13978_v4, 0.0 }
 0xb1d   :  { %5090 = vadd.xlane.f32.xlu0 %v5089_v8  ;;  %6144 = vrot.lane.b32.xlu1 %v16048_v28, %s11220_s21  ;;  %v5004_v25 = vpop.xlane.xlu0 %5003 }
 0xb21   :  { %6140 = vrot.lane.b32.xlu1 %v16048_v28, %s11221_s22  ;;  %v5022_v16 = vpop.xlane.xlu0 %5021 }
 0xb25   :  { %6213 = vrot.lane.b32.xlu1 %v16049_v43, %s11220_s21  ;;  %v5016_v37 = vpop.xlane.xlu0 %5015 }
 0xb29   :  { %6209 = vrot.lane.b32.xlu1 %v16049_v43, %s11221_s22  ;;  %v5034_v61 = vpop.xlane.xlu0 %5033 }
 0xb2d   :  { %6282 = vrot.lane.b32.xlu1 %v16050_v41, %s11220_s21  ;;  %v5028_v46 = vpop.xlane.xlu0 %5027 }
 0xb31   :  { %6278 = vrot.lane.b32.xlu1 %v16050_v41, %s11221_s22 }
 0xb33   :  { %5605 = vrot.lane.b32.xlu0 %v16051_v49, %s11219_s16 }
 0xb35   :  { %6351 = vrot.lane.b32.xlu1 %v16052_v2, %s11220_s21 }
 0xb37   :  { %5935 = vrot.lane.b32.xlu0 %v16053_v58, %s11220_s21 }
 0xb39   :  { %6347 = vrot.lane.b32.xlu1 %v16052_v2, %s11221_s22  ;;  %v16059_v2 = vld [vmem:[#allocation83_spill] sm:$0xff] }
 0xb3b   :  { %5931 = vrot.lane.b32.xlu0 %v16053_v58, %s11221_s22 }
 0xb3d   :  { %6420 = vrot.lane.b32.xlu1 %v15958_v26, %s11220_s21 }
 0xb3f   :  { %6004 = vrot.lane.b32.xlu0 %v16054_v38, %s11220_s21 }
 0xb41   :  { %v5013_v44 = vpop.xlane.xlu1 %5012  ;;  %6416 = vrot.lane.b32.xlu1 %v15958_v26, %s11221_s22 }
 0xb42   :  { %10926 = vrcp.f32 %v5013_v44 }
 0xb43   :  { %6000 = vrot.lane.b32.xlu0 %v16054_v38, %s11221_s22  ;;  %10928 = vrcp.f32 %v5004_v25 }
 0xb44   :  { %10930 = vrcp.f32 %v5010_v40  ;;  %v16058_v40 = vld [vmem:[#allocation15_spill] sm:$0xff] }
 0xb45   :  { %v5007_v29 = vpop.xlane.xlu1 %5006  ;;  %6885 = vrot.lane.b32.xlu1 %v15969_v52, %s11221_s22  ;;  %v16056_v52 = vld [vmem:[#allocation11_spill] sm:$0xff] }
 0xb46   :  { %10932 = vrcp.f32 %v5007_v29  ;;  %v16060_v29 = vld [vmem:[#allocation16_spill] sm:$0xff] }
 0xb47   :  { %6073 = vrot.lane.b32.xlu0 %v16055_v39, %s11220_s21  ;;  %v14022_v26 = vpop.xlane.xlu0 %5057 }
 0xb49   :  { %v5025_v35 = vpop.xlane.xlu1 %5024  ;;  %6946 = vrot.lane.b32.xlu1 %v15970_v57, %s11221_s22 }
 0xb4a   :  { %10934 = vrcp.f32 %v5025_v35  ;;  %v16061_v35 = vld [vmem:[#allocation81_spill] sm:$0xff] }
 0xb4b   :  { %6069 = vrot.lane.b32.xlu0 %v16055_v39, %s11221_s22  ;;  %10936 = vrcp.f32 %v5016_v37  ;;  %v14031_v28 = vpop.xlane.xlu0 %5051 }
 0xb4c   :  { %v10927_v18 = vpop.eup %10926  ;;  %10938 = vrcp.f32 %v5022_v16 }
 0xb4d   :  { %v5019_v34 = vpop.xlane.xlu1 %5018  ;;  %7007 = vrot.lane.b32.xlu1 %v16056_v52, %s11221_s22  ;;  %v10929_v51 = vpop.eup %10928  ;;  %v5133_v8 = vmul.f32 %v10927_v18, %v13785_v9 }
 0xb4e   :  { %10940 = vrcp.f32 %v5019_v34  ;;  %v10931_v32 = vpop.eup %10930  ;;  %v5130_v41 = vmul.f32 %v10929_v51, %v13710_v30 }
 0xb4f   :  { %6142 = vrot.lane.b32.xlu0 %v16057_v24, %s11220_s21  ;;  %v5132_v16 = vmul.f32 %v10931_v32, %v16059_v2  ;;  %v16062_v32 = vld [vmem:[#allocation80_spill] sm:$0xff] }
 0xb50   :  { %v10933_v57 = vpop.eup %10932 }
 0xb51   :  { %v5037_v43 = vpop.xlane.xlu1 %5036  ;;  %7068 = vrot.lane.b32.xlu1 %v16058_v40, %s11221_s22  ;;  %v5131_v25 = vmul.f32 %v10933_v57, %v13792_v13  ;;  %v5163_v37 = vpack.c.bf16 %v5133_v8, %v5132_v16  ;;  %v5061_v13 = vpop.xlane.xlu0 %5060 }
 0xb52   :  { %10942 = vrcp.f32 %v5037_v43 }
 0xb53   :  { %6138 = vrot.lane.b32.xlu0 %v16057_v24, %s11221_s22  ;;  %v5162_v58 = vpack.c.bf16 %v5131_v25, %v5130_v41  ;;  %10944 = vrcp.f32 %v5028_v46  ;;  %v16065_v41 = vld [vmem:[#allocation82_spill] sm:$0xff] }
 0xb54   :  { %v10935_v9 = vpop.eup %10934  ;;  %10946 = vrcp.f32 %v5034_v61 }
 0xb55   :  { %v5031_v38 = vpop.xlane.xlu1 %5030  ;;  %10072 = vmatprep.mubr.msk.bf16.mxu1 %vm1479_vm3, %v5162_v58  ;;  %v10937_v44 = vpop.eup %10936  ;;  %v5137_v46 = vmul.f32 %v10935_v9, %v13803_v56 }
 0xb56   :  { %10948 = vrcp.f32 %v5031_v38  ;;  %10073 = vmatmul.mubr.msk.bf16.vlgmr.msra.gmra.mrb[112].mxu1 %vm1479_vm3, %v5163_v37  ;;  %v10939_v30 = vpop.eup %10938  ;;  %v5134_v18 = vmul.f32 %v10937_v44, %v13726_v11 }
 0xb57   :  { %10085 = vmatpush3.bf16.msra.mxu1 %v13681_v21  ;;  %6211 = vrot.lane.b32.xlu0 %v16060_v29, %s11220_s21  ;;  %v5136_v52 = vmul.f32 %v10939_v30, %v13714_v7  ;;  %v5070_v51 = vpop.xlane.xlu0 %5069  ;;  %v16064_v7 = vld [vmem:[#allocation20_spill] sm:$0xff] }
 0xb58   :  { %v10941_v39 = vpop.eup %10940  ;;  %10086 = vmatprep.subr.bf16.mxu1 %v16061_v35 }
 0xb59   :  { %v5046_v61 = vpop.xlane.xlu1 %5045  ;;  %v5135_v34 = vmul.f32 %v10941_v39, %v13814_v54  ;;  %v5165_v24 = vpack.c.bf16 %v5137_v46, %v5136_v52  ;;  %v16063_v54 = vld [vmem:[#allocation30_spill] sm:$0xff] }
 0xb5b   :  { %10087 = vmatpush3.bf16.msra.mxu1 %v16061_v35  ;;  %6207 = vrot.lane.b32.xlu0 %v16060_v29, %s11221_s22  ;;  %v5164_v21 = vpack.c.bf16 %v5135_v34, %v5134_v18  ;;  %v5073_v25 = vpop.xlane.xlu0 %5072 }
 0xb5c   :  { %10100 = vmatprep.subr.bf16.mxu1 %v16062_v32  ;;  %v10943_v56 = vpop.eup %10942 }
 0xb5d   :  { %v5040_v57 = vpop.xlane.xlu1 %5039  ;;  %10080 = vmatprep.mubr.msk.bf16.mxu0 %vm1479_vm3, %v5164_v21  ;;  %v10945_v8 = vpop.eup %10944  ;;  %v5141_v40 = vmul.f32 %v10943_v56, %v13837_v10 }
 0xb5e   :  { %10081 = vmatmul.mubr.msk.bf16.vlgmr.msra.gmra.mrb[160].mxu0 %vm1479_vm3, %v5165_v24  ;;  %v10947_v11 = vpop.eup %10946  ;;  %v5138_v16 = vmul.f32 %v10945_v8, %v13743_v14  ;;  %v16066_v14 = vld [vmem:[#allocation24_spill] sm:$0xff] }
 0xb5f   :  { %10093 = vmatpush3.bf16.msra.mxu0 %v16063_v54  ;;  %6280 = vrot.lane.b32.xlu0 %v16064_v7, %s11220_s21  ;;  %v5140_v37 = vmul.f32 %v10947_v11, %v13739_v53  ;;  %v5067_v53 = vpop.xlane.xlu0 %5066 }
 0xb60   :  { %v10949_v43 = vpop.eup %10948  ;;  %10094 = vmatprep.subr.bf16.mxu0 %v16065_v41 }
 0xb61   :  { %v5049_v2 = vpop.xlane.xlu1 %5048  ;;  %v5139_v58 = vmul.f32 %v10949_v43, %v13846_v20  ;;  %v5167_v10 = vpack.c.bf16 %v5141_v40, %v5140_v37  ;;  %v16067_v20 = vld [vmem:[#allocation84_spill] sm:$0xff]  ;;  %v16071_v37 = vld [vmem:[#allocation9_spill] sm:$0xff] }
 0xb62   :  { %10950 = vrcp.f32 %v5049_v2 }
 0xb63   :  { %10095 = vmatpush3.bf16.msra.mxu0 %v16065_v41  ;;  %6276 = vrot.lane.b32.xlu0 %v16064_v7, %s11221_s22  ;;  %v5166_v9 = vpack.c.bf16 %v5139_v58, %v5138_v16  ;;  %10952 = vrcp.f32 %v5040_v57 }
 0xb64   :  { %10108 = vmatprep.subr.bf16.mxu0 %v13988_v17  ;;  %10954 = vrcp.f32 %v5046_v61 }
 0xb65   :  { %v5043_v38 = vpop.xlane.xlu1 %5042  ;;  %10088 = vmatprep.mubr.msk.bf16.mxu1 %vm1479_vm3, %v5166_v9 }
 0xb66   :  { %10956 = vrcp.f32 %v5043_v38  ;;  %10089 = vmatmul.mubr.msk.bf16.vlgmr.msra.gmra.mrb[116].mxu1 %vm1479_vm3, %v5167_v10 }
 0xb67   :  { %10958 = vrcp.f32 %v5061_v13  ;;  %10101 = vmatpush3.bf16.msra.mxu1 %v16062_v32  ;;  %6349 = vrot.lane.b32.xlu0 %v16066_v14, %s11220_s21 }
 0xb68   :  { %10960 = vrcp.f32 %v14031_v28  ;;  %10102 = vmatprep.subr.bf16.mxu1 %v16067_v20 }
 0xb69   :  { %10962 = vrcp.f32 %v14022_v26  ;;  %v5055_v44 = vpop.xlane.xlu1 %5054  ;;  %v16068_v26 = vld [vmem:[#allocation28_spill] sm:$0xff] }
 0xb6a   :  { %10964 = vrcp.f32 %v5055_v44  ;;  %v5085_v30 = vpop.xlane.xlu0 %5084 }
 0xb6b   :  { %10966 = vrcp.f32 %v5073_v25  ;;  %10103 = vmatpush3.bf16.msra.mxu1 %v16067_v20  ;;  %6345 = vrot.lane.b32.xlu0 %v16066_v14, %s11221_s22  ;;  %v16072_v14 = vld [vmem:[#allocation13_spill] sm:$0xff] }
 0xb6c   :  { %10968 = vrcp.f32 %v5067_v53  ;;  %10116 = vmatprep.subr.bf16.mxu1 %v13958_v60  ;;  %v10951_v13 = vpop.eup %10950 }
 0xb6d   :  { %10970 = vrcp.f32 %v5070_v51  ;;  %v5064_v29 = vpop.xlane.xlu1 %5063  ;;  %v10953_v28 = vpop.eup %10952  ;;  %v5145_v35 = vmul.f32 %v10951_v13, %v13888_v59 }
 0xb6e   :  { %10972 = vrcp.f32 %v5064_v29  ;;  %v10955_v39 = vpop.eup %10954  ;;  %v5079_v18 = vpop.xlane.xlu0 %5078  ;;  %v5142_v52 = vmul.f32 %v10953_v28, %v13870_v3 }
 0xb6f   :  { %6418 = vrot.lane.b32.xlu0 %v16068_v26, %s11220_s21  ;;  %v5144_v51 = vmul.f32 %v10955_v39, %v13857_v45 }
 0xb70   :  { %v10957_v46 = vpop.eup %10956 }
 0xb71   :  { %v10959_v61 = vpop.eup %10958  ;;  %v5082_v34 = vpop.xlane.xlu1 %5081  ;;  %v5143_v21 = vmul.f32 %v10957_v46, %v13896_v19  ;;  %v5169_v59 = vpack.c.bf16 %v5145_v35, %v5144_v51 }
 0xb72   :  { %v10961_v32 = vpop.eup %10960  ;;  %10974 = vrcp.f32 %v5082_v34  ;;  %v5149_v8 = vmul.f32 %v10959_v61, %v13831_v27  ;;  %v16069_v27 = vld [vmem:[#allocation3_spill] sm:$0xff] }
 0xb73   :  { %v10963_v24 = vpop.eup %10962  ;;  %6414 = vrot.lane.b32.xlu0 %v16068_v26, %s11221_s22  ;;  %v5168_v56 = vpack.c.bf16 %v5143_v21, %v5142_v52  ;;  %10976 = vrcp.f32 %v5079_v18  ;;  %v5146_v3 = vmul.f32 %v10961_v32, %v13818_v0 }
 0xb74   :  { %v10965_v57 = vpop.eup %10964  ;;  %10978 = vrcp.f32 %v5085_v30  ;;  %v5148_v7 = vmul.f32 %v10963_v24, %v13807_v6 }
 0xb75   :  { %v10967_v11 = vpop.eup %10966  ;;  %v5076_v54 = vpop.xlane.xlu1 %5075  ;;  %10096 = vmatprep.mubr.msk.bf16.mxu0 %vm1479_vm3, %v5168_v56  ;;  %v5147_v45 = vmul.f32 %v10965_v57, %v13908_v50 }
 0xb76   :  { %v10969_v19 = vpop.eup %10968  ;;  %10980 = vrcp.f32 %v5076_v54  ;;  %10097 = vmatmul.mubr.msk.bf16.vlgmr.msra.gmra.mrb[164].mxu0 %vm1479_vm3, %v5169_v59  ;;  %v5153_v25 = vmul.f32 %v10967_v11, %v13865_v42  ;;  %v5171_v0 = vpack.c.bf16 %v5149_v8, %v5148_v7  ;;  %v16070_v42 = vld [vmem:[#allocation6_spill] sm:$0xff] }
 0xb77   :  { %v10971_v43 = vpop.eup %10970  ;;  %10109 = vmatpush3.bf16.msra.mxu0 %v13988_v17  ;;  %6883 = vrot.lane.b32.xlu0 %v16069_v27, %s11221_s22  ;;  %v5170_v40 = vpack.c.bf16 %v5147_v45, %v5146_v3  ;;  %v5151_v50 = vmul.f32 %v10969_v19, %v13883_v62 }
 0xb78   :  { %v10973_v41 = vpop.eup %10972  ;;  %10110 = vmatprep.subr.bf16.mxu0 %v13954_v47  ;;  %v5152_v2 = vmul.f32 %v10971_v43, %v13861_v15 }
 0xb79   :  { %10104 = vmatprep.mubr.msk.bf16.mxu1 %vm1479_vm3, %v5170_v40  ;;  %v5150_v6 = vmul.f32 %v10973_v41, %v13917_v31  ;;  %v10512_v31 = vld [vmem:[%s15713_s4 + $0x10] sm:$0xff]  }
 0xb7a   :  { %10105 = vmatmul.mubr.msk.bf16.vlgmr.msra.gmra.mrb[120].mxu1 %vm1479_vm3, %v5171_v0  ;;  %v5173_v16 = vpack.c.bf16 %v5153_v25, %v5152_v2 }
 0xb7b   :  { %10111 = vmatpush3.bf16.msra.mxu0 %v13954_v47  ;;  %10117 = vmatpush3.bf16.msra.mxu1 %v13958_v60  ;;  %v5172_v17 = vpack.c.bf16 %v5151_v50, %v5150_v6 }
 0xb7c   :  { %6944 = vrot.lane.b32.xlu0 %v16070_v42, %s11221_s22  ;;  %10118 = vmatprep.subr.bf16.mxu1 %v14006_v63  ;;  %v10975_v62 = vpop.eup %10974 }
 0xb7d   :  { %10112 = vmatprep.mubr.msk.bf16.mxu0 %vm1479_vm3, %v5172_v17  ;;  %v10977_v15 = vpop.eup %10976  ;;  %v5156_v58 = vmul.f32 %v10975_v62, %v13934_v1  ;;  %v5094_v1 = vpop.xlane.xlu1 %5093 }
 0xb7e   :  { %10113 = vmatmul.mubr.msk.bf16.vlgmr.msra.gmra.mrb[168].mxu0 %vm1479_vm3, %v5173_v16  ;;  %v10979_v47 = vpop.eup %10978  ;;  %v5155_v10 = vmul.f32 %v10977_v15, %v13927_v33 }
 0xb7f   :  { %10119 = vmatpush3.bf16.msra.mxu1 %v14006_v63  ;;  %v5157_v38 = vmul.f32 %v10979_v47, %v13910_v36 }
 0xb80   :  { %v10981_v60 = vpop.eup %10980  ;;  %7005 = vrot.lane.b32.xlu0 %v16071_v37, %s11221_s22  ;;  %10132 = vmatprep.subr.bf16.mxu1 %v10512_v31 }
 0xb81   :  { %v5154_v9 = vmul.f32 %v10981_v60, %v13938_v48  ;;  %v5175_v20 = vpack.c.bf16 %v5157_v38, %v5156_v58  ;;  %v5088_v63 = vpop.xlane.xlu1 %5087 }
 0xb83   :  { %v5174_v53 = vpack.c.bf16 %v5155_v10, %v5154_v9 }
 0xb84   :  { %7066 = vrot.lane.b32.xlu0 %v16072_v14, %s11221_s22 }
 0xb85   :  { %10120 = vmatprep.mubr.msk.bf16.mxu1 %vm1479_vm3, %v5174_v53  ;;  %v5608_v33 = vpop.permute.xlu1 %5607 }
 0xb86   :  { %10121 = vmatmul.mubr.msk.bf16.vlgmr.msra.gmra.mrb[124].mxu1 %vm1479_vm3, %v5175_v20 }
 0xb87   :  { %10133 = vmatpush3.bf16.msra.mxu1 %v10512_v31 }
 0xb89   :  { %v5938_v30 = vpop.permute.xlu1 %5937 }
 0xb8d   :  { %v5934_v52 = vpop.permute.xlu1 %5933 }
 0xb91   :  { %v6007_v24 = vpop.permute.xlu1 %6006 }
 0xb92   :  { %v6018_v19 = vsel %vm908_vm1, %v6007_v24, 0 }
 0xb95   :  { %v6003_v56 = vpop.permute.xlu1 %6002 }
 0xb99   :  { %v6076_v8 = vpop.permute.xlu1 %6075 }
 0xb9a   :  { %v6087_v25 = vsel %vm908_vm1, %v6076_v8, 0 }
 0xb9d   :  { %v6072_v3 = vpop.permute.xlu1 %6071 }
 0xba1   :  { %v6145_v7 = vpop.permute.xlu1 %6144 }
 0xba2   :  { %v6156_v31 = vsel %vm908_vm1, %v6145_v7, 0 }
 0xba5   :  { %v6141_v43 = vpop.permute.xlu1 %6140 }
 0xba6   :  { %v5097_v44 = vpop.xlane.xlu0 %5096 }
 0xba7   :  { %10982 = vrcp.f32 %v5097_v44 }
 0xba8   :  { %10984 = vrcp.f32 %v5088_v63 }
 0xba9   :  { %10986 = vrcp.f32 %v5094_v1  ;;  %v14153_v41 = vpop.permute.xlu1 %6213 }
 0xbaa   :  { %v5091_v48 = vpop.xlane.xlu0 %5090 }
 0xbab   :  { %10988 = vrcp.f32 %v5091_v48 }
 0xbad   :  { %v14157_v6 = vpop.permute.xlu1 %6209 }
 0xbae   :  { %v5606_v36 = vpop.permute.xlu0 %5605 }
 0xbaf   :  { %10124 = vmatprep.subr.bf16.mxu0 %v5606_v36 }
 0xbb0   :  { %10125 = vmatpush3.bf16.msra.mxu0 %v5606_v36 }
 0xbb1   :  { %10126 = vmatprep.subr.bf16.mxu0 %v5608_v33  ;;  %v10983_v13 = vpop.eup %10982  ;;  %v6283_v17 = vpop.permute.xlu1 %6282 }
 0xbb2   :  { %v5936_v29 = vpop.permute.xlu0 %5935  ;;  %v10985_v28 = vpop.eup %10984  ;;  %v5161_v46 = vmul.f32 %v10983_v13, %v13972_v23  ;;  %v6294_v9 = vsel %vm908_vm1, %v6283_v17, 0 }
 0xbb3   :  { %v10987_v39 = vpop.eup %10986  ;;  %v5158_v61 = vmul.f32 %v10985_v28, %v13950_v5  ;;  %v5946_v23 = vsel %vm908_vm1, %v5936_v29, 0 }
 0xbb4   :  { %10127 = vmatpush3.bf16.msra.mxu0 %v5608_v33  ;;  %v5160_v34 = vmul.f32 %v10987_v39, %v13946_v55  ;;  %v5949_v55 = vsel %vm908_vm1, %v5938_v30, 0 }
 0xbb5   :  { %v10989_v26 = vpop.eup %10988  ;;  %10474 = vmatprep.subr.msk.bf16.mxu0 %vm908_vm1, %v5936_v29  ;;  %v6279_v16 = vpop.permute.xlu1 %6278 }
 0xbb6   :  { %v5932_v35 = vpop.permute.xlu0 %5931  ;;  %v5159_v18 = vmul.f32 %v10989_v26, %v13978_v4  ;;  %v5177_v32 = vpack.c.bf16 %v5161_v46, %v5160_v34 }
 0xbb8   :  { %v5176_v21 = vpack.c.bf16 %v5159_v18, %v5158_v61 }
 0xbb9   :  { %v14169_v15 = vpop.permute.xlu1 %6351 }
 0xbba   :  { %10128 = vmatprep.mubr.msk.bf16.mxu0 %vm1479_vm3, %v5176_v21  ;;  %v6005_v51 = vpop.permute.xlu0 %6004  ;;  %v6225_v21 = vsel %vm908_vm1, %v14153_v41, 0 }
 0xbbb   :  { %10129 = vmatmul.mubr.msk.bf16.vlgmr.msra.gmra.mrb[172].mxu0 %vm1479_vm3, %v5177_v32  ;;  %v6015_v11 = vsel %vm908_vm1, %v6005_v51, 0 }
 0xbbc   :  { %10170 = vmatprep.mubr.msk.bf16.mxu0 %vm908_vm1, %v5932_v35 }
 0xbbd   :  { %10167 = vmatpush3.bf16.xpose.msra.mxu0 %v5946_v23  ;;  %v14175_v58 = vpop.permute.xlu1 %6347 }
 0xbbe   :  { %10475 = vmatprep.subr.msk.bf16.mxu0 %vm908_vm1, %v5938_v30  ;;  %v6001_v5 = vpop.permute.xlu0 %6000 }
 0xbc1   :  { %v6421_v10 = vpop.permute.xlu1 %6420 }
 0xbc2   :  { %v6074_v4 = vpop.permute.xlu0 %6073  ;;  %v6432_v63 = vsel %vm908_vm1, %v6421_v10, 0 }
 0xbc3   :  { %v6084_v27 = vsel %vm908_vm1, %v6074_v4, 0 }
 0xbc5   :  { %10169 = vmatpush3.bf16.xpose.msra.mxu0 %v5949_v55  ;;  %v6417_v53 = vpop.permute.xlu1 %6416 }
 0xbc6   :  { %10476 = vmatprep.subr.msk.bf16.mxu0 %vm908_vm1, %v6005_v51  ;;  %v6070_v57 = vpop.permute.xlu0 %6069 }
 0xbc9   :  { %v14187_v1 = vpop.permute.xlu1 %6885 }
 0xbca   :  { %v6143_v59 = vpop.permute.xlu0 %6142 }
 0xbcb   :  { %v6153_v2 = vsel %vm908_vm1, %v6143_v59, 0 }
 0xbcc   :  { %10171 = vmatmul.mubr.msk.bf16.vlgmr.msra.gmra.mrb[176].mxu0 %vm908_vm1, %v5934_v52 }
 0xbcd   :  { %10175 = vmatpush3.bf16.xpose.msra.mxu0 %v6015_v11  ;;  %10178 = vmatprep.mubr.msk.bf16.mxu0 %vm908_vm1, %v6001_v5  ;;  %v14190_v48 = vpop.permute.xlu1 %6946 }
 0xbce   :  { %10477 = vmatprep.subr.msk.bf16.mxu0 %vm908_vm1, %v6007_v24  ;;  %v6139_v54 = vpop.permute.xlu0 %6138 }
 0xbd1   :  { %v7008_v33 = vpop.permute.xlu1 %7007 }
 0xbd2   :  { %v14141_v45 = vpop.permute.xlu0 %6211 }
 0xbd3   :  { %10482 = vmatprep.subr.msk.bf16.mxu1 %vm908_vm1, %v14141_v45  ;;  %v6222_v26 = vsel %vm908_vm1, %v14141_v45, 0 }
 0xbd5   :  { %10177 = vmatpush3.bf16.xpose.msra.mxu0 %v6018_v19 }
 0xbd6   :  { %10478 = vmatprep.subr.msk.bf16.mxu0 %vm908_vm1, %v6074_v4  ;;  %v14151_v40 = vpop.permute.xlu0 %6207 }
 0xbda   :  { %v6281_v0 = vpop.permute.xlu0 %6280 }
 0xbdb   :  { %v6291_v47 = vsel %vm908_vm1, %v6281_v0, 0 }
 0xbdc   :  { %10179 = vmatmul.mubr.msk.bf16.vlgmr.msra.gmra.mrb[180].mxu0 %vm908_vm1, %v6003_v56 }
 0xbdd   :  { %10183 = vmatpush3.bf16.xpose.msra.mxu0 %v6084_v27  ;;  %10186 = vmatprep.mubr.msk.bf16.mxu0 %vm908_vm1, %v6070_v57 }
 0xbde   :  { %10479 = vmatprep.subr.msk.bf16.mxu0 %vm908_vm1, %v6076_v8  ;;  %v6277_v50 = vpop.permute.xlu0 %6276 }
 0xbe2   :  { %v14163_v42 = vpop.permute.xlu0 %6349 }
 0xbe5   :  { %10185 = vmatpush3.bf16.xpose.msra.mxu0 %v6087_v25 }
 0xbe6   :  { %10480 = vmatprep.subr.msk.bf16.mxu0 %vm908_vm1, %v6143_v59  ;;  %v14167_v62 = vpop.permute.xlu0 %6345 }
 0xbea   :  { %v6419_v60 = vpop.permute.xlu0 %6418 }
 0xbeb   :  { %v6429_v14 = vsel %vm908_vm1, %v6419_v60, 0 }
 0xbec   :  { %10187 = vmatmul.mubr.msk.bf16.vlgmr.msra.gmra.mrb[184].mxu0 %vm908_vm1, %v6072_v3 }
 0xbed   :  { %10191 = vmatpush3.bf16.xpose.msra.mxu0 %v6153_v2  ;;  %10194 = vmatprep.mubr.msk.bf16.mxu0 %vm908_vm1, %v6139_v54 }
 0xbee   :  { %10481 = vmatprep.subr.msk.bf16.mxu0 %vm908_vm1, %v6145_v7  ;;  %v6415_v37 = vpop.permute.xlu0 %6414 }
 0xbf2   :  { %v14179_v38 = vpop.permute.xlu0 %6883 }
 0xbf5   :  { %10193 = vmatpush3.bf16.xpose.msra.mxu0 %v6156_v31 }
 0xbf6   :  { %10484 = vmatprep.subr.msk.bf16.mxu0 %vm908_vm1, %v6281_v0  ;;  %v14185_v20 = vpop.permute.xlu0 %6944 }
 0xbfa   :  { %v7006_v44 = vpop.permute.xlu0 %7005 }
 0xbfc   :  { %10195 = vmatmul.mubr.msk.bf16.vlgmr.msra.gmra.mrb[188].mxu0 %vm908_vm1, %v6141_v43 }
 0xbfd   :  { %10207 = vmatpush3.bf16.xpose.msra.mxu0 %v6291_v47  ;;  %10210 = vmatprep.mubr.msk.bf16.mxu0 %vm908_vm1, %v6277_v50 }
 0xbfe   :  { %10485 = vmatprep.subr.msk.bf16.mxu0 %vm908_vm1, %v6283_v17 }
 0xc05   :  { %10209 = vmatpush3.bf16.xpose.msra.mxu0 %v6294_v9 }
 0xc06   :  { %10488 = vmatprep.subr.msk.bf16.mxu0 %vm908_vm1, %v6419_v60 }
 0xc0c   :  { %10211 = vmatmul.mubr.msk.bf16.vlgmr.msra.gmra.mrb[192].mxu0 %vm908_vm1, %v6279_v16 }
 0xc0d   :  { %10223 = vmatpush3.bf16.xpose.msra.mxu0 %v6429_v14  ;;  %10226 = vmatprep.mubr.msk.bf16.mxu0 %vm908_vm1, %v6415_v37 }
 0xc0e   :  { %10489 = vmatprep.subr.msk.bf16.mxu0 %vm908_vm1, %v6421_v10 }
 0xc15   :  { %10225 = vmatpush3.bf16.xpose.msra.mxu0 %v6432_v63 }
 0xc16   :  { %10246 = vmatprep.subr.bf16.mxu0 %v7006_v44 }
 0xc1c   :  { %10227 = vmatmul.mubr.msk.bf16.vlgmr.msra.gmra.mrb[196].mxu0 %vm908_vm1, %v6417_v53 }
 0xc1d   :  { %10247 = vmatpush3.bf16.msra.mxu0 %v7006_v44 }
 0xc1e   :  { %10248 = vmatprep.subr.bf16.mxu0 %v7008_v33 }
 0xc21   :  { %10249 = vmatpush3.bf16.msra.mxu0 %v7008_v33  ;;  %v6360_v33 = vsel %vm908_vm1, %v14163_v42, 0 }
 0xc29   :  { %v10074_v36 = vpop.f32.mrb[112].mxu1 }
 0xc2a   :  { %v5224_v30 = vpop.f32.mrb[113].mxu1 }
 0xc2b   :  { %v10075_v13 = vpop.f32.mrb[114].mxu1 }
 0xc2c   :  { %v5667_v29 = vpack.c.bf16 %v10075_v13, %v10074_v36  ;;  %v5227_v28 = vpop.f32.mrb[115].mxu1 }
 0xc2d   :  { %v5666_v39 = vpack.c.bf16 %v5227_v28, %v5224_v30  ;;  %v16077_v28 = vld [vmem:[#allocation19_spill] sm:$0xff] }
 0xc2f   :  { %10134 = vmatprep.mubr.msk.bf16.mxu1 %vm908_vm1, %v5666_v39 }
 0xc30   :  { %10135 = vmatmul.mubr.msk.bf16.vlgmr.msra.gmra.mrb[96].mxu1 %vm908_vm1, %v5667_v29 }
 0xc31   :  { %10199 = vmatpush3.bf16.xpose.msra.mxu1 %v6222_v26  ;;  %v10082_v46 = vpop.f32.mrb[160].mxu0 }
 0xc32   :  { %10483 = vmatprep.subr.msk.bf16.mxu1 %vm908_vm1, %v14153_v41  ;;  %v5285_v35 = vpop.f32.mrb[161].mxu0 }
 0xc33   :  { %v10083_v61 = vpop.f32.mrb[162].mxu0 }
 0xc34   :  { %v5669_v18 = vpack.c.bf16 %v10083_v61, %v10082_v46  ;;  %v5288_v34 = vpop.f32.mrb[163].mxu0  ;;  %v6363_v61 = vsel %vm908_vm1, %v14169_v15, 0 }
 0xc35   :  { %v5668_v52 = vpack.c.bf16 %v5288_v34, %v5285_v35 }
 0xc37   :  { %10138 = vmatprep.mubr.msk.bf16.mxu1 %vm908_vm1, %v5668_v52 }
 0xc38   :  { %10139 = vmatmul.mubr.msk.bf16.gmra.mrb[100].mxu1 %vm908_vm1, %v5669_v18 }
 0xc39   :  { %10201 = vmatpush3.bf16.xpose.msra.mxu1 %v6225_v21  ;;  %v10090_v32 = vpop.f32.mrb[116].mxu1 }
 0xc3a   :  { %10486 = vmatprep.subr.msk.bf16.mxu1 %vm908_vm1, %v14163_v42  ;;  %v5346_v51 = vpop.f32.mrb[117].mxu1 }
 0xc3b   :  { %v10091_v23 = vpop.f32.mrb[118].mxu1 }
 0xc3c   :  { %v5671_v24 = vpack.c.bf16 %v10091_v23, %v10090_v32  ;;  %v5349_v5 = vpop.f32.mrb[119].mxu1 }
 0xc3d   :  { %v5670_v4 = vpack.c.bf16 %v5349_v5, %v5346_v51 }
 0xc3f   :  { %10142 = vmatprep.mubr.msk.bf16.mxu1 %vm908_vm1, %v5670_v4 }
 0xc40   :  { %10143 = vmatmul.mubr.msk.bf16.gmra.mrb[104].mxu1 %vm908_vm1, %v5671_v24 }
 0xc49   :  { %v10098_v56 = vpop.f32.mrb[164].mxu0 }
 0xc4a   :  { %v5407_v55 = vpop.f32.mrb[165].mxu0 }
 0xc4b   :  { %v10099_v57 = vpop.f32.mrb[166].mxu0 }
 0xc4c   :  { %v5673_v8 = vpack.c.bf16 %v10099_v57, %v10098_v56  ;;  %v5410_v59 = vpop.f32.mrb[167].mxu0 }
 0xc4d   :  { %v5672_v11 = vpack.c.bf16 %v5410_v59, %v5407_v55  ;;  %v10106_v54 = vpop.f32.mrb[120].mxu1 }
 0xc4e   :  { %v5468_v3 = vpop.f32.mrb[121].mxu1 }
 0xc4f   :  { %v10107_v45 = vpop.f32.mrb[122].mxu1  ;;  %10146 = vmatprep.mubr.msk.bf16.mxu1 %vm908_vm1, %v5672_v11 }
 0xc50   :  { %v5675_v19 = vpack.c.bf16 %v10107_v45, %v10106_v54  ;;  %v5471_v7 = vpop.f32.mrb[123].mxu1  ;;  %10147 = vmatmul.mubr.msk.bf16.gmra.mrb[108].mxu1 %vm908_vm1, %v5673_v8 }
 0xc51   :  { %v5674_v43 = vpack.c.bf16 %v5471_v7, %v5468_v3  ;;  %v10114_v27 = vpop.f32.mrb[168].mxu0 }
 0xc52   :  { %v5529_v41 = vpop.f32.mrb[169].mxu0 }
 0xc53   :  { %v10115_v25 = vpop.f32.mrb[170].mxu0  ;;  %10150 = vmatprep.mubr.msk.bf16.mxu1 %vm908_vm1, %v5674_v43 }
 0xc54   :  { %v5677_v0 = vpack.c.bf16 %v10115_v25, %v10114_v27  ;;  %v5532_v50 = vpop.f32.mrb[171].mxu0 }
 0xc55   :  { %v5676_v2 = vpack.c.bf16 %v5532_v50, %v5529_v41 }
 0xc58   :  { %10151 = vmatmul.mubr.msk.bf16.gmra.mrb[80].mxu1 %vm908_vm1, %v5675_v19 }
 0xc59   :  { %v10122_v17 = vpop.f32.mrb[124].mxu1  ;;  %10154 = vmatprep.mubr.msk.bf16.mxu1 %vm908_vm1, %v5676_v2 }
 0xc5a   :  { %v5590_v16 = vpop.f32.mrb[125].mxu1 }
 0xc5b   :  { %v10123_v31 = vpop.f32.mrb[126].mxu1 }
 0xc5c   :  { %v5679_v47 = vpack.c.bf16 %v10123_v31, %v10122_v17  ;;  %v5593_v60 = vpop.f32.mrb[127].mxu1 }
 0xc5d   :  { %v5678_v37 = vpack.c.bf16 %v5593_v60, %v5590_v16 }
 0xc60   :  { %10155 = vmatmul.mubr.msk.bf16.gmra.mrb[84].mxu1 %vm908_vm1, %v5677_v0 }
 0xc61   :  { %10158 = vmatprep.mubr.msk.bf16.mxu1 %vm908_vm1, %v5678_v37 }
 0xc68   :  { %10159 = vmatmul.mubr.msk.bf16.gmra.mrb[88].mxu1 %vm908_vm1, %v5679_v47 }
 0xc8e   :  { %v10130_v9 = vpop.f32.mrb[172].mxu0 }
 0xc8f   :  { %v5651_v10 = vpop.f32.mrb[173].mxu0 }
 0xc90   :  { %v10131_v53 = vpop.f32.mrb[174].mxu0 }
 0xc91   :  { %v5681_v14 = vpack.c.bf16 %v10131_v53, %v10130_v9  ;;  %v5654_v63 = vpop.f32.mrb[175].mxu0 }
 0xc92   :  { %v5680_v44 = vpack.c.bf16 %v5654_v63, %v5651_v10 }
 0xc94   :  { %10162 = vmatprep.mubr.msk.bf16.mxu1 %vm908_vm1, %v5680_v44 }
 0xc95   :  { %10163 = vmatmul.mubr.msk.bf16.gmra.mrb[92].mxu1 %vm908_vm1, %v5681_v14 }
 0xc96   :  { %10202 = vmatprep.mubr.msk.bf16.mxu1 %vm908_vm1, %v14151_v40 }
 0xc9d   :  { %10203 = vmatmul.mubr.msk.bf16.vlgmr.msra.gmra.mrb[128].mxu1 %vm908_vm1, %v14157_v6 }
 0xc9e   :  { %10215 = vmatpush3.bf16.xpose.msra.mxu1 %v6360_v33  ;;  %10218 = vmatprep.mubr.msk.bf16.mxu1 %vm908_vm1, %v14167_v62 }
 0xc9f   :  { %10487 = vmatprep.subr.msk.bf16.mxu1 %vm908_vm1, %v14169_v15  ;;  %v10172_v36 = vpop.f32.mrb[176].mxu0 }
 0xca0   :  { %v14229_v13 = vsel %vm12039_vm2, %v10172_v36, -inf  ;;  %v5985_v29 = vpop.f32.mrb[177].mxu0 }
 0xca1   :  { %v6521_v40 = vsel %vm1479_vm3, %v14229_v13, -inf  ;;  %v10173_v6 = vpop.f32.mrb[178].mxu0  ;;  %v14235_v42 = vsel %vm12044_vm4, %v5985_v29, -inf }
 0xca2   :  { %6522 = vmax.xlane.f32.xlu0 %v6521_v40  ;;  %v5988_v39 = vpop.f32.mrb[179].mxu0  ;;  %v6515_v35 = vsel %vm1479_vm3, %v14235_v42, -inf  ;;  %v14249_v34 = vsel %vm12063_vm6, %v10173_v6, -inf }
 0xca3   :  { %v14239_v26 = vsel %vm12053_vm5, %v5988_v39, -inf  ;;  %v6524_v52 = vsel %vm1479_vm3, %v14249_v34, -inf }
 0xca4   :  { %v6518_v46 = vsel %vm1479_vm3, %v14239_v26, -inf }
 0xca5   :  { %6519 = vmax.xlane.f32.xlu1 %v6518_v46 }
 0xca6   :  { %10217 = vmatpush3.bf16.xpose.msra.mxu1 %v6363_v61  ;;  %6516 = vmax.xlane.f32.xlu0 %v6515_v35 }
 0xca7   :  { %10230 = vmatprep.subr.bf16.mxu1 %v14179_v38 }
 0xcaa   :  { %6525 = vmax.xlane.f32.xlu0 %v6524_v52 }
 0xcad   :  { %10219 = vmatmul.mubr.msk.bf16.vlgmr.msra.gmra.mrb[132].mxu1 %vm908_vm1, %v14175_v58 }
 0xcae   :  { %10231 = vmatpush3.bf16.msra.mxu1 %v14179_v38 }
 0xcaf   :  { %10232 = vmatprep.subr.bf16.mxu1 %v14187_v1  ;;  %v10180_v15 = vpop.f32.mrb[180].mxu0 }
 0xcb0   :  { %v14260_v21 = vsel %vm12039_vm2, %v10180_v15, -inf  ;;  %v6054_v32 = vpop.f32.mrb[181].mxu0 }
 0xcb1   :  { %v6533_v51 = vsel %vm1479_vm3, %v14260_v21, -inf  ;;  %v10181_v23 = vpop.f32.mrb[182].mxu0  ;;  %v14266_v24 = vsel %vm12044_vm4, %v6054_v32, -inf }
 0xcb2   :  { %v14270_v58 = vsel %vm12063_vm6, %v10181_v23, -inf  ;;  %10233 = vmatpush3.bf16.msra.mxu1 %v14187_v1  ;;  %6534 = vmax.xlane.f32.xlu0 %v6533_v51  ;;  %v6057_v38 = vpop.f32.mrb[183].mxu0  ;;  %v6527_v56 = vsel %vm1479_vm3, %v14266_v24, -inf }
 0xcb3   :  { %v6536_v5 = vsel %vm1479_vm3, %v14270_v58, -inf  ;;  %10238 = vmatprep.subr.bf16.mxu1 %v14185_v20  ;;  %v14278_v4 = vsel %vm12053_vm5, %v6057_v38, -inf }
 0xcb4   :  { %6537 = vmax.xlane.f32.xlu1 %v6536_v5  ;;  %v6530_v55 = vsel %vm1479_vm3, %v14278_v4, -inf }
 0xcb6   :  { %6528 = vmax.xlane.f32.xlu0 %v6527_v56 }
 0xcb8   :  { %6531 = vmax.xlane.f32.xlu1 %v6530_v55 }
 0xcbf   :  { %v10188_v1 = vpop.f32.mrb[184].mxu0 }
 0xcc0   :  { %v14286_v57 = vsel %vm12039_vm2, %v10188_v1, -inf  ;;  %v6123_v8 = vpop.f32.mrb[185].mxu0 }
 0xcc1   :  { %v6545_v59 = vsel %vm1479_vm3, %v14286_v57, -inf  ;;  %v10189_v11 = vpop.f32.mrb[186].mxu0  ;;  %v14292_v54 = vsel %vm12044_vm4, %v6123_v8, -inf  ;;  %v14380_v8 = vpop.permute.xlu0 %7066 }
 0xcc2   :  { %v14296_v3 = vsel %vm12063_vm6, %v10189_v11, -inf  ;;  %6546 = vmax.xlane.f32.xlu0 %v6545_v59  ;;  %v6126_v45 = vpop.f32.mrb[187].mxu0  ;;  %v6539_v43 = vsel %vm1479_vm3, %v14292_v54, -inf  ;;  %v14382_v59 = vpop.permute.xlu1 %7068 }
 0xcc3   :  { %v6548_v19 = vsel %vm1479_vm3, %v14296_v3, -inf  ;;  %v14302_v7 = vsel %vm12053_vm5, %v6126_v45, -inf }
 0xcc4   :  { %6549 = vmax.xlane.f32.xlu1 %v6548_v19  ;;  %v6542_v27 = vsel %vm1479_vm3, %v14302_v7, -inf }
 0xcc6   :  { %6540 = vmax.xlane.f32.xlu0 %v6539_v43 }
 0xcc8   :  { %6543 = vmax.xlane.f32.xlu1 %v6542_v27 }
 0xccf   :  { %v10196_v41 = vpop.f32.mrb[188].mxu0 }
 0xcd0   :  { %v14310_v25 = vsel %vm12039_vm2, %v10196_v41, -inf  ;;  %v6192_v0 = vpop.f32.mrb[189].mxu0 }
 0xcd1   :  { %v6557_v50 = vsel %vm1479_vm3, %v14310_v25, -inf  ;;  %v10197_v2 = vpop.f32.mrb[190].mxu0  ;;  %v14316_v17 = vsel %vm12044_vm4, %v6192_v0, -inf }
 0xcd2   :  { %v14320_v16 = vsel %vm12063_vm6, %v10197_v2, -inf  ;;  %6558 = vmax.xlane.f32.xlu0 %v6557_v50  ;;  %v6195_v31 = vpop.f32.mrb[191].mxu0  ;;  %v6551_v37 = vsel %vm1479_vm3, %v14316_v17, -inf }
 0xcd3   :  { %v6560_v47 = vsel %vm1479_vm3, %v14320_v16, -inf  ;;  %v14326_v60 = vsel %vm12053_vm5, %v6195_v31, -inf }
 0xcd4   :  { %6561 = vmax.xlane.f32.xlu1 %v6560_v47  ;;  %v6554_v9 = vsel %vm1479_vm3, %v14326_v60, -inf }
 0xcd6   :  { %6552 = vmax.xlane.f32.xlu0 %v6551_v37 }
 0xcd8   :  { %6555 = vmax.xlane.f32.xlu1 %v6554_v9 }
 0xcdf   :  { %v10212_v10 = vpop.f32.mrb[192].mxu0 }
 0xce0   :  { %v14334_v53 = vsel %vm12039_vm2, %v10212_v10, -inf  ;;  %v6330_v14 = vpop.f32.mrb[193].mxu0 }
 0xce1   :  { %v6581_v63 = vsel %vm1479_vm3, %v14334_v53, -inf  ;;  %v10213_v44 = vpop.f32.mrb[194].mxu0  ;;  %v14340_v33 = vsel %vm12044_vm4, %v6330_v14, -inf }
 0xce2   :  { %v14344_v36 = vsel %vm12063_vm6, %v10213_v44, -inf  ;;  %6582 = vmax.xlane.f32.xlu0 %v6581_v63  ;;  %v6333_v29 = vpop.f32.mrb[195].mxu0  ;;  %v6575_v39 = vsel %vm1479_vm3, %v14340_v33, -inf }
 0xce3   :  { %v6584_v40 = vsel %vm1479_vm3, %v14344_v36, -inf  ;;  %v14350_v6 = vsel %vm12053_vm5, %v6333_v29, -inf }
 0xce4   :  { %6585 = vmax.xlane.f32.xlu1 %v6584_v40  ;;  %v6578_v46 = vsel %vm1479_vm3, %v14350_v6, -inf }
 0xce6   :  { %6576 = vmax.xlane.f32.xlu0 %v6575_v39 }
 0xce8   :  { %6579 = vmax.xlane.f32.xlu1 %v6578_v46 }
 0xcef   :  { %v10228_v35 = vpop.f32.mrb[196].mxu0 }
 0xcf0   :  { %v14358_v61 = vsel %vm12039_vm2, %v10228_v35, -inf  ;;  %v6468_v52 = vpop.f32.mrb[197].mxu0 }
 0xcf1   :  { %v6605_v15 = vsel %vm1479_vm3, %v14358_v61, -inf  ;;  %v14364_v32 = vsel %vm12044_vm4, %v6468_v52, -inf  ;;  %v10229_v51 = vpop.f32.mrb[198].mxu0 }
 0xcf2   :  { %v6599_v23 = vsel %vm1479_vm3, %v14364_v32, -inf  ;;  %6606 = vmax.xlane.f32.xlu0 %v6605_v15  ;;  %v6471_v38 = vpop.f32.mrb[199].mxu0  ;;  %v14370_v5 = vsel %vm12063_vm6, %v10229_v51, -inf }
 0xcf3   :  { %6600 = vmax.xlane.f32.xlu1 %v6599_v23  ;;  %v6608_v56 = vsel %vm1479_vm3, %v14370_v5, -inf  ;;  %v14376_v55 = vsel %vm12053_vm5, %v6471_v38, -inf }
 0xcf4   :  { %v6602_v1 = vsel %vm1479_vm3, %v14376_v55, -inf }
 0xcf7   :  { %6609 = vmax.xlane.f32.xlu1 %v6608_v56 }
 0xcfb   :  { %6603 = vmax.xlane.f32.xlu1 %v6602_v1 }
 0xd2f   :  { %v6523_v11 = vpop.xlane.xlu0 %6522 }
 0xd30   :  { %v6613_v45 = vsub.f32 %v14229_v13, %v6523_v11 }
 0xd32   :  { %v6647_v19 = vmul.f32 1.442695, %v6613_v45  ;;  %v6520_v43 = vpop.xlane.xlu1 %6519 }
 0xd33   :  { %v6517_v27 = vpop.xlane.xlu0 %6516  ;;  %v6612_v0 = vsub.f32 %v14239_v26, %v6520_v43 }
 0xd34   :  { %10990 = vpow2.f32 %v6647_v19  ;;  %v6611_v41 = vsub.f32 %v14235_v42, %v6517_v27 }
 0xd35   :  { %v6645_v47 = vmul.f32 1.442695, %v6612_v0 }
 0xd36   :  { %v6643_v50 = vmul.f32 1.442695, %v6611_v41 }
 0xd37   :  { %v6526_v2 = vpop.xlane.xlu0 %6525 }
 0xd38   :  { %10992 = vpow2.f32 %v6643_v50  ;;  %v6614_v31 = vsub.f32 %v14249_v34, %v6526_v2 }
 0xd3a   :  { %v6649_v37 = vmul.f32 1.442695, %v6614_v31 }
 0xd3c   :  { %10994 = vpow2.f32 %v6649_v37 }
 0xd3d   :  { %10996 = vpow2.f32 %v6645_v47 }
 0xd3e   :  { %v14388_v9 = vpop.eup %10990 }
 0xd3f   :  { %v6535_v13 = vpop.xlane.xlu0 %6534  ;;  %v6713_v10 = vsel %vm1479_vm3, %v14388_v9, 0.0 }
 0xd40   :  { %v6617_v14 = vsub.f32 %v14260_v21, %v6535_v13  ;;  %6714 = vadd.xlane.f32.xlu0 %v6713_v10 }
 0xd41   :  { %v6538_v42 = vpop.xlane.xlu1 %6537 }
 0xd42   :  { %v14393_v26 = vpop.eup %10992  ;;  %v6655_v63 = vmul.f32 1.442695, %v6617_v14  ;;  %v6618_v44 = vsub.f32 %v14270_v58, %v6538_v42 }
 0xd43   :  { %v6529_v34 = vpop.xlane.xlu0 %6528  ;;  %v6707_v29 = vsel %vm1479_vm3, %v14393_v26, 0.0 }
 0xd44   :  { %10998 = vpow2.f32 %v6655_v63  ;;  %v6657_v40 = vmul.f32 1.442695, %v6618_v44  ;;  %v6615_v39 = vsub.f32 %v14266_v24, %v6529_v34  ;;  %6708 = vadd.xlane.f32.xlu0 %v6707_v29 }
 0xd45   :  { %v6532_v46 = vpop.xlane.xlu1 %6531 }
 0xd46   :  { %v14399_v35 = vpop.eup %10994  ;;  %11000 = vpow2.f32 %v6657_v40  ;;  %v6651_v21 = vmul.f32 1.442695, %v6615_v39  ;;  %v6616_v52 = vsub.f32 %v14278_v4, %v6532_v46 }
 0xd47   :  { %v6716_v15 = vsel %vm1479_vm3, %v14399_v35, 0.0  ;;  %v14404_v58 = vpop.eup %10996 }
 0xd48   :  { %11002 = vpow2.f32 %v6651_v21  ;;  %v6653_v51 = vmul.f32 1.442695, %v6616_v52  ;;  %6717 = vadd.xlane.f32.xlu1 %v6716_v15  ;;  %v6710_v24 = vsel %vm1479_vm3, %v14404_v58, 0.0 }
 0xd4a   :  { %11004 = vpow2.f32 %v6653_v51 }
 0xd4c   :  { %6711 = vadd.xlane.f32.xlu1 %v6710_v24 }
 0xd4e   :  { %v14408_v23 = vpop.eup %10998 }
 0xd4f   :  { %v6547_v38 = vpop.xlane.xlu0 %6546  ;;  %v6725_v56 = vsel %vm1479_vm3, %v14408_v23, 0.0 }
 0xd50   :  { %v14412_v4 = vpop.eup %11000  ;;  %v6621_v1 = vsub.f32 %v14286_v57, %v6547_v38  ;;  %6726 = vadd.xlane.f32.xlu0 %v6725_v56 }
 0xd51   :  { %v6550_v11 = vpop.xlane.xlu1 %6549  ;;  %v6728_v45 = vsel %vm1479_vm3, %v14412_v4, 0.0 }
 0xd52   :  { %v14417_v19 = vpop.eup %11002  ;;  %v6663_v43 = vmul.f32 1.442695, %v6621_v1  ;;  %v6622_v27 = vsub.f32 %v14296_v3, %v6550_v11  ;;  %6729 = vadd.xlane.f32.xlu1 %v6728_v45 }
 0xd53   :  { %v6541_v41 = vpop.xlane.xlu0 %6540  ;;  %v6719_v0 = vsel %vm1479_vm3, %v14417_v19, 0.0 }
 0xd54   :  { %v14422_v50 = vpop.eup %11004  ;;  %11006 = vpow2.f32 %v6663_v43  ;;  %v6665_v2 = vmul.f32 1.442695, %v6622_v27  ;;  %v6619_v57 = vsub.f32 %v14292_v54, %v6541_v41  ;;  %6720 = vadd.xlane.f32.xlu0 %v6719_v0 }
 0xd55   :  { %v6544_v31 = vpop.xlane.xlu1 %6543  ;;  %v6722_v47 = vsel %vm1479_vm3, %v14422_v50, 0.0 }
 0xd56   :  { %11008 = vpow2.f32 %v6665_v2  ;;  %v6659_v37 = vmul.f32 1.442695, %v6619_v57  ;;  %v6620_v3 = vsub.f32 %v14302_v7, %v6544_v31  ;;  %6723 = vadd.xlane.f32.xlu1 %v6722_v47 }
 0xd58   :  { %11010 = vpow2.f32 %v6659_v37  ;;  %v6661_v13 = vmul.f32 1.442695, %v6620_v3 }
 0xd5a   :  { %11012 = vpow2.f32 %v6661_v13 }
 0xd5e   :  { %v14428_v10 = vpop.eup %11006 }
 0xd5f   :  { %v6559_v14 = vpop.xlane.xlu0 %6558  ;;  %v6737_v42 = vsel %vm1479_vm3, %v14428_v10, 0.0 }
 0xd60   :  { %v14432_v54 = vpop.eup %11008  ;;  %v6625_v63 = vsub.f32 %v14310_v25, %v6559_v14  ;;  %6738 = vadd.xlane.f32.xlu0 %v6737_v42 }
 0xd61   :  { %v6562_v44 = vpop.xlane.xlu1 %6561  ;;  %v6740_v34 = vsel %vm1479_vm3, %v14432_v54, 0.0 }
 0xd62   :  { %v14437_v7 = vpop.eup %11010  ;;  %v6671_v29 = vmul.f32 1.442695, %v6625_v63  ;;  %v6626_v40 = vsub.f32 %v14320_v16, %v6562_v44  ;;  %6741 = vadd.xlane.f32.xlu1 %v6740_v34 }
 0xd63   :  { %v6553_v39 = vpop.xlane.xlu0 %6552  ;;  %v6731_v46 = vsel %vm1479_vm3, %v14437_v7, 0.0 }
 0xd64   :  { %v14442_v21 = vpop.eup %11012  ;;  %11014 = vpow2.f32 %v6671_v29  ;;  %v6623_v25 = vsub.f32 %v14316_v17, %v6553_v39  ;;  %6732 = vadd.xlane.f32.xlu0 %v6731_v46  ;;  %v6673_v52 = vmul.f32 1.442695, %v6626_v40 }
 0xd65   :  { %v6556_v15 = vpop.xlane.xlu1 %6555  ;;  %v6734_v38 = vsel %vm1479_vm3, %v14442_v21, 0.0 }
 0xd66   :  { %v6667_v51 = vmul.f32 1.442695, %v6623_v25  ;;  %v6624_v24 = vsub.f32 %v14326_v60, %v6556_v15 }
 0xd68   :  { %11016 = vpow2.f32 %v6667_v51  ;;  %v6669_v16 = vmul.f32 1.442695, %v6624_v24  ;;  %6735 = vadd.xlane.f32.xlu0 %v6734_v38 }
 0xd69   :  { %11018 = vpow2.f32 %v6673_v52 }
 0xd6a   :  { %11020 = vpow2.f32 %v6669_v16 }
 0xd6e   :  { %v14448_v56 = vpop.eup %11014 }
 0xd6f   :  { %v6583_v1 = vpop.xlane.xlu0 %6582  ;;  %v6749_v17 = vsel %vm1479_vm3, %v14448_v56, 0.0 }
 0xd70   :  { %v6633_v11 = vsub.f32 %v14334_v53, %v6583_v1  ;;  %v10204_v45 = vpop.f32.mrb[128].mxu1  ;;  %6750 = vadd.xlane.f32.xlu0 %v6749_v17 }
 0xd71   :  { %v6261_v43 = vpop.f32.mrb[129].mxu1  ;;  %v6586_v60 = vpop.xlane.xlu1 %6585  ;;  %v14467_v42 = vsel %vm12039_vm2, %v10204_v45, -inf }
 0xd72   :  { %v14453_v27 = vpop.eup %11016  ;;  %v6687_v41 = vmul.f32 1.442695, %v6633_v11  ;;  %v10205_v0 = vpop.f32.mrb[130].mxu1  ;;  %v6634_v57 = vsub.f32 %v14344_v36, %v6586_v60  ;;  %v6569_v40 = vsel %vm1479_vm3, %v14467_v42, -inf  ;;  %v14480_v39 = vsel %vm12044_vm4, %v6261_v43, -inf }
 0xd73   :  { %v14455_v2 = vpop.eup %11018  ;;  %v6264_v31 = vpop.f32.mrb[131].mxu1  ;;  %v6743_v37 = vsel %vm1479_vm3, %v14453_v27, 0.0  ;;  %v14474_v29 = vsel %vm12063_vm6, %v10205_v0, -inf  ;;  %v6563_v25 = vsel %vm1479_vm3, %v14480_v39, -inf }
 0xd74   :  { %v6577_v47 = vpop.xlane.xlu0 %6576  ;;  %v14460_v3 = vpop.eup %11020  ;;  %11022 = vpow2.f32 %v6687_v41  ;;  %6744 = vadd.xlane.f32.xlu1 %v6743_v37  ;;  %v6689_v63 = vmul.f32 1.442695, %v6634_v57  ;;  %v6752_v34 = vsel %vm1479_vm3, %v14455_v2, 0.0  ;;  %v14486_v46 = vsel %vm12053_vm5, %v6264_v31, -inf }
 0xd75   :  { %v6631_v53 = vsub.f32 %v14340_v33, %v6577_v47  ;;  %v6580_v13 = vpop.xlane.xlu1 %6579  ;;  %v6746_v14 = vsel %vm1479_vm3, %v14460_v3, 0.0  ;;  %v6566_v15 = vsel %vm1479_vm3, %v14486_v46, -inf }
 0xd76   :  { %v6632_v36 = vsub.f32 %v14350_v6, %v6580_v13  ;;  %6747 = vadd.xlane.f32.xlu0 %v6746_v14  ;;  %v6572_v6 = vsel %vm1479_vm3, %v14474_v29, -inf  ;;  %v16078_v13 = vld [vmem:[#allocation17_spill] sm:$0xff] }
 0xd77   :  { %v6683_v44 = vmul.f32 1.442695, %v6631_v53 }
 0xd78   :  { %v6685_v33 = vmul.f32 1.442695, %v6632_v36  ;;  %6753 = vadd.xlane.f32.xlu1 %v6752_v34 }
 0xd79   :  { %11024 = vpow2.f32 %v6683_v44 }
 0xd7a   :  { %11026 = vpow2.f32 %v6685_v33  ;;  %6570 = vmax.xlane.f32.xlu0 %v6569_v40 }
 0xd7b   :  { %11028 = vpow2.f32 %v6689_v63 }
 0xd7c   :  { %6573 = vmax.xlane.f32.xlu1 %v6572_v6 }
 0xd7e   :  { %v14490_v52 = vpop.eup %11022  ;;  %6564 = vmax.xlane.f32.xlu0 %v6563_v25 }
 0xd7f   :  { %v6773_v38 = vsel %vm1479_vm3, %v14490_v52, 0.0  ;;  %v14538_v36 = vpop.xlane.xlu0 %6606 }
 0xd80   :  { %v10220_v51 = vpop.f32.mrb[132].mxu1  ;;  %6567 = vmax.xlane.f32.xlu1 %v6566_v15  ;;  %v14536_v14 = vpop.xlane.xlu1 %6600 }
 0xd81   :  { %v6399_v24 = vpop.f32.mrb[133].mxu1  ;;  %v14508_v41 = vsel %vm12039_vm2, %v10220_v51, -inf }
 0xd82   :  { %v10221_v16 = vpop.f32.mrb[134].mxu1  ;;  %6774 = vadd.xlane.f32.xlu0 %v6773_v38  ;;  %v6593_v57 = vsel %vm1479_vm3, %v14508_v41, -inf  ;;  %v14520_v47 = vsel %vm12044_vm4, %v6399_v24, -inf }
 0xd83   :  { %v14496_v1 = vpop.eup %11024  ;;  %v6402_v17 = vpop.f32.mrb[135].mxu1  ;;  %v14516_v31 = vsel %vm12063_vm6, %v10221_v16, -inf  ;;  %v6587_v37 = vsel %vm1479_vm3, %v14520_v47, -inf }
 0xd84   :  { %v14498_v11 = vpop.eup %11026  ;;  %v6767_v45 = vsel %vm1479_vm3, %v14496_v1, 0.0  ;;  %v6596_v30 = vsel %vm1479_vm3, %v14516_v31, -inf  ;;  %v14528_v53 = vsel %vm12053_vm5, %v6402_v17, -inf  ;;  %v14540_v63 = vpop.xlane.xlu1 %6609 }
 0xd85   :  { %v14502_v43 = vpop.eup %11028  ;;  %6768 = vadd.xlane.f32.xlu1 %v6767_v45  ;;  %v6770_v60 = vsel %vm1479_vm3, %v14498_v11, 0.0  ;;  %v6590_v18 = vsel %vm1479_vm3, %v14528_v53, -inf }
 0xd86   :  { %6771 = vadd.xlane.f32.xlu0 %v6770_v60  ;;  %v6776_v0 = vsel %vm1479_vm3, %v14502_v43, 0.0 }
 0xd88   :  { %v14542_v44 = vpop.xlane.xlu1 %6603 }
 0xd89   :  { %6777 = vadd.xlane.f32.xlu1 %v6776_v0 }
 0xd8a   :  { %6594 = vmax.xlane.f32.xlu0 %v6593_v57 }
 0xd8d   :  { %6597 = vmax.xlane.f32.xlu1 %v6596_v30 }
 0xd8e   :  { %6588 = vmax.xlane.f32.xlu0 %v6587_v37 }
 0xd91   :  { %6591 = vmax.xlane.f32.xlu1 %v6590_v18 }
 0xda2   :  { %7129 = vrot.lane.b32.xlu1 %v16077_v28, %s11221_s22 }
 0xda4   :  { %7127 = vrot.lane.b32.xlu0 %v16078_v13, %s11221_s22 }
 0xdcd   :  { %v6715_v62 = vpop.xlane.xlu0 %6714 }
 0xdd1   :  { %v6709_v34 = vpop.xlane.xlu0 %6708 }
 0xdd5   :  { %v6718_v33 = vpop.xlane.xlu1 %6717 }
 0xdd6   :  { %11030 = vrcp.f32 %v6718_v33 }
 0xdd7   :  { %11032 = vrcp.f32 %v6709_v34 }
 0xdd8   :  { %11034 = vrcp.f32 %v6715_v62 }
 0xdd9   :  { %v6712_v40 = vpop.xlane.xlu1 %6711 }
 0xdda   :  { %11036 = vrcp.f32 %v6712_v40 }
 0xddd   :  { %v6727_v6 = vpop.xlane.xlu0 %6726 }
 0xddf   :  { %v6730_v25 = vpop.xlane.xlu1 %6729 }
 0xde0   :  { %v11031_v15 = vpop.eup %11030  ;;  %11038 = vrcp.f32 %v6730_v25 }
 0xde1   :  { %v6721_v51 = vpop.xlane.xlu0 %6720  ;;  %v11033_v24 = vpop.eup %11032  ;;  %v6838_v45 = vmul.f32 %v11031_v15, %v14399_v35 }
 0xde2   :  { %11040 = vrcp.f32 %v6721_v51  ;;  %v11035_v38 = vpop.eup %11034  ;;  %v6835_v60 = vmul.f32 %v11033_v24, %v14393_v26 }
 0xde3   :  { %11042 = vrcp.f32 %v6727_v6  ;;  %v6724_v16 = vpop.xlane.xlu1 %6723  ;;  %v6837_v57 = vmul.f32 %v11035_v38, %v14388_v9 }
 0xde4   :  { %v11037_v17 = vpop.eup %11036  ;;  %11044 = vrcp.f32 %v6724_v16 }
 0xde5   :  { %v6836_v0 = vmul.f32 %v11037_v17, %v14404_v58  ;;  %v6868_v37 = vpack.c.bf16 %v6838_v45, %v6837_v57 }
 0xde7   :  { %v6867_v30 = vpack.c.bf16 %v6836_v0, %v6835_v60 }
 0xde9   :  { %10234 = vmatprep.mubr.msk.bf16.mxu1 %vm1479_vm3, %v6867_v30 }
 0xdea   :  { %10235 = vmatmul.mubr.msk.bf16.vlgmr.msra.gmra.mrb[136].mxu1 %vm1479_vm3, %v6868_v37  ;;  %v11039_v18 = vpop.eup %11038 }
 0xdeb   :  { %10239 = vmatpush3.bf16.msra.mxu1 %v14185_v20  ;;  %v6842_v26 = vmul.f32 %v11039_v18, %v14412_v4 }
 0xdec   :  { %v11041_v28 = vpop.eup %11040  ;;  %10240 = vmatprep.subr.bf16.mxu1 %v14190_v48 }
 0xded   :  { %v11043_v35 = vpop.eup %11042  ;;  %v6739_v13 = vpop.xlane.xlu0 %6738  ;;  %v6839_v9 = vmul.f32 %v11041_v28, %v14417_v19 }
 0xdee   :  { %v11045_v62 = vpop.eup %11044  ;;  %v6841_v34 = vmul.f32 %v11043_v35, %v14408_v23 }
 0xdef   :  { %10241 = vmatpush3.bf16.msra.mxu1 %v14190_v48  ;;  %v6840_v58 = vmul.f32 %v11045_v62, %v14422_v50  ;;  %v6742_v33 = vpop.xlane.xlu1 %6741 }
 0xdf0   :  { %10254 = vmatprep.subr.bf16.mxu1 %v14380_v8  ;;  %v6870_v6 = vpack.c.bf16 %v6842_v26, %v6841_v34  ;;  %11046 = vrcp.f32 %v6742_v33 }
 0xdf1   :  { %v6733_v20 = vpop.xlane.xlu0 %6732  ;;  %v6869_v40 = vpack.c.bf16 %v6840_v58, %v6839_v9 }
 0xdf2   :  { %11048 = vrcp.f32 %v6733_v20 }
 0xdf3   :  { %10242 = vmatprep.mubr.msk.bf16.mxu1 %vm1479_vm3, %v6869_v40  ;;  %11050 = vrcp.f32 %v6739_v13 }
 0xdf4   :  { %10243 = vmatmul.mubr.msk.bf16.vlgmr.msra.gmra.mrb[140].mxu1 %vm1479_vm3, %v6870_v6 }
 0xdf5   :  { %10255 = vmatpush3.bf16.msra.mxu1 %v14380_v8  ;;  %v6736_v48 = vpop.xlane.xlu0 %6735 }
 0xdf6   :  { %10256 = vmatprep.subr.bf16.mxu1 %v14382_v59  ;;  %11052 = vrcp.f32 %v6736_v48 }
 0xdf9   :  { %10257 = vmatpush3.bf16.msra.mxu1 %v14382_v59 }
 0xdfa   :  { %v11047_v23 = vpop.eup %11046 }
 0xdfb   :  { %v6846_v15 = vmul.f32 %v11047_v23, %v14432_v54 }
 0xdfc   :  { %v11049_v4 = vpop.eup %11048 }
 0xdfd   :  { %v11051_v19 = vpop.eup %11050  ;;  %v6751_v50 = vpop.xlane.xlu0 %6750  ;;  %v6843_v24 = vmul.f32 %v11049_v4, %v14437_v7 }
 0xdfe   :  { %v6845_v8 = vmul.f32 %v11051_v19, %v14428_v10 }
 0xe00   :  { %v11053_v25 = vpop.eup %11052  ;;  %v6872_v59 = vpack.c.bf16 %v6846_v15, %v6845_v8 }
 0xe01   :  { %v6745_v51 = vpop.xlane.xlu1 %6744  ;;  %v6844_v38 = vmul.f32 %v11053_v25, %v14442_v21 }
 0xe02   :  { %11054 = vrcp.f32 %v6745_v51 }
 0xe03   :  { %11056 = vrcp.f32 %v6751_v50  ;;  %v6748_v16 = vpop.xlane.xlu0 %6747  ;;  %v6871_v17 = vpack.c.bf16 %v6844_v38, %v6843_v24 }
 0xe04   :  { %11058 = vrcp.f32 %v6748_v16 }
 0xe05   :  { %v6754_v45 = vpop.xlane.xlu1 %6753  ;;  %10250 = vmatprep.mubr.msk.bf16.mxu0 %vm1479_vm3, %v6871_v17 }
 0xe06   :  { %11060 = vrcp.f32 %v6754_v45  ;;  %10251 = vmatmul.mubr.msk.bf16.vlgmr.msra.gmra.mrb[200].mxu0 %vm1479_vm3, %v6872_v59 }
 0xe07   :  { %v6571_v54 = vpop.xlane.xlu0 %6570 }
 0xe08   :  { %v6629_v60 = vsub.f32 %v14467_v42, %v6571_v54 }
 0xe09   :  { %v6574_v7 = vpop.xlane.xlu1 %6573 }
 0xe0a   :  { %v6679_v0 = vmul.f32 1.442695, %v6629_v60  ;;  %v6630_v21 = vsub.f32 %v14474_v29, %v6574_v7 }
 0xe0b   :  { %v6565_v10 = vpop.xlane.xlu0 %6564 }
 0xe0c   :  { %v11055_v57 = vpop.eup %11054  ;;  %11062 = vpow2.f32 %v6679_v0  ;;  %v6627_v30 = vsub.f32 %v14480_v39, %v6565_v10  ;;  %v6681_v18 = vmul.f32 1.442695, %v6630_v21  ;;  %v16080_v21 = vld [vmem:[#allocation21_spill] sm:$0xff]  ;;  %v6641_v10 = vsub.f32 %v14358_v61, %v14538_v36 }
 0xe0d   :  { %v11057_v37 = vpop.eup %11056  ;;  %v6568_v28 = vpop.xlane.xlu1 %6567  ;;  %v6847_v9 = vmul.f32 %v11055_v57, %v14453_v27 }
 0xe0e   :  { %v11059_v35 = vpop.eup %11058  ;;  %v6675_v13 = vmul.f32 1.442695, %v6627_v30  ;;  %v6628_v62 = vsub.f32 %v14486_v46, %v6568_v28  ;;  %v6849_v34 = vmul.f32 %v11057_v37, %v14448_v56  ;;  %v6642_v37 = vsub.f32 %v14370_v5, %v14540_v63 }
 0xe0f   :  { %v6775_v26 = vpop.xlane.xlu0 %6774  ;;  %v6848_v42 = vmul.f32 %v11059_v35, %v14460_v3 }
 0xe10   :  { %v11061_v58 = vpop.eup %11060  ;;  %11064 = vpow2.f32 %v6675_v13  ;;  %v6677_v29 = vmul.f32 1.442695, %v6628_v62  ;;  %v6705_v35 = vmul.f32 1.442695, %v6642_v37 }
 0xe11   :  { %v6850_v33 = vmul.f32 %v11061_v58, %v14455_v2  ;;  %11066 = vpow2.f32 %v6681_v18  ;;  %v6873_v39 = vpack.c.bf16 %v6848_v42, %v6847_v9  ;;  %v6703_v18 = vmul.f32 1.442695, %v6641_v10 }
 0xe12   :  { %11068 = vpow2.f32 %v6677_v29  ;;  %v6769_v20 = vpop.xlane.xlu1 %6768 }
 0xe13   :  { %11070 = vrcp.f32 %v6769_v20  ;;  %10258 = vmatprep.mubr.msk.bf16.mxu1 %vm1479_vm3, %v6873_v39  ;;  %v6772_v46 = vpop.xlane.xlu0 %6771  ;;  %v6874_v40 = vpack.c.bf16 %v6850_v33, %v6849_v34 }
 0xe14   :  { %11072 = vrcp.f32 %v6772_v46  ;;  %v16081_v46 = vld [vmem:[#allocation25_spill] sm:$0xff] }
 0xe15   :  { %11074 = vrcp.f32 %v6775_v26  ;;  %10259 = vmatmul.mubr.msk.bf16.vlgmr.msra.gmra.mrb[144].mxu1 %vm1479_vm3, %v6874_v40 }
 0xe16   :  { %v14579_v27 = vpop.eup %11062  ;;  %v6778_v3 = vpop.xlane.xlu1 %6777 }
 0xe17   :  { %11076 = vrcp.f32 %v6778_v3  ;;  %v6595_v56 = vpop.xlane.xlu0 %6594  ;;  %v6761_v2 = vsel %vm1479_vm3, %v14579_v27, 0.0 }
 0xe18   :  { %6762 = vadd.xlane.f32.xlu0 %v6761_v2  ;;  %v6637_v28 = vsub.f32 %v14508_v41, %v6595_v56 }
 0xe1a   :  { %v14583_v6 = vpop.eup %11064  ;;  %v6598_v48 = vpop.xlane.xlu1 %6597 }
 0xe1b   :  { %v14585_v23 = vpop.eup %11066  ;;  %v6589_v4 = vpop.xlane.xlu0 %6588  ;;  %v6755_v19 = vsel %vm1479_vm3, %v14583_v6, 0.0  ;;  %v6638_v61 = vsub.f32 %v14516_v31, %v6598_v48 }
 0xe1c   :  { %v14589_v50 = vpop.eup %11068  ;;  %6756 = vadd.xlane.f32.xlu1 %v6755_v19  ;;  %v6764_v16 = vsel %vm1479_vm3, %v14585_v23, 0.0  ;;  %v6635_v13 = vsub.f32 %v14520_v47, %v6589_v4 }
 0xe1d   :  { %v11071_v25 = vpop.eup %11070  ;;  %v6758_v15 = vsel %vm1479_vm3, %v14589_v50, 0.0  ;;  %v6697_v5 = vmul.f32 1.442695, %v6638_v61 }
 0xe1e   :  { %v11073_v51 = vpop.eup %11072  ;;  %v6592_v24 = vpop.xlane.xlu1 %6591  ;;  %6759 = vadd.xlane.f32.xlu0 %v6758_v15  ;;  %v6855_v17 = vmul.f32 %v11071_v25, %v14496_v1 }
 0xe1f   :  { %v11075_v38 = vpop.eup %11074  ;;  %v7128_v8 = vpop.permute.xlu0 %7127  ;;  %v6856_v59 = vmul.f32 %v11073_v51, %v14498_v11  ;;  %v16079_v11 = vld [vmem:[#allocation23_spill] sm:$0xff] }
 0xe20   :  { %6765 = vadd.xlane.f32.xlu1 %v6764_v16  ;;  %10262 = vmatprep.subr.bf16.mxu0 %v7128_v8  ;;  %v14598_v60 = vmul.f32 %v11075_v38, %v14490_v52  ;;  %v6640_v52 = vsub.f32 %v14376_v55, %v14542_v44  ;;  %v6695_v55 = vmul.f32 1.442695, %v6637_v28 }
 0xe21   :  { %v11077_v45 = vpop.eup %11076  ;;  %10263 = vmatpush3.bf16.msra.mxu0 %v7128_v8  ;;  %v6877_v54 = vpack.c.bf16 %v6856_v59, %v6855_v17 }
 0xe22   :  { %v14601_v7 = vmul.f32 %v11077_v45, %v14502_v43  ;;  %v7130_v0 = vpop.permute.xlu1 %7129  ;;  %v6639_v43 = vsub.f32 %v14364_v32, %v14536_v14  ;;  %v6701_v57 = vmul.f32 1.442695, %v6640_v52  ;;  %v6636_v32 = vsub.f32 %v14528_v53, %v6592_v24 }
 0xe23   :  { %10264 = vmatprep.subr.bf16.mxu0 %v7130_v0  ;;  %10274 = vmatprep.mubr.msk.bf16.mxu1 %vm1479_vm3, %v6877_v54  ;;  %v6691_v14 = vmul.f32 1.442695, %v6635_v13 }
 0xe24   :  { %v6878_v1 = vpack.c.bf16 %v14601_v7, %v14598_v60  ;;  %v6699_v30 = vmul.f32 1.442695, %v6639_v43  ;;  %11078 = vpow2.f32 %v6701_v57  ;;  %v6693_v36 = vmul.f32 1.442695, %v6636_v32 }
 0xe25   :  { %10265 = vmatpush3.bf16.msra.mxu0 %v7130_v0 }
 0xe26   :  { %11080 = vpow2.f32 %v6699_v30 }
 0xe27   :  { %11082 = vpow2.f32 %v6703_v18 }
 0xe28   :  { %11084 = vpow2.f32 %v6705_v35 }
 0xe29   :  { %11086 = vpow2.f32 %v6695_v55 }
 0xe2a   :  { %11088 = vpow2.f32 %v6691_v14 }
 0xe2b   :  { %11090 = vpow2.f32 %v6693_v36 }
 0xe2c   :  { %11092 = vpow2.f32 %v6697_v5 }
 0xe2e   :  { %v14622_v44 = vpop.eup %11078 }
 0xe2f   :  { %v6794_v41 = vsel %vm1479_vm3, %v14622_v44, 0.0 }
 0xe30   :  { %v14624_v63 = vpop.eup %11080 }
 0xe31   :  { %7190 = vrot.lane.b32.xlu1 %v16079_v11, %s11221_s22  ;;  %v14628_v47 = vpop.eup %11082  ;;  %v6791_v31 = vsel %vm1479_vm3, %v14624_v63, 0.0 }
 0xe32   :  { %v14632_v53 = vpop.eup %11084  ;;  %v6797_v62 = vsel %vm1479_vm3, %v14628_v47, 0.0 }
 0xe33   :  { %v14636_v26 = vpop.eup %11086  ;;  %v6800_v9 = vsel %vm1479_vm3, %v14632_v53, 0.0 }
 0xe34   :  { %7188 = vrot.lane.b32.xlu0 %v16080_v21, %s11221_s22  ;;  %v14640_v42 = vpop.eup %11088  ;;  %v6785_v58 = vsel %vm1479_vm3, %v14636_v26, 0.0 }
 0xe35   :  { %v14644_v29 = vpop.eup %11090  ;;  %v6779_v34 = vsel %vm1479_vm3, %v14640_v42, 0.0 }
 0xe36   :  { %v14648_v33 = vpop.eup %11092  ;;  %v6782_v39 = vsel %vm1479_vm3, %v14644_v29, 0.0 }
 0xe37   :  { %v6788_v20 = vsel %vm1479_vm3, %v14648_v33, 0.0 }
 0xe53   :  { %6795 = vadd.xlane.f32.xlu0 %v6794_v41 }
 0xe55   :  { %6792 = vadd.xlane.f32.xlu1 %v6791_v31 }
 0xe57   :  { %6798 = vadd.xlane.f32.xlu0 %v6797_v62 }
 0xe59   :  { %6801 = vadd.xlane.f32.xlu1 %v6800_v9 }
 0xe5b   :  { %6786 = vadd.xlane.f32.xlu0 %v6785_v58 }
 0xe5d   :  { %6780 = vadd.xlane.f32.xlu1 %v6779_v34 }
 0xe5f   :  { %6783 = vadd.xlane.f32.xlu0 %v6782_v39 }
 0xe61   :  { %6789 = vadd.xlane.f32.xlu1 %v6788_v20 }
 0xe72   :  { %7251 = vrot.lane.b32.xlu1 %v15967_v12, %s11221_s22 }
 0xe75   :  { %7249 = vrot.lane.b32.xlu0 %v16081_v46, %s11221_s22 }
 0xe76   :  { %7310 = vrot.lane.b32.xlu1 %v16051_v49, %s11221_s22 }
 0xe7a   :  { %7312 = vrot.lane.b32.xlu1 %v15916_v22, %s11221_s22 }
 0xea5   :  { %v6763_v40 = vpop.xlane.xlu0 %6762 }
 0xea9   :  { %v6757_v3 = vpop.xlane.xlu1 %6756 }
 0xeaa   :  { %11094 = vrcp.f32 %v6757_v3 }
 0xeab   :  { %11096 = vrcp.f32 %v6763_v40  ;;  %v6760_v56 = vpop.xlane.xlu0 %6759 }
 0xeac   :  { %11098 = vrcp.f32 %v6760_v56 }
 0xead   :  { %v6766_v2 = vpop.xlane.xlu1 %6765 }
 0xeae   :  { %11100 = vrcp.f32 %v6766_v2 }
 0xeaf   :  { %v7189_v48 = vpop.permute.xlu0 %7188 }
 0xeb0   :  { %10270 = vmatprep.subr.bf16.mxu1 %v7189_v48 }
 0xeb1   :  { %v7191_v12 = vpop.permute.xlu1 %7190  ;;  %10271 = vmatpush3.bf16.msra.mxu1 %v7189_v48 }
 0xeb2   :  { %10272 = vmatprep.subr.bf16.mxu1 %v7191_v12 }
 0xeb4   :  { %v11095_v4 = vpop.eup %11094 }
 0xeb5   :  { %v11097_v19 = vpop.eup %11096  ;;  %10273 = vmatpush3.bf16.msra.mxu1 %v7191_v12  ;;  %v6851_v25 = vmul.f32 %v11095_v4, %v14583_v6 }
 0xeb6   :  { %v11099_v49 = vpop.eup %11098  ;;  %v6853_v51 = vmul.f32 %v11097_v19, %v14579_v27  ;;  %v10513_v19 = vld [vmem:[%s15713_s4 + $0x18] sm:$0xff]  }
 0xeb7   :  { %v6852_v22 = vmul.f32 %v11099_v49, %v14589_v50 }
 0xeb8   :  { %v11101_v15 = vpop.eup %11100  ;;  %10275 = vmatmul.mubr.msk.bf16.vlgmr.msra.gmra.mrb[148].mxu1 %vm1479_vm3, %v6878_v1 }
 0xeb9   :  { %v6854_v24 = vmul.f32 %v11101_v15, %v14585_v23  ;;  %v6875_v38 = vpack.c.bf16 %v6852_v22, %v6851_v25 }
 0xebb   :  { %10266 = vmatprep.mubr.msk.bf16.mxu0 %vm1479_vm3, %v6875_v38  ;;  %v6876_v8 = vpack.c.bf16 %v6854_v24, %v6853_v51 }
 0xebd   :  { %v14671_v16 = vpop.f32.mrb[136].mxu1  ;;  %10267 = vmatmul.mubr.msk.bf16.vlgmr.msra.gmra.mrb[204].mxu0 %vm1479_vm3, %v6876_v8 }
 0xebe   :  { %v14674_v6 = vpop.f32.mrb[137].mxu1 }
 0xebf   :  { %v14676_v50 = vpop.f32.mrb[138].mxu1 }
 0xec0   :  { %v7372_v17 = vpack.c.bf16 %v14676_v50, %v14671_v16  ;;  %v14680_v59 = vpop.f32.mrb[139].mxu1 }
 0xec1   :  { %v7371_v27 = vpack.c.bf16 %v14680_v59, %v14674_v6 }
 0xec7   :  { %v14684_v23 = vpop.f32.mrb[140].mxu1 }
 0xec8   :  { %v14686_v45 = vpop.f32.mrb[141].mxu1 }
 0xec9   :  { %v14688_v54 = vpop.f32.mrb[142].mxu1 }
 0xeca   :  { %v7374_v60 = vpack.c.bf16 %v14688_v54, %v14684_v23  ;;  %v14692_v7 = vpop.f32.mrb[143].mxu1 }
 0xecb   :  { %v7373_v0 = vpack.c.bf16 %v14692_v7, %v14686_v45 }
 0xed9   :  { %v14696_v1 = vpop.f32.mrb[200].mxu0 }
 0xeda   :  { %v14698_v11 = vpop.f32.mrb[201].mxu0 }
 0xedb   :  { %v14700_v21 = vpop.f32.mrb[202].mxu0 }
 0xedc   :  { %v7376_v52 = vpack.c.bf16 %v14700_v21, %v14696_v1  ;;  %v14704_v43 = vpop.f32.mrb[203].mxu0 }
 0xedd   :  { %v7375_v10 = vpack.c.bf16 %v14704_v43, %v14698_v11 }
 0xee0   :  { %v6796_v57 = vpop.xlane.xlu0 %6795 }
 0xee1   :  { %11102 = vrcp.f32 %v6796_v57 }
 0xee2   :  { %v6793_v30 = vpop.xlane.xlu1 %6792 }
 0xee3   :  { %11104 = vrcp.f32 %v6793_v30  ;;  %v16083_v30 = vld [vmem:[#allocation27_spill] sm:$0xff] }
 0xee4   :  { %v6799_v37 = vpop.xlane.xlu0 %6798 }
 0xee6   :  { %v6802_v18 = vpop.xlane.xlu1 %6801 }
 0xee7   :  { %11106 = vrcp.f32 %v6802_v18 }
 0xee8   :  { %v14708_v28 = vpop.f32.mrb[144].mxu1  ;;  %v6787_v35 = vpop.xlane.xlu0 %6786 }
 0xee9   :  { %v7112_v13 = vpop.f32.mrb[145].mxu1 }
 0xeea   :  { %v10261_v55 = vpop.f32.mrb[146].mxu1  ;;  %v6781_v32 = vpop.xlane.xlu1 %6780 }
 0xeeb   :  { %v11103_v61 = vpop.eup %11102  ;;  %v7378_v14 = vpack.c.bf16 %v10261_v55, %v14708_v28  ;;  %11108 = vrcp.f32 %v6781_v32  ;;  %v7115_v36 = vpop.f32.mrb[147].mxu1  ;;  %v16084_v28 = vld [vmem:[#allocation4_spill] sm:$0xff]  ;;  %v14765_v55 = vld [vmem:[%s15714_s5] ss:$0 sm:$0xff]  ;;  %v16085_v32 = vld [vmem:[#allocation7_spill] sm:$0xff] }
 0xeec   :  { %11110 = vrcp.f32 %v6787_v35  ;;  %v7377_v5 = vpack.c.bf16 %v7115_v36, %v7112_v13  ;;  %v6784_v41 = vpop.xlane.xlu0 %6783  ;;  %v6864_v58 = vmul.f32 %v11103_v61, %v14622_v44  ;;  %v11182_v36 = vld [vmem:[%s15709_s0 + $0x10] sm:$0xff] }
 0xeed   :  { %v11105_v31 = vpop.eup %11104  ;;  %11112 = vrcp.f32 %v6784_v41  ;;  %v11183_v41 = vld [vmem:[%s15709_s0] sm:$0xff] }
 0xeee   :  { %11114 = vrcp.f32 %v6799_v37  ;;  %v6790_v62 = vpop.xlane.xlu1 %6789  ;;  %v6863_v9 = vmul.f32 %v11105_v31, %v14624_v63 }
 0xeef   :  { %11116 = vrcp.f32 %v6790_v62  ;;  %v16086_v62 = vld [vmem:[#allocation67_spill] sm:$0xff] }
 0xef0   :  { %v7250_v34 = vpop.permute.xlu0 %7249  ;;  %v6881_v39 = vpack.c.bf16 %v6864_v58, %v6863_v9 }
 0xef1   :  { %10278 = vmatprep.subr.bf16.mxu0 %v7250_v34  ;;  %v11107_v46 = vpop.eup %11106 }
 0xef2   :  { %v7252_v20 = vpop.permute.xlu1 %7251  ;;  %10279 = vmatpush3.bf16.msra.mxu0 %v7250_v34  ;;  %10290 = vmatprep.mubr.msk.bf16.mxu1 %vm1479_vm3, %v6881_v39  ;;  %v6866_v4 = vmul.f32 %v11107_v46, %v14632_v53  ;;  %v16082_v53 = vmov 0   ;;  %v11184_v34 = vld [vmem:[%s15709_s0 + $0x8] sm:$0xff]  ;;  %v11185_v46 = vld [vmem:[%s15709_s0 + $0x18] sm:$0xff] }
 0xef3   :  { %10280 = vmatprep.subr.bf16.mxu0 %v7252_v20 }
 0xef5   :  { %v11109_v40 = vpop.eup %11108 }
 0xef6   :  { %v11111_v3 = vpop.eup %11110  ;;  %v7311_v56 = vpop.permute.xlu1 %7310  ;;  %10281 = vmatpush3.bf16.msra.mxu0 %v7252_v20  ;;  %v6859_v44 = vmul.f32 %v11109_v40, %v14640_v42 }
 0xef7   :  { %v11113_v2 = vpop.eup %11112  ;;  %10286 = vmatprep.subr.bf16.mxu1 %v7311_v56  ;;  %v6861_v49 = vmul.f32 %v11111_v3, %v14636_v26 }
 0xef8   :  { %v11115_v48 = vpop.eup %11114  ;;  %10287 = vmatpush3.bf16.msra.mxu1 %v7311_v56  ;;  %v6860_v63 = vmul.f32 %v11113_v2, %v14644_v29 }
 0xef9   :  { %v11117_v12 = vpop.eup %11116  ;;  %v6865_v51 = vmul.f32 %v11115_v48, %v14628_v47  ;;  %v16087_v48 = vld [vmem:[#allocation68_spill] sm:$0xff] }
 0xefa   :  { %v6862_v25 = vmul.f32 %v11117_v12, %v14648_v33  ;;  %v7313_v22 = vpop.permute.xlu1 %7312  ;;  %v6879_v15 = vpack.c.bf16 %v6860_v63, %v6859_v44  ;;  %v16088_v12 = vld [vmem:[#allocation69_spill] sm:$0xff] }
 0xefb   :  { %10288 = vmatprep.subr.bf16.mxu1 %v7313_v22  ;;  %v6882_v29 = vpack.c.bf16 %v6866_v4, %v6865_v51 }
 0xefc   :  { %10282 = vmatprep.mubr.msk.bf16.mxu0 %vm1479_vm3, %v6879_v15  ;;  %10289 = vmatpush3.bf16.msra.mxu1 %v7313_v22  ;;  %v6880_v42 = vpack.c.bf16 %v6862_v25, %v6861_v49  ;;  %v16089_v25 = vld [vmem:[#allocation70_spill] sm:$0xff] }
 0xefd   :  { %10294 = vmatprep.subr.bf16.mxu1 %v10513_v19 }
 0xefe   :  { %10283 = vmatmul.mubr.msk.bf16.vlgmr.msra.gmra.mrb[208].mxu0 %vm1479_vm3, %v6880_v42  ;;  %v11186_v42 = vld [vmem:[%s15709_s0 + $0x20] sm:$0xff] }
 0xeff   :  { %10291 = vmatmul.mubr.msk.bf16.vlgmr.msra.gmra.mrb[152].mxu1 %vm1479_vm3, %v6882_v29  ;;  %8357 = vmatprep.mubr.bf16.mxu0 %v16082_v53 }
 0xf00   :  { %10296 = vmatprep.mubr.msk.bf16.mxu1 %vm908_vm1, %v7371_v27  ;;  %10295 = vmatpush3.bf16.msra.mxu1 %v10513_v19 }
 0xf07   :  { %10297 = vmatmul.mubr.msk.bf16.vlgmr.msra.gmra.mrb[96].mxu1 %vm908_vm1, %v7372_v17 }
 0xf08   :  { %10300 = vmatprep.mubr.msk.bf16.mxu1 %vm908_vm1, %v7373_v0 }
 0xf0f   :  { %10301 = vmatmul.mubr.msk.bf16.gmra.mrb[100].mxu1 %vm908_vm1, %v7374_v60 }
 0xf10   :  { %10304 = vmatprep.mubr.msk.bf16.mxu1 %vm908_vm1, %v7375_v10 }
 0xf17   :  { %10305 = vmatmul.mubr.msk.bf16.gmra.mrb[104].mxu1 %vm908_vm1, %v7376_v52 }
 0xf18   :  { %10308 = vmatprep.mubr.msk.bf16.mxu1 %vm908_vm1, %v7377_v5 }
 0xf1f   :  { %10309 = vmatmul.mubr.msk.bf16.gmra.mrb[108].mxu1 %vm908_vm1, %v7378_v14 }
 0xf8b   :  { %v10276_v47 = vpop.f32.mrb[148].mxu1 }
 0xf8c   :  { %v7234_v26 = vpop.f32.mrb[149].mxu1 }
 0xf8d   :  { %v10277_v33 = vpop.f32.mrb[150].mxu1 }
 0xf8e   :  { %v7382_v24 = vpack.c.bf16 %v10277_v33, %v10276_v47  ;;  %v7237_v38 = vpop.f32.mrb[151].mxu1  ;;  %v16090_v47 = vld [vmem:[#allocation71_spill] sm:$0xff] }
 0xf8f   :  { %v7381_v8 = vpack.c.bf16 %v7237_v38, %v7234_v26 }
 0xf90   :  { %v10268_v16 = vpop.f32.mrb[204].mxu0 }
 0xf91   :  { %v7173_v6 = vpop.f32.mrb[205].mxu0 }
 0xf92   :  { %v10269_v50 = vpop.f32.mrb[206].mxu0 }
 0xf93   :  { %v7380_v17 = vpack.c.bf16 %v10269_v50, %v10268_v16  ;;  %v7176_v59 = vpop.f32.mrb[207].mxu0 }
 0xf94   :  { %v7379_v27 = vpack.c.bf16 %v7176_v59, %v7173_v6  ;;  %v11189_v6 = vld [vmem:[%s15709_s0 + $0x30] sm:$0xff] }
 0xf96   :  { %10312 = vmatprep.mubr.msk.bf16.mxu1 %vm908_vm1, %v7379_v27 }
 0xf97   :  { %10313 = vmatmul.mubr.msk.bf16.gmra.mrb[80].mxu1 %vm908_vm1, %v7380_v17 }
 0xf98   :  { %10316 = vmatprep.mubr.msk.bf16.mxu1 %vm908_vm1, %v7381_v8  ;;  %v11188_v8 = vld [vmem:[%s15709_s0 + $0x28] sm:$0xff] }
 0xf9f   :  { %10317 = vmatmul.mubr.msk.bf16.gmra.mrb[84].mxu1 %vm908_vm1, %v7382_v24  ;;  %v11187_v24 = vld [vmem:[%s15709_s0 + $0x38] sm:$0xff] }
 0xfd1   :  { %v10284_v23 = vpop.f32.mrb[208].mxu0 }
 0xfd2   :  { %v7295_v45 = vpop.f32.mrb[209].mxu0  ;;  %v10292_v54 = vpop.f32.mrb[152].mxu1 }
 0xfd3   :  { %v10285_v60 = vpop.f32.mrb[210].mxu0  ;;  %v7356_v7 = vpop.f32.mrb[153].mxu1 }
 0xfd4   :  { %v7384_v0 = vpack.c.bf16 %v10285_v60, %v10284_v23  ;;  %v7298_v1 = vpop.f32.mrb[211].mxu0  ;;  %v10293_v11 = vpop.f32.mrb[154].mxu1 }
 0xfd5   :  { %v7383_v21 = vpack.c.bf16 %v7298_v1, %v7295_v45  ;;  %v7386_v52 = vpack.c.bf16 %v10293_v11, %v10292_v54  ;;  %v7359_v43 = vpop.f32.mrb[155].mxu1  ;;  %v16091_v45 = vld [vmem:[#allocation72_spill] sm:$0xff] }
 0xfd6   :  { %v7385_v10 = vpack.c.bf16 %v7359_v43, %v7356_v7 }
 0xfd7   :  { %10320 = vmatprep.mubr.msk.bf16.mxu1 %vm908_vm1, %v7383_v21 }
 0xfd8   :  { %10321 = vmatmul.mubr.msk.bf16.gmra.mrb[88].mxu1 %vm908_vm1, %v7384_v0  ;;  %v16092_v0 = vld [vmem:[#allocation73_spill] sm:$0xff] }
 0xfd9   :  { %10324 = vmatprep.mubr.msk.bf16.mxu1 %vm908_vm1, %v7385_v10 }
 0xfda   :  { %v10298_v57 = vpop.f32.mrb[96].mxu1 }
 0xfdb   :  { %v10330_v37 = vadd.f32 %v10298_v57, %v16083_v30  ;;  %v7477_v18 = vpop.f32.mrb[97].mxu1  ;;  %v11190_v30 = vld [vmem:[%s15709_s0 + $0x40] sm:$0xff] }
 0xfdc   :  { %v10331_v35 = vadd.f32 %v7477_v18, %v16084_v28  ;;  %v10299_v13 = vpop.f32.mrb[98].mxu1  ;;  %v16094_v18 = vld [vmem:[#allocation75_spill] sm:$0xff] }
 0xfdd   :  { %v10332_v61 = vadd.f32 %v10299_v13, %v16085_v32  ;;  %v7480_v14 = vpop.f32.mrb[99].mxu1  ;;  %v7638_v5 = vadd.f32 %v11182_v36, %v10330_v37  ;;  %v11191_v13 = vld [vmem:[%s15709_s0 + $0x58] sm:$0xff] }
 0xfde   :  { %v7636_v31 = vadd.f32 %v11183_v41, %v10331_v35  ;;  %v10333_v9 = vadd.f32 %v7480_v14, %v16086_v62 }
 0xfdf   :  { %v14783_v20 = vadd.f32 %v14765_v55, %v7638_v5  ;;  %v7639_v40 = vadd.f32 %v11185_v46, %v10332_v61  ;;  %v11192_v61 = vld [vmem:[%s15709_s0 + $0x48] sm:$0xff]  ;;  %v11193_v5 = vld [vmem:[%s15709_s0 + $0x50] sm:$0xff] }
 0xfe0   :  { %v14776_v58 = vadd.f32 %v14765_v55, %v7636_v31  ;;  %v7637_v39 = vadd.f32 %v11184_v34, %v10333_v9  ;;  %10325 = vmatmul.mubr.msk.bf16.gmra.mrb[92].mxu1 %vm908_vm1, %v7386_v52  ;;  %v16093_v52 = vld [vmem:[#allocation74_spill] sm:$0xff] }
 0xfe1   :  { %v14799_v51 = vadd.f32 %v14765_v55, %v7639_v40  ;;  %v7715_v33 = vsel %vm76_vm0, %v14783_v20, 0.0 }
 0xfe2   :  { %v14789_v3 = vadd.f32 %v14765_v55, %v7637_v39  ;;  %v10302_v56 = vpop.f32.mrb[100].mxu1  ;;  %v7709_v2 = vsel %vm76_vm0, %v14776_v58, 0.0  ;;  %v16095_v39 = vld [vmem:[#allocation76_spill] sm:$0xff] }
 0xfe3   :  { %v10334_v44 = vadd.f32 %v10302_v56, %v16087_v48  ;;  %7710 = vadd.xlane.f32.xlu0 %v7709_v2  ;;  %v7493_v63 = vpop.f32.mrb[101].mxu1  ;;  %v7718_v23 = vsel %vm76_vm0, %v14799_v51, 0.0  ;;  %v16096_v2 = vld [vmem:[#allocation77_spill] sm:$0xff] }
 0xfe4   :  { %v10335_v4 = vadd.f32 %v7493_v63, %v16088_v12  ;;  %v10303_v19 = vpop.f32.mrb[102].mxu1  ;;  %v7712_v49 = vsel %vm76_vm0, %v14789_v3, 0.0  ;;  %v16097_v12 = vld [vmem:[#allocation78_spill] sm:$0xff] }
 0xfe5   :  { %v10336_v22 = vadd.f32 %v10303_v19, %v16089_v25  ;;  %7713 = vadd.xlane.f32.xlu1 %v7712_v49  ;;  %v7496_v15 = vpop.f32.mrb[103].mxu1  ;;  %v7642_v50 = vadd.f32 %v11189_v6, %v10334_v44  ;;  %v11194_v25 = vld [vmem:[%s15709_s0 + $0x60] sm:$0xff] }
 0xfe6   :  { %v7640_v29 = vadd.f32 %v11186_v42, %v10335_v4  ;;  %v10337_v26 = vadd.f32 %v7496_v15, %v16090_v47  ;;  %v16098_v15 = vld [vmem:[#allocation79_spill] sm:$0xff]  ;;  %v11195_v47 = vld [vmem:[%s15709_s0 + $0x78] sm:$0xff] }
 0xfe7   :  { %7716 = vadd.xlane.f32.xlu0 %v7715_v33  ;;  %v7643_v38 = vadd.f32 %v11187_v24, %v10336_v22  ;;  %v14833_v57 = vadd.f32 %v14765_v55, %v7642_v50  ;;  %v11196_v33 = vld [vmem:[%s15709_s0 + $0x68] sm:$0xff] }
 0xfe8   :  { %v7641_v16 = vadd.f32 %v11188_v8, %v10337_v26  ;;  %v14817_v17 = vadd.f32 %v14765_v55, %v7640_v29  ;;  %v11197_v8 = vld [vmem:[%s15709_s0 + $0x70] sm:$0xff] }
 0xfe9   :  { %v14826_v7 = vadd.f32 %v14765_v55, %v7643_v38  ;;  %v7727_v34 = vsel %vm76_vm0, %v14833_v57, 0.0 }
 0xfea   :  { %v14820_v59 = vadd.f32 %v14765_v55, %v7641_v16  ;;  %v10306_v27 = vpop.f32.mrb[104].mxu1  ;;  %v7721_v35 = vsel %vm76_vm0, %v14817_v17, 0.0 }
 0xfeb   :  { %v10338_v54 = vadd.f32 %v10306_v27, %v16091_v45  ;;  %7719 = vadd.xlane.f32.xlu0 %v7718_v23  ;;  %v7509_v60 = vpop.f32.mrb[105].mxu1  ;;  %v7730_v36 = vsel %vm76_vm0, %v14826_v7, 0.0 }
 0xfec   :  { %v10339_v1 = vadd.f32 %v7509_v60, %v16092_v0  ;;  %v10307_v11 = vpop.f32.mrb[106].mxu1  ;;  %v7724_v21 = vsel %vm76_vm0, %v14820_v59, 0.0 }
 0xfed   :  { %v10340_v43 = vadd.f32 %v10307_v11, %v16093_v52  ;;  %7725 = vadd.xlane.f32.xlu1 %v7724_v21  ;;  %v7512_v10 = vpop.f32.mrb[107].mxu1  ;;  %v7646_v41 = vadd.f32 %v11193_v5, %v10338_v54  ;;  %v11198_v52 = vld [vmem:[%s15709_s0 + $0x90] sm:$0xff] }
 0xfee   :  { %v7644_v37 = vadd.f32 %v11190_v30, %v10339_v1  ;;  %v10341_v28 = vadd.f32 %v7512_v10, %v16094_v18  ;;  %v11199_v10 = vld [vmem:[%s15709_s0 + $0x80] sm:$0xff] }
 0xfef   :  { %7722 = vadd.xlane.f32.xlu0 %v7721_v35  ;;  %v7647_v32 = vadd.f32 %v11191_v13, %v10340_v43  ;;  %v14869_v49 = vadd.f32 %v14765_v55, %v7646_v41  ;;  %v11200_v35 = vld [vmem:[%s15709_s0 + $0x98] sm:$0xff] }
 0xff0   :  { %v7645_v14 = vadd.f32 %v11192_v61, %v10341_v28  ;;  %v14853_v31 = vadd.f32 %v14765_v55, %v7644_v37 }
 0xff1   :  { %7731 = vadd.xlane.f32.xlu1 %v7730_v36  ;;  %v14862_v56 = vadd.f32 %v14765_v55, %v7647_v32  ;;  %v7739_v27 = vsel %vm76_vm0, %v14869_v49, 0.0  ;;  %v11201_v32 = vld [vmem:[%s15709_s0 + $0x88] sm:$0xff] }
 0xff2   :  { %v14856_v62 = vadd.f32 %v14765_v55, %v7645_v14  ;;  %v10310_v9 = vpop.f32.mrb[108].mxu1  ;;  %v7733_v29 = vsel %vm76_vm0, %v14853_v31, 0.0 }
 0xff3   :  { %v10342_v46 = vadd.f32 %v10310_v9, %v16095_v39  ;;  %7728 = vadd.xlane.f32.xlu0 %v7727_v34  ;;  %v7525_v40 = vpop.f32.mrb[109].mxu1  ;;  %v7742_v38 = vsel %vm76_vm0, %v14862_v56, 0.0 }
 0xff4   :  { %v10343_v48 = vadd.f32 %v7525_v40, %v16096_v2  ;;  %v10311_v44 = vpop.f32.mrb[110].mxu1  ;;  %v7736_v63 = vsel %vm76_vm0, %v14856_v62, 0.0 }
 0xff5   :  { %v10344_v4 = vadd.f32 %v10311_v44, %v16097_v12  ;;  %7737 = vadd.xlane.f32.xlu1 %v7736_v63  ;;  %v7528_v19 = vpop.f32.mrb[111].mxu1  ;;  %v7650_v16 = vadd.f32 %v11197_v8, %v10342_v46  ;;  %v11202_v63 = vld [vmem:[%s15709_s0 + $0xa0] sm:$0xff] }
 0xff6   :  { %v7648_v22 = vadd.f32 %v11194_v25, %v10343_v48  ;;  %v10345_v42 = vadd.f32 %v7528_v19, %v16098_v15 }
 0xff7   :  { %7734 = vadd.xlane.f32.xlu0 %v7733_v29  ;;  %v7651_v26 = vadd.f32 %v11195_v47, %v10344_v4  ;;  %v14902_v54 = vadd.f32 %v14765_v55, %v7650_v16  ;;  %v11203_v29 = vld [vmem:[%s15709_s0 + $0xa8] sm:$0xff] }
 0xff8   :  { %v7649_v24 = vadd.f32 %v11196_v33, %v10345_v42  ;;  %v14889_v6 = vadd.f32 %v14765_v55, %v7648_v22 }
 0xff9   :  { %7743 = vadd.xlane.f32.xlu1 %v7742_v38  ;;  %v14897_v23 = vadd.f32 %v14765_v55, %v7651_v26  ;;  %v7751_v1 = vsel %vm76_vm0, %v14902_v54, 0.0 }
 0xffa   :  { %v14892_v50 = vadd.f32 %v14765_v55, %v7649_v24  ;;  %v7745_v60 = vsel %vm76_vm0, %v14889_v6, 0.0 }
 0xffb   :  { %7740 = vadd.xlane.f32.xlu0 %v7739_v27  ;;  %16099 = vst [vmem:[#allocation38_spill] sm:$0xff] %v14897_v23  ;;  %v7754_v0 = vsel %vm76_vm0, %v14897_v23, 0.0 }
 0xffc   :  { %v7748_v45 = vsel %vm76_vm0, %v14892_v50, 0.0 }
 0xffd   :  { %7749 = vadd.xlane.f32.xlu1 %v7748_v45 }
 0xfff   :  { %7746 = vadd.xlane.f32.xlu0 %v7745_v60 }
0x1001   :  { %7755 = vadd.xlane.f32.xlu1 %v7754_v0 }
0x1003   :  { %7752 = vadd.xlane.f32.xlu0 %v7751_v1 }
0x106a   :  { %v10314_v11 = vpop.f32.mrb[80].mxu1 }
0x106b   :  { %v7541_v21 = vpop.f32.mrb[81].mxu1  ;;  %v7654_v43 = vadd.f32 %v11198_v52, %v10314_v11 }
0x106c   :  { %v7652_v30 = vadd.f32 %v11199_v10, %v7541_v21  ;;  %v10315_v37 = vpop.f32.mrb[82].mxu1  ;;  %v11204_v21 = vld [vmem:[%s15709_s0 + $0xb0] sm:$0xff] }
0x106d   :  { %v7544_v18 = vpop.f32.mrb[83].mxu1  ;;  %v7655_v13 = vadd.f32 %v11200_v35, %v10315_v37  ;;  %v14926_v14 = vadd.f32 %v14765_v55, %v7654_v43 }
0x106e   :  { %v14917_v28 = vadd.f32 %v14765_v55, %v7652_v30  ;;  %v7653_v61 = vadd.f32 %v11201_v32, %v7544_v18  ;;  %v11205_v18 = vld [vmem:[%s15709_s0 + $0xb8] sm:$0xff] }
0x106f   :  { %16101 = vst [vmem:[#allocation37_spill] sm:$0xff] %v14926_v14  ;;  %v14934_v34 = vadd.f32 %v14765_v55, %v7655_v13  ;;  %v7763_v25 = vsel %vm76_vm0, %v14926_v14, 0.0 }
0x1070   :  { %16100 = vst [vmem:[#allocation31_spill] sm:$0xff] %v14917_v28  ;;  %v14929_v36 = vadd.f32 %v14765_v55, %v7653_v61  ;;  %v7711_v5 = vpop.xlane.xlu0 %7710  ;;  %v7757_v41 = vsel %vm76_vm0, %v14917_v28, 0.0 }
0x1071   :  { %v7805_v9 = vmul.f32 0.015625, %v7711_v5  ;;  %7758 = vadd.xlane.f32.xlu0 %v7757_v41  ;;  %16103 = vst [vmem:[#allocation42_spill] sm:$0xff] %v14934_v34  ;;  %v7766_v26 = vsel %vm76_vm0, %v14934_v34, 0.0 }
0x1072   :  { %16102 = vst [vmem:[#allocation10_spill] sm:$0xff] %v14929_v36  ;;  %v7714_v39 = vpop.xlane.xlu1 %7713  ;;  %v10318_v46 = vpop.f32.mrb[84].mxu1  ;;  %v7760_v40 = vsel %vm76_vm0, %v14929_v36, 0.0 }
0x1073   :  { %v14939_v2 = vsub.f32 %v14776_v58, %v7805_v9  ;;  %v7806_v48 = vmul.f32 0.015625, %v7714_v39  ;;  %7761 = vadd.xlane.f32.xlu1 %v7760_v40  ;;  %v7557_v44 = vpop.f32.mrb[85].mxu1  ;;  %v7658_v52 = vadd.f32 %v11204_v21, %v10318_v46 }
0x1074   :  { %v7656_v12 = vadd.f32 %v11202_v63, %v7557_v44  ;;  %v10319_v4 = vpop.f32.mrb[86].mxu1  ;;  %v7717_v19 = vpop.xlane.xlu0 %7716 }
0x1075   :  { %v14947_v22 = vsub.f32 %v14789_v3, %v7806_v48  ;;  %v7807_v15 = vmul.f32 0.015625, %v7717_v19  ;;  %7764 = vadd.xlane.f32.xlu0 %v7763_v25  ;;  %v7560_v42 = vpop.f32.mrb[87].mxu1  ;;  %v7869_v33 = vmul.f32 %v14939_v2, %v14939_v2  ;;  %v7659_v35 = vadd.f32 %v11205_v18, %v10319_v4  ;;  %v10516_v25 = vld [vmem:[%s15715_s8 + $0x4] ss:$8 sps:$4 sm:$0xff]  }
0x1076   :  { %v7657_v47 = vadd.f32 %v11203_v29, %v7560_v42  ;;  %v14959_v38 = vadd.f32 %v14765_v55, %v7656_v12  ;;  %v14987_v5 = vadd.f32 %v14765_v55, %v7658_v52  ;;  %8325 = vmatprep.subr.bf16.mxu0 %v10516_v25  ;;  %v10519_v42 = vld [vmem:[%s15715_s8 + $0x14] ss:$8 sps:$4 sm:$0xff]   ;;  %v10517_v29 = vld [vmem:[%s15715_s8 + $0x10] ss:$8 sps:$4 sm:$0xff]  }
0x1077   :  { %7767 = vadd.xlane.f32.xlu1 %v7766_v26  ;;  %v7870_v24 = vmul.f32 %v14947_v22, %v14947_v22  ;;  %v14962_v8 = vsub.f32 %v14783_v20, %v7807_v15  ;;  %v7901_v27 = vsel %vm76_vm0, %v7869_v33, 0.0  ;;  %v14994_v39 = vadd.f32 %v14765_v55, %v7659_v35  ;;  %v10514_v15 = vld [vmem:[%s15715_s8] ss:$8 sps:$4 sm:$0xff]   ;;  %v10525_v33 = vld [vmem:[%s15715_s8 + $0x34] ss:$8 sps:$4 sm:$0xff]  }
0x1078   :  { %16104 = vst [vmem:[#allocation40_spill] sm:$0xff] %v14959_v38  ;;  %v7720_v16 = vpop.xlane.xlu0 %7719  ;;  %v14967_v0 = vadd.f32 %v14765_v55, %v7657_v47  ;;  %v7769_v10 = vsel %vm76_vm0, %v14959_v38, 0.0  ;;  %16106 = vst [vmem:[#allocation39_spill] sm:$0xff] %v14987_v5  ;;  %v7775_v48 = vsel %vm76_vm0, %v14987_v5, 0.0  ;;  %8326 = vmatpush1.bf16.msra.mxu0 %v10514_v15  ;;  %v10522_v47 = vld [vmem:[%s15715_s8 + $0x24] ss:$8 sps:$4 sm:$0xff]  }
0x1079   :  { %v7808_v45 = vmul.f32 0.015625, %v7720_v16  ;;  %7902 = vadd.xlane.f32.xlu0 %v7901_v27  ;;  %v7904_v60 = vsel %vm76_vm0, %v7870_v24, 0.0  ;;  %v7871_v30 = vmul.f32 %v14962_v8, %v14962_v8  ;;  %16107 = vst [vmem:[#allocation46_spill] sm:$0xff] %v14994_v39  ;;  %v7778_v63 = vsel %vm76_vm0, %v14994_v39, 0.0  ;;  %8327 = vmatprep.subr.bf16.mxu0 %v10519_v42  ;;  %v10520_v26 = vld [vmem:[%s15715_s8 + $0x20] ss:$8 sps:$4 sm:$0xff]  }
0x107a   :  { %16105 = vst [vmem:[#allocation41_spill] sm:$0xff] %v14967_v0  ;;  %v7726_v11 = vpop.xlane.xlu1 %7725  ;;  %v7772_v32 = vsel %vm76_vm0, %v14967_v0, 0.0  ;;  %v10523_v24 = vld [vmem:[%s15715_s8 + $0x30] ss:$8 sps:$4 sm:$0xff]  }
0x107b   :  { %v14970_v1 = vsub.f32 %v14799_v51, %v7808_v45  ;;  %7905 = vadd.xlane.f32.xlu1 %v7904_v60  ;;  %v7810_v13 = vmul.f32 0.015625, %v7726_v11  ;;  %v7907_v9 = vsel %vm76_vm0, %v7871_v30, 0.0  ;;  %v11209_v25 = vld [vmem:[%s15709_s0 + $0xd8] sm:$0xff] }
0x107c   :  { %v7723_v43 = vpop.xlane.xlu0 %7722  ;;  %8328 = vmatpush1.bf16.msra.mxu0 %v10517_v29 }
0x107d   :  { %v7809_v37 = vmul.f32 0.015625, %v7723_v43  ;;  %7770 = vadd.xlane.f32.xlu0 %v7769_v10  ;;  %v7872_v61 = vmul.f32 %v14970_v1, %v14970_v1  ;;  %v14997_v46 = vsub.f32 %v14820_v59, %v7810_v13  ;;  %8329 = vmatprep.subr.bf16.mxu0 %v10522_v47  ;;  %v11206_v10 = vld [vmem:[%s15709_s0 + $0xc0] sm:$0xff] }
0x107e   :  { %v7732_v27 = vpop.xlane.xlu1 %7731 }
0x107f   :  { %7773 = vadd.xlane.f32.xlu1 %v7772_v32  ;;  %v14990_v41 = vsub.f32 %v14817_v17, %v7809_v37  ;;  %v7910_v40 = vsel %vm76_vm0, %v7872_v61, 0.0  ;;  %v7874_v12 = vmul.f32 %v14997_v46, %v14997_v46  ;;  %v7812_v60 = vmul.f32 0.015625, %v7732_v27  ;;  %v11207_v32 = vld [vmem:[%s15709_s0 + $0xc8] sm:$0xff] }
0x1080   :  { %8330 = vmatpush1.bf16.msra.mxu0 %v10520_v26  ;;  %v7729_v16 = vpop.xlane.xlu0 %7728 }
0x1081   :  { %7908 = vadd.xlane.f32.xlu0 %v7907_v9  ;;  %v7873_v44 = vmul.f32 %v14990_v41, %v14990_v41  ;;  %v7916_v19 = vsel %vm76_vm0, %v7874_v12, 0.0  ;;  %8331 = vmatprep.subr.bf16.mxu0 %v10525_v33  ;;  %v7811_v45 = vmul.f32 0.015625, %v7729_v16  ;;  %v15041_v35 = vsub.f32 %v14826_v7, %v7812_v60 }
0x1082   :  { %v7738_v9 = vpop.xlane.xlu1 %7737 }
0x1083   :  { %7911 = vadd.xlane.f32.xlu1 %v7910_v40  ;;  %v7913_v4 = vsel %vm76_vm0, %v7873_v44, 0.0  ;;  %v15035_v52 = vsub.f32 %v14833_v57, %v7811_v45  ;;  %v7876_v47 = vmul.f32 %v15041_v35, %v15041_v35 }
0x1084   :  { %8332 = vmatpush1.bf16.msra.mxu0 %v10523_v24  ;;  %v7735_v43 = vpop.xlane.xlu0 %7734 }
0x1085   :  { %7776 = vadd.xlane.f32.xlu0 %v7775_v48  ;;  %v7813_v40 = vmul.f32 0.015625, %v7735_v43  ;;  %v11208_v48 = vld [vmem:[%s15709_s0 + $0xd0] sm:$0xff]  ;;  %v7922_v43 = vsel %vm76_vm0, %v7876_v47, 0.0 }
0x1087   :  { %7779 = vadd.xlane.f32.xlu1 %v7778_v63  ;;  %v15067_v33 = vsub.f32 %v14853_v31, %v7813_v40  ;;  %v11211_v40 = vld [vmem:[%s15709_s0 + $0xe8] sm:$0xff] }
0x1088   :  { %v7741_v45 = vpop.xlane.xlu0 %7740 }
0x1089   :  { %7914 = vadd.xlane.f32.xlu0 %v7913_v4  ;;  %v7875_v4 = vmul.f32 %v15035_v52, %v15035_v52 }
0x108b   :  { %7917 = vadd.xlane.f32.xlu1 %v7916_v19  ;;  %v7814_v19 = vmul.f32 0.015625, %v7738_v9  ;;  %v7919_v27 = vsel %vm76_vm0, %v7875_v4, 0.0 }
0x108c   :  { %v7747_v4 = vpop.xlane.xlu0 %7746 }
0x10ab   :  { %v10322_v11 = vpop.f32.mrb[88].mxu1 }
0x10ac   :  { %v7573_v21 = vpop.f32.mrb[89].mxu1  ;;  %v7662_v44 = vadd.f32 %v11208_v48, %v10322_v11  ;;  %v15074_v11 = vsub.f32 %v14856_v62, %v7814_v19 }
0x10ad   :  { %v7660_v30 = vadd.f32 %v11206_v10, %v7573_v21  ;;  %v10323_v37 = vpop.f32.mrb[90].mxu1  ;;  %v7744_v10 = vpop.xlane.xlu1 %7743 }
0x10ae   :  { %v7576_v18 = vpop.f32.mrb[91].mxu1  ;;  %v7663_v15 = vadd.f32 %v11209_v25, %v10323_v37  ;;  %v15070_v24 = vadd.f32 %v14765_v55, %v7662_v44  ;;  %v11210_v37 = vld [vmem:[%s15709_s0 + $0xe0] sm:$0xff]  ;;  %v7816_v9 = vmul.f32 0.015625, %v7744_v10 }
0x10af   :  { %v15044_v13 = vadd.f32 %v14765_v55, %v7660_v30  ;;  %v7661_v61 = vadd.f32 %v11207_v32, %v7576_v18  ;;  %v7815_v30 = vmul.f32 0.015625, %v7741_v45  ;;  %v7817_v45 = vmul.f32 0.015625, %v7747_v4 }
0x10b0   :  { %v15077_v21 = vadd.f32 %v14765_v55, %v7663_v15  ;;  %v7787_v32 = vsel %vm76_vm0, %v15070_v24, 0.0  ;;  %v15102_v47 = vsub.f32 %v14862_v56, %v7816_v9 }
0x10b1   :  { %v15053_v63 = vadd.f32 %v14765_v55, %v7661_v61  ;;  %v7781_v12 = vsel %vm76_vm0, %v15044_v13, 0.0  ;;  %v7877_v61 = vmul.f32 %v15067_v33, %v15067_v33  ;;  %v15095_v19 = vsub.f32 %v14869_v49, %v7815_v30 }
0x10b2   :  { %7782 = vadd.xlane.f32.xlu0 %v7781_v12  ;;  %v7790_v44 = vsel %vm76_vm0, %v15077_v21, 0.0  ;;  %v7878_v12 = vmul.f32 %v15074_v11, %v15074_v11 }
0x10b3   :  { %v10326_v42 = vpop.f32.mrb[92].mxu1  ;;  %v7784_v29 = vsel %vm76_vm0, %v15053_v63, 0.0  ;;  %v7925_v15 = vsel %vm76_vm0, %v7877_v61, 0.0  ;;  %v7879_v30 = vmul.f32 %v15095_v19, %v15095_v19 }
0x10b4   :  { %v7589_v26 = vpop.f32.mrb[93].mxu1  ;;  %7785 = vadd.xlane.f32.xlu1 %v7784_v29  ;;  %v7750_v29 = vpop.xlane.xlu1 %7749 }
0x10b5   :  { %v10327_v16 = vpop.f32.mrb[94].mxu1  ;;  %v7664_v18 = vadd.f32 %v11210_v37, %v7589_v26  ;;  %v7753_v37 = vpop.xlane.xlu0 %7752  ;;  %v7931_v4 = vsel %vm76_vm0, %v7879_v30, 0.0 }
0x10b6   :  { %v7592_v60 = vpop.f32.mrb[95].mxu1  ;;  %7920 = vadd.xlane.f32.xlu0 %v7919_v27  ;;  %v7928_v27 = vsel %vm76_vm0, %v7878_v12, 0.0 }
0x10b7   :  { %v7665_v48 = vadd.f32 %v11211_v40, %v7592_v60  ;;  %v15098_v25 = vadd.f32 %v14765_v55, %v7664_v18  ;;  %v11212_v60 = vld [vmem:[%s15709_s0 + $0xf0] sm:$0xff]  ;;  %v7818_v18 = vmul.f32 0.015625, %v7750_v29 }
0x10b8   :  { %7923 = vadd.xlane.f32.xlu1 %v7922_v43  ;;  %v7666_v43 = vadd.f32 %v11212_v60, %v10326_v42  ;;  %v7880_v42 = vmul.f32 %v15102_v47, %v15102_v47  ;;  %v7756_v40 = vpop.xlane.xlu1 %7755 }
0x10b9   :  { %v15105_v26 = vadd.f32 %v14765_v55, %v7665_v48  ;;  %v7793_v10 = vsel %vm76_vm0, %v15098_v25, 0.0  ;;  %v15123_v48 = vsub.f32 %v14889_v6, %v7817_v45 }
0x10ba   :  { %7788 = vadd.xlane.f32.xlu0 %v7787_v32  ;;  %v11213_v32 = vld [vmem:[%s15709_s0 + $0xf8] sm:$0xff]  ;;  %v15126_v12 = vadd.f32 %v14765_v55, %v7666_v43 }
0x10bb   :  { %16108 = vst [vmem:[#allocation44_spill] sm:$0xff] %v15105_v26  ;;  %v7667_v61 = vadd.f32 %v11213_v32, %v10327_v16  ;;  %v7796_v9 = vsel %vm76_vm0, %v15105_v26, 0.0  ;;  %v15130_v16 = vsub.f32 %v14892_v50, %v7818_v18  ;;  %v7881_v43 = vmul.f32 %v15123_v48, %v15123_v48 }
0x10bc   :  { %7791 = vadd.xlane.f32.xlu1 %v7790_v44  ;;  %v7819_v44 = vmul.f32 0.015625, %v7753_v37  ;;  %v7799_v60 = vsel %vm76_vm0, %v15126_v12, 0.0 }
0x10bd   :  { %v15133_v29 = vadd.f32 %v14765_v55, %v7667_v61  ;;  %v7882_v30 = vmul.f32 %v15130_v16, %v15130_v16  ;;  %v7937_v37 = vsel %vm76_vm0, %v7881_v43, 0.0 }
0x10be   :  { %7926 = vadd.xlane.f32.xlu0 %v7925_v15  ;;  %v7820_v15 = vmul.f32 0.015625, %v7756_v40  ;;  %v15137_v45 = vsub.f32 %v14902_v54, %v7819_v44 }
0x10bf   :  { %v7802_v55 = vsel %vm76_vm0, %v15133_v29, 0.0  ;;  %v7940_v32 = vsel %vm76_vm0, %v7882_v30, 0.0 }
0x10c0   :  { %7929 = vadd.xlane.f32.xlu1 %v7928_v27  ;;  %v7934_v27 = vsel %vm76_vm0, %v7880_v42, 0.0  ;;  %v7883_v18 = vmul.f32 %v15137_v45, %v15137_v45 }
0x10c2   :  { %7794 = vadd.xlane.f32.xlu0 %v7793_v10  ;;  %v15144_v10 = vsub.f32 %v14897_v23, %v7820_v15 }
0x10c4   :  { %7797 = vadd.xlane.f32.xlu1 %v7796_v9  ;;  %v7884_v61 = vmul.f32 %v15144_v10, %v15144_v10  ;;  %v7943_v9 = vsel %vm76_vm0, %v7883_v18, 0.0 }
0x10c6   :  { %7932 = vadd.xlane.f32.xlu0 %v7931_v4  ;;  %v7946_v42 = vsel %vm76_vm0, %v7884_v61, 0.0 }
0x10c8   :  { %7935 = vadd.xlane.f32.xlu1 %v7934_v27 }
0x10ca   :  { %7800 = vadd.xlane.f32.xlu0 %v7799_v60 }
0x10cc   :  { %7803 = vadd.xlane.f32.xlu1 %v7802_v55 }
0x10ce   :  { %7938 = vadd.xlane.f32.xlu0 %v7937_v37 }
0x10d0   :  { %7941 = vadd.xlane.f32.xlu1 %v7940_v32 }
0x10d2   :  { %7944 = vadd.xlane.f32.xlu0 %v7943_v9 }
0x10d4   :  { %7947 = vadd.xlane.f32.xlu1 %v7946_v42 }
0x10fe   :  { %v7759_v40 = vpop.xlane.xlu0 %7758 }
0x10ff   :  { %v7821_v44 = vmul.f32 0.015625, %v7759_v40 }
0x1100   :  { %v7762_v4 = vpop.xlane.xlu1 %7761 }
0x1101   :  { %v15159_v15 = vsub.f32 %v14917_v28, %v7821_v44  ;;  %v7822_v27 = vmul.f32 0.015625, %v7762_v4 }
0x1102   :  { %v7765_v60 = vpop.xlane.xlu0 %7764 }
0x1103   :  { %v15162_v43 = vsub.f32 %v14929_v36, %v7822_v27  ;;  %v7823_v55 = vmul.f32 0.015625, %v7765_v60  ;;  %v7885_v30 = vmul.f32 %v15159_v15, %v15159_v15 }
0x1104   :  { %v7768_v37 = vpop.xlane.xlu1 %7767 }
0x1105   :  { %v15167_v18 = vsub.f32 %v14926_v14, %v7823_v55  ;;  %v7824_v32 = vmul.f32 0.015625, %v7768_v37  ;;  %v7949_v61 = vsel %vm76_vm0, %v7885_v30, 0.0  ;;  %v7886_v9 = vmul.f32 %v15162_v43, %v15162_v43 }
0x1106   :  { %7950 = vadd.xlane.f32.xlu0 %v7949_v61  ;;  %v7903_v42 = vpop.xlane.xlu0 %7902 }
0x1107   :  { %v15173_v40 = vsub.f32 %v14934_v34, %v7824_v32  ;;  %v7997_v44 = vmul.f32 0.015625, %v7903_v42  ;;  %v7952_v4 = vsel %vm76_vm0, %v7886_v9, 0.0  ;;  %v7887_v27 = vmul.f32 %v15167_v18, %v15167_v18 }
0x1108   :  { %v7906_v60 = vpop.xlane.xlu1 %7905  ;;  %7953 = vadd.xlane.f32.xlu1 %v7952_v4 }
0x1109   :  { %v8029_v55 = vadd.f32 1e-05, %v7997_v44  ;;  %v7998_v37 = vmul.f32 0.015625, %v7906_v60  ;;  %v7955_v30 = vsel %vm76_vm0, %v7887_v27, 0.0  ;;  %v7888_v14 = vmul.f32 %v15173_v40, %v15173_v40 }
0x110a   :  { %7956 = vadd.xlane.f32.xlu0 %v7955_v30  ;;  %v7771_v61 = vpop.xlane.xlu0 %7770 }
0x110b   :  { %11118 = vrsqrt.f32 %v8029_v55  ;;  %v8030_v32 = vadd.f32 1e-05, %v7998_v37  ;;  %v7825_v34 = vmul.f32 0.015625, %v7771_v61  ;;  %v7958_v42 = vsel %vm76_vm0, %v7888_v14, 0.0 }
0x110c   :  { %v7774_v9 = vpop.xlane.xlu1 %7773  ;;  %7959 = vadd.xlane.f32.xlu1 %v7958_v42 }
0x110d   :  { %11120 = vrsqrt.f32 %v8030_v32  ;;  %v15183_v36 = vsub.f32 %v14959_v38, %v7825_v34  ;;  %v7826_v44 = vmul.f32 0.015625, %v7774_v9 }
0x110e   :  { %v7909_v4 = vpop.xlane.xlu0 %7908 }
0x110f   :  { %v15186_v27 = vsub.f32 %v14967_v0, %v7826_v44  ;;  %v7999_v60 = vmul.f32 0.015625, %v7909_v4  ;;  %v7889_v30 = vmul.f32 %v15183_v36, %v15183_v36 }
0x1110   :  { %v7912_v55 = vpop.xlane.xlu1 %7911 }
0x1111   :  { %v8031_v37 = vadd.f32 1e-05, %v7999_v60  ;;  %v8000_v61 = vmul.f32 0.015625, %v7912_v55  ;;  %v7961_v14 = vsel %vm76_vm0, %v7889_v30, 0.0  ;;  %v7890_v32 = vmul.f32 %v15186_v27, %v15186_v27  ;;  %v15197_v60 = vld [vmem:[%s15716_s6] ss:$0 sm:$0xff] }
0x1112   :  { %7962 = vadd.xlane.f32.xlu0 %v7961_v14  ;;  %v7777_v34 = vpop.xlane.xlu0 %7776 }
0x1113   :  { %11122 = vrsqrt.f32 %v8031_v37  ;;  %v8032_v42 = vadd.f32 1e-05, %v8000_v61  ;;  %v7827_v9 = vmul.f32 0.015625, %v7777_v34  ;;  %v7964_v44 = vsel %vm76_vm0, %v7890_v32, 0.0 }
0x1114   :  { %7965 = vadd.xlane.f32.xlu1 %v7964_v44  ;;  %v7780_v4 = vpop.xlane.xlu1 %7779 }
0x1115   :  { %v11119_v0 = vpop.eup %11118  ;;  %11124 = vrsqrt.f32 %v8032_v42  ;;  %v15200_v30 = vsub.f32 %v14987_v5, %v7827_v9  ;;  %v7828_v55 = vmul.f32 0.015625, %v7780_v4 }
0x1116   :  { %v8093_v14 = vmul.f32 %v11119_v0, %v14939_v2  ;;  %v7915_v37 = vpop.xlane.xlu0 %7914  ;;  %v15216_v0 = vld [vmem:[%s15717_s7] ss:$0 sm:$0xff] }
0x1117   :  { %v11121_v61 = vpop.eup %11120  ;;  %v15204_v34 = vsub.f32 %v14994_v39, %v7828_v55  ;;  %v8001_v32 = vmul.f32 0.015625, %v7915_v37  ;;  %v7891_v44 = vmul.f32 %v15200_v30, %v15200_v30 }
0x1118   :  { %v8131_v38 = vmul.f32 %v15197_v60, %v8093_v14  ;;  %v8094_v28 = vmul.f32 %v11121_v61, %v14947_v22  ;;  %v7918_v42 = vpop.xlane.xlu1 %7917 }
0x1119   :  { %v8033_v23 = vadd.f32 1e-05, %v8001_v32  ;;  %v8002_v9 = vmul.f32 0.015625, %v7918_v42  ;;  %v7967_v4 = vsel %vm76_vm0, %v7891_v44, 0.0  ;;  %v7892_v2 = vmul.f32 %v15204_v34, %v15204_v34 }
0x111a   :  { %v8132_v55 = vmul.f32 %v15197_v60, %v8094_v28  ;;  %7968 = vadd.xlane.f32.xlu0 %v7967_v4  ;;  %v8169_v37 = vadd.f32 %v15216_v0, %v8131_v38 }
0x111b   :  { %11126 = vrsqrt.f32 %v8033_v23  ;;  %v8034_v14 = vadd.f32 1e-05, %v8002_v9  ;;  %v7970_v22 = vsel %vm76_vm0, %v7892_v2, 0.0 }
0x111c   :  { %7971 = vadd.xlane.f32.xlu1 %v7970_v22  ;;  %v8170_v61 = vadd.f32 %v15216_v0, %v8132_v55 }
0x111d   :  { %v11123_v32 = vpop.eup %11122  ;;  %11128 = vrsqrt.f32 %v8034_v14 }
0x111e   :  { %v8095_v44 = vmul.f32 %v11123_v32, %v14962_v8  ;;  %v8201_v42 = vpack.c.bf16 %v8170_v61, %v8169_v37 }
0x111f   :  { %v11125_v39 = vpop.eup %11124 }
0x1120   :  { %v8096_v5 = vmul.f32 %v11125_v39, %v14970_v1  ;;  %9211 = vmatmul.mubr.msk.bf16.vlgmr.msra.gmra.mrb[212].mxu0 %vm76_vm0, %v8201_v42  ;;  %v8133_v23 = vmul.f32 %v15197_v60, %v8095_v44 }
0x1121   :  { %8367 = vmatprep.mubr.bf16.mxu0 %v16082_v53 }
0x1122   :  { %v8134_v28 = vmul.f32 %v15197_v60, %v8096_v5  ;;  %v8171_v38 = vadd.f32 %v15216_v0, %v8133_v23 }
0x1124   :  { %v8172_v9 = vadd.f32 %v15216_v0, %v8134_v28 }
0x1125   :  { %v11127_v4 = vpop.eup %11126 }
0x1126   :  { %v8097_v2 = vmul.f32 %v11127_v4, %v14990_v41  ;;  %v8202_v8 = vpack.c.bf16 %v8172_v9, %v8171_v38 }
0x1127   :  { %v11129_v55 = vpop.eup %11128 }
0x1128   :  { %v8098_v14 = vmul.f32 %v11129_v55, %v14997_v46  ;;  %9212 = vmatmul.mubr.msk.bf16.gmra.mrb[216].mxu0 %vm76_vm0, %v8202_v8  ;;  %v8135_v1 = vmul.f32 %v15197_v60, %v8097_v2 }
0x1129   :  { %8377 = vmatprep.mubr.bf16.mxu0 %v16082_v53 }
0x112a   :  { %v8136_v39 = vmul.f32 %v15197_v60, %v8098_v14  ;;  %v8173_v5 = vadd.f32 %v15216_v0, %v8135_v1 }
0x112c   :  { %v8174_v22 = vadd.f32 %v15216_v0, %v8136_v39 }
0x112e   :  { %v8203_v37 = vpack.c.bf16 %v8174_v22, %v8173_v5 }
0x1130   :  { %9213 = vmatmul.mubr.msk.bf16.gmra.mrb[220].mxu0 %vm76_vm0, %v8203_v37 }
0x1131   :  { %8387 = vmatprep.mubr.bf16.mxu0 %v16082_v53 }
0x113f   :  { %v7783_v41 = vpop.xlane.xlu0 %7782 }
0x1140   :  { %v7829_v61 = vmul.f32 0.015625, %v7783_v41 }
0x1141   :  { %v7786_v46 = vpop.xlane.xlu1 %7785 }
0x1142   :  { %v15241_v32 = vsub.f32 %v15044_v13, %v7829_v61  ;;  %v7830_v44 = vmul.f32 0.015625, %v7786_v46 }
0x1143   :  { %v7921_v42 = vpop.xlane.xlu0 %7920 }
0x1144   :  { %v15244_v23 = vsub.f32 %v15053_v63, %v7830_v44  ;;  %v8003_v28 = vmul.f32 0.015625, %v7921_v42  ;;  %v7893_v38 = vmul.f32 %v15241_v32, %v15241_v32 }
0x1145   :  { %v7924_v9 = vpop.xlane.xlu1 %7923 }
0x1146   :  { %v8035_v4 = vadd.f32 1e-05, %v8003_v28  ;;  %v8004_v2 = vmul.f32 0.015625, %v7924_v9  ;;  %v7973_v8 = vsel %vm76_vm0, %v7893_v38, 0.0  ;;  %v7894_v55 = vmul.f32 %v15244_v23, %v15244_v23 }
0x1147   :  { %7974 = vadd.xlane.f32.xlu0 %v7973_v8  ;;  %v7789_v14 = vpop.xlane.xlu0 %7788 }
0x1148   :  { %11130 = vrsqrt.f32 %v8035_v4  ;;  %v8036_v1 = vadd.f32 1e-05, %v8004_v2  ;;  %v7831_v39 = vmul.f32 0.015625, %v7789_v14  ;;  %v7976_v5 = vsel %vm76_vm0, %v7894_v55, 0.0 }
0x1149   :  { %7977 = vadd.xlane.f32.xlu1 %v7976_v5  ;;  %v7792_v22 = vpop.xlane.xlu1 %7791 }
0x114a   :  { %11132 = vrsqrt.f32 %v8036_v1  ;;  %v15253_v37 = vsub.f32 %v15070_v24, %v7831_v39  ;;  %v7832_v41 = vmul.f32 0.015625, %v7792_v22 }
0x114b   :  { %v7927_v61 = vpop.xlane.xlu0 %7926 }
0x114c   :  { %v15256_v46 = vsub.f32 %v15077_v21, %v7832_v41  ;;  %v8005_v44 = vmul.f32 0.015625, %v7927_v61  ;;  %v7895_v42 = vmul.f32 %v15253_v37, %v15253_v37 }
0x114d   :  { %v7930_v28 = vpop.xlane.xlu1 %7929 }
0x114e   :  { %v8037_v38 = vadd.f32 1e-05, %v8005_v44  ;;  %v8006_v9 = vmul.f32 0.015625, %v7930_v28  ;;  %v7979_v4 = vsel %vm76_vm0, %v7895_v42, 0.0  ;;  %v7896_v2 = vmul.f32 %v15256_v46, %v15256_v46 }
0x114f   :  { %7980 = vadd.xlane.f32.xlu0 %v7979_v4  ;;  %v7795_v8 = vpop.xlane.xlu0 %7794 }
0x1150   :  { %11134 = vrsqrt.f32 %v8037_v38  ;;  %v8038_v55 = vadd.f32 1e-05, %v8006_v9  ;;  %v7833_v14 = vmul.f32 0.015625, %v7795_v8  ;;  %v7982_v1 = vsel %vm76_vm0, %v7896_v2, 0.0 }
0x1151   :  { %7983 = vadd.xlane.f32.xlu1 %v7982_v1  ;;  %v7798_v39 = vpop.xlane.xlu1 %7797 }
0x1152   :  { %v11131_v5 = vpop.eup %11130  ;;  %11136 = vrsqrt.f32 %v8038_v55  ;;  %v15265_v22 = vsub.f32 %v15098_v25, %v7833_v14  ;;  %v7834_v41 = vmul.f32 0.015625, %v7798_v39 }
0x1153   :  { %v8099_v61 = vmul.f32 %v11131_v5, %v15035_v52  ;;  %v7933_v44 = vpop.xlane.xlu0 %7932 }
0x1154   :  { %v11133_v42 = vpop.eup %11132  ;;  %v15269_v28 = vsub.f32 %v15105_v26, %v7834_v41  ;;  %v8007_v38 = vmul.f32 0.015625, %v7933_v44  ;;  %v7897_v9 = vmul.f32 %v15265_v22, %v15265_v22 }
0x1155   :  { %v8100_v4 = vmul.f32 %v11133_v42, %v15041_v35  ;;  %v7936_v2 = vpop.xlane.xlu1 %7935  ;;  %v8137_v8 = vmul.f32 %v15197_v60, %v8099_v61 }
0x1156   :  { %v8039_v55 = vadd.f32 1e-05, %v8007_v38  ;;  %v8008_v14 = vmul.f32 0.015625, %v7936_v2  ;;  %v7985_v1 = vsel %vm76_vm0, %v7897_v9, 0.0  ;;  %v7898_v52 = vmul.f32 %v15269_v28, %v15269_v28 }
0x1157   :  { %7986 = vadd.xlane.f32.xlu0 %v7985_v1  ;;  %v7801_v39 = vpop.xlane.xlu0 %7800  ;;  %v8138_v5 = vmul.f32 %v15197_v60, %v8100_v4  ;;  %v8175_v61 = vadd.f32 %v15216_v0, %v8137_v8 }
0x1158   :  { %11138 = vrsqrt.f32 %v8039_v55  ;;  %v8040_v41 = vadd.f32 1e-05, %v8008_v14  ;;  %v7835_v44 = vmul.f32 0.015625, %v7801_v39  ;;  %v7988_v26 = vsel %vm76_vm0, %v7898_v52, 0.0 }
0x1159   :  { %7989 = vadd.xlane.f32.xlu1 %v7988_v26  ;;  %v7804_v35 = vpop.xlane.xlu1 %7803  ;;  %v8176_v42 = vadd.f32 %v15216_v0, %v8138_v5 }
0x115a   :  { %v11135_v38 = vpop.eup %11134  ;;  %11140 = vrsqrt.f32 %v8040_v41  ;;  %v15283_v9 = vsub.f32 %v15126_v12, %v7835_v44  ;;  %v7836_v2 = vmul.f32 0.015625, %v7804_v35 }
0x115b   :  { %v8101_v1 = vmul.f32 %v11135_v38, %v15067_v33  ;;  %v7939_v4 = vpop.xlane.xlu0 %7938  ;;  %v8204_v55 = vpack.c.bf16 %v8176_v42, %v8175_v61  ;;  %v10526_v33 = vld [vmem:[%s15718_s10 + $0x40] sm:$0xff]  }
0x115c   :  { %v11137_v14 = vpop.eup %11136  ;;  %v15287_v39 = vsub.f32 %v15133_v29, %v7836_v2  ;;  %v8009_v26 = vmul.f32 0.015625, %v7939_v4  ;;  %v7899_v8 = vmul.f32 %v15283_v9, %v15283_v9  ;;  %9568 = vmatprep.subr.bf16.mxu1 %v10526_v33  ;;  %v10527_v2 = vld [vmem:[%s15718_s10] sm:$0xff]  }
0x115d   :  { %v8102_v52 = vmul.f32 %v11137_v14, %v15074_v11  ;;  %v7942_v5 = vpop.xlane.xlu1 %7941  ;;  %9214 = vmatmul.mubr.msk.bf16.gmra.mrb[224].mxu0 %vm76_vm0, %v8204_v55  ;;  %v8139_v41 = vmul.f32 %v15197_v60, %v8101_v1  ;;  %9569 = vmatpush3.bf16.msra.mxu1 %v10527_v2 }
0x115e   :  { %v8041_v44 = vadd.f32 1e-05, %v8009_v26  ;;  %v8010_v35 = vmul.f32 0.015625, %v7942_v5  ;;  %v7991_v61 = vsel %vm76_vm0, %v7899_v8, 0.0  ;;  %v7900_v42 = vmul.f32 %v15287_v39, %v15287_v39  ;;  %8397 = vmatprep.mubr.bf16.mxu0 %v16082_v53 }
0x115f   :  { %7992 = vadd.xlane.f32.xlu0 %v7991_v61  ;;  %v7945_v11 = vpop.xlane.xlu0 %7944  ;;  %v8140_v38 = vmul.f32 %v15197_v60, %v8102_v52  ;;  %v8177_v26 = vadd.f32 %v15216_v0, %v8139_v41  ;;  %v10528_v52 = vld [vmem:[%s15718_s10 + $0x48] sm:$0xff]  }
0x1160   :  { %11142 = vrsqrt.f32 %v8041_v44  ;;  %v8042_v1 = vadd.f32 1e-05, %v8010_v35  ;;  %v8011_v4 = vmul.f32 0.015625, %v7945_v11  ;;  %v7994_v55 = vsel %vm76_vm0, %v7900_v42, 0.0  ;;  %v10529_v44 = vld [vmem:[%s15718_s10 + $0x8] sm:$0xff]   ;;  %9570 = vmatprep.subr.bf16.mxu1 %v10528_v52 }
0x1161   :  { %7995 = vadd.xlane.f32.xlu1 %v7994_v55  ;;  %v7948_v14 = vpop.xlane.xlu1 %7947  ;;  %v8178_v8 = vadd.f32 %v15216_v0, %v8140_v38  ;;  %9571 = vmatpush3.bf16.msra.mxu1 %v10529_v44 }
0x1162   :  { %v11139_v5 = vpop.eup %11138  ;;  %11144 = vrsqrt.f32 %v8042_v1  ;;  %v8043_v33 = vadd.f32 1e-05, %v8011_v4  ;;  %v8012_v61 = vmul.f32 0.015625, %v7948_v14  ;;  %v10530_v1 = vld [vmem:[%s15718_s10 + $0x50] sm:$0xff]   ;;  %v10532_v14 = vld [vmem:[%s15718_s10 + $0x58] sm:$0xff]  }
0x1163   :  { %v8103_v35 = vmul.f32 %v11139_v5, %v15095_v19  ;;  %v8205_v42 = vpack.c.bf16 %v8178_v8, %v8177_v26  ;;  %v10531_v19 = vld [vmem:[%s15718_s10 + $0x10] sm:$0xff]   ;;  %9572 = vmatprep.subr.bf16.mxu1 %v10530_v1  ;;  %v10533_v8 = vld [vmem:[%s15718_s10 + $0x18] sm:$0xff]  }
0x1164   :  { %v11141_v41 = vpop.eup %11140  ;;  %11146 = vrsqrt.f32 %v8043_v33  ;;  %v8044_v11 = vadd.f32 1e-05, %v8012_v61 }
0x1165   :  { %v8104_v38 = vmul.f32 %v11141_v41, %v15102_v47  ;;  %9215 = vmatmul.mubr.msk.bf16.gmra.mrb[228].mxu0 %vm76_vm0, %v8205_v42  ;;  %v8141_v2 = vmul.f32 %v15197_v60, %v8103_v35  ;;  %9573 = vmatpush3.bf16.msra.mxu1 %v10531_v19  ;;  %v10534_v35 = vld [vmem:[%s15718_s10 + $0x60] sm:$0xff]   ;;  %v10536_v19 = vld [vmem:[%s15718_s10 + $0x68] sm:$0xff]  }
0x1166   :  { %11148 = vrsqrt.f32 %v8044_v11  ;;  %8407 = vmatprep.mubr.bf16.mxu0 %v16082_v53  ;;  %9574 = vmatprep.subr.bf16.mxu1 %v10532_v14  ;;  %v10539_v14 = vld [vmem:[%s15718_s10 + $0x30] sm:$0xff]  }
0x1167   :  { %v8142_v4 = vmul.f32 %v15197_v60, %v8104_v38  ;;  %v8179_v47 = vadd.f32 %v15216_v0, %v8141_v2 }
0x1169   :  { %v8180_v55 = vadd.f32 %v15216_v0, %v8142_v4  ;;  %9575 = vmatpush3.bf16.msra.mxu1 %v10533_v8  ;;  %v10537_v4 = vld [vmem:[%s15718_s10 + $0x28] sm:$0xff]  }
0x116a   :  { %v11143_v26 = vpop.eup %11142  ;;  %9576 = vmatprep.subr.bf16.mxu1 %v10534_v35 }
0x116b   :  { %v8105_v52 = vmul.f32 %v11143_v26, %v15123_v48  ;;  %v8206_v5 = vpack.c.bf16 %v8180_v55, %v8179_v47  ;;  %v10535_v48 = vld [vmem:[%s15718_s10 + $0x20] sm:$0xff]  }
0x116c   :  { %v11145_v33 = vpop.eup %11144 }
0x116d   :  { %v8106_v61 = vmul.f32 %v11145_v33, %v15130_v16  ;;  %9216 = vmatmul.mubr.msk.bf16.gmra.mrb[232].mxu0 %vm76_vm0, %v8206_v5  ;;  %v8143_v44 = vmul.f32 %v15197_v60, %v8105_v52  ;;  %9577 = vmatpush3.bf16.msra.mxu1 %v10535_v48  ;;  %v10540_v52 = vld [vmem:[%s15718_s10 + $0x78] sm:$0xff]  }
0x116e   :  { %v11147_v42 = vpop.eup %11146  ;;  %8417 = vmatprep.mubr.bf16.mxu0 %v16082_v53  ;;  %9578 = vmatprep.subr.bf16.mxu1 %v10536_v19  ;;  %v10541_v5 = vld [vmem:[%s15718_s10 + $0x38] sm:$0xff]  }
0x116f   :  { %v8144_v41 = vmul.f32 %v15197_v60, %v8106_v61  ;;  %v8107_v11 = vmul.f32 %v11147_v42, %v15137_v45  ;;  %v8181_v2 = vadd.f32 %v15216_v0, %v8143_v44 }
0x1170   :  { %v11149_v16 = vpop.eup %11148 }
0x1171   :  { %v8108_v38 = vmul.f32 %v11149_v16, %v15144_v10  ;;  %v8182_v1 = vadd.f32 %v15216_v0, %v8144_v41  ;;  %v8145_v45 = vmul.f32 %v15197_v60, %v8107_v11  ;;  %9579 = vmatpush3.bf16.msra.mxu1 %v10537_v4  ;;  %v10538_v10 = vld [vmem:[%s15718_s10 + $0x70] sm:$0xff]  }
0x1172   :  { %9580 = vmatprep.subr.bf16.mxu1 %v10538_v10 }
0x1173   :  { %v8207_v47 = vpack.c.bf16 %v8182_v1, %v8181_v2  ;;  %v8146_v55 = vmul.f32 %v15197_v60, %v8108_v38  ;;  %v8183_v8 = vadd.f32 %v15216_v0, %v8145_v45 }
0x1175   :  { %9217 = vmatmul.mubr.msk.bf16.gmra.mrb[236].mxu0 %vm76_vm0, %v8207_v47  ;;  %v8184_v26 = vadd.f32 %v15216_v0, %v8146_v55  ;;  %9581 = vmatpush3.bf16.msra.mxu1 %v10539_v14 }
0x1176   :  { %8427 = vmatprep.mubr.bf16.mxu0 %v16082_v53  ;;  %9582 = vmatprep.subr.bf16.mxu1 %v10540_v52 }
0x1177   :  { %v8208_v33 = vpack.c.bf16 %v8184_v26, %v8183_v8 }
0x1179   :  { %9583 = vmatpush3.bf16.msra.mxu1 %v10541_v5 }
0x117d   :  { %9218 = vmatmul.mubr.msk.bf16.gmra.mrb[240].mxu0 %vm76_vm0, %v8208_v33 }
0x117e   :  { %8437 = vmatprep.mubr.bf16.mxu0 %v16082_v53 }
0x1193   :  { %v7951_v61 = vpop.xlane.xlu0 %7950 }
0x1194   :  { %v8013_v44 = vmul.f32 0.015625, %v7951_v61 }
0x1195   :  { %v7954_v35 = vpop.xlane.xlu1 %7953 }
0x1196   :  { %v8045_v42 = vadd.f32 1e-05, %v8013_v44  ;;  %v8014_v48 = vmul.f32 0.015625, %v7954_v35 }
0x1197   :  { %v7957_v41 = vpop.xlane.xlu0 %7956 }
0x1198   :  { %11150 = vrsqrt.f32 %v8045_v42  ;;  %v8046_v16 = vadd.f32 1e-05, %v8014_v48  ;;  %v8015_v11 = vmul.f32 0.015625, %v7957_v41 }
0x1199   :  { %v7960_v38 = vpop.xlane.xlu1 %7959 }
0x119a   :  { %11152 = vrsqrt.f32 %v8046_v16  ;;  %v8047_v2 = vadd.f32 1e-05, %v8015_v11  ;;  %v8016_v1 = vmul.f32 0.015625, %v7960_v38 }
0x119c   :  { %11154 = vrsqrt.f32 %v8047_v2  ;;  %v8048_v19 = vadd.f32 1e-05, %v8016_v1 }
0x119e   :  { %11156 = vrsqrt.f32 %v8048_v19 }
0x119f   :  { %v7963_v4 = vpop.xlane.xlu0 %7962 }
0x11a0   :  { %v8017_v47 = vmul.f32 0.015625, %v7963_v4 }
0x11a1   :  { %v7966_v55 = vpop.xlane.xlu1 %7965 }
0x11a2   :  { %v11151_v45 = vpop.eup %11150  ;;  %v8049_v10 = vadd.f32 1e-05, %v8017_v47  ;;  %v8018_v14 = vmul.f32 0.015625, %v7966_v55 }
0x11a3   :  { %v8109_v26 = vmul.f32 %v11151_v45, %v15159_v15 }
0x11a4   :  { %v11153_v8 = vpop.eup %11152  ;;  %11158 = vrsqrt.f32 %v8049_v10  ;;  %v8050_v52 = vadd.f32 1e-05, %v8018_v14 }
0x11a5   :  { %v8110_v5 = vmul.f32 %v11153_v8, %v15162_v43  ;;  %v8147_v33 = vmul.f32 %v15197_v60, %v8109_v26 }
0x11a6   :  { %v11155_v61 = vpop.eup %11154  ;;  %11160 = vrsqrt.f32 %v8050_v52 }
0x11a7   :  { %v7969_v44 = vpop.xlane.xlu0 %7968  ;;  %v8148_v35 = vmul.f32 %v15197_v60, %v8110_v5  ;;  %v8111_v41 = vmul.f32 %v11155_v61, %v15167_v18  ;;  %v8185_v15 = vadd.f32 %v15216_v0, %v8147_v33 }
0x11a8   :  { %v11157_v42 = vpop.eup %11156  ;;  %v8019_v48 = vmul.f32 0.015625, %v7969_v44 }
0x11a9   :  { %v8112_v16 = vmul.f32 %v11157_v42, %v15173_v40  ;;  %v7972_v11 = vpop.xlane.xlu1 %7971  ;;  %v8186_v38 = vadd.f32 %v15216_v0, %v8148_v35  ;;  %v8149_v47 = vmul.f32 %v15197_v60, %v8111_v41 }
0x11aa   :  { %v8051_v2 = vadd.f32 1e-05, %v8019_v48  ;;  %v8020_v43 = vmul.f32 0.015625, %v7972_v11 }
0x11ab   :  { %v8209_v1 = vpack.c.bf16 %v8186_v38, %v8185_v15  ;;  %v8150_v19 = vmul.f32 %v15197_v60, %v8112_v16  ;;  %v8187_v14 = vadd.f32 %v15216_v0, %v8149_v47 }
0x11ac   :  { %11162 = vrsqrt.f32 %v8051_v2  ;;  %v8052_v4 = vadd.f32 1e-05, %v8020_v43 }
0x11ad   :  { %9219 = vmatmul.mubr.msk.bf16.gmra.mrb[244].mxu0 %vm76_vm0, %v8209_v1  ;;  %v8188_v18 = vadd.f32 %v15216_v0, %v8150_v19 }
0x11ae   :  { %v11159_v55 = vpop.eup %11158  ;;  %11164 = vrsqrt.f32 %v8052_v4  ;;  %8447 = vmatprep.mubr.bf16.mxu0 %v16082_v53 }
0x11af   :  { %v8113_v45 = vmul.f32 %v11159_v55, %v15183_v36  ;;  %v8210_v26 = vpack.c.bf16 %v8188_v18, %v8187_v14 }
0x11b0   :  { %v11161_v40 = vpop.eup %11160 }
0x11b1   :  { %v8114_v10 = vmul.f32 %v11161_v40, %v15186_v27  ;;  %v8151_v52 = vmul.f32 %v15197_v60, %v8113_v45 }
0x11b3   :  { %v8152_v8 = vmul.f32 %v15197_v60, %v8114_v10  ;;  %v8189_v27 = vadd.f32 %v15216_v0, %v8151_v52 }
0x11b5   :  { %9220 = vmatmul.mubr.msk.bf16.gmra.mrb[248].mxu0 %vm76_vm0, %v8210_v26  ;;  %v8190_v33 = vadd.f32 %v15216_v0, %v8152_v8 }
0x11b6   :  { %v11163_v5 = vpop.eup %11162  ;;  %8457 = vmatprep.mubr.bf16.mxu0 %v16082_v53 }
0x11b7   :  { %v8115_v44 = vmul.f32 %v11163_v5, %v15200_v30  ;;  %v8211_v42 = vpack.c.bf16 %v8190_v33, %v8189_v27 }
0x11b8   :  { %v11165_v61 = vpop.eup %11164 }
0x11b9   :  { %v8116_v36 = vmul.f32 %v11165_v61, %v15204_v34  ;;  %v8153_v48 = vmul.f32 %v15197_v60, %v8115_v44 }
0x11bb   :  { %v8154_v35 = vmul.f32 %v15197_v60, %v8116_v36  ;;  %v8191_v16 = vadd.f32 %v15216_v0, %v8153_v48 }
0x11bd   :  { %9221 = vmatmul.mubr.msk.bf16.gmra.mrb[252].mxu0 %vm76_vm0, %v8211_v42  ;;  %v8192_v41 = vadd.f32 %v15216_v0, %v8154_v35 }
0x11be   :  { %8467 = vmatprep.mubr.bf16.mxu0 %v16082_v53 }
0x11bf   :  { %v8212_v11 = vpack.c.bf16 %v8192_v41, %v8191_v16 }
0x11c5   :  { %9222 = vmatmul.mubr.msk.bf16.gmra.mrb[0].mxu0 %vm76_vm0, %v8212_v11 }
0x11c6   :  { %8477 = vmatprep.mubr.bf16.mxu0 %v16082_v53 }
0x11d4   :  { %v7975_v30 = vpop.xlane.xlu0 %7974 }
0x11d5   :  { %v8021_v34 = vmul.f32 0.015625, %v7975_v30  ;;  %v8225_v30 = vld [vmem:[%s15719_s9] sm:$0x3] }
0x11d6   :  { %v7978_v15 = vpop.xlane.xlu1 %7977 }
0x11d7   :  { %v8053_v38 = vadd.f32 1e-05, %v8021_v34  ;;  %v8022_v2 = vmul.f32 0.015625, %v7978_v15 }
0x11d9   :  { %11166 = vrsqrt.f32 %v8053_v38  ;;  %v8054_v43 = vadd.f32 1e-05, %v8022_v2 }
0x11db   :  { %11168 = vrsqrt.f32 %v8054_v43 }
0x11dc   :  { %v7981_v1 = vpop.xlane.xlu0 %7980 }
0x11dd   :  { %v8023_v19 = vmul.f32 0.015625, %v7981_v1 }
0x11de   :  { %v7984_v4 = vpop.xlane.xlu1 %7983 }
0x11df   :  { %v8055_v47 = vadd.f32 1e-05, %v8023_v19  ;;  %v8024_v55 = vmul.f32 0.015625, %v7984_v4 }
0x11e1   :  { %11170 = vrsqrt.f32 %v8055_v47  ;;  %v8056_v18 = vadd.f32 1e-05, %v8024_v55 }
0x11e3   :  { %v11167_v40 = vpop.eup %11166  ;;  %11172 = vrsqrt.f32 %v8056_v18 }
0x11e4   :  { %v8117_v45 = vmul.f32 %v11167_v40, %v15241_v32  ;;  %v7987_v10 = vpop.xlane.xlu0 %7986  ;;  %v16109_v32 = vld [vmem:[#allocation32_spill] sm:$0xff] }
0x11e5   :  { %v11169_v14 = vpop.eup %11168  ;;  %v8025_v26 = vmul.f32 0.015625, %v7987_v10  ;;  %v8229_v48 = vsub.s32 0, %v16109_v32  ;;  %v8233_v34 = vsub.s32 1, %v16109_v32 }
0x11e6   :  { %v8155_v8 = vmul.f32 %v15197_v60, %v8117_v45  ;;  %v8118_v52 = vmul.f32 %v11169_v14, %v15244_v23  ;;  %v7990_v5 = vpop.xlane.xlu1 %7989 }
0x11e7   :  { %v8057_v33 = vadd.f32 1e-05, %v8025_v26  ;;  %v8026_v61 = vmul.f32 0.015625, %v7990_v5  ;;  %v15427_v47 = vrot.slane %v8225_v30, %v8233_v34 }
0x11e8   :  { %v8156_v44 = vmul.f32 %v15197_v60, %v8118_v52  ;;  %v8193_v27 = vadd.f32 %v15216_v0, %v8155_v8 }
0x11e9   :  { %11174 = vrsqrt.f32 %v8057_v33  ;;  %v8058_v36 = vadd.f32 1e-05, %v8026_v61 }
0x11ea   :  { %v8194_v35 = vadd.f32 %v15216_v0, %v8156_v44 }
0x11eb   :  { %v11171_v42 = vpop.eup %11170  ;;  %11176 = vrsqrt.f32 %v8058_v36 }
0x11ec   :  { %v8213_v41 = vpack.c.bf16 %v8194_v35, %v8193_v27  ;;  %v8119_v16 = vmul.f32 %v11171_v42, %v15253_v37  ;;  %v7993_v11 = vpop.xlane.xlu0 %7992  ;;  %v15424_v37 = vrot.slane %v8225_v30, %v8229_v48 }
0x11ed   :  { %v11173_v23 = vpop.eup %11172  ;;  %v8027_v15 = vmul.f32 0.015625, %v7993_v11 }
0x11ee   :  { %v8157_v38 = vmul.f32 %v15197_v60, %v8119_v16  ;;  %v8120_v2 = vmul.f32 %v11173_v23, %v15256_v46  ;;  %v7996_v43 = vpop.xlane.xlu1 %7995  ;;  %9223 = vmatmul.mubr.msk.bf16.gmra.mrb[4].mxu0 %vm76_vm0, %v8213_v41 }
0x11ef   :  { %v8059_v1 = vadd.f32 1e-05, %v8027_v15  ;;  %v8028_v19 = vmul.f32 0.015625, %v7996_v43  ;;  %8487 = vmatprep.mubr.bf16.mxu0 %v16082_v53 }
0x11f0   :  { %v8158_v4 = vmul.f32 %v15197_v60, %v8120_v2  ;;  %v8195_v18 = vadd.f32 %v15216_v0, %v8157_v38 }
0x11f1   :  { %11178 = vrsqrt.f32 %v8059_v1  ;;  %v8060_v55 = vadd.f32 1e-05, %v8028_v19 }
0x11f2   :  { %v8196_v40 = vadd.f32 %v15216_v0, %v8158_v4 }
0x11f3   :  { %v11175_v46 = vpop.eup %11174  ;;  %11180 = vrsqrt.f32 %v8060_v55  ;;  %v8359_v45 = vpop.f32.mrb[212].mxu0 }
0x11f4   :  { %v8214_v10 = vpack.c.bf16 %v8196_v40, %v8195_v18  ;;  %v8121_v14 = vmul.f32 %v11175_v46, %v15265_v22  ;;  %v8360_v26 = vadd.f32 %v8359_v45, %v15424_v37  ;;  %v8361_v8 = vpop.f32.mrb[213].mxu0 }
0x11f5   :  { %v11177_v52 = vpop.eup %11176  ;;  %v8362_v5 = vadd.f32 %v8361_v8, %v15427_v47  ;;  %v8363_v33 = vpop.f32.mrb[214].mxu0 }
0x11f6   :  { %v8159_v61 = vmul.f32 %v15197_v60, %v8121_v14  ;;  %v8122_v44 = vmul.f32 %v11177_v52, %v15269_v28  ;;  %v8364_v36 = vadd.f32 %v8363_v33, %v15424_v37  ;;  %v8365_v27 = vpop.f32.mrb[215].mxu0  ;;  %9224 = vmatmul.mubr.msk.bf16.gmra.mrb[8].mxu0 %vm76_vm0, %v8214_v10  ;;  %v8518_v42 = vmax.f32 %v8360_v26, 0.0 }
0x11f7   :  { %v8366_v35 = vadd.f32 %v8365_v27, %v15427_v47  ;;  %8497 = vmatprep.mubr.bf16.mxu0 %v16082_v53  ;;  %v8519_v48 = vmax.f32 %v8362_v5, 0.0 }
0x11f8   :  { %v8160_v22 = vmul.f32 %v15197_v60, %v8122_v44  ;;  %v8520_v32 = vmax.f32 %v8364_v36, 0.0  ;;  %v8197_v16 = vadd.f32 %v15216_v0, %v8159_v61 }
0x11f9   :  { %v8521_v41 = vmax.f32 %v8366_v35, 0.0 }
0x11fa   :  { %v8198_v11 = vadd.f32 %v15216_v0, %v8160_v22  ;;  %v8582_v28 = vpack.c.bf16 %v8520_v32, %v8518_v42 }
0x11fb   :  { %v11179_v23 = vpop.eup %11178  ;;  %v8583_v30 = vpack.c.bf16 %v8521_v41, %v8519_v48  ;;  %v8369_v34 = vpop.f32.mrb[216].mxu0 }
0x11fc   :  { %v8215_v15 = vpack.c.bf16 %v8198_v11, %v8197_v16  ;;  %v8123_v38 = vmul.f32 %v11179_v23, %v15283_v9  ;;  %v8370_v2 = vadd.f32 %v8369_v34, %v15424_v37  ;;  %v8371_v43 = vpop.f32.mrb[217].mxu0 }
0x11fd   :  { %v11181_v1 = vpop.eup %11180  ;;  %v8372_v19 = vadd.f32 %v8371_v43, %v15427_v47  ;;  %v8373_v4 = vpop.f32.mrb[218].mxu0  ;;  %8781 = vmatprep.mubr.bf16.mxu1 %v8583_v30 }
0x11fe   :  { %v8161_v55 = vmul.f32 %v15197_v60, %v8123_v38  ;;  %v8124_v18 = vmul.f32 %v11181_v1, %v15287_v39  ;;  %v8374_v40 = vadd.f32 %v8373_v4, %v15424_v37  ;;  %v8375_v46 = vpop.f32.mrb[219].mxu0  ;;  %9225 = vmatmul.mubr.msk.bf16.gmra.mrb[12].mxu0 %vm76_vm0, %v8215_v15  ;;  %8782 = vmatmul.mubr.bf16.vlgmr.msra.gmra.mrb[156].mxu1 %v8582_v28  ;;  %v8522_v10 = vmax.f32 %v8370_v2, 0.0 }
0x11ff   :  { %v8376_v9 = vadd.f32 %v8375_v46, %v15427_v47  ;;  %8507 = vmatprep.mubr.bf16.mxu0 %v16082_v53  ;;  %v8523_v26 = vmax.f32 %v8372_v19, 0.0 }
0x1200   :  { %v8162_v45 = vmul.f32 %v15197_v60, %v8124_v18  ;;  %v8524_v14 = vmax.f32 %v8374_v40, 0.0  ;;  %v8199_v52 = vadd.f32 %v15216_v0, %v8161_v55 }
0x1201   :  { %v8525_v8 = vmax.f32 %v8376_v9, 0.0 }
0x1202   :  { %v8200_v39 = vadd.f32 %v15216_v0, %v8162_v45  ;;  %v8584_v5 = vpack.c.bf16 %v8524_v14, %v8522_v10 }
0x1203   :  { %v8585_v33 = vpack.c.bf16 %v8525_v8, %v8523_v26  ;;  %v8379_v61 = vpop.f32.mrb[220].mxu0 }
0x1204   :  { %v8216_v44 = vpack.c.bf16 %v8200_v39, %v8199_v52  ;;  %v8380_v36 = vadd.f32 %v8379_v61, %v15424_v37  ;;  %v8381_v27 = vpop.f32.mrb[221].mxu0 }
0x1205   :  { %v8382_v35 = vadd.f32 %v8381_v27, %v15427_v47  ;;  %v8383_v53 = vpop.f32.mrb[222].mxu0  ;;  %8789 = vmatprep.mubr.bf16.mxu1 %v8585_v33 }
0x1206   :  { %v8384_v60 = vadd.f32 %v8383_v53, %v15424_v37  ;;  %v8385_v22 = vpop.f32.mrb[223].mxu0  ;;  %9226 = vmatmul.mubr.msk.bf16.gmra.mrb[16].mxu0 %vm76_vm0, %v8216_v44  ;;  %8790 = vmatmul.mubr.bf16.gmra.mrb[160].mxu1 %v8584_v5  ;;  %v8526_v0 = vmax.f32 %v8380_v36, 0.0 }
0x1207   :  { %v8386_v42 = vadd.f32 %v8385_v22, %v15427_v47  ;;  %v8527_v48 = vmax.f32 %v8382_v35, 0.0 }
0x1208   :  { %v8528_v32 = vmax.f32 %v8384_v60, 0.0 }
0x1209   :  { %v8529_v41 = vmax.f32 %v8386_v42, 0.0 }
0x120a   :  { %v8586_v16 = vpack.c.bf16 %v8528_v32, %v8526_v0 }
0x120b   :  { %v8587_v11 = vpack.c.bf16 %v8529_v41, %v8527_v48 }
0x120d   :  { %8797 = vmatprep.mubr.bf16.mxu1 %v8587_v11 }
0x120e   :  { %8798 = vmatmul.mubr.bf16.gmra.mrb[164].mxu1 %v8586_v16 }
0x1230   :  { %v8389_v28 = vpop.f32.mrb[224].mxu0 }
0x1231   :  { %v8390_v23 = vadd.f32 %v8389_v28, %v15424_v37  ;;  %v8391_v30 = vpop.f32.mrb[225].mxu0 }
0x1232   :  { %v8392_v34 = vadd.f32 %v8391_v30, %v15427_v47  ;;  %v8393_v15 = vpop.f32.mrb[226].mxu0 }
0x1233   :  { %v8394_v38 = vadd.f32 %v8393_v15, %v15424_v37  ;;  %v8395_v2 = vpop.f32.mrb[227].mxu0  ;;  %v8530_v1 = vmax.f32 %v8390_v23, 0.0 }
0x1234   :  { %v8396_v43 = vadd.f32 %v8395_v2, %v15427_v47  ;;  %v8531_v4 = vmax.f32 %v8392_v34, 0.0 }
0x1235   :  { %v8532_v19 = vmax.f32 %v8394_v38, 0.0 }
0x1236   :  { %v8533_v55 = vmax.f32 %v8396_v43, 0.0 }
0x1237   :  { %v8588_v18 = vpack.c.bf16 %v8532_v19, %v8530_v1 }
0x1238   :  { %v8589_v40 = vpack.c.bf16 %v8533_v55, %v8531_v4  ;;  %v8399_v46 = vpop.f32.mrb[228].mxu0 }
0x1239   :  { %v8400_v9 = vadd.f32 %v8399_v46, %v15424_v37  ;;  %v8401_v45 = vpop.f32.mrb[229].mxu0 }
0x123a   :  { %v8402_v10 = vadd.f32 %v8401_v45, %v15427_v47  ;;  %v8403_v14 = vpop.f32.mrb[230].mxu0  ;;  %8805 = vmatprep.mubr.bf16.mxu1 %v8589_v40 }
0x123b   :  { %v8404_v26 = vadd.f32 %v8403_v14, %v15424_v37  ;;  %v8405_v8 = vpop.f32.mrb[231].mxu0  ;;  %8806 = vmatmul.mubr.bf16.gmra.mrb[168].mxu1 %v8588_v18  ;;  %v8534_v39 = vmax.f32 %v8400_v9, 0.0 }
0x123c   :  { %v8406_v52 = vadd.f32 %v8405_v8, %v15427_v47  ;;  %v8535_v33 = vmax.f32 %v8402_v10, 0.0 }
0x123d   :  { %v8536_v5 = vmax.f32 %v8404_v26, 0.0 }
0x123e   :  { %v8537_v61 = vmax.f32 %v8406_v52, 0.0 }
0x123f   :  { %v8590_v44 = vpack.c.bf16 %v8536_v5, %v8534_v39 }
0x1240   :  { %v8591_v36 = vpack.c.bf16 %v8537_v61, %v8535_v33  ;;  %v8409_v27 = vpop.f32.mrb[232].mxu0 }
0x1241   :  { %v8410_v35 = vadd.f32 %v8409_v27, %v15424_v37  ;;  %v8411_v53 = vpop.f32.mrb[233].mxu0 }
0x1242   :  { %v8412_v60 = vadd.f32 %v8411_v53, %v15427_v47  ;;  %v8413_v22 = vpop.f32.mrb[234].mxu0  ;;  %8813 = vmatprep.mubr.bf16.mxu1 %v8591_v36 }
0x1243   :  { %v8414_v42 = vadd.f32 %v8413_v22, %v15424_v37  ;;  %v8415_v0 = vpop.f32.mrb[235].mxu0  ;;  %8814 = vmatmul.mubr.bf16.gmra.mrb[172].mxu1 %v8590_v44  ;;  %v8538_v48 = vmax.f32 %v8410_v35, 0.0 }
0x1244   :  { %v8416_v32 = vadd.f32 %v8415_v0, %v15427_v47  ;;  %v8539_v16 = vmax.f32 %v8412_v60, 0.0 }
0x1245   :  { %v8540_v41 = vmax.f32 %v8414_v42, 0.0 }
0x1246   :  { %v8541_v11 = vmax.f32 %v8416_v32, 0.0 }
0x1247   :  { %v8592_v28 = vpack.c.bf16 %v8540_v41, %v8538_v48 }
0x1248   :  { %v8593_v23 = vpack.c.bf16 %v8541_v11, %v8539_v16  ;;  %v8419_v30 = vpop.f32.mrb[236].mxu0 }
0x1249   :  { %v8420_v34 = vadd.f32 %v8419_v30, %v15424_v37  ;;  %v8421_v15 = vpop.f32.mrb[237].mxu0 }
0x124a   :  { %v8422_v38 = vadd.f32 %v8421_v15, %v15427_v47  ;;  %v8423_v2 = vpop.f32.mrb[238].mxu0  ;;  %8821 = vmatprep.mubr.bf16.mxu1 %v8593_v23 }
0x124b   :  { %v8424_v43 = vadd.f32 %v8423_v2, %v15424_v37  ;;  %v8425_v1 = vpop.f32.mrb[239].mxu0  ;;  %8822 = vmatmul.mubr.bf16.gmra.mrb[176].mxu1 %v8592_v28  ;;  %v8542_v4 = vmax.f32 %v8420_v34, 0.0 }
0x124c   :  { %v8426_v19 = vadd.f32 %v8425_v1, %v15427_v47  ;;  %v8543_v18 = vmax.f32 %v8422_v38, 0.0 }
0x124d   :  { %v8544_v55 = vmax.f32 %v8424_v43, 0.0 }
0x124e   :  { %v8545_v40 = vmax.f32 %v8426_v19, 0.0 }
0x124f   :  { %v8594_v46 = vpack.c.bf16 %v8544_v55, %v8542_v4 }
0x1250   :  { %v8595_v9 = vpack.c.bf16 %v8545_v40, %v8543_v18  ;;  %v8429_v45 = vpop.f32.mrb[240].mxu0 }
0x1251   :  { %v8430_v10 = vadd.f32 %v8429_v45, %v15424_v37  ;;  %v8431_v14 = vpop.f32.mrb[241].mxu0 }
0x1252   :  { %v8432_v26 = vadd.f32 %v8431_v14, %v15427_v47  ;;  %v8433_v8 = vpop.f32.mrb[242].mxu0  ;;  %8829 = vmatprep.mubr.bf16.mxu1 %v8595_v9 }
0x1253   :  { %v8434_v52 = vadd.f32 %v8433_v8, %v15424_v37  ;;  %v8435_v39 = vpop.f32.mrb[243].mxu0  ;;  %8830 = vmatmul.mubr.bf16.gmra.mrb[180].mxu1 %v8594_v46  ;;  %v8546_v33 = vmax.f32 %v8430_v10, 0.0 }
0x1254   :  { %v8436_v5 = vadd.f32 %v8435_v39, %v15427_v47  ;;  %v8547_v44 = vmax.f32 %v8432_v26, 0.0 }
0x1255   :  { %v8548_v61 = vmax.f32 %v8434_v52, 0.0 }
0x1256   :  { %v8549_v36 = vmax.f32 %v8436_v5, 0.0 }
0x1257   :  { %v8596_v27 = vpack.c.bf16 %v8548_v61, %v8546_v33 }
0x1258   :  { %v8597_v35 = vpack.c.bf16 %v8549_v36, %v8547_v44 }
0x125a   :  { %8837 = vmatprep.mubr.bf16.mxu1 %v8597_v35 }
0x125b   :  { %8838 = vmatmul.mubr.bf16.gmra.mrb[184].mxu1 %v8596_v27 }
0x1280   :  { %v8439_v53 = vpop.f32.mrb[244].mxu0 }
0x1281   :  { %v8440_v60 = vadd.f32 %v8439_v53, %v15424_v37  ;;  %v8441_v22 = vpop.f32.mrb[245].mxu0 }
0x1282   :  { %v8442_v42 = vadd.f32 %v8441_v22, %v15427_v47  ;;  %v8443_v0 = vpop.f32.mrb[246].mxu0 }
0x1283   :  { %v8444_v32 = vadd.f32 %v8443_v0, %v15424_v37  ;;  %v8445_v48 = vpop.f32.mrb[247].mxu0  ;;  %v8550_v16 = vmax.f32 %v8440_v60, 0.0 }
0x1284   :  { %v8446_v41 = vadd.f32 %v8445_v48, %v15427_v47  ;;  %v8551_v28 = vmax.f32 %v8442_v42, 0.0 }
0x1285   :  { %v8552_v11 = vmax.f32 %v8444_v32, 0.0 }
0x1286   :  { %v8553_v23 = vmax.f32 %v8446_v41, 0.0 }
0x1287   :  { %v8598_v30 = vpack.c.bf16 %v8552_v11, %v8550_v16 }
0x1288   :  { %v8599_v34 = vpack.c.bf16 %v8553_v23, %v8551_v28  ;;  %v8449_v15 = vpop.f32.mrb[248].mxu0 }
0x1289   :  { %v8450_v38 = vadd.f32 %v8449_v15, %v15424_v37  ;;  %v8451_v2 = vpop.f32.mrb[249].mxu0 }
0x128a   :  { %v8452_v43 = vadd.f32 %v8451_v2, %v15427_v47  ;;  %v8453_v1 = vpop.f32.mrb[250].mxu0  ;;  %8845 = vmatprep.mubr.bf16.mxu1 %v8599_v34 }
0x128b   :  { %v8454_v19 = vadd.f32 %v8453_v1, %v15424_v37  ;;  %v8455_v4 = vpop.f32.mrb[251].mxu0  ;;  %8846 = vmatmul.mubr.bf16.gmra.mrb[188].mxu1 %v8598_v30  ;;  %v8554_v18 = vmax.f32 %v8450_v38, 0.0 }
0x128c   :  { %v8456_v55 = vadd.f32 %v8455_v4, %v15427_v47  ;;  %v8555_v46 = vmax.f32 %v8452_v43, 0.0 }
0x128d   :  { %v8556_v40 = vmax.f32 %v8454_v19, 0.0 }
0x128e   :  { %v8557_v9 = vmax.f32 %v8456_v55, 0.0 }
0x128f   :  { %v8600_v45 = vpack.c.bf16 %v8556_v40, %v8554_v18 }
0x1290   :  { %v8601_v10 = vpack.c.bf16 %v8557_v9, %v8555_v46  ;;  %v8459_v14 = vpop.f32.mrb[252].mxu0 }
0x1291   :  { %v8460_v26 = vadd.f32 %v8459_v14, %v15424_v37  ;;  %v8461_v8 = vpop.f32.mrb[253].mxu0 }
0x1292   :  { %v8462_v52 = vadd.f32 %v8461_v8, %v15427_v47  ;;  %v8463_v39 = vpop.f32.mrb[254].mxu0  ;;  %8853 = vmatprep.mubr.bf16.mxu1 %v8601_v10 }
0x1293   :  { %v8464_v5 = vadd.f32 %v8463_v39, %v15424_v37  ;;  %v8465_v33 = vpop.f32.mrb[255].mxu0  ;;  %8854 = vmatmul.mubr.bf16.gmra.mrb[192].mxu1 %v8600_v45  ;;  %v8558_v44 = vmax.f32 %v8460_v26, 0.0 }
0x1294   :  { %v8466_v61 = vadd.f32 %v8465_v33, %v15427_v47  ;;  %v8559_v27 = vmax.f32 %v8462_v52, 0.0 }
0x1295   :  { %v8560_v36 = vmax.f32 %v8464_v5, 0.0 }
0x1296   :  { %v8561_v35 = vmax.f32 %v8466_v61, 0.0 }
0x1297   :  { %v8602_v53 = vpack.c.bf16 %v8560_v36, %v8558_v44 }
0x1298   :  { %v8603_v60 = vpack.c.bf16 %v8561_v35, %v8559_v27  ;;  %v8469_v22 = vpop.f32.mrb[0].mxu0 }
0x1299   :  { %v8470_v42 = vadd.f32 %v8469_v22, %v15424_v37  ;;  %v8471_v0 = vpop.f32.mrb[1].mxu0 }
0x129a   :  { %v8472_v32 = vadd.f32 %v8471_v0, %v15427_v47  ;;  %v8473_v48 = vpop.f32.mrb[2].mxu0  ;;  %8861 = vmatprep.mubr.bf16.mxu1 %v8603_v60 }
0x129b   :  { %v8474_v41 = vadd.f32 %v8473_v48, %v15424_v37  ;;  %v8475_v16 = vpop.f32.mrb[3].mxu0  ;;  %8862 = vmatmul.mubr.bf16.gmra.mrb[196].mxu1 %v8602_v53  ;;  %v8562_v28 = vmax.f32 %v8470_v42, 0.0 }
0x129c   :  { %v8476_v11 = vadd.f32 %v8475_v16, %v15427_v47  ;;  %v8563_v30 = vmax.f32 %v8472_v32, 0.0  ;;  %v15508_v16 = vld [vmem:[%s15720_s11] ss:$0 sm:$0xff] }
0x129d   :  { %v8564_v23 = vmax.f32 %v8474_v41, 0.0 }
0x129e   :  { %v8565_v34 = vmax.f32 %v8476_v11, 0.0 }
0x129f   :  { %v8604_v15 = vpack.c.bf16 %v8564_v23, %v8562_v28 }
0x12a0   :  { %v8605_v38 = vpack.c.bf16 %v8565_v34, %v8563_v30 }
0x12a2   :  { %8869 = vmatprep.mubr.bf16.mxu1 %v8605_v38 }
0x12a3   :  { %8870 = vmatmul.mubr.bf16.gmra.mrb[200].mxu1 %v8604_v15 }
0x12c1   :  { %v8479_v2 = vpop.f32.mrb[4].mxu0 }
0x12c2   :  { %v8480_v43 = vadd.f32 %v8479_v2, %v15424_v37  ;;  %v8481_v1 = vpop.f32.mrb[5].mxu0 }
0x12c3   :  { %v8482_v19 = vadd.f32 %v8481_v1, %v15427_v47  ;;  %v8483_v4 = vpop.f32.mrb[6].mxu0 }
0x12c4   :  { %v8484_v55 = vadd.f32 %v8483_v4, %v15424_v37  ;;  %v8485_v18 = vpop.f32.mrb[7].mxu0  ;;  %v8566_v46 = vmax.f32 %v8480_v43, 0.0 }
0x12c5   :  { %v8486_v40 = vadd.f32 %v8485_v18, %v15427_v47  ;;  %v8567_v45 = vmax.f32 %v8482_v19, 0.0 }
0x12c6   :  { %v8568_v9 = vmax.f32 %v8484_v55, 0.0 }
0x12c7   :  { %v8569_v10 = vmax.f32 %v8486_v40, 0.0 }
0x12c8   :  { %v8606_v14 = vpack.c.bf16 %v8568_v9, %v8566_v46 }
0x12c9   :  { %v8607_v26 = vpack.c.bf16 %v8569_v10, %v8567_v45  ;;  %v8489_v8 = vpop.f32.mrb[8].mxu0 }
0x12ca   :  { %v8490_v52 = vadd.f32 %v8489_v8, %v15424_v37  ;;  %v8491_v39 = vpop.f32.mrb[9].mxu0 }
0x12cb   :  { %v8492_v5 = vadd.f32 %v8491_v39, %v15427_v47  ;;  %v8493_v33 = vpop.f32.mrb[10].mxu0  ;;  %8877 = vmatprep.mubr.bf16.mxu1 %v8607_v26 }
0x12cc   :  { %v8494_v61 = vadd.f32 %v8493_v33, %v15424_v37  ;;  %v8495_v44 = vpop.f32.mrb[11].mxu0  ;;  %8878 = vmatmul.mubr.bf16.gmra.mrb[204].mxu1 %v8606_v14  ;;  %v8570_v27 = vmax.f32 %v8490_v52, 0.0 }
0x12cd   :  { %v8496_v36 = vadd.f32 %v8495_v44, %v15427_v47  ;;  %v8571_v53 = vmax.f32 %v8492_v5, 0.0 }
0x12ce   :  { %v8572_v35 = vmax.f32 %v8494_v61, 0.0 }
0x12cf   :  { %v8573_v60 = vmax.f32 %v8496_v36, 0.0 }
0x12d0   :  { %v8608_v22 = vpack.c.bf16 %v8572_v35, %v8570_v27 }
0x12d1   :  { %v8609_v42 = vpack.c.bf16 %v8573_v60, %v8571_v53  ;;  %v8499_v0 = vpop.f32.mrb[12].mxu0  ;;  %v9584_v32 = vpop.f32.mrb[156].mxu1 }
0x12d2   :  { %v8500_v48 = vadd.f32 %v8499_v0, %v15424_v37  ;;  %v8501_v41 = vpop.f32.mrb[13].mxu0  ;;  %v9585_v11 = vpop.f32.mrb[157].mxu1 }
0x12d3   :  { %v8502_v28 = vadd.f32 %v8501_v41, %v15427_v47  ;;  %v9586_v23 = vadd.f32 %v9585_v11, %v9584_v32  ;;  %v8503_v30 = vpop.f32.mrb[14].mxu0  ;;  %v9587_v34 = vpop.f32.mrb[158].mxu1  ;;  %8885 = vmatprep.mubr.bf16.mxu1 %v8609_v42 }
0x12d4   :  { %v8504_v15 = vadd.f32 %v8503_v30, %v15424_v37  ;;  %v8505_v38 = vpop.f32.mrb[15].mxu0  ;;  %v9588_v2 = vpop.f32.mrb[159].mxu1  ;;  %8886 = vmatmul.mubr.bf16.gmra.mrb[208].mxu1 %v8608_v22  ;;  %v8574_v4 = vmax.f32 %v8500_v48, 0.0 }
0x12d5   :  { %v8784_v43 = vadd.f32 %v9586_v23, %v15508_v16  ;;  %v8506_v1 = vadd.f32 %v8505_v38, %v15427_v47  ;;  %v9589_v19 = vadd.f32 %v9588_v2, %v9587_v34  ;;  %v8575_v18 = vmax.f32 %v8502_v28, 0.0 }
0x12d6   :  { %v8576_v55 = vmax.f32 %v8504_v15, 0.0 }
0x12d7   :  { %v8910_v40 = vadd.f32 %v8784_v43, %v14776_v58  ;;  %v8577_v46 = vmax.f32 %v8506_v1, 0.0  ;;  %v8787_v9 = vadd.f32 %v9589_v19, %v15508_v16 }
0x12d8   :  { %v8610_v45 = vpack.c.bf16 %v8576_v55, %v8574_v4 }
0x12d9   :  { %8942 = vst.msk [vmem:[%s15721_s12] sm:$0xff] %vm76_vm0, %v8910_v40  ;;  %v8611_v10 = vpack.c.bf16 %v8577_v46, %v8575_v18  ;;  %v8911_v14 = vadd.f32 %v8787_v9, %v14789_v3  ;;  %v8509_v26 = vpop.f32.mrb[16].mxu0  ;;  %v9590_v8 = vpop.f32.mrb[160].mxu1 }
0x12da   :  { %v8510_v52 = vadd.f32 %v8509_v26, %v15424_v37  ;;  %v8511_v39 = vpop.f32.mrb[17].mxu0  ;;  %v9591_v5 = vpop.f32.mrb[161].mxu1 }
0x12db   :  { %8943 = vst.msk [vmem:[%s15721_s12 + $0x8] sm:$0xff] %vm76_vm0, %v8911_v14  ;;  %v8512_v58 = vadd.f32 %v8511_v39, %v15427_v47  ;;  %v9592_v33 = vadd.f32 %v9591_v5, %v9590_v8  ;;  %v8513_v61 = vpop.f32.mrb[18].mxu0  ;;  %v9593_v44 = vpop.f32.mrb[162].mxu1  ;;  %8893 = vmatprep.mubr.bf16.mxu1 %v8611_v10 }
0x12dc   :  { %v8514_v36 = vadd.f32 %v8513_v61, %v15424_v37  ;;  %v8515_v3 = vpop.f32.mrb[19].mxu0  ;;  %v9594_v27 = vpop.f32.mrb[163].mxu1  ;;  %8894 = vmatmul.mubr.bf16.gmra.mrb[212].mxu1 %v8610_v45  ;;  %v8578_v22 = vmax.f32 %v8510_v52, 0.0 }
0x12dd   :  { %v8792_v35 = vadd.f32 %v9592_v33, %v15508_v16  ;;  %v8516_v53 = vadd.f32 %v8515_v3, %v15427_v47  ;;  %v9595_v60 = vadd.f32 %v9594_v27, %v9593_v44  ;;  %v8579_v0 = vmax.f32 %v8512_v58, 0.0 }
0x12de   :  { %v8580_v42 = vmax.f32 %v8514_v36, 0.0 }
0x12df   :  { %v8912_v32 = vadd.f32 %v8792_v35, %v14783_v20  ;;  %v8581_v48 = vmax.f32 %v8516_v53, 0.0  ;;  %v8795_v41 = vadd.f32 %v9595_v60, %v15508_v16 }
0x12e0   :  { %v8612_v11 = vpack.c.bf16 %v8580_v42, %v8578_v22 }
0x12e1   :  { %8944 = vst.msk [vmem:[%s15721_s12 + $0x10] sm:$0xff] %vm76_vm0, %v8912_v32  ;;  %v8613_v37 = vpack.c.bf16 %v8581_v48, %v8579_v0  ;;  %v8913_v28 = vadd.f32 %v8795_v41, %v14799_v51  ;;  %v9596_v23 = vpop.f32.mrb[164].mxu1 }
0x12e2   :  { %v9597_v47 = vpop.f32.mrb[165].mxu1 }
0x12e3   :  { %8945 = vst.msk [vmem:[%s15721_s12 + $0x18] sm:$0xff] %vm76_vm0, %v8913_v28  ;;  %v9598_v20 = vadd.f32 %v9597_v47, %v9596_v23  ;;  %v9599_v30 = vpop.f32.mrb[166].mxu1  ;;  %8901 = vmatprep.mubr.bf16.mxu1 %v8613_v37 }
0x12e4   :  { %v9600_v34 = vpop.f32.mrb[167].mxu1  ;;  %8902 = vmatmul.mubr.bf16.gmra.mrb[216].mxu1 %v8612_v11 }
0x12e5   :  { %v8800_v15 = vadd.f32 %v9598_v20, %v15508_v16  ;;  %v9601_v38 = vadd.f32 %v9600_v34, %v9599_v30 }
0x12e7   :  { %v8914_v2 = vadd.f32 %v8800_v15, %v14817_v17  ;;  %v8803_v43 = vadd.f32 %v9601_v38, %v15508_v16 }
0x12e9   :  { %8946 = vst.msk [vmem:[%s15721_s12 + $0x20] sm:$0xff] %vm76_vm0, %v8914_v2  ;;  %v8915_v51 = vadd.f32 %v8803_v43, %v14820_v59 }
0x12eb   :  { %8947 = vst.msk [vmem:[%s15721_s12 + $0x28] sm:$0xff] %vm76_vm0, %v8915_v51 }
0x130e   :  { %v9602_v1 = vpop.f32.mrb[168].mxu1 }
0x130f   :  { %v9603_v19 = vpop.f32.mrb[169].mxu1 }
0x1310   :  { %v9604_v4 = vadd.f32 %v9603_v19, %v9602_v1  ;;  %v9605_v55 = vpop.f32.mrb[170].mxu1 }
0x1311   :  { %v9606_v18 = vpop.f32.mrb[171].mxu1 }
0x1312   :  { %v8808_v17 = vadd.f32 %v9604_v4, %v15508_v16  ;;  %v9607_v40 = vadd.f32 %v9606_v18, %v9605_v55  ;;  %v16111_v4 = vld [vmem:[#allocation31_spill] sm:$0xff] }
0x1314   :  { %v8916_v46 = vadd.f32 %v8808_v17, %v14833_v57  ;;  %v8811_v9 = vadd.f32 %v9607_v40, %v15508_v16  ;;  %v16112_v17 = vld [vmem:[#allocation10_spill] sm:$0xff] }
0x1316   :  { %8948 = vst.msk [vmem:[%s15721_s12 + $0x30] sm:$0xff] %vm76_vm0, %v8916_v46  ;;  %v8917_v59 = vadd.f32 %v8811_v9, %v14826_v7  ;;  %v9608_v45 = vpop.f32.mrb[172].mxu1 }
0x1317   :  { %v9609_v10 = vpop.f32.mrb[173].mxu1 }
0x1318   :  { %8949 = vst.msk [vmem:[%s15721_s12 + $0x38] sm:$0xff] %vm76_vm0, %v8917_v59  ;;  %v9610_v14 = vadd.f32 %v9609_v10, %v9608_v45  ;;  %v9611_v26 = vpop.f32.mrb[174].mxu1 }
0x1319   :  { %v9612_v8 = vpop.f32.mrb[175].mxu1 }
0x131a   :  { %v8816_v57 = vadd.f32 %v9610_v14, %v15508_v16  ;;  %v9613_v52 = vadd.f32 %v9612_v8, %v9611_v26  ;;  %v16113_v8 = vld [vmem:[#allocation37_spill] sm:$0xff] }
0x131c   :  { %v8918_v39 = vadd.f32 %v8816_v57, %v14853_v31  ;;  %v8819_v5 = vadd.f32 %v9613_v52, %v15508_v16 }
0x131e   :  { %8950 = vst.msk [vmem:[%s15721_s12 + $0x40] sm:$0xff] %vm76_vm0, %v8918_v39  ;;  %v8919_v7 = vadd.f32 %v8819_v5, %v14856_v62  ;;  %v9614_v58 = vpop.f32.mrb[176].mxu1  ;;  %v16114_v39 = vld [vmem:[#allocation42_spill] sm:$0xff] }
0x131f   :  { %v9615_v33 = vpop.f32.mrb[177].mxu1 }
0x1320   :  { %8951 = vst.msk [vmem:[%s15721_s12 + $0x48] sm:$0xff] %vm76_vm0, %v8919_v7  ;;  %v9616_v61 = vadd.f32 %v9615_v33, %v9614_v58  ;;  %v9617_v44 = vpop.f32.mrb[178].mxu1 }
0x1321   :  { %v9618_v36 = vpop.f32.mrb[179].mxu1 }
0x1322   :  { %v8824_v31 = vadd.f32 %v9616_v61, %v15508_v16  ;;  %v9619_v3 = vadd.f32 %v9618_v36, %v9617_v44 }
0x1324   :  { %v8920_v27 = vadd.f32 %v8824_v31, %v14869_v49  ;;  %v8827_v35 = vadd.f32 %v9619_v3, %v15508_v16  ;;  %v16115_v3 = vld [vmem:[#allocation40_spill] sm:$0xff] }
0x1326   :  { %8952 = vst.msk [vmem:[%s15721_s12 + $0x50] sm:$0xff] %vm76_vm0, %v8920_v27  ;;  %v8921_v62 = vadd.f32 %v8827_v35, %v14862_v56  ;;  %v9620_v53 = vpop.f32.mrb[180].mxu1 }
0x1327   :  { %v9621_v60 = vpop.f32.mrb[181].mxu1 }
0x1328   :  { %8953 = vst.msk [vmem:[%s15721_s12 + $0x58] sm:$0xff] %vm76_vm0, %v8921_v62  ;;  %v9622_v22 = vadd.f32 %v9621_v60, %v9620_v53  ;;  %v9623_v42 = vpop.f32.mrb[182].mxu1  ;;  %v16116_v62 = vld [vmem:[#allocation41_spill] sm:$0xff] }
0x1329   :  { %v9624_v0 = vpop.f32.mrb[183].mxu1 }
0x132a   :  { %v8832_v49 = vadd.f32 %v9622_v22, %v15508_v16  ;;  %v9625_v32 = vadd.f32 %v9624_v0, %v9623_v42 }
0x132c   :  { %v8922_v48 = vadd.f32 %v8832_v49, %v14889_v6  ;;  %v8835_v41 = vadd.f32 %v9625_v32, %v15508_v16 }
0x132e   :  { %8954 = vst.msk [vmem:[%s15721_s12 + $0x60] sm:$0xff] %vm76_vm0, %v8922_v48  ;;  %v8923_v56 = vadd.f32 %v8835_v41, %v14892_v50  ;;  %v9626_v11 = vpop.f32.mrb[184].mxu1  ;;  %v16110_v50 = vld [vmem:[#allocation38_spill] sm:$0xff]  ;;  %v16117_v41 = vld [vmem:[#allocation39_spill] sm:$0xff] }
0x132f   :  { %v9627_v37 = vpop.f32.mrb[185].mxu1 }
0x1330   :  { %8955 = vst.msk [vmem:[%s15721_s12 + $0x68] sm:$0xff] %vm76_vm0, %v8923_v56  ;;  %v9628_v28 = vadd.f32 %v9627_v37, %v9626_v11  ;;  %v9629_v23 = vpop.f32.mrb[186].mxu1  ;;  %v16118_v37 = vld [vmem:[#allocation46_spill] sm:$0xff] }
0x1331   :  { %v9630_v47 = vpop.f32.mrb[187].mxu1 }
0x1332   :  { %v8840_v6 = vadd.f32 %v9628_v28, %v15508_v16  ;;  %v9631_v20 = vadd.f32 %v9630_v47, %v9629_v23 }
0x1334   :  { %v8924_v30 = vadd.f32 %v8840_v6, %v14902_v54  ;;  %v8843_v34 = vadd.f32 %v9631_v20, %v15508_v16 }
0x1336   :  { %8956 = vst.msk [vmem:[%s15721_s12 + $0x70] sm:$0xff] %vm76_vm0, %v8924_v30  ;;  %v8925_v15 = vadd.f32 %v8843_v34, %v16110_v50 }
0x1338   :  { %8957 = vst.msk [vmem:[%s15721_s12 + $0x78] sm:$0xff] %vm76_vm0, %v8925_v15 }
0x135e   :  { %v9632_v38 = vpop.f32.mrb[188].mxu1 }
0x135f   :  { %v9633_v2 = vpop.f32.mrb[189].mxu1 }
0x1360   :  { %v9634_v43 = vadd.f32 %v9633_v2, %v9632_v38  ;;  %v9635_v51 = vpop.f32.mrb[190].mxu1 }
0x1361   :  { %v9636_v1 = vpop.f32.mrb[191].mxu1 }
0x1362   :  { %v8848_v54 = vadd.f32 %v9634_v43, %v15508_v16  ;;  %v9637_v19 = vadd.f32 %v9636_v1, %v9635_v51 }
0x1364   :  { %v8926_v55 = vadd.f32 %v8848_v54, %v16111_v4  ;;  %v8851_v18 = vadd.f32 %v9637_v19, %v15508_v16 }
0x1366   :  { %8958 = vst.msk [vmem:[%s15721_s12 + $0x80] sm:$0xff] %vm76_vm0, %v8926_v55  ;;  %v8927_v40 = vadd.f32 %v8851_v18, %v16112_v17  ;;  %v9638_v46 = vpop.f32.mrb[192].mxu1 }
0x1367   :  { %v9639_v9 = vpop.f32.mrb[193].mxu1 }
0x1368   :  { %8959 = vst.msk [vmem:[%s15721_s12 + $0x88] sm:$0xff] %vm76_vm0, %v8927_v40  ;;  %v9640_v59 = vadd.f32 %v9639_v9, %v9638_v46  ;;  %v9641_v45 = vpop.f32.mrb[194].mxu1 }
0x1369   :  { %v9642_v10 = vpop.f32.mrb[195].mxu1 }
0x136a   :  { %v8856_v14 = vadd.f32 %v9640_v59, %v15508_v16  ;;  %v9643_v26 = vadd.f32 %v9642_v10, %v9641_v45 }
0x136c   :  { %v8928_v57 = vadd.f32 %v8856_v14, %v16113_v8  ;;  %v8859_v52 = vadd.f32 %v9643_v26, %v15508_v16 }
0x136e   :  { %8960 = vst.msk [vmem:[%s15721_s12 + $0x90] sm:$0xff] %vm76_vm0, %v8928_v57  ;;  %v8929_v5 = vadd.f32 %v8859_v52, %v16114_v39  ;;  %v9644_v7 = vpop.f32.mrb[196].mxu1 }
0x136f   :  { %v9645_v58 = vpop.f32.mrb[197].mxu1 }
0x1370   :  { %8961 = vst.msk [vmem:[%s15721_s12 + $0x98] sm:$0xff] %vm76_vm0, %v8929_v5  ;;  %v9646_v33 = vadd.f32 %v9645_v58, %v9644_v7  ;;  %v9647_v61 = vpop.f32.mrb[198].mxu1 }
0x1371   :  { %v9648_v44 = vpop.f32.mrb[199].mxu1 }
0x1372   :  { %v8864_v36 = vadd.f32 %v9646_v33, %v15508_v16  ;;  %v9649_v31 = vadd.f32 %v9648_v44, %v9647_v61 }
0x1374   :  { %v8930_v27 = vadd.f32 %v8864_v36, %v16115_v3  ;;  %v8867_v35 = vadd.f32 %v9649_v31, %v15508_v16 }
0x1376   :  { %8962 = vst.msk [vmem:[%s15721_s12 + $0xa0] sm:$0xff] %vm76_vm0, %v8930_v27  ;;  %v8931_v53 = vadd.f32 %v8867_v35, %v16116_v62  ;;  %v9650_v60 = vpop.f32.mrb[200].mxu1 }
0x1377   :  { %v9651_v22 = vpop.f32.mrb[201].mxu1 }
0x1378   :  { %8963 = vst.msk [vmem:[%s15721_s12 + $0xa8] sm:$0xff] %vm76_vm0, %v8931_v53  ;;  %v9652_v42 = vadd.f32 %v9651_v22, %v9650_v60  ;;  %v9653_v0 = vpop.f32.mrb[202].mxu1 }
0x1379   :  { %v9654_v49 = vpop.f32.mrb[203].mxu1 }
0x137a   :  { %v8872_v32 = vadd.f32 %v9652_v42, %v15508_v16  ;;  %v9655_v48 = vadd.f32 %v9654_v49, %v9653_v0 }
0x137c   :  { %v8932_v56 = vadd.f32 %v8872_v32, %v16117_v41  ;;  %v8875_v11 = vadd.f32 %v9655_v48, %v15508_v16 }
0x137e   :  { %8964 = vst.msk [vmem:[%s15721_s12 + $0xb0] sm:$0xff] %vm76_vm0, %v8932_v56  ;;  %v8933_v28 = vadd.f32 %v8875_v11, %v16118_v37 }
0x1380   :  { %8965 = vst.msk [vmem:[%s15721_s12 + $0xb8] sm:$0xff] %vm76_vm0, %v8933_v28 }
0x139f   :  { %v9656_v23 = vpop.f32.mrb[204].mxu1 }
0x13a0   :  { %v9657_v47 = vpop.f32.mrb[205].mxu1 }
0x13a1   :  { %v9658_v6 = vadd.f32 %v9657_v47, %v9656_v23  ;;  %v9659_v20 = vpop.f32.mrb[206].mxu1 }
0x13a2   :  { %v9660_v30 = vpop.f32.mrb[207].mxu1 }
0x13a3   :  { %v8880_v34 = vadd.f32 %v9658_v6, %v15508_v16  ;;  %v9661_v50 = vadd.f32 %v9660_v30, %v9659_v20 }
0x13a5   :  { %v8934_v15 = vadd.f32 %v8880_v34, %v15044_v13  ;;  %v8883_v38 = vadd.f32 %v9661_v50, %v15508_v16 }
0x13a7   :  { %8966 = vst.msk [vmem:[%s15721_s12 + $0xc0] sm:$0xff] %vm76_vm0, %v8934_v15  ;;  %v8935_v2 = vadd.f32 %v8883_v38, %v15053_v63  ;;  %v9662_v43 = vpop.f32.mrb[208].mxu1 }
0x13a8   :  { %v9663_v51 = vpop.f32.mrb[209].mxu1 }
0x13a9   :  { %8967 = vst.msk [vmem:[%s15721_s12 + $0xc8] sm:$0xff] %vm76_vm0, %v8935_v2  ;;  %v9664_v1 = vadd.f32 %v9663_v51, %v9662_v43  ;;  %v9665_v54 = vpop.f32.mrb[210].mxu1 }
0x13aa   :  { %v9666_v19 = vpop.f32.mrb[211].mxu1 }
0x13ab   :  { %v8888_v13 = vadd.f32 %v9664_v1, %v15508_v16  ;;  %v9667_v4 = vadd.f32 %v9666_v19, %v9665_v54 }
0x13ad   :  { %v8936_v55 = vadd.f32 %v8888_v13, %v15070_v24  ;;  %v8891_v18 = vadd.f32 %v9667_v4, %v15508_v16 }
0x13af   :  { %8968 = vst.msk [vmem:[%s15721_s12 + $0xd0] sm:$0xff] %vm76_vm0, %v8936_v55  ;;  %v8937_v63 = vadd.f32 %v8891_v18, %v15077_v21  ;;  %v9668_v17 = vpop.f32.mrb[212].mxu1  ;;  %v16119_v21 = vld [vmem:[#allocation44_spill] sm:$0xff] }
0x13b0   :  { %v9669_v40 = vpop.f32.mrb[213].mxu1 }
0x13b1   :  { %8969 = vst.msk [vmem:[%s15721_s12 + $0xd8] sm:$0xff] %vm76_vm0, %v8937_v63  ;;  %v9670_v46 = vadd.f32 %v9669_v40, %v9668_v17  ;;  %v9671_v9 = vpop.f32.mrb[214].mxu1 }
0x13b2   :  { %v9672_v59 = vpop.f32.mrb[215].mxu1 }
0x13b3   :  { %v8896_v24 = vadd.f32 %v9670_v46, %v15508_v16  ;;  %v9673_v45 = vadd.f32 %v9672_v59, %v9671_v9 }
0x13b5   :  { %v8938_v10 = vadd.f32 %v8896_v24, %v15098_v25  ;;  %v8899_v14 = vadd.f32 %v9673_v45, %v15508_v16 }
0x13b7   :  { %8970 = vst.msk [vmem:[%s15721_s12 + $0xe0] sm:$0xff] %vm76_vm0, %v8938_v10  ;;  %v8939_v26 = vadd.f32 %v8899_v14, %v16119_v21  ;;  %v9674_v8 = vpop.f32.mrb[216].mxu1 }
0x13b8   :  { %v9675_v57 = vpop.f32.mrb[217].mxu1 }
0x13b9   :  { %8971 = vst.msk [vmem:[%s15721_s12 + $0xe8] sm:$0xff] %vm76_vm0, %v8939_v26  ;;  %v9676_v52 = vadd.f32 %v9675_v57, %v9674_v8  ;;  %v9677_v39 = vpop.f32.mrb[218].mxu1 }
0x13ba   :  { %v9678_v5 = vpop.f32.mrb[219].mxu1 }
0x13bb   :  { %v8904_v25 = vadd.f32 %v9676_v52, %v15508_v16  ;;  %v9679_v7 = vadd.f32 %v9678_v5, %v9677_v39 }
0x13bd   :  { %v8940_v58 = vadd.f32 %v8904_v25, %v15126_v12  ;;  %v8907_v33 = vadd.f32 %v9679_v7, %v15508_v16 }
0x13bf   :  { %8972 = vst.msk [vmem:[%s15721_s12 + $0xf0] sm:$0xff] %vm76_vm0, %v8940_v58  ;;  %v8941_v61 = vadd.f32 %v8907_v33, %v15133_v29 }
0x13c1   :  { %8973 = vst.msk [vmem:[%s15721_s12 + $0xf8] sm:$0xff] %vm76_vm0, %v8941_v61 }

</bundles_post_ra>
